<compile_context>
chip_gen: v7x
topology: tpu7x:2x2x1
jax: 0.10.0
libtpu: 0.0.40
codegen_flags: <defaults>
</compile_context>

<pallas_src>
import jax
import jax.numpy as jnp
from jax.experimental import pallas as pl
from jax.experimental.pallas import tpu as pltpu

# ----- static shapes implied by the module (fc1 in_features=432 => L_in=100)
L_IN, C_IN, K = 100, 6, 5
C1, C2, C3 = 12, 24, 48
L1 = L_IN - K + 1          # 96
P1 = L1 // 2               # 48
L2 = P1 - K + 1            # 44
P2 = L2 // 2               # 22
L3 = P2 - K + 1            # 18
P3 = L3 // 2               # 9
FLAT = C3 * P3             # 432
H1, H2, H3, OUT = 256, 128, 64, 26
NEG_SLOPE = 0.01           # F.leaky_relu default
EPS = 1e-5                 # BatchNorm1d default


def _round_up(v, m):
    return ((v + m - 1) // m) * m


# lane-dense (multiple-of-128) padded widths
IN_PAD = _round_up(C_IN * L_IN, 128)     # 600 -> 640
F1_PAD = _round_up(C1 * P1, 128)         # 576 -> 640
F2_PAD = _round_up(C2 * P2, 128)         # 528 -> 640
F3_PAD = _round_up(FLAT, 128)            # 432 -> 512
OUT_PAD = _round_up(OUT, 128)            # 26  -> 128


# --------------------------------------------------------------------------
# fused kernel: (B, 640) -> (B, 128)
# --------------------------------------------------------------------------
def fused_kernel(x_ref,
                 a1_ref, b1_ref,
                 a2_ref, b2_ref,
                 a3_ref, b3_ref,
                 w1_ref, c1_ref, w2_ref, c2_ref, w3_ref, c3_ref,
                 w4_ref, c4_ref,
                 out_ref):
    h = x_ref[...]                                            # (B, 640) f32

    # conv -> maxpool(2) -> bias -> leaky_relu, as ONE structured matmul per
    # layer: columns [0:half) are the even pooling phase, [half:2*half) the odd
    # phase.  Bias-after-max and leaky-after-max are exact (bias constant per
    # pooled pair; leaky_relu monotone).
    for a_ref, b_ref, half in ((a1_ref, b1_ref, F1_PAD),
                               (a2_ref, b2_ref, F2_PAD),
                               (a3_ref, b3_ref, F3_PAD)):
        y = jnp.dot(h.astype(jnp.bfloat16), a_ref[...],
                    preferred_element_type=jnp.float32)        # (B, 2*half) f32
        y = jnp.maximum(y[:, :half], y[:, half:]) + b_ref[...]  # pool + bias
        h = jnp.maximum(y, NEG_SLOPE * y)                      # leaky_relu

    # fc -> BatchNorm(eval, folded) -> relu
    for w_ref, c_ref in ((w1_ref, c1_ref), (w2_ref, c2_ref), (w3_ref, c3_ref)):
        h = jnp.maximum(
            jnp.dot(h.astype(jnp.bfloat16), w_ref[...],
                    preferred_element_type=jnp.float32) + c_ref[...],
            0.0)

    # fc4 (no BN / activation); output padded to 128 lanes, sliced host-side.
    out_ref[...] = (jnp.dot(h.astype(jnp.bfloat16), w4_ref[...],
                            preferred_element_type=jnp.float32) + c4_ref[...])


# --------------------------------------------------------------------------
# host-side parameter re-layout (plain JAX glue)
# --------------------------------------------------------------------------
def _conv_pool_matrices(w, b, lin, in_pad, half_pad):
    """Dense [even | odd] matrix for conv1d(valid) + maxpool(2), bf16, padded.

    Flattening is per sample in (channel, position) order, so
      A[ci*lin + l, co*pout + m] = w[co, ci, l - (2m + offset)]  (0 elsewhere)
    with offset = 0 for the even half, 1 for the odd half.
    """
    w = w.astype(jnp.float32)
    b = b.astype(jnp.float32)
    cout, cin, k = w.shape
    lconv = lin - k + 1
    pout = lconv // 2
    l = jnp.arange(lin)[:, None]            # (lin, 1)
    m = jnp.arange(pout)[None, :]           # (1, pout)

    def branch(offset):
        tap = l - (2 * m + offset)                          # (lin, pout)
        valid = (tap >= 0) & (tap < k)
        tap_c = jnp.clip(tap, 0, k - 1)
        wt = w[:, :, tap_c]                                 # (cout, cin, lin, pout)
        wt = jnp.where(valid[None, None, :, :], wt, 0.0)
        a = jnp.transpose(wt, (1, 2, 0, 3)).reshape(cin * lin, cout * pout)
        return jnp.pad(a, ((0, in_pad - cin * lin), (0, half_pad - cout * pout)))

    a = jnp.concatenate([branch(0), branch(1)], axis=1).astype(jnp.bfloat16)
    bb = jnp.pad(jnp.repeat(b, pout), (0, half_pad - cout * pout))
    return a, bb.reshape(1, half_pad).astype(jnp.float32)


def _fold_bn(w, b, gamma, beta, mean, var, in_pad=None):
    """Fold eval-mode BatchNorm1d into the preceding Linear layer (bf16 W)."""
    s = gamma / jnp.sqrt(var + EPS)
    wf = w.astype(jnp.float32).T * s[None, :]                # (in, out)
    if in_pad is not None and in_pad > wf.shape[0]:
        wf = jnp.pad(wf, ((0, in_pad - wf.shape[0]), (0, 0)))
    bf = (b * s + (beta - mean * s)).reshape(1, -1).astype(jnp.float32)
    return wf.astype(jnp.bfloat16), bf


def _const_spec(a, single_buffer):
    nd = a.ndim
    idx = lambda i, _nd=nd: (0,) * _nd
    if single_buffer:
        # constant index_map -> a second pipeline buffer is never used
        return pl.BlockSpec(a.shape, idx, pipeline_mode=pl.Buffered(1))
    return pl.BlockSpec(a.shape, idx)


def _pick_batch_tile(n, block_batch):
    if n >= 2 * block_batch:
        return block_batch
    if n > block_batch:
        # two grid steps so a "parallel" axis can shard across v7x's 2 TCs
        return max(8, _round_up(-(-n // 2), 8))
    return max(8, _round_up(n, 8))


# --------------------------------------------------------------------------
# public forward: x in PyTorch NCL layout (N, 6, 100)
# --------------------------------------------------------------------------
def net_forward(x_ncl, p, block_batch=256, single_buffer_consts=True):
    n = x_ncl.shape[0]
    xf = x_ncl.astype(jnp.float32).reshape(n, C_IN * L_IN)    # (N, 600), (c,l)
    xf = jnp.pad(xf, ((0, 0), (0, IN_PAD - C_IN * L_IN)))     # lane-dense 640

    a1, bb1 = _conv_pool_matrices(p['conv1_w'], p['conv1_b'], L_IN, IN_PAD, F1_PAD)
    a2, bb2 = _conv_pool_matrices(p['conv2_w'], p['conv2_b'], P1, F1_PAD, F2_PAD)
    a3, bb3 = _conv_pool_matrices(p['conv3_w'], p['conv3_b'], P2, F2_PAD, F3_PAD)

    wf1, cf1 = _fold_bn(p['fc1_w'], p['fc1_b'], p['bn1_gamma'], p['bn1_beta'],
                        p['bn1_mean'], p['bn1_var'], in_pad=F3_PAD)
    wf2, cf2 = _fold_bn(p['fc2_w'], p['fc2_b'], p['bn2_gamma'], p['bn2_beta'],
                        p['bn2_mean'], p['bn2_var'])
    wf3, cf3 = _fold_bn(p['fc3_w'], p['fc3_b'], p['bn3_gamma'], p['bn3_beta'],
                        p['bn3_mean'], p['bn3_var'])
    wf4 = jnp.pad(p['fc4_w'].astype(jnp.float32).T,
                  ((0, 0), (0, OUT_PAD - OUT))).astype(jnp.bfloat16)   # (64,128)
    cf4 = jnp.pad(p['fc4_b'].astype(jnp.float32),
                  (0, OUT_PAD - OUT)).reshape(1, OUT_PAD)

    params = (a1, bb1, a2, bb2, a3, bb3,
              wf1, cf1, wf2, cf2, wf3, cf3, wf4, cf4)

    # batch tile: big enough to amortize grid-step overhead & fill the MXU M
    # dim; >=2 steps for large N so the parallel axis engages both v7x TCs.
    bt = _pick_batch_tile(n, block_batch)
    n_pad = _round_up(n, bt)
    if n_pad != n:
        xf = jnp.pad(xf, ((0, n_pad - n), (0, 0)))

    out = pl.pallas_call(
        fused_kernel,
        out_shape=jax.ShapeDtypeStruct((n_pad, OUT_PAD), jnp.float32),
        grid=(n_pad // bt,),
        in_specs=[pl.BlockSpec((bt, IN_PAD), lambda i: (i, 0))]
                 + [_const_spec(a, single_buffer_consts) for a in params],
        out_specs=pl.BlockSpec((bt, OUT_PAD), lambda i: (i, 0)),
        compiler_params=pltpu.CompilerParams(
            dimension_semantics=("parallel",),
            vmem_limit_bytes=32 * 1024 * 1024),
    )(xf, *params)

    return out[:n, :OUT]


# --------------------------------------------------------------------------
# parameters + pure-JAX reference (mirrors the PyTorch forward, eval-mode BN)
# --------------------------------------------------------------------------
def init_params(key):
    ks = jax.random.split(key, 20)

    def w(k, shape, scale=0.1):
        return jax.random.normal(k, shape, jnp.float32) * scale

    p = {
        'conv1_w': w(ks[0], (C1, C_IN, K)), 'conv1_b': w(ks[1], (C1,)),
        'conv2_w': w(ks[2], (C2, C1, K)),   'conv2_b': w(ks[3], (C2,)),
        'conv3_w': w(ks[4], (C3, C2, K)),   'conv3_b': w(ks[5], (C3,)),
        'fc1_w': w(ks[6], (H1, FLAT)),      'fc1_b': w(ks[7], (H1,)),
        'fc2_w': w(ks[8], (H2, H1)),        'fc2_b': w(ks[9], (H2,)),
        'fc3_w': w(ks[10], (H3, H2)),       'fc3_b': w(ks[11], (H3,)),
        'fc4_w': w(ks[12], (OUT, H3)),      'fc4_b': w(ks[13], (OUT,)),
    }
    for i, h in enumerate((H1, H2, H3), start=1):
        kk = jax.random.split(ks[13 + i], 4)
        p[f'bn{i}_gamma'] = 1.0 + 0.1 * jax.random.normal(kk[0], (h,), jnp.float32)
        p[f'bn{i}_beta'] = 0.1 * jax.random.normal(kk[1], (h,), jnp.float32)
        p[f'bn{i}_mean'] = 0.1 * jax.random.normal(kk[2], (h,), jnp.float32)
        p[f'bn{i}_var'] = 0.5 + 0.1 * jnp.abs(jax.random.normal(kk[3], (h,), jnp.float32))
    return p


def ref_forward(x_ncl, p):
    hp = jax.lax.Precision.HIGHEST
    lrelu = lambda v: jnp.where(v >= 0, v, NEG_SLOPE * v)

    def conv1d(x, w, b):
        y = jax.lax.conv_general_dilated(
            x, w, window_strides=(1,), padding='VALID',
            dimension_numbers=('NCH', 'OIH', 'NCH'), precision=hp)
        return y + b[None, :, None]

    def pool(x):
        n, c, l = x.shape
        return jnp.max(x.reshape(n, c, l // 2, 2), axis=-1)

    h = pool(lrelu(conv1d(x_ncl, p['conv1_w'], p['conv1_b'])))
    h = pool(lrelu(conv1d(h, p['conv2_w'], p['conv2_b'])))
    h = pool(lrelu(conv1d(h, p['conv3_w'], p['conv3_b'])))
    h = h.reshape(h.shape[0], -1)

    def bn(v, i):
        return ((v - p[f'bn{i}_mean']) / jnp.sqrt(p[f'bn{i}_var'] + EPS)
                * p[f'bn{i}_gamma'] + p[f'bn{i}_beta'])

    h = jax.nn.relu(bn(jnp.dot(h, p['fc1_w'].T, precision=hp) + p['fc1_b'], 1))
    h = jax.nn.relu(bn(jnp.dot(h, p['fc2_w'].T, precision=hp) + p['fc2_b'], 2))
    h = jax.nn.relu(bn(jnp.dot(h, p['fc3_w'].T, precision=hp) + p['fc3_b'], 3))
    return jnp.dot(h, p['fc4_w'].T, precision=hp) + p['fc4_b']


if __name__ == "__main__":
    key = jax.random.PRNGKey(0)
    pkey, xkey = jax.random.split(key)
    params = init_params(pkey)
    x = jax.random.normal(xkey, (2, C_IN, L_IN), jnp.float32)   # batch=2, NCL

    try:
        fwd = jax.jit(lambda xx: net_forward(xx, params, single_buffer_consts=True))
        out = jax.block_until_ready(fwd(x))
    except Exception:
        # Fallback if this JAX build rejects pipeline_mode=pl.Buffered(1) on
        # constant-index BlockSpecs (perf-only feature; semantics identical).
        fwd = jax.jit(lambda xx: net_forward(xx, params, single_buffer_consts=False))
        out = jax.block_until_ready(fwd(x))

    assert out.shape == (2, OUT)

    ref = ref_forward(x, params)
    err = float(jnp.max(jnp.abs(out - ref)))
    if err > 3e-2:
        raise SystemExit(f"mismatch vs reference: max abs err = {err}")
    print("KERNEL_OK")
</pallas_src>

<mosaic_0001>
module attributes {stable_mosaic.version = 11 : i64} {
  func.func @fused_kernel(%arg0: i32, %arg1: memref<8x640xf32, #tpu.memory_space<vmem>>, %arg2: memref<640x1280xbf16, #tpu.memory_space<vmem>>, %arg3: memref<1x640xf32, #tpu.memory_space<vmem>>, %arg4: memref<640x1280xbf16, #tpu.memory_space<vmem>>, %arg5: memref<1x640xf32, #tpu.memory_space<vmem>>, %arg6: memref<640x1024xbf16, #tpu.memory_space<vmem>>, %arg7: memref<1x512xf32, #tpu.memory_space<vmem>>, %arg8: memref<512x256xbf16, #tpu.memory_space<vmem>>, %arg9: memref<1x256xf32, #tpu.memory_space<vmem>>, %arg10: memref<256x128xbf16, #tpu.memory_space<vmem>>, %arg11: memref<1x128xf32, #tpu.memory_space<vmem>>, %arg12: memref<128x64xbf16, #tpu.memory_space<vmem>>, %arg13: memref<1x64xf32, #tpu.memory_space<vmem>>, %arg14: memref<64x128xbf16, #tpu.memory_space<vmem>>, %arg15: memref<1x128xf32, #tpu.memory_space<vmem>>, %arg16: memref<8x128xf32, #tpu.memory_space<vmem>>) attributes {dimension_semantics = [#tpu.dimension_semantics<parallel>], iteration_bounds = array<i64: 1>, scalar_prefetch = 0 : i64, scratch_operands = 0 : i64, tpu.core_type = #tpu.core_type<tc>, window_params = [{transform_indices = @transform_0, window_bounds = array<i64: 8, 640>}, {pipeline_mode = #tpu.pipeline_mode<synchronous>, transform_indices = @transform_1, window_bounds = array<i64: 640, 1280>}, {pipeline_mode = #tpu.pipeline_mode<synchronous>, transform_indices = @transform_2, window_bounds = array<i64: 1, 640>}, {pipeline_mode = #tpu.pipeline_mode<synchronous>, transform_indices = @transform_3, window_bounds = array<i64: 640, 1280>}, {pipeline_mode = #tpu.pipeline_mode<synchronous>, transform_indices = @transform_4, window_bounds = array<i64: 1, 640>}, {pipeline_mode = #tpu.pipeline_mode<synchronous>, transform_indices = @transform_5, window_bounds = array<i64: 640, 1024>}, {pipeline_mode = #tpu.pipeline_mode<synchronous>, transform_indices = @transform_6, window_bounds = array<i64: 1, 512>}, {pipeline_mode = #tpu.pipeline_mode<synchronous>, transform_indices = @transform_7, window_bounds = array<i64: 512, 256>}, {pipeline_mode = #tpu.pipeline_mode<synchronous>, transform_indices = @transform_8, window_bounds = array<i64: 1, 256>}, {pipeline_mode = #tpu.pipeline_mode<synchronous>, transform_indices = @transform_9, window_bounds = array<i64: 256, 128>}, {pipeline_mode = #tpu.pipeline_mode<synchronous>, transform_indices = @transform_10, window_bounds = array<i64: 1, 128>}, {pipeline_mode = #tpu.pipeline_mode<synchronous>, transform_indices = @transform_11, window_bounds = array<i64: 128, 64>}, {pipeline_mode = #tpu.pipeline_mode<synchronous>, transform_indices = @transform_12, window_bounds = array<i64: 1, 64>}, {pipeline_mode = #tpu.pipeline_mode<synchronous>, transform_indices = @transform_13, window_bounds = array<i64: 64, 128>}, {pipeline_mode = #tpu.pipeline_mode<synchronous>, transform_indices = @transform_14, window_bounds = array<i64: 1, 128>}, {transform_indices = @transform_15, window_bounds = array<i64: 8, 128>}]} {
    %c0 = arith.constant 0 : index
    %c0_0 = arith.constant 0 : index
    %0 = vector.load %arg1[%c0, %c0_0] : memref<8x640xf32, #tpu.memory_space<vmem>>, vector<8x640xf32>
    %1 = arith.truncf %0 : vector<8x640xf32> to vector<8x640xbf16>
    %c0_1 = arith.constant 0 : index
    %c0_2 = arith.constant 0 : index
    %2 = vector.load %arg2[%c0_1, %c0_2] : memref<640x1280xbf16, #tpu.memory_space<vmem>>, vector<640x1280xbf16>
    %cst = arith.constant dense<0.000000e+00> : vector<8x1280xf32>
    %3 = tpu.matmul %1, %2, %cst {dimension_numbers = #tpu.dot_dimension_numbers<[1], [0], [0], [1], [0, 0, 1, 1], [], []>} : vector<8x640xbf16>, vector<640x1280xbf16>, vector<8x1280xf32> -> vector<8x1280xf32>
    %4 = vector.extract_strided_slice %3 {offsets = [0, 0], sizes = [8, 640], strides = [1, 1]} : vector<8x1280xf32> to vector<8x640xf32>
    %5 = vector.extract_strided_slice %3 {offsets = [0, 640], sizes = [8, 640], strides = [1, 1]} : vector<8x1280xf32> to vector<8x640xf32>
    %6 = arith.maximumf %4, %5 : vector<8x640xf32>
    %c0_3 = arith.constant 0 : index
    %c0_4 = arith.constant 0 : index
    %7 = vector.load %arg3[%c0_3, %c0_4] : memref<1x640xf32, #tpu.memory_space<vmem>>, vector<1x640xf32>
    %8 = vector.broadcast %7 : vector<1x640xf32> to vector<8x640xf32>
    %9 = arith.addf %6, %8 : vector<8x640xf32>
    %cst_5 = arith.constant 0.00999999977 : f32
    %10 = vector.broadcast %cst_5 : f32 to vector<8x640xf32>
    %11 = arith.mulf %10, %9 : vector<8x640xf32>
    %12 = arith.maximumf %9, %11 : vector<8x640xf32>
    %13 = arith.truncf %12 : vector<8x640xf32> to vector<8x640xbf16>
    %c0_6 = arith.constant 0 : index
    %c0_7 = arith.constant 0 : index
    %14 = vector.load %arg4[%c0_6, %c0_7] : memref<640x1280xbf16, #tpu.memory_space<vmem>>, vector<640x1280xbf16>
    %cst_8 = arith.constant dense<0.000000e+00> : vector<8x1280xf32>
    %15 = tpu.matmul %13, %14, %cst_8 {dimension_numbers = #tpu.dot_dimension_numbers<[1], [0], [0], [1], [0, 0, 1, 1], [], []>} : vector<8x640xbf16>, vector<640x1280xbf16>, vector<8x1280xf32> -> vector<8x1280xf32>
    %16 = vector.extract_strided_slice %15 {offsets = [0, 0], sizes = [8, 640], strides = [1, 1]} : vector<8x1280xf32> to vector<8x640xf32>
    %17 = vector.extract_strided_slice %15 {offsets = [0, 640], sizes = [8, 640], strides = [1, 1]} : vector<8x1280xf32> to vector<8x640xf32>
    %18 = arith.maximumf %16, %17 : vector<8x640xf32>
    %c0_9 = arith.constant 0 : index
    %c0_10 = arith.constant 0 : index
    %19 = vector.load %arg5[%c0_9, %c0_10] : memref<1x640xf32, #tpu.memory_space<vmem>>, vector<1x640xf32>
    %20 = vector.broadcast %19 : vector<1x640xf32> to vector<8x640xf32>
    %21 = arith.addf %18, %20 : vector<8x640xf32>
    %cst_11 = arith.constant 0.00999999977 : f32
    %22 = vector.broadcast %cst_11 : f32 to vector<8x640xf32>
    %23 = arith.mulf %22, %21 : vector<8x640xf32>
    %24 = arith.maximumf %21, %23 : vector<8x640xf32>
    %25 = arith.truncf %24 : vector<8x640xf32> to vector<8x640xbf16>
    %c0_12 = arith.constant 0 : index
    %c0_13 = arith.constant 0 : index
    %26 = vector.load %arg6[%c0_12, %c0_13] : memref<640x1024xbf16, #tpu.memory_space<vmem>>, vector<640x1024xbf16>
    %cst_14 = arith.constant dense<0.000000e+00> : vector<8x1024xf32>
    %27 = tpu.matmul %25, %26, %cst_14 {dimension_numbers = #tpu.dot_dimension_numbers<[1], [0], [0], [1], [0, 0, 1, 1], [], []>} : vector<8x640xbf16>, vector<640x1024xbf16>, vector<8x1024xf32> -> vector<8x1024xf32>
    %28 = vector.extract_strided_slice %27 {offsets = [0, 0], sizes = [8, 512], strides = [1, 1]} : vector<8x1024xf32> to vector<8x512xf32>
    %29 = vector.extract_strided_slice %27 {offsets = [0, 512], sizes = [8, 512], strides = [1, 1]} : vector<8x1024xf32> to vector<8x512xf32>
    %30 = arith.maximumf %28, %29 : vector<8x512xf32>
    %c0_15 = arith.constant 0 : index
    %c0_16 = arith.constant 0 : index
    %31 = vector.load %arg7[%c0_15, %c0_16] : memref<1x512xf32, #tpu.memory_space<vmem>>, vector<1x512xf32>
    %32 = vector.broadcast %31 : vector<1x512xf32> to vector<8x512xf32>
    %33 = arith.addf %30, %32 : vector<8x512xf32>
    %cst_17 = arith.constant 0.00999999977 : f32
    %34 = vector.broadcast %cst_17 : f32 to vector<8x512xf32>
    %35 = arith.mulf %34, %33 : vector<8x512xf32>
    %36 = arith.maximumf %33, %35 : vector<8x512xf32>
    %37 = arith.truncf %36 : vector<8x512xf32> to vector<8x512xbf16>
    %c0_18 = arith.constant 0 : index
    %c0_19 = arith.constant 0 : index
    %38 = vector.load %arg8[%c0_18, %c0_19] : memref<512x256xbf16, #tpu.memory_space<vmem>>, vector<512x256xbf16>
    %cst_20 = arith.constant dense<0.000000e+00> : vector<8x256xf32>
    %39 = tpu.matmul %37, %38, %cst_20 {dimension_numbers = #tpu.dot_dimension_numbers<[1], [0], [0], [1], [0, 0, 1, 1], [], []>} : vector<8x512xbf16>, vector<512x256xbf16>, vector<8x256xf32> -> vector<8x256xf32>
    %c0_21 = arith.constant 0 : index
    %c0_22 = arith.constant 0 : index
    %40 = vector.load %arg9[%c0_21, %c0_22] : memref<1x256xf32, #tpu.memory_space<vmem>>, vector<1x256xf32>
    %41 = vector.broadcast %40 : vector<1x256xf32> to vector<8x256xf32>
    %42 = arith.addf %39, %41 : vector<8x256xf32>
    %cst_23 = arith.constant 0.000000e+00 : f32
    %43 = vector.broadcast %cst_23 : f32 to vector<8x256xf32>
    %44 = arith.maximumf %42, %43 : vector<8x256xf32>
    %45 = arith.truncf %44 : vector<8x256xf32> to vector<8x256xbf16>
    %c0_24 = arith.constant 0 : index
    %c0_25 = arith.constant 0 : index
    %46 = vector.load %arg10[%c0_24, %c0_25] : memref<256x128xbf16, #tpu.memory_space<vmem>>, vector<256x128xbf16>
    %cst_26 = arith.constant dense<0.000000e+00> : vector<8x128xf32>
    %47 = tpu.matmul %45, %46, %cst_26 {dimension_numbers = #tpu.dot_dimension_numbers<[1], [0], [0], [1], [0, 0, 1, 1], [], []>} : vector<8x256xbf16>, vector<256x128xbf16>, vector<8x128xf32> -> vector<8x128xf32>
    %c0_27 = arith.constant 0 : index
    %c0_28 = arith.constant 0 : index
    %48 = vector.load %arg11[%c0_27, %c0_28] : memref<1x128xf32, #tpu.memory_space<vmem>>, vector<1x128xf32>
    %49 = vector.broadcast %48 : vector<1x128xf32> to vector<8x128xf32>
    %50 = arith.addf %47, %49 : vector<8x128xf32>
    %cst_29 = arith.constant 0.000000e+00 : f32
    %51 = vector.broadcast %cst_29 : f32 to vector<8x128xf32>
    %52 = arith.maximumf %50, %51 : vector<8x128xf32>
    %53 = arith.truncf %52 : vector<8x128xf32> to vector<8x128xbf16>
    %c0_30 = arith.constant 0 : index
    %c0_31 = arith.constant 0 : index
    %54 = vector.load %arg12[%c0_30, %c0_31] : memref<128x64xbf16, #tpu.memory_space<vmem>>, vector<128x64xbf16>
    %cst_32 = arith.constant dense<0.000000e+00> : vector<8x64xf32>
    %55 = tpu.matmul %53, %54, %cst_32 {dimension_numbers = #tpu.dot_dimension_numbers<[1], [0], [0], [1], [0, 0, 1, 1], [], []>} : vector<8x128xbf16>, vector<128x64xbf16>, vector<8x64xf32> -> vector<8x64xf32>
    %c0_33 = arith.constant 0 : index
    %c0_34 = arith.constant 0 : index
    %56 = vector.load %arg13[%c0_33, %c0_34] : memref<1x64xf32, #tpu.memory_space<vmem>>, vector<1x64xf32>
    %57 = vector.broadcast %56 : vector<1x64xf32> to vector<8x64xf32>
    %58 = arith.addf %55, %57 : vector<8x64xf32>
    %cst_35 = arith.constant 0.000000e+00 : f32
    %59 = vector.broadcast %cst_35 : f32 to vector<8x64xf32>
    %60 = arith.maximumf %58, %59 : vector<8x64xf32>
    %61 = arith.truncf %60 : vector<8x64xf32> to vector<8x64xbf16>
    %c0_36 = arith.constant 0 : index
    %c0_37 = arith.constant 0 : index
    %62 = vector.load %arg14[%c0_36, %c0_37] : memref<64x128xbf16, #tpu.memory_space<vmem>>, vector<64x128xbf16>
    %cst_38 = arith.constant dense<0.000000e+00> : vector<8x128xf32>
    %63 = tpu.matmul %61, %62, %cst_38 {dimension_numbers = #tpu.dot_dimension_numbers<[1], [0], [0], [1], [0, 0, 1, 1], [], []>} : vector<8x64xbf16>, vector<64x128xbf16>, vector<8x128xf32> -> vector<8x128xf32>
    %c0_39 = arith.constant 0 : index
    %c0_40 = arith.constant 0 : index
    %64 = vector.load %arg15[%c0_39, %c0_40] : memref<1x128xf32, #tpu.memory_space<vmem>>, vector<1x128xf32>
    %65 = vector.broadcast %64 : vector<1x128xf32> to vector<8x128xf32>
    %66 = arith.addf %63, %65 : vector<8x128xf32>
    %c0_41 = arith.constant 0 : index
    %c0_42 = arith.constant 0 : index
    %67 = vector.load %arg16[%c0_41, %c0_42] : memref<8x128xf32, #tpu.memory_space<vmem>>, vector<8x128xf32>
    tpu.vector_store %arg16[%c0_41, %c0_42], %66 {strides = array<i32>} : memref<8x128xf32, #tpu.memory_space<vmem>>, vector<8x128xf32>,
    return
  }
  func.func @transform_0(%arg0: i32) -> (i32, i32) {
    %c0_i32 = arith.constant 0 : i32
    %c0_i32_0 = arith.constant 0 : i32
    return %arg0, %c0_i32 : i32, i32
  }
  func.func @transform_1(%arg0: i32) -> (i32, i32) {
    %c0_i32 = arith.constant 0 : i32
    %c0_i32_0 = arith.constant 0 : i32
    %c0_i32_1 = arith.constant 0 : i32
    return %c0_i32, %c0_i32_0 : i32, i32
  }
  func.func @transform_2(%arg0: i32) -> (i32, i32) {
    %c0_i32 = arith.constant 0 : i32
    %c0_i32_0 = arith.constant 0 : i32
    %c0_i32_1 = arith.constant 0 : i32
    return %c0_i32, %c0_i32_0 : i32, i32
  }
  func.func @transform_3(%arg0: i32) -> (i32, i32) {
    %c0_i32 = arith.constant 0 : i32
    %c0_i32_0 = arith.constant 0 : i32
    %c0_i32_1 = arith.constant 0 : i32
    return %c0_i32, %c0_i32_0 : i32, i32
  }
  func.func @transform_4(%arg0: i32) -> (i32, i32) {
    %c0_i32 = arith.constant 0 : i32
    %c0_i32_0 = arith.constant 0 : i32
    %c0_i32_1 = arith.constant 0 : i32
    return %c0_i32, %c0_i32_0 : i32, i32
  }
  func.func @transform_5(%arg0: i32) -> (i32, i32) {
    %c0_i32 = arith.constant 0 : i32
    %c0_i32_0 = arith.constant 0 : i32
    %c0_i32_1 = arith.constant 0 : i32
    return %c0_i32, %c0_i32_0 : i32, i32
  }
  func.func @transform_6(%arg0: i32) -> (i32, i32) {
    %c0_i32 = arith.constant 0 : i32
    %c0_i32_0 = arith.constant 0 : i32
    %c0_i32_1 = arith.constant 0 : i32
    return %c0_i32, %c0_i32_0 : i32, i32
  }
  func.func @transform_7(%arg0: i32) -> (i32, i32) {
    %c0_i32 = arith.constant 0 : i32
    %c0_i32_0 = arith.constant 0 : i32
    %c0_i32_1 = arith.constant 0 : i32
    return %c0_i32, %c0_i32_0 : i32, i32
  }
  func.func @transform_8(%arg0: i32) -> (i32, i32) {
    %c0_i32 = arith.constant 0 : i32
    %c0_i32_0 = arith.constant 0 : i32
    %c0_i32_1 = arith.constant 0 : i32
    return %c0_i32, %c0_i32_0 : i32, i32
  }
  func.func @transform_9(%arg0: i32) -> (i32, i32) {
    %c0_i32 = arith.constant 0 : i32
    %c0_i32_0 = arith.constant 0 : i32
    %c0_i32_1 = arith.constant 0 : i32
    return %c0_i32, %c0_i32_0 : i32, i32
  }
  func.func @transform_10(%arg0: i32) -> (i32, i32) {
    %c0_i32 = arith.constant 0 : i32
    %c0_i32_0 = arith.constant 0 : i32
    %c0_i32_1 = arith.constant 0 : i32
    return %c0_i32, %c0_i32_0 : i32, i32
  }
  func.func @transform_11(%arg0: i32) -> (i32, i32) {
    %c0_i32 = arith.constant 0 : i32
    %c0_i32_0 = arith.constant 0 : i32
    %c0_i32_1 = arith.constant 0 : i32
    return %c0_i32, %c0_i32_0 : i32, i32
  }
  func.func @transform_12(%arg0: i32) -> (i32, i32) {
    %c0_i32 = arith.constant 0 : i32
    %c0_i32_0 = arith.constant 0 : i32
    %c0_i32_1 = arith.constant 0 : i32
    return %c0_i32, %c0_i32_0 : i32, i32
  }
  func.func @transform_13(%arg0: i32) -> (i32, i32) {
    %c0_i32 = arith.constant 0 : i32
    %c0_i32_0 = arith.constant 0 : i32
    %c0_i32_1 = arith.constant 0 : i32
    return %c0_i32, %c0_i32_0 : i32, i32
  }
  func.func @transform_14(%arg0: i32) -> (i32, i32) {
    %c0_i32 = arith.constant 0 : i32
    %c0_i32_0 = arith.constant 0 : i32
    %c0_i32_1 = arith.constant 0 : i32
    return %c0_i32, %c0_i32_0 : i32, i32
  }
  func.func @transform_15(%arg0: i32) -> (i32, i32) {
    %c0_i32 = arith.constant 0 : i32
    %c0_i32_0 = arith.constant 0 : i32
    return %arg0, %c0_i32 : i32, i32
  }
}

module attributes {stable_mosaic.version = 11 : i64} {
  func.func @fused_kernel(%arg0: i32, %arg1: memref<8x640xf32, #tpu.memory_space<vmem>>, %arg2: memref<640x1280xbf16, #tpu.memory_space<vmem>>, %arg3: memref<1x640xf32, #tpu.memory_space<vmem>>, %arg4: memref<640x1280xbf16, #tpu.memory_space<vmem>>, %arg5: memref<1x640xf32, #tpu.memory_space<vmem>>, %arg6: memref<640x1024xbf16, #tpu.memory_space<vmem>>, %arg7: memref<1x512xf32, #tpu.memory_space<vmem>>, %arg8: memref<512x256xbf16, #tpu.memory_space<vmem>>, %arg9: memref<1x256xf32, #tpu.memory_space<vmem>>, %arg10: memref<256x128xbf16, #tpu.memory_space<vmem>>, %arg11: memref<1x128xf32, #tpu.memory_space<vmem>>, %arg12: memref<128x64xbf16, #tpu.memory_space<vmem>>, %arg13: memref<1x64xf32, #tpu.memory_space<vmem>>, %arg14: memref<64x128xbf16, #tpu.memory_space<vmem>>, %arg15: memref<1x128xf32, #tpu.memory_space<vmem>>, %arg16: memref<8x128xf32, #tpu.memory_space<vmem>>) attributes {dimension_semantics = [#tpu.dimension_semantics<parallel>], iteration_bounds = array<i64: 1>, scalar_prefetch = 0 : i64, scratch_operands = 0 : i64, tpu.core_type = #tpu.core_type<tc>, window_params = [{transform_indices = @transform_0, window_bounds = array<i64: 8, 640>}, {pipeline_mode = #tpu.pipeline_mode<synchronous>, transform_indices = @transform_1, window_bounds = array<i64: 640, 1280>}, {pipeline_mode = #tpu.pipeline_mode<synchronous>, transform_indices = @transform_2, window_bounds = array<i64: 1, 640>}, {pipeline_mode = #tpu.pipeline_mode<synchronous>, transform_indices = @transform_3, window_bounds = array<i64: 640, 1280>}, {pipeline_mode = #tpu.pipeline_mode<synchronous>, transform_indices = @transform_4, window_bounds = array<i64: 1, 640>}, {pipeline_mode = #tpu.pipeline_mode<synchronous>, transform_indices = @transform_5, window_bounds = array<i64: 640, 1024>}, {pipeline_mode = #tpu.pipeline_mode<synchronous>, transform_indices = @transform_6, window_bounds = array<i64: 1, 512>}, {pipeline_mode = #tpu.pipeline_mode<synchronous>, transform_indices = @transform_7, window_bounds = array<i64: 512, 256>}, {pipeline_mode = #tpu.pipeline_mode<synchronous>, transform_indices = @transform_8, window_bounds = array<i64: 1, 256>}, {pipeline_mode = #tpu.pipeline_mode<synchronous>, transform_indices = @transform_9, window_bounds = array<i64: 256, 128>}, {pipeline_mode = #tpu.pipeline_mode<synchronous>, transform_indices = @transform_10, window_bounds = array<i64: 1, 128>}, {pipeline_mode = #tpu.pipeline_mode<synchronous>, transform_indices = @transform_11, window_bounds = array<i64: 128, 64>}, {pipeline_mode = #tpu.pipeline_mode<synchronous>, transform_indices = @transform_12, window_bounds = array<i64: 1, 64>}, {pipeline_mode = #tpu.pipeline_mode<synchronous>, transform_indices = @transform_13, window_bounds = array<i64: 64, 128>}, {pipeline_mode = #tpu.pipeline_mode<synchronous>, transform_indices = @transform_14, window_bounds = array<i64: 1, 128>}, {transform_indices = @transform_15, window_bounds = array<i64: 8, 128>}]} {
    %c0 = arith.constant 0 : index
    %c0_0 = arith.constant 0 : index
    %0 = vector.load %arg1[%c0, %c0_0] : memref<8x640xf32, #tpu.memory_space<vmem>>, vector<8x640xf32>
    %1 = arith.truncf %0 : vector<8x640xf32> to vector<8x640xbf16>
    %c0_1 = arith.constant 0 : index
    %c0_2 = arith.constant 0 : index
    %2 = vector.load %arg2[%c0_1, %c0_2] : memref<640x1280xbf16, #tpu.memory_space<vmem>>, vector<640x1280xbf16>
    %cst = arith.constant dense<0.000000e+00> : vector<8x1280xf32>
    %3 = tpu.matmul %1, %2, %cst {dimension_numbers = #tpu.dot_dimension_numbers<[1], [0], [0], [1], [0, 0, 1, 1], [], []>} : vector<8x640xbf16>, vector<640x1280xbf16>, vector<8x1280xf32> -> vector<8x1280xf32>
    %4 = vector.extract_strided_slice %3 {offsets = [0, 0], sizes = [8, 640], strides = [1, 1]} : vector<8x1280xf32> to vector<8x640xf32>
    %5 = vector.extract_strided_slice %3 {offsets = [0, 640], sizes = [8, 640], strides = [1, 1]} : vector<8x1280xf32> to vector<8x640xf32>
    %6 = arith.maximumf %4, %5 : vector<8x640xf32>
    %c0_3 = arith.constant 0 : index
    %c0_4 = arith.constant 0 : index
    %7 = vector.load %arg3[%c0_3, %c0_4] : memref<1x640xf32, #tpu.memory_space<vmem>>, vector<1x640xf32>
    %8 = vector.broadcast %7 : vector<1x640xf32> to vector<8x640xf32>
    %9 = arith.addf %6, %8 : vector<8x640xf32>
    %cst_5 = arith.constant 0.00999999977 : f32
    %10 = vector.broadcast %cst_5 : f32 to vector<8x640xf32>
    %11 = arith.mulf %10, %9 : vector<8x640xf32>
    %12 = arith.maximumf %9, %11 : vector<8x640xf32>
    %13 = arith.truncf %12 : vector<8x640xf32> to vector<8x640xbf16>
    %c0_6 = arith.constant 0 : index
    %c0_7 = arith.constant 0 : index
    %14 = vector.load %arg4[%c0_6, %c0_7] : memref<640x1280xbf16, #tpu.memory_space<vmem>>, vector<640x1280xbf16>
    %cst_8 = arith.constant dense<0.000000e+00> : vector<8x1280xf32>
    %15 = tpu.matmul %13, %14, %cst_8 {dimension_numbers = #tpu.dot_dimension_numbers<[1], [0], [0], [1], [0, 0, 1, 1], [], []>} : vector<8x640xbf16>, vector<640x1280xbf16>, vector<8x1280xf32> -> vector<8x1280xf32>
    %16 = vector.extract_strided_slice %15 {offsets = [0, 0], sizes = [8, 640], strides = [1, 1]} : vector<8x1280xf32> to vector<8x640xf32>
    %17 = vector.extract_strided_slice %15 {offsets = [0, 640], sizes = [8, 640], strides = [1, 1]} : vector<8x1280xf32> to vector<8x640xf32>
    %18 = arith.maximumf %16, %17 : vector<8x640xf32>
    %c0_9 = arith.constant 0 : index
    %c0_10 = arith.constant 0 : index
    %19 = vector.load %arg5[%c0_9, %c0_10] : memref<1x640xf32, #tpu.memory_space<vmem>>, vector<1x640xf32>
    %20 = vector.broadcast %19 : vector<1x640xf32> to vector<8x640xf32>
    %21 = arith.addf %18, %20 : vector<8x640xf32>
    %cst_11 = arith.constant 0.00999999977 : f32
    %22 = vector.broadcast %cst_11 : f32 to vector<8x640xf32>
    %23 = arith.mulf %22, %21 : vector<8x640xf32>
    %24 = arith.maximumf %21, %23 : vector<8x640xf32>
    %25 = arith.truncf %24 : vector<8x640xf32> to vector<8x640xbf16>
    %c0_12 = arith.constant 0 : index
    %c0_13 = arith.constant 0 : index
    %26 = vector.load %arg6[%c0_12, %c0_13] : memref<640x1024xbf16, #tpu.memory_space<vmem>>, vector<640x1024xbf16>
    %cst_14 = arith.constant dense<0.000000e+00> : vector<8x1024xf32>
    %27 = tpu.matmul %25, %26, %cst_14 {dimension_numbers = #tpu.dot_dimension_numbers<[1], [0], [0], [1], [0, 0, 1, 1], [], []>} : vector<8x640xbf16>, vector<640x1024xbf16>, vector<8x1024xf32> -> vector<8x1024xf32>
    %28 = vector.extract_strided_slice %27 {offsets = [0, 0], sizes = [8, 512], strides = [1, 1]} : vector<8x1024xf32> to vector<8x512xf32>
    %29 = vector.extract_strided_slice %27 {offsets = [0, 512], sizes = [8, 512], strides = [1, 1]} : vector<8x1024xf32> to vector<8x512xf32>
    %30 = arith.maximumf %28, %29 : vector<8x512xf32>
    %c0_15 = arith.constant 0 : index
    %c0_16 = arith.constant 0 : index
    %31 = vector.load %arg7[%c0_15, %c0_16] : memref<1x512xf32, #tpu.memory_space<vmem>>, vector<1x512xf32>
    %32 = vector.broadcast %31 : vector<1x512xf32> to vector<8x512xf32>
    %33 = arith.addf %30, %32 : vector<8x512xf32>
    %cst_17 = arith.constant 0.00999999977 : f32
    %34 = vector.broadcast %cst_17 : f32 to vector<8x512xf32>
    %35 = arith.mulf %34, %33 : vector<8x512xf32>
    %36 = arith.maximumf %33, %35 : vector<8x512xf32>
    %37 = arith.truncf %36 : vector<8x512xf32> to vector<8x512xbf16>
    %c0_18 = arith.constant 0 : index
    %c0_19 = arith.constant 0 : index
    %38 = vector.load %arg8[%c0_18, %c0_19] : memref<512x256xbf16, #tpu.memory_space<vmem>>, vector<512x256xbf16>
    %cst_20 = arith.constant dense<0.000000e+00> : vector<8x256xf32>
    %39 = tpu.matmul %37, %38, %cst_20 {dimension_numbers = #tpu.dot_dimension_numbers<[1], [0], [0], [1], [0, 0, 1, 1], [], []>} : vector<8x512xbf16>, vector<512x256xbf16>, vector<8x256xf32> -> vector<8x256xf32>
    %c0_21 = arith.constant 0 : index
    %c0_22 = arith.constant 0 : index
    %40 = vector.load %arg9[%c0_21, %c0_22] : memref<1x256xf32, #tpu.memory_space<vmem>>, vector<1x256xf32>
    %41 = vector.broadcast %40 : vector<1x256xf32> to vector<8x256xf32>
    %42 = arith.addf %39, %41 : vector<8x256xf32>
    %cst_23 = arith.constant 0.000000e+00 : f32
    %43 = vector.broadcast %cst_23 : f32 to vector<8x256xf32>
    %44 = arith.maximumf %42, %43 : vector<8x256xf32>
    %45 = arith.truncf %44 : vector<8x256xf32> to vector<8x256xbf16>
    %c0_24 = arith.constant 0 : index
    %c0_25 = arith.constant 0 : index
    %46 = vector.load %arg10[%c0_24, %c0_25] : memref<256x128xbf16, #tpu.memory_space<vmem>>, vector<256x128xbf16>
    %cst_26 = arith.constant dense<0.000000e+00> : vector<8x128xf32>
    %47 = tpu.matmul %45, %46, %cst_26 {dimension_numbers = #tpu.dot_dimension_numbers<[1], [0], [0], [1], [0, 0, 1, 1], [], []>} : vector<8x256xbf16>, vector<256x128xbf16>, vector<8x128xf32> -> vector<8x128xf32>
    %c0_27 = arith.constant 0 : index
    %c0_28 = arith.constant 0 : index
    %48 = vector.load %arg11[%c0_27, %c0_28] : memref<1x128xf32, #tpu.memory_space<vmem>>, vector<1x128xf32>
    %49 = vector.broadcast %48 : vector<1x128xf32> to vector<8x128xf32>
    %50 = arith.addf %47, %49 : vector<8x128xf32>
    %cst_29 = arith.constant 0.000000e+00 : f32
    %51 = vector.broadcast %cst_29 : f32 to vector<8x128xf32>
    %52 = arith.maximumf %50, %51 : vector<8x128xf32>
    %53 = arith.truncf %52 : vector<8x128xf32> to vector<8x128xbf16>
    %c0_30 = arith.constant 0 : index
    %c0_31 = arith.constant 0 : index
    %54 = vector.load %arg12[%c0_30, %c0_31] : memref<128x64xbf16, #tpu.memory_space<vmem>>, vector<128x64xbf16>
    %cst_32 = arith.constant dense<0.000000e+00> : vector<8x64xf32>
    %55 = tpu.matmul %53, %54, %cst_32 {dimension_numbers = #tpu.dot_dimension_numbers<[1], [0], [0], [1], [0, 0, 1, 1], [], []>} : vector<8x128xbf16>, vector<128x64xbf16>, vector<8x64xf32> -> vector<8x64xf32>
    %c0_33 = arith.constant 0 : index
    %c0_34 = arith.constant 0 : index
    %56 = vector.load %arg13[%c0_33, %c0_34] : memref<1x64xf32, #tpu.memory_space<vmem>>, vector<1x64xf32>
    %57 = vector.broadcast %56 : vector<1x64xf32> to vector<8x64xf32>
    %58 = arith.addf %55, %57 : vector<8x64xf32>
    %cst_35 = arith.constant 0.000000e+00 : f32
    %59 = vector.broadcast %cst_35 : f32 to vector<8x64xf32>
    %60 = arith.maximumf %58, %59 : vector<8x64xf32>
    %61 = arith.truncf %60 : vector<8x64xf32> to vector<8x64xbf16>
    %c0_36 = arith.constant 0 : index
    %c0_37 = arith.constant 0 : index
    %62 = vector.load %arg14[%c0_36, %c0_37] : memref<64x128xbf16, #tpu.memory_space<vmem>>, vector<64x128xbf16>
    %cst_38 = arith.constant dense<0.000000e+00> : vector<8x128xf32>
    %63 = tpu.matmul %61, %62, %cst_38 {dimension_numbers = #tpu.dot_dimension_numbers<[1], [0], [0], [1], [0, 0, 1, 1], [], []>} : vector<8x64xbf16>, vector<64x128xbf16>, vector<8x128xf32> -> vector<8x128xf32>
    %c0_39 = arith.constant 0 : index
    %c0_40 = arith.constant 0 : index
    %64 = vector.load %arg15[%c0_39, %c0_40] : memref<1x128xf32, #tpu.memory_space<vmem>>, vector<1x128xf32>
    %65 = vector.broadcast %64 : vector<1x128xf32> to vector<8x128xf32>
    %66 = arith.addf %63, %65 : vector<8x128xf32>
    %c0_41 = arith.constant 0 : index
    %c0_42 = arith.constant 0 : index
    %67 = vector.load %arg16[%c0_41, %c0_42] : memref<8x128xf32, #tpu.memory_space<vmem>>, vector<8x128xf32>
    tpu.vector_store %arg16[%c0_41, %c0_42], %66 {strides = array<i32>} : memref<8x128xf32, #tpu.memory_space<vmem>>, vector<8x128xf32>,
    return
  }
  func.func @transform_0(%arg0: i32) -> (i32, i32) {
    %c0_i32 = arith.constant 0 : i32
    %c0_i32_0 = arith.constant 0 : i32
    return %arg0, %c0_i32 : i32, i32
  }
  func.func @transform_1(%arg0: i32) -> (i32, i32) {
    %c0_i32 = arith.constant 0 : i32
    %c0_i32_0 = arith.constant 0 : i32
    %c0_i32_1 = arith.constant 0 : i32
    return %c0_i32, %c0_i32_0 : i32, i32
  }
  func.func @transform_2(%arg0: i32) -> (i32, i32) {
    %c0_i32 = arith.constant 0 : i32
    %c0_i32_0 = arith.constant 0 : i32
    %c0_i32_1 = arith.constant 0 : i32
    return %c0_i32, %c0_i32_0 : i32, i32
  }
  func.func @transform_3(%arg0: i32) -> (i32, i32) {
    %c0_i32 = arith.constant 0 : i32
    %c0_i32_0 = arith.constant 0 : i32
    %c0_i32_1 = arith.constant 0 : i32
    return %c0_i32, %c0_i32_0 : i32, i32
  }
  func.func @transform_4(%arg0: i32) -> (i32, i32) {
    %c0_i32 = arith.constant 0 : i32
    %c0_i32_0 = arith.constant 0 : i32
    %c0_i32_1 = arith.constant 0 : i32
    return %c0_i32, %c0_i32_0 : i32, i32
  }
  func.func @transform_5(%arg0: i32) -> (i32, i32) {
    %c0_i32 = arith.constant 0 : i32
    %c0_i32_0 = arith.constant 0 : i32
    %c0_i32_1 = arith.constant 0 : i32
    return %c0_i32, %c0_i32_0 : i32, i32
  }
  func.func @transform_6(%arg0: i32) -> (i32, i32) {
    %c0_i32 = arith.constant 0 : i32
    %c0_i32_0 = arith.constant 0 : i32
    %c0_i32_1 = arith.constant 0 : i32
    return %c0_i32, %c0_i32_0 : i32, i32
  }
  func.func @transform_7(%arg0: i32) -> (i32, i32) {
    %c0_i32 = arith.constant 0 : i32
    %c0_i32_0 = arith.constant 0 : i32
    %c0_i32_1 = arith.constant 0 : i32
    return %c0_i32, %c0_i32_0 : i32, i32
  }
  func.func @transform_8(%arg0: i32) -> (i32, i32) {
    %c0_i32 = arith.constant 0 : i32
    %c0_i32_0 = arith.constant 0 : i32
    %c0_i32_1 = arith.constant 0 : i32
    return %c0_i32, %c0_i32_0 : i32, i32
  }
  func.func @transform_9(%arg0: i32) -> (i32, i32) {
    %c0_i32 = arith.constant 0 : i32
    %c0_i32_0 = arith.constant 0 : i32
    %c0_i32_1 = arith.constant 0 : i32
    return %c0_i32, %c0_i32_0 : i32, i32
  }
  func.func @transform_10(%arg0: i32) -> (i32, i32) {
    %c0_i32 = arith.constant 0 : i32
    %c0_i32_0 = arith.constant 0 : i32
    %c0_i32_1 = arith.constant 0 : i32
    return %c0_i32, %c0_i32_0 : i32, i32
  }
  func.func @transform_11(%arg0: i32) -> (i32, i32) {
    %c0_i32 = arith.constant 0 : i32
    %c0_i32_0 = arith.constant 0 : i32
    %c0_i32_1 = arith.constant 0 : i32
    return %c0_i32, %c0_i32_0 : i32, i32
  }
  func.func @transform_12(%arg0: i32) -> (i32, i32) {
    %c0_i32 = arith.constant 0 : i32
    %c0_i32_0 = arith.constant 0 : i32
    %c0_i32_1 = arith.constant 0 : i32
    return %c0_i32, %c0_i32_0 : i32, i32
  }
  func.func @transform_13(%arg0: i32) -> (i32, i32) {
    %c0_i32 = arith.constant 0 : i32
    %c0_i32_0 = arith.constant 0 : i32
    %c0_i32_1 = arith.constant 0 : i32
    return %c0_i32, %c0_i32_0 : i32, i32
  }
  func.func @transform_14(%arg0: i32) -> (i32, i32) {
    %c0_i32 = arith.constant 0 : i32
    %c0_i32_0 = arith.constant 0 : i32
    %c0_i32_1 = arith.constant 0 : i32
    return %c0_i32, %c0_i32_0 : i32, i32
  }
  func.func @transform_15(%arg0: i32) -> (i32, i32) {
    %c0_i32 = arith.constant 0 : i32
    %c0_i32_0 = arith.constant 0 : i32
    return %arg0, %c0_i32 : i32, i32
  }
}

</mosaic_0001>

<bundles_post_ra>
// kernel: _lambda_.1
= control target key start
LH: loop header
LB: loop body
LE: loop exit
PB: predicated region body
PF: predicated region fallthrough
CT: control target
= control target key end

     0   :  { %v12236_v1 = vmov 0   ;;  %vm12238_vm0 = vmmov 0   ;;  %vm9460_vm1 = vcmask 523264   ;;  %s16271_s1 = inlined_call_operand.vmem [shape: bf16[640,1280], index: 1, kind: input, shape index: {}]   ;;  %s16272_s0 = inlined_call_operand.vmem [shape: f32[8,640], index: 0, kind: input, shape index: {}]   ;;  %s16273_s3 = inlined_call_operand.vmem [shape: bf16[640,1280], index: 3, kind: input, shape index: {}]   ;;  %s16274_s2 = inlined_call_operand.vmem [shape: f32[1,640], index: 2, kind: input, shape index: {}]   ;;  %s16275_s5 = inlined_call_operand.vmem [shape: bf16[640,1024], index: 5, kind: input, shape index: {}]   ;;  %s16276_s4 = inlined_call_operand.vmem [shape: f32[1,640], index: 4, kind: input, shape index: {}]   ;;  %s16277_s7 = inlined_call_operand.vmem [shape: bf16[512,256], index: 7, kind: input, shape index: {}]   ;;  %s16278_s9 = inlined_call_operand.vmem [shape: bf16[256,128], index: 9, kind: input, shape index: {}]   ;;  %s16279_s6 = inlined_call_operand.vmem [shape: f32[1,512], index: 6, kind: input, shape index: {}]   ;;  %s16280_s11 = inlined_call_operand.vmem [shape: bf16[128,64], index: 11, kind: input, shape index: {}]   ;;  %s16281_s8 = inlined_call_operand.vmem [shape: f32[1,256], index: 8, kind: input, shape index: {}]   ;;  %s16282_s13 = inlined_call_operand.vmem [shape: bf16[64,128], index: 13, kind: input, shape index: {}]   ;;  %s16283_s10 = inlined_call_operand.vmem [shape: f32[1,128], index: 10, kind: input, shape index: {}]   ;;  %s16284_s12 = inlined_call_operand.vmem [shape: f32[1,64], index: 12, kind: input, shape index: {}]   ;;  %s16285_s14 = inlined_call_operand.vmem [shape: f32[1,128], index: 14, kind: input, shape index: {}]   ;;  %s16286_s15 = inlined_call_operand.vmem [shape: f32[8,128], index: 15, kind: output, shape index: {}]  }
   0x1   :  { %v10912_v0 = vld [vmem:[%s16271_s1 + $0x4] ss:$40 sps:$4 sm:$0xff]   ;;  %2575 = vmatprep.mubr.bf16.mxu1 %v12236_v1  ;;  %v10916_v3 = vld [vmem:[%s16271_s1] ss:$40 sps:$4 sm:$0xff]   ;;  %v10918_v5 = vld [vmem:[%s16271_s1 + $0x54] ss:$40 sps:$4 sm:$0xff]  }
   0x2   :  { %v10914_v2 = vld [vmem:[%s16271_s1 + $0xa04] ss:$40 sps:$4 sm:$0xff]   ;;  %2461 = vmatprep.subr.bf16.mxu0 %v10912_v0  ;;  %v10917_v4 = vld [vmem:[%s16271_s1 + $0xa00] ss:$40 sps:$4 sm:$0xff]   ;;  %v10920_v6 = vld [vmem:[%s16271_s1 + $0xa54] ss:$40 sps:$4 sm:$0xff]  }
   0x3   :  { %2543 = vmatprep.subr.bf16.mxu1 %v10914_v2  ;;  %2462 = vmatpush1.bf16.msra.mxu0 %v10916_v3  ;;  %v10922_v7 = vld [vmem:[%s16271_s1 + $0x50] ss:$40 sps:$4 sm:$0xff]   ;;  %v10924_v9 = vld [vmem:[%s16271_s1 + $0xa4] ss:$40 sps:$4 sm:$0xff]   ;;  %v10928_v11 = vld [vmem:[%s16271_s1 + $0xa0] ss:$40 sps:$4 sm:$0xff]  }
   0x4   :  { %2544 = vmatpush1.bf16.msra.mxu1 %v10917_v4  ;;  %2463 = vmatprep.subr.bf16.mxu0 %v10918_v5  ;;  %v10923_v8 = vld [vmem:[%s16271_s1 + $0xa50] ss:$40 sps:$4 sm:$0xff]   ;;  %v10926_v10 = vld [vmem:[%s16271_s1 + $0xaa4] ss:$40 sps:$4 sm:$0xff]   ;;  %v10929_v12 = vld [vmem:[%s16271_s1 + $0xaa0] ss:$40 sps:$4 sm:$0xff]  }
   0x5   :  { %2545 = vmatprep.subr.bf16.mxu1 %v10920_v6  ;;  %v10930_v13 = vld [vmem:[%s16271_s1 + $0xf4] ss:$40 sps:$4 sm:$0xff]   ;;  %v10934_v15 = vld [vmem:[%s16271_s1 + $0xf0] ss:$40 sps:$4 sm:$0xff]   ;;  %v10936_v17 = vld [vmem:[%s16271_s1 + $0x144] ss:$40 sps:$4 sm:$0xff]  }
   0x6   :  { %v10932_v14 = vld [vmem:[%s16271_s1 + $0xaf4] ss:$40 sps:$4 sm:$0xff]   ;;  %v10935_v16 = vld [vmem:[%s16271_s1 + $0xaf0] ss:$40 sps:$4 sm:$0xff]   ;;  %v10938_v18 = vld [vmem:[%s16271_s1 + $0xb44] ss:$40 sps:$4 sm:$0xff]  }
   0x7   :  { %2464 = vmatpush1.bf16.msra.mxu0 %v10922_v7  ;;  %v10940_v19 = vld [vmem:[%s16271_s1 + $0x140] ss:$40 sps:$4 sm:$0xff]   ;;  %v10942_v21 = vld [vmem:[%s16271_s1 + $0x194] ss:$40 sps:$4 sm:$0xff]   ;;  %v10946_v23 = vld [vmem:[%s16271_s1 + $0x190] ss:$40 sps:$4 sm:$0xff]  }
   0x8   :  { %2546 = vmatpush1.bf16.msra.mxu1 %v10923_v8  ;;  %2465 = vmatprep.subr.bf16.mxu0 %v10924_v9  ;;  %v10941_v20 = vld [vmem:[%s16271_s1 + $0xb40] ss:$40 sps:$4 sm:$0xff]   ;;  %v10944_v22 = vld [vmem:[%s16271_s1 + $0xb94] ss:$40 sps:$4 sm:$0xff]   ;;  %v10947_v24 = vld [vmem:[%s16271_s1 + $0xb90] ss:$40 sps:$4 sm:$0xff]  }
   0x9   :  { %2547 = vmatprep.subr.bf16.mxu1 %v10926_v10  ;;  %v10948_v25 = vld [vmem:[%s16271_s1 + $0x1e4] ss:$40 sps:$4 sm:$0xff]   ;;  %v10952_v27 = vld [vmem:[%s16271_s1 + $0x1e0] ss:$40 sps:$4 sm:$0xff]   ;;  %v10954_v29 = vld [vmem:[%s16271_s1 + $0x234] ss:$40 sps:$4 sm:$0xff]  }
   0xa   :  { %v10950_v26 = vld [vmem:[%s16271_s1 + $0xbe4] ss:$40 sps:$4 sm:$0xff]   ;;  %v10953_v28 = vld [vmem:[%s16271_s1 + $0xbe0] ss:$40 sps:$4 sm:$0xff]   ;;  %v10956_v30 = vld [vmem:[%s16271_s1 + $0xc34] ss:$40 sps:$4 sm:$0xff]  }
   0xb   :  { %2466 = vmatpush1.bf16.msra.mxu0 %v10928_v11  ;;  %v10958_v31 = vld [vmem:[%s16271_s1 + $0x230] ss:$40 sps:$4 sm:$0xff]   ;;  %v55_v33 = vld [vmem:[%s16272_s0 + $0x20] sm:$0xff]  ;;  %v10964_v35 = vld [vmem:[%s16271_s1 + $0xc] ss:$40 sps:$4 sm:$0xff]  }
   0xc   :  { %2548 = vmatpush1.bf16.msra.mxu1 %v10929_v12  ;;  %2467 = vmatprep.subr.bf16.mxu0 %v10930_v13  ;;  %v10959_v32 = vld [vmem:[%s16271_s1 + $0xc30] ss:$40 sps:$4 sm:$0xff]   ;;  %v10960_v34 = vld [vmem:[%s16271_s1 + $0x284] ss:$40 sps:$4 sm:$0xff]   ;;  %v10965_v37 = vld [vmem:[%s16271_s1 + $0x280] ss:$40 sps:$4 sm:$0xff]   ;;  %v12431_v38 = vpack.c.bf16 %v55_v33, %v55_v33 }
   0xd   :  { %2549 = vmatprep.subr.bf16.mxu1 %v10932_v14  ;;  %v10962_v36 = vld [vmem:[%s16271_s1 + $0x8] ss:$40 sps:$4 sm:$0xff]   ;;  %v10966_v39 = vld [vmem:[%s16271_s1 + $0x2d4] ss:$40 sps:$4 sm:$0xff]   ;;  %v10968_v41 = vld [vmem:[%s16271_s1 + $0x58] ss:$40 sps:$4 sm:$0xff]  }
   0xe   :  { %v10970_v40 = vld [vmem:[%s16271_s1 + $0x5c] ss:$40 sps:$4 sm:$0xff]   ;;  %v10971_v42 = vld [vmem:[%s16271_s1 + $0x2d0] ss:$40 sps:$4 sm:$0xff]   ;;  %v10976_v44 = vld [vmem:[%s16271_s1 + $0xac] ss:$40 sps:$4 sm:$0xff]  }
   0xf   :  { %2468 = vmatpush1.bf16.msra.mxu0 %v10934_v15  ;;  %v10972_v43 = vld [vmem:[%s16271_s1 + $0x324] ss:$40 sps:$4 sm:$0xff]   ;;  %v10974_v45 = vld [vmem:[%s16271_s1 + $0xa8] ss:$40 sps:$4 sm:$0xff]   ;;  %v10978_v47 = vld [vmem:[%s16271_s1 + $0x374] ss:$40 sps:$4 sm:$0xff]  }
  0x10   :  { %2550 = vmatpush1.bf16.msra.mxu1 %v10935_v16  ;;  %2469 = vmatprep.subr.bf16.mxu0 %v10936_v17  ;;  %v10977_v46 = vld [vmem:[%s16271_s1 + $0x320] ss:$40 sps:$4 sm:$0xff]   ;;  %v10982_v48 = vld [vmem:[%s16271_s1 + $0xfc] ss:$40 sps:$4 sm:$0xff]   ;;  %v10983_v51 = vld [vmem:[%s16271_s1 + $0x370] ss:$40 sps:$4 sm:$0xff]  }
  0x11   :  { %2551 = vmatprep.subr.bf16.mxu1 %v10938_v18  ;;  %v52_v49 = vld [vmem:[%s16272_s0 + $0x8] sm:$0xff]  ;;  %v10980_v50 = vld [vmem:[%s16271_s1 + $0xf8] ss:$40 sps:$4 sm:$0xff]   ;;  %v10990_v57 = vld [vmem:[%s16271_s1 + $0x414] ss:$40 sps:$4 sm:$0xff]  }
  0x12   :  { %v12473_v52 = vpack.c.bf16 %v52_v49, %v52_v49  ;;  %v10984_v53 = vld [vmem:[%s16271_s1 + $0x3c4] ss:$40 sps:$4 sm:$0xff]   ;;  %v10986_v55 = vld [vmem:[%s16271_s1 + $0x148] ss:$40 sps:$4 sm:$0xff]   ;;  %v10992_v59 = vld [vmem:[%s16271_s1 + $0x198] ss:$40 sps:$4 sm:$0xff]  }
  0x13   :  { %2470 = vmatpush1.bf16.msra.mxu0 %v10940_v19  ;;  %v10988_v54 = vld [vmem:[%s16271_s1 + $0x14c] ss:$40 sps:$4 sm:$0xff]   ;;  %v10989_v56 = vld [vmem:[%s16271_s1 + $0x3c0] ss:$40 sps:$4 sm:$0xff]   ;;  %v10994_v58 = vld [vmem:[%s16271_s1 + $0x19c] ss:$40 sps:$4 sm:$0xff]  }
  0x14   :  { %2552 = vmatpush1.bf16.msra.mxu1 %v10941_v20  ;;  %2471 = vmatprep.subr.bf16.mxu0 %v10942_v21  ;;  %v10995_v60 = vld [vmem:[%s16271_s1 + $0x410] ss:$40 sps:$4 sm:$0xff]   ;;  %v10996_v61 = vld [vmem:[%s16271_s1 + $0x464] ss:$40 sps:$4 sm:$0xff]   ;;  %v11001_v0 = vld [vmem:[%s16271_s1 + $0x460] ss:$40 sps:$4 sm:$0xff]  }
  0x15   :  { %2553 = vmatprep.subr.bf16.mxu1 %v10944_v22  ;;  %2493 = vmatprep.mubr.bf16.mxu0 %v12473_v52  ;;  %v11000_v62 = vld [vmem:[%s16271_s1 + $0x1ec] ss:$40 sps:$4 sm:$0xff]   ;;  %v10998_v63 = vld [vmem:[%s16271_s1 + $0x1e8] ss:$40 sps:$4 sm:$0xff]   ;;  %v11006_v3 = vld [vmem:[%s16271_s1 + $0x23c] ss:$40 sps:$4 sm:$0xff]  }
  0x16   :  { %v11002_v2 = vld [vmem:[%s16271_s1 + $0x4b4] ss:$40 sps:$4 sm:$0xff]   ;;  %v11004_v4 = vld [vmem:[%s16271_s1 + $0x238] ss:$40 sps:$4 sm:$0xff]   ;;  %v11010_v6 = vld [vmem:[%s16271_s1 + $0x504] ss:$40 sps:$4 sm:$0xff]  }
  0x17   :  { %2472 = vmatpush1.bf16.msra.mxu0 %v10946_v23  ;;  %v11007_v5 = vld [vmem:[%s16271_s1 + $0x4b0] ss:$40 sps:$4 sm:$0xff]   ;;  %v51_v7 = vld [vmem:[%s16272_s0] sm:$0xff]  ;;  %v11013_v8 = vld [vmem:[%s16271_s1 + $0x28c] ss:$40 sps:$4 sm:$0xff]  }
  0x18   :  { %2554 = vmatpush1.bf16.msra.mxu1 %v10947_v24  ;;  %2473 = vmatprep.subr.bf16.mxu0 %v10948_v25  ;;  %v11008_v9 = vld [vmem:[%s16271_s1 + $0x500] ss:$40 sps:$4 sm:$0xff]   ;;  %v12537_v10 = vpack.c.bf16 %v51_v7, %v51_v7  ;;  %v11016_v12 = vld [vmem:[%s16271_s1 + $0x554] ss:$40 sps:$4 sm:$0xff]   ;;  %v11014_v14 = vld [vmem:[%s16271_s1 + $0x550] ss:$40 sps:$4 sm:$0xff]  }
  0x19   :  { %2555 = vmatprep.subr.bf16.mxu1 %v10950_v26  ;;  %v11011_v11 = vld [vmem:[%s16271_s1 + $0x288] ss:$40 sps:$4 sm:$0xff]   ;;  %v11019_v13 = vld [vmem:[%s16271_s1 + $0x2dc] ss:$40 sps:$4 sm:$0xff]   ;;  %v11017_v15 = vld [vmem:[%s16271_s1 + $0x2d8] ss:$40 sps:$4 sm:$0xff]  }
  0x1a   :  { %v11022_v16 = vld [vmem:[%s16271_s1 + $0x5a4] ss:$40 sps:$4 sm:$0xff]   ;;  %v11020_v18 = vld [vmem:[%s16271_s1 + $0x5a0] ss:$40 sps:$4 sm:$0xff]   ;;  %v11028_v20 = vld [vmem:[%s16271_s1 + $0x5f4] ss:$40 sps:$4 sm:$0xff]  }
  0x1b   :  { %2474 = vmatpush1.bf16.msra.mxu0 %v10952_v27  ;;  %v11025_v17 = vld [vmem:[%s16271_s1 + $0x32c] ss:$40 sps:$4 sm:$0xff]   ;;  %v11023_v19 = vld [vmem:[%s16271_s1 + $0x328] ss:$40 sps:$4 sm:$0xff]   ;;  %v11031_v21 = vld [vmem:[%s16271_s1 + $0x37c] ss:$40 sps:$4 sm:$0xff]  }
  0x1c   :  { %2556 = vmatpush1.bf16.msra.mxu1 %v10953_v28  ;;  %2475 = vmatprep.subr.bf16.mxu0 %v10954_v29  ;;  %v11026_v22 = vld [vmem:[%s16271_s1 + $0x5f0] ss:$40 sps:$4 sm:$0xff]   ;;  %v11034_v24 = vld [vmem:[%s16271_s1 + $0x644] ss:$40 sps:$4 sm:$0xff]   ;;  %v11032_v26 = vld [vmem:[%s16271_s1 + $0x640] ss:$40 sps:$4 sm:$0xff]  }
  0x1d   :  { %2557 = vmatprep.subr.bf16.mxu1 %v10956_v30  ;;  %v11029_v23 = vld [vmem:[%s16271_s1 + $0x378] ss:$40 sps:$4 sm:$0xff]   ;;  %v11037_v25 = vld [vmem:[%s16271_s1 + $0x3cc] ss:$40 sps:$4 sm:$0xff]   ;;  %v11035_v27 = vld [vmem:[%s16271_s1 + $0x3c8] ss:$40 sps:$4 sm:$0xff]  }
  0x1e   :  { %v11040_v28 = vld [vmem:[%s16271_s1 + $0x694] ss:$40 sps:$4 sm:$0xff]   ;;  %v11038_v30 = vld [vmem:[%s16271_s1 + $0x690] ss:$40 sps:$4 sm:$0xff]   ;;  %v11092_v7 = vld [vmem:[%s16271_s1 + $0x960] ss:$40 sps:$4 sm:$0xff]  }
  0x1f   :  { %2476 = vmatpush1.bf16.msra.mxu0 %v10958_v31  ;;  %v11043_v29 = vld [vmem:[%s16271_s1 + $0x41c] ss:$40 sps:$4 sm:$0xff]   ;;  %v11041_v31 = vld [vmem:[%s16271_s1 + $0x418] ss:$40 sps:$4 sm:$0xff]   ;;  %v11049_v33 = vld [vmem:[%s16271_s1 + $0x46c] ss:$40 sps:$4 sm:$0xff]  }
  0x20   :  { %2558 = vmatpush1.bf16.msra.mxu1 %v10959_v32  ;;  %2477 = vmatprep.subr.bf16.mxu0 %v10960_v34  ;;  %v11046_v32 = vld [vmem:[%s16271_s1 + $0x6e4] ss:$40 sps:$4 sm:$0xff]   ;;  %v54_v34 = vld [vmem:[%s16272_s0 + $0x18] sm:$0xff] }
  0x21   :  { %2584 = vmatprep.subr.bf16.mxu1 %v10964_v35  ;;  %v11044_v35 = vld [vmem:[%s16271_s1 + $0x6e0] ss:$40 sps:$4 sm:$0xff]   ;;  %v11062_v49 = vld [vmem:[%s16271_s1 + $0x7d0] ss:$40 sps:$4 sm:$0xff]  }
  0x23   :  { %2576 = vmatmul.mubr.bf16.vlgmr.msra.gmra.mrb[0].mxu1 %v12431_v38  ;;  %2478 = vmatpush1.bf16.msra.mxu0 %v10965_v37  ;;  %v11047_v37 = vld [vmem:[%s16271_s1 + $0x468] ss:$40 sps:$4 sm:$0xff]  }
  0x24   :  { %2585 = vmatpush1.bf16.msra.mxu1 %v10962_v36  ;;  %2479 = vmatprep.subr.bf16.mxu0 %v10966_v39  ;;  %v12615_v36 = vpack.c.bf16 %v54_v34, %v54_v34  ;;  %v11052_v39 = vld [vmem:[%s16271_s1 + $0x734] ss:$40 sps:$4 sm:$0xff]   ;;  %v11128_v34 = vld [vmem:[%s16271_s1 + $0x8c8] ss:$40 sps:$4 sm:$0xff]  }
  0x25   :  { %2586 = vmatprep.subr.bf16.mxu1 %v10970_v40  ;;  %2616 = vmatprep.mubr.bf16.mxu1 %v12473_v52  ;;  %v11055_v40 = vld [vmem:[%s16271_s1 + $0x4bc] ss:$40 sps:$4 sm:$0xff]  }
  0x27   :  { %2480 = vmatpush1.bf16.msra.mxu0 %v10971_v42  ;;  %v11053_v42 = vld [vmem:[%s16271_s1 + $0x4b8] ss:$40 sps:$4 sm:$0xff]  }
  0x28   :  { %2587 = vmatpush1.bf16.msra.mxu1 %v10968_v41  ;;  %2481 = vmatprep.subr.bf16.mxu0 %v10972_v43  ;;  %v11050_v41 = vld [vmem:[%s16271_s1 + $0x730] ss:$40 sps:$4 sm:$0xff]   ;;  %v11058_v43 = vld [vmem:[%s16271_s1 + $0x784] ss:$40 sps:$4 sm:$0xff]  }
  0x29   :  { %2588 = vmatprep.subr.bf16.mxu1 %v10976_v44  ;;  %v11061_v44 = vld [vmem:[%s16271_s1 + $0x50c] ss:$40 sps:$4 sm:$0xff]  }
  0x2b   :  { %2482 = vmatpush1.bf16.msra.mxu0 %v10977_v46  ;;  %v11059_v46 = vld [vmem:[%s16271_s1 + $0x508] ss:$40 sps:$4 sm:$0xff]  }
  0x2c   :  { %2589 = vmatpush1.bf16.msra.mxu1 %v10974_v45  ;;  %2483 = vmatprep.subr.bf16.mxu0 %v10978_v47  ;;  %v11056_v45 = vld [vmem:[%s16271_s1 + $0x780] ss:$40 sps:$4 sm:$0xff]   ;;  %v11064_v47 = vld [vmem:[%s16271_s1 + $0x7d4] ss:$40 sps:$4 sm:$0xff]  }
  0x2d   :  { %2590 = vmatprep.subr.bf16.mxu1 %v10982_v48  ;;  %v11067_v48 = vld [vmem:[%s16271_s1 + $0x55c] ss:$40 sps:$4 sm:$0xff]  }
  0x2f   :  { %2484 = vmatpush1.bf16.msra.mxu0 %v10983_v51  ;;  %v11070_v51 = vld [vmem:[%s16271_s1 + $0x824] ss:$40 sps:$4 sm:$0xff]  }
  0x30   :  { %2591 = vmatpush1.bf16.msra.mxu1 %v10980_v50  ;;  %2485 = vmatprep.subr.bf16.mxu0 %v10984_v53  ;;  %v11065_v50 = vld [vmem:[%s16271_s1 + $0x558] ss:$40 sps:$4 sm:$0xff]   ;;  %v11073_v53 = vld [vmem:[%s16271_s1 + $0x5ac] ss:$40 sps:$4 sm:$0xff]  }
  0x31   :  { %2592 = vmatprep.subr.bf16.mxu1 %v10988_v54  ;;  %v11068_v54 = vld [vmem:[%s16271_s1 + $0x820] ss:$40 sps:$4 sm:$0xff]  }
  0x33   :  { %2486 = vmatpush1.bf16.msra.mxu0 %v10989_v56  ;;  %v11076_v56 = vld [vmem:[%s16271_s1 + $0x874] ss:$40 sps:$4 sm:$0xff]  }
  0x34   :  { %2593 = vmatpush1.bf16.msra.mxu1 %v10986_v55  ;;  %2487 = vmatprep.subr.bf16.mxu0 %v10990_v57  ;;  %v11071_v55 = vld [vmem:[%s16271_s1 + $0x5a8] ss:$40 sps:$4 sm:$0xff]   ;;  %v11079_v57 = vld [vmem:[%s16271_s1 + $0x5fc] ss:$40 sps:$4 sm:$0xff]  }
  0x35   :  { %2594 = vmatprep.subr.bf16.mxu1 %v10994_v58  ;;  %v11074_v58 = vld [vmem:[%s16271_s1 + $0x870] ss:$40 sps:$4 sm:$0xff]  }
  0x37   :  { %2488 = vmatpush1.bf16.msra.mxu0 %v10995_v60  ;;  %v11082_v60 = vld [vmem:[%s16271_s1 + $0x8c4] ss:$40 sps:$4 sm:$0xff]  }
  0x38   :  { %2595 = vmatpush1.bf16.msra.mxu1 %v10992_v59  ;;  %2489 = vmatprep.subr.bf16.mxu0 %v10996_v61  ;;  %v11077_v59 = vld [vmem:[%s16271_s1 + $0x5f8] ss:$40 sps:$4 sm:$0xff]   ;;  %v11085_v61 = vld [vmem:[%s16271_s1 + $0x64c] ss:$40 sps:$4 sm:$0xff]  }
  0x39   :  { %2596 = vmatprep.subr.bf16.mxu1 %v11000_v62  ;;  %v11080_v62 = vld [vmem:[%s16271_s1 + $0x8c0] ss:$40 sps:$4 sm:$0xff]  }
  0x3b   :  { %2490 = vmatpush1.bf16.msra.mxu0 %v11001_v0  ;;  %v11088_v0 = vld [vmem:[%s16271_s1 + $0x914] ss:$40 sps:$4 sm:$0xff]  }
  0x3c   :  { %2597 = vmatpush1.bf16.msra.mxu1 %v10998_v63  ;;  %2491 = vmatprep.subr.bf16.mxu0 %v11002_v2  ;;  %v11083_v63 = vld [vmem:[%s16271_s1 + $0x648] ss:$40 sps:$4 sm:$0xff]   ;;  %v11091_v2 = vld [vmem:[%s16271_s1 + $0x69c] ss:$40 sps:$4 sm:$0xff]  }
  0x3d   :  { %2598 = vmatprep.subr.bf16.mxu1 %v11006_v3  ;;  %v11086_v3 = vld [vmem:[%s16271_s1 + $0x910] ss:$40 sps:$4 sm:$0xff]  }
  0x3f   :  { %2492 = vmatpush1.bf16.msra.mxu0 %v11007_v5  ;;  %v11094_v5 = vld [vmem:[%s16271_s1 + $0x964] ss:$40 sps:$4 sm:$0xff]  }
  0x40   :  { %2599 = vmatpush1.bf16.msra.mxu1 %v11004_v4  ;;  %2502 = vmatprep.subr.bf16.mxu0 %v11010_v6  ;;  %v11089_v4 = vld [vmem:[%s16271_s1 + $0x698] ss:$40 sps:$4 sm:$0xff]   ;;  %v11097_v6 = vld [vmem:[%s16271_s1 + $0x6ec] ss:$40 sps:$4 sm:$0xff]  }
  0x41   :  { %2600 = vmatprep.subr.bf16.mxu1 %v11013_v8  ;;  %v11095_v8 = vld [vmem:[%s16271_s1 + $0x6e8] ss:$40 sps:$4 sm:$0xff]  }
  0x42   :  { %2494 = vmatmul.mubr.bf16.vlgmr.msra.gmra.mrb[0].mxu0 %v12537_v10 }
  0x43   :  { %2503 = vmatpush1.bf16.msra.mxu0 %v11008_v9  ;;  %2534 = vmatprep.mubr.bf16.mxu0 %v12615_v36  ;;  %v11100_v9 = vld [vmem:[%s16271_s1 + $0x9b4] ss:$40 sps:$4 sm:$0xff]  }
  0x44   :  { %2601 = vmatpush1.bf16.msra.mxu1 %v11011_v11  ;;  %2504 = vmatprep.subr.bf16.mxu0 %v11016_v12  ;;  %v11103_v11 = vld [vmem:[%s16271_s1 + $0x73c] ss:$40 sps:$4 sm:$0xff]   ;;  %v11098_v12 = vld [vmem:[%s16271_s1 + $0x9b0] ss:$40 sps:$4 sm:$0xff]  }
  0x45   :  { %2602 = vmatprep.subr.bf16.mxu1 %v11019_v13  ;;  %v11101_v13 = vld [vmem:[%s16271_s1 + $0x738] ss:$40 sps:$4 sm:$0xff]  }
  0x47   :  { %2505 = vmatpush1.bf16.msra.mxu0 %v11014_v14  ;;  %v53_v14 = vld [vmem:[%s16272_s0 + $0x10] sm:$0xff] }
  0x48   :  { %2603 = vmatpush1.bf16.msra.mxu1 %v11017_v15  ;;  %2506 = vmatprep.subr.bf16.mxu0 %v11022_v16  ;;  %v11106_v15 = vld [vmem:[%s16271_s1 + $0x78c] ss:$40 sps:$4 sm:$0xff]  }
  0x49   :  { %2604 = vmatprep.subr.bf16.mxu1 %v11025_v17  ;;  %v11109_v16 = vld [vmem:[%s16271_s1 + $0x14] ss:$40 sps:$4 sm:$0xff]   ;;  %v12740_v17 = vpack.c.bf16 %v53_v14, %v53_v14 }
  0x4a   :  { %v11193_v14 = vld [vmem:[%s16271_s1 + $0x474] ss:$40 sps:$4 sm:$0xff]  }
  0x4b   :  { %2507 = vmatpush1.bf16.msra.mxu0 %v11020_v18  ;;  %v11104_v18 = vld [vmem:[%s16271_s1 + $0x788] ss:$40 sps:$4 sm:$0xff]  }
  0x4c   :  { %2605 = vmatpush1.bf16.msra.mxu1 %v11023_v19  ;;  %2508 = vmatprep.subr.bf16.mxu0 %v11028_v20  ;;  %v11107_v19 = vld [vmem:[%s16271_s1 + $0x10] ss:$40 sps:$4 sm:$0xff]   ;;  %v11112_v20 = vld [vmem:[%s16271_s1 + $0x7dc] ss:$40 sps:$4 sm:$0xff]  }
  0x4d   :  { %2606 = vmatprep.subr.bf16.mxu1 %v11031_v21  ;;  %v11115_v21 = vld [vmem:[%s16271_s1 + $0x64] ss:$40 sps:$4 sm:$0xff]  }
  0x4f   :  { %2509 = vmatpush1.bf16.msra.mxu0 %v11026_v22  ;;  %v11110_v22 = vld [vmem:[%s16271_s1 + $0x7d8] ss:$40 sps:$4 sm:$0xff]  }
  0x50   :  { %2607 = vmatpush1.bf16.msra.mxu1 %v11029_v23  ;;  %2510 = vmatprep.subr.bf16.mxu0 %v11034_v24  ;;  %v11113_v23 = vld [vmem:[%s16271_s1 + $0x60] ss:$40 sps:$4 sm:$0xff]   ;;  %v11118_v24 = vld [vmem:[%s16271_s1 + $0x82c] ss:$40 sps:$4 sm:$0xff]  }
  0x51   :  { %2608 = vmatprep.subr.bf16.mxu1 %v11037_v25  ;;  %v11121_v25 = vld [vmem:[%s16271_s1 + $0xb4] ss:$40 sps:$4 sm:$0xff]  }
  0x53   :  { %2511 = vmatpush1.bf16.msra.mxu0 %v11032_v26  ;;  %v11116_v26 = vld [vmem:[%s16271_s1 + $0x828] ss:$40 sps:$4 sm:$0xff]  }
  0x54   :  { %2609 = vmatpush1.bf16.msra.mxu1 %v11035_v27  ;;  %2512 = vmatprep.subr.bf16.mxu0 %v11040_v28  ;;  %v11119_v27 = vld [vmem:[%s16271_s1 + $0xb0] ss:$40 sps:$4 sm:$0xff]   ;;  %v11124_v28 = vld [vmem:[%s16271_s1 + $0x87c] ss:$40 sps:$4 sm:$0xff]  }
  0x55   :  { %2610 = vmatprep.subr.bf16.mxu1 %v11043_v29  ;;  %v11127_v29 = vld [vmem:[%s16271_s1 + $0x104] ss:$40 sps:$4 sm:$0xff]  }
  0x57   :  { %2513 = vmatpush1.bf16.msra.mxu0 %v11038_v30  ;;  %v11122_v30 = vld [vmem:[%s16271_s1 + $0x878] ss:$40 sps:$4 sm:$0xff]  }
  0x58   :  { %2611 = vmatpush1.bf16.msra.mxu1 %v11041_v31  ;;  %2514 = vmatprep.subr.bf16.mxu0 %v11046_v32  ;;  %v11125_v31 = vld [vmem:[%s16271_s1 + $0x100] ss:$40 sps:$4 sm:$0xff]   ;;  %v11130_v32 = vld [vmem:[%s16271_s1 + $0x8cc] ss:$40 sps:$4 sm:$0xff]  }
  0x59   :  { %2612 = vmatprep.subr.bf16.mxu1 %v11049_v33  ;;  %v11133_v33 = vld [vmem:[%s16271_s1 + $0x154] ss:$40 sps:$4 sm:$0xff]  }
  0x5b   :  { %2515 = vmatpush1.bf16.msra.mxu0 %v11044_v35  ;;  %v11131_v35 = vld [vmem:[%s16271_s1 + $0x150] ss:$40 sps:$4 sm:$0xff]  }
  0x5c   :  { %2613 = vmatpush1.bf16.msra.mxu1 %v11047_v37  ;;  %2516 = vmatprep.subr.bf16.mxu0 %v11052_v39  ;;  %v11136_v37 = vld [vmem:[%s16271_s1 + $0x91c] ss:$40 sps:$4 sm:$0xff]  }
  0x5d   :  { %2614 = vmatprep.subr.bf16.mxu1 %v11055_v40  ;;  %v11139_v39 = vld [vmem:[%s16271_s1 + $0x1a4] ss:$40 sps:$4 sm:$0xff]   ;;  %v11134_v40 = vld [vmem:[%s16271_s1 + $0x918] ss:$40 sps:$4 sm:$0xff]  }
  0x5f   :  { %2517 = vmatpush1.bf16.msra.mxu0 %v11050_v41  ;;  %v11137_v41 = vld [vmem:[%s16271_s1 + $0x1a0] ss:$40 sps:$4 sm:$0xff]  }
  0x60   :  { %2615 = vmatpush1.bf16.msra.mxu1 %v11053_v42  ;;  %2518 = vmatprep.subr.bf16.mxu0 %v11058_v43  ;;  %v11142_v42 = vld [vmem:[%s16271_s1 + $0x96c] ss:$40 sps:$4 sm:$0xff]  }
  0x61   :  { %2625 = vmatprep.subr.bf16.mxu1 %v11061_v44  ;;  %v11145_v43 = vld [vmem:[%s16271_s1 + $0x1f4] ss:$40 sps:$4 sm:$0xff]   ;;  %v11140_v44 = vld [vmem:[%s16271_s1 + $0x968] ss:$40 sps:$4 sm:$0xff]  }
  0x63   :  { %2617 = vmatmul.mubr.bf16.vlgmr.msra.gmra.mrb[4].mxu1 %v12537_v10  ;;  %2519 = vmatpush1.bf16.msra.mxu0 %v11056_v45  ;;  %v11143_v45 = vld [vmem:[%s16271_s1 + $0x1f0] ss:$40 sps:$4 sm:$0xff]  }
  0x64   :  { %2626 = vmatpush1.bf16.msra.mxu1 %v11059_v46  ;;  %2520 = vmatprep.subr.bf16.mxu0 %v11064_v47  ;;  %v11148_v46 = vld [vmem:[%s16271_s1 + $0x9bc] ss:$40 sps:$4 sm:$0xff]  }
  0x65   :  { %2627 = vmatprep.subr.bf16.mxu1 %v11067_v48  ;;  %2657 = vmatprep.mubr.bf16.mxu1 %v12615_v36  ;;  %v11151_v47 = vld [vmem:[%s16271_s1 + $0x244] ss:$40 sps:$4 sm:$0xff]   ;;  %v11146_v48 = vld [vmem:[%s16271_s1 + $0x9b8] ss:$40 sps:$4 sm:$0xff]  }
  0x67   :  { %2521 = vmatpush1.bf16.msra.mxu0 %v11062_v49  ;;  %v11149_v49 = vld [vmem:[%s16271_s1 + $0x240] ss:$40 sps:$4 sm:$0xff]  }
  0x68   :  { %2628 = vmatpush1.bf16.msra.mxu1 %v11065_v50  ;;  %2522 = vmatprep.subr.bf16.mxu0 %v11070_v51  ;;  %v11154_v50 = vld [vmem:[%s16271_s1 + $0xa0c] ss:$40 sps:$4 sm:$0xff]  }
  0x69   :  { %2629 = vmatprep.subr.bf16.mxu1 %v11073_v53  ;;  %v11157_v51 = vld [vmem:[%s16271_s1 + $0x294] ss:$40 sps:$4 sm:$0xff]   ;;  %v11152_v53 = vld [vmem:[%s16271_s1 + $0xa08] ss:$40 sps:$4 sm:$0xff]  }
  0x6b   :  { %2523 = vmatpush1.bf16.msra.mxu0 %v11068_v54  ;;  %v11155_v54 = vld [vmem:[%s16271_s1 + $0x290] ss:$40 sps:$4 sm:$0xff]  }
  0x6c   :  { %2630 = vmatpush1.bf16.msra.mxu1 %v11071_v55  ;;  %2524 = vmatprep.subr.bf16.mxu0 %v11076_v56  ;;  %v11160_v55 = vld [vmem:[%s16271_s1 + $0xa5c] ss:$40 sps:$4 sm:$0xff]  }
  0x6d   :  { %2631 = vmatprep.subr.bf16.mxu1 %v11079_v57  ;;  %v11163_v56 = vld [vmem:[%s16271_s1 + $0x2e4] ss:$40 sps:$4 sm:$0xff]   ;;  %v11158_v57 = vld [vmem:[%s16271_s1 + $0xa58] ss:$40 sps:$4 sm:$0xff]  }
  0x6f   :  { %2525 = vmatpush1.bf16.msra.mxu0 %v11074_v58  ;;  %v11161_v58 = vld [vmem:[%s16271_s1 + $0x2e0] ss:$40 sps:$4 sm:$0xff]  }
  0x70   :  { %2632 = vmatpush1.bf16.msra.mxu1 %v11077_v59  ;;  %2526 = vmatprep.subr.bf16.mxu0 %v11082_v60  ;;  %v11166_v59 = vld [vmem:[%s16271_s1 + $0xaac] ss:$40 sps:$4 sm:$0xff]  }
  0x71   :  { %2633 = vmatprep.subr.bf16.mxu1 %v11085_v61  ;;  %v11169_v60 = vld [vmem:[%s16271_s1 + $0x334] ss:$40 sps:$4 sm:$0xff]   ;;  %v11164_v61 = vld [vmem:[%s16271_s1 + $0xaa8] ss:$40 sps:$4 sm:$0xff]  }
  0x73   :  { %2527 = vmatpush1.bf16.msra.mxu0 %v11080_v62  ;;  %v11167_v62 = vld [vmem:[%s16271_s1 + $0x330] ss:$40 sps:$4 sm:$0xff]  }
  0x74   :  { %2634 = vmatpush1.bf16.msra.mxu1 %v11083_v63  ;;  %2528 = vmatprep.subr.bf16.mxu0 %v11088_v0  ;;  %v11172_v63 = vld [vmem:[%s16271_s1 + $0xafc] ss:$40 sps:$4 sm:$0xff]  }
  0x75   :  { %2635 = vmatprep.subr.bf16.mxu1 %v11091_v2  ;;  %v11175_v0 = vld [vmem:[%s16271_s1 + $0x384] ss:$40 sps:$4 sm:$0xff]   ;;  %v11170_v2 = vld [vmem:[%s16271_s1 + $0xaf8] ss:$40 sps:$4 sm:$0xff]  }
  0x77   :  { %2529 = vmatpush1.bf16.msra.mxu0 %v11086_v3  ;;  %v11173_v3 = vld [vmem:[%s16271_s1 + $0x380] ss:$40 sps:$4 sm:$0xff]  }
  0x78   :  { %2636 = vmatpush1.bf16.msra.mxu1 %v11089_v4  ;;  %2530 = vmatprep.subr.bf16.mxu0 %v11094_v5  ;;  %v11178_v4 = vld [vmem:[%s16271_s1 + $0xb4c] ss:$40 sps:$4 sm:$0xff]  }
  0x79   :  { %2637 = vmatprep.subr.bf16.mxu1 %v11097_v6  ;;  %v11181_v5 = vld [vmem:[%s16271_s1 + $0x3d4] ss:$40 sps:$4 sm:$0xff]   ;;  %v11176_v6 = vld [vmem:[%s16271_s1 + $0xb48] ss:$40 sps:$4 sm:$0xff]  }
  0x7b   :  { %2531 = vmatpush1.bf16.msra.mxu0 %v11092_v7  ;;  %v11179_v7 = vld [vmem:[%s16271_s1 + $0x3d0] ss:$40 sps:$4 sm:$0xff]  }
  0x7c   :  { %2638 = vmatpush1.bf16.msra.mxu1 %v11095_v8  ;;  %2532 = vmatprep.subr.bf16.mxu0 %v11100_v9  ;;  %v11184_v8 = vld [vmem:[%s16271_s1 + $0xb9c] ss:$40 sps:$4 sm:$0xff]  }
  0x7d   :  { %2639 = vmatprep.subr.bf16.mxu1 %v11103_v11  ;;  %v11187_v9 = vld [vmem:[%s16271_s1 + $0x424] ss:$40 sps:$4 sm:$0xff]   ;;  %v11182_v11 = vld [vmem:[%s16271_s1 + $0xb98] ss:$40 sps:$4 sm:$0xff]  }
  0x7f   :  { %2533 = vmatpush1.bf16.msra.mxu0 %v11098_v12  ;;  %v11185_v12 = vld [vmem:[%s16271_s1 + $0x420] ss:$40 sps:$4 sm:$0xff]  }
  0x80   :  { %2640 = vmatpush1.bf16.msra.mxu1 %v11101_v13  ;;  %2707 = vmatprep.subr.bf16.mxu0 %v11109_v16  ;;  %v11190_v13 = vld [vmem:[%s16271_s1 + $0xbec] ss:$40 sps:$4 sm:$0xff]   ;;  %v11191_v16 = vld [vmem:[%s16271_s1 + $0x470] ss:$40 sps:$4 sm:$0xff]  }
  0x81   :  { %2641 = vmatprep.subr.bf16.mxu1 %v11106_v15  ;;  %v11188_v15 = vld [vmem:[%s16271_s1 + $0xbe8] ss:$40 sps:$4 sm:$0xff]  }
  0x82   :  { %2535 = vmatmul.mubr.bf16.vlgmr.msra.gmra.mrb[0].mxu0 %v12740_v17 }
  0x83   :  { %2708 = vmatpush1.bf16.msra.mxu0 %v11107_v19  ;;  %2739 = vmatprep.mubr.bf16.mxu0 %v12473_v52  ;;  %v11199_v19 = vld [vmem:[%s16271_s1 + $0x4c4] ss:$40 sps:$4 sm:$0xff]  }
  0x84   :  { %2642 = vmatpush1.bf16.msra.mxu1 %v11104_v18  ;;  %2709 = vmatprep.subr.bf16.mxu0 %v11115_v21  ;;  %v11196_v18 = vld [vmem:[%s16271_s1 + $0xc3c] ss:$40 sps:$4 sm:$0xff]   ;;  %v11197_v21 = vld [vmem:[%s16271_s1 + $0x4c0] ss:$40 sps:$4 sm:$0xff]  }
  0x85   :  { %2643 = vmatprep.subr.bf16.mxu1 %v11112_v20  ;;  %v11194_v20 = vld [vmem:[%s16271_s1 + $0xc38] ss:$40 sps:$4 sm:$0xff]  }
  0x87   :  { %2710 = vmatpush1.bf16.msra.mxu0 %v11113_v23  ;;  %v11205_v23 = vld [vmem:[%s16271_s1 + $0x1c] ss:$40 sps:$4 sm:$0xff]  }
  0x88   :  { %2644 = vmatpush1.bf16.msra.mxu1 %v11110_v22  ;;  %2711 = vmatprep.subr.bf16.mxu0 %v11121_v25  ;;  %v11202_v22 = vld [vmem:[%s16271_s1 + $0x514] ss:$40 sps:$4 sm:$0xff]   ;;  %v11203_v25 = vld [vmem:[%s16271_s1 + $0x18] ss:$40 sps:$4 sm:$0xff]  }
  0x89   :  { %2645 = vmatprep.subr.bf16.mxu1 %v11118_v24  ;;  %v11200_v24 = vld [vmem:[%s16271_s1 + $0x510] ss:$40 sps:$4 sm:$0xff]  }
  0x8b   :  { %2712 = vmatpush1.bf16.msra.mxu0 %v11119_v27  ;;  %v11211_v27 = vld [vmem:[%s16271_s1 + $0x6c] ss:$40 sps:$4 sm:$0xff]  }
  0x8c   :  { %2646 = vmatpush1.bf16.msra.mxu1 %v11116_v26  ;;  %2713 = vmatprep.subr.bf16.mxu0 %v11127_v29  ;;  %v11208_v26 = vld [vmem:[%s16271_s1 + $0x564] ss:$40 sps:$4 sm:$0xff]   ;;  %v11209_v29 = vld [vmem:[%s16271_s1 + $0x68] ss:$40 sps:$4 sm:$0xff]  }
  0x8d   :  { %2647 = vmatprep.subr.bf16.mxu1 %v11124_v28  ;;  %v11206_v28 = vld [vmem:[%s16271_s1 + $0x560] ss:$40 sps:$4 sm:$0xff]  }
  0x8f   :  { %2714 = vmatpush1.bf16.msra.mxu0 %v11125_v31  ;;  %v11217_v31 = vld [vmem:[%s16271_s1 + $0xbc] ss:$40 sps:$4 sm:$0xff]  }
  0x90   :  { %2648 = vmatpush1.bf16.msra.mxu1 %v11122_v30  ;;  %2715 = vmatprep.subr.bf16.mxu0 %v11133_v33  ;;  %v11214_v30 = vld [vmem:[%s16271_s1 + $0x5b4] ss:$40 sps:$4 sm:$0xff]   ;;  %v11215_v33 = vld [vmem:[%s16271_s1 + $0xb8] ss:$40 sps:$4 sm:$0xff]  }
  0x91   :  { %2649 = vmatprep.subr.bf16.mxu1 %v11130_v32  ;;  %v11212_v32 = vld [vmem:[%s16271_s1 + $0x5b0] ss:$40 sps:$4 sm:$0xff]  }
  0x93   :  { %2716 = vmatpush1.bf16.msra.mxu0 %v11131_v35  ;;  %v11223_v35 = vld [vmem:[%s16271_s1 + $0x10c] ss:$40 sps:$4 sm:$0xff]  }
  0x94   :  { %2650 = vmatpush1.bf16.msra.mxu1 %v11128_v34  ;;  %2717 = vmatprep.subr.bf16.mxu0 %v11139_v39  ;;  %v11220_v34 = vld [vmem:[%s16271_s1 + $0x604] ss:$40 sps:$4 sm:$0xff]   ;;  %v11221_v39 = vld [vmem:[%s16271_s1 + $0x108] ss:$40 sps:$4 sm:$0xff]  }
  0x95   :  { %2651 = vmatprep.subr.bf16.mxu1 %v11136_v37  ;;  %v11218_v37 = vld [vmem:[%s16271_s1 + $0x600] ss:$40 sps:$4 sm:$0xff]  }
  0x97   :  { %2718 = vmatpush1.bf16.msra.mxu0 %v11137_v41  ;;  %v11229_v41 = vld [vmem:[%s16271_s1 + $0x15c] ss:$40 sps:$4 sm:$0xff]  }
  0x98   :  { %2652 = vmatpush1.bf16.msra.mxu1 %v11134_v40  ;;  %2719 = vmatprep.subr.bf16.mxu0 %v11145_v43  ;;  %v11226_v40 = vld [vmem:[%s16271_s1 + $0x654] ss:$40 sps:$4 sm:$0xff]   ;;  %v11227_v43 = vld [vmem:[%s16271_s1 + $0x158] ss:$40 sps:$4 sm:$0xff]  }
  0x99   :  { %2653 = vmatprep.subr.bf16.mxu1 %v11142_v42  ;;  %v11224_v42 = vld [vmem:[%s16271_s1 + $0x650] ss:$40 sps:$4 sm:$0xff]  }
  0x9b   :  { %2720 = vmatpush1.bf16.msra.mxu0 %v11143_v45  ;;  %v11235_v45 = vld [vmem:[%s16271_s1 + $0x1ac] ss:$40 sps:$4 sm:$0xff]  }
  0x9c   :  { %2654 = vmatpush1.bf16.msra.mxu1 %v11140_v44  ;;  %2721 = vmatprep.subr.bf16.mxu0 %v11151_v47  ;;  %v11232_v44 = vld [vmem:[%s16271_s1 + $0x6a4] ss:$40 sps:$4 sm:$0xff]   ;;  %v11233_v47 = vld [vmem:[%s16271_s1 + $0x1a8] ss:$40 sps:$4 sm:$0xff]  }
  0x9d   :  { %2655 = vmatprep.subr.bf16.mxu1 %v11148_v46  ;;  %v11230_v46 = vld [vmem:[%s16271_s1 + $0x6a0] ss:$40 sps:$4 sm:$0xff]  }
  0x9f   :  { %2722 = vmatpush1.bf16.msra.mxu0 %v11149_v49  ;;  %v11241_v49 = vld [vmem:[%s16271_s1 + $0x1fc] ss:$40 sps:$4 sm:$0xff]  }
  0xa0   :  { %2656 = vmatpush1.bf16.msra.mxu1 %v11146_v48  ;;  %2723 = vmatprep.subr.bf16.mxu0 %v11157_v51  ;;  %v11238_v48 = vld [vmem:[%s16271_s1 + $0x6f4] ss:$40 sps:$4 sm:$0xff]   ;;  %v11239_v51 = vld [vmem:[%s16271_s1 + $0x1f8] ss:$40 sps:$4 sm:$0xff]  }
  0xa1   :  { %2666 = vmatprep.subr.bf16.mxu1 %v11154_v50  ;;  %v11236_v50 = vld [vmem:[%s16271_s1 + $0x6f0] ss:$40 sps:$4 sm:$0xff]  }
  0xa3   :  { %2658 = vmatmul.mubr.bf16.vlgmr.msra.gmra.mrb[4].mxu1 %v12740_v17  ;;  %2724 = vmatpush1.bf16.msra.mxu0 %v11155_v54  ;;  %v11247_v54 = vld [vmem:[%s16271_s1 + $0x24c] ss:$40 sps:$4 sm:$0xff]  }
  0xa4   :  { %2667 = vmatpush1.bf16.msra.mxu1 %v11152_v53  ;;  %2725 = vmatprep.subr.bf16.mxu0 %v11163_v56  ;;  %v11244_v53 = vld [vmem:[%s16271_s1 + $0x744] ss:$40 sps:$4 sm:$0xff]   ;;  %v11245_v56 = vld [vmem:[%s16271_s1 + $0x248] ss:$40 sps:$4 sm:$0xff]  }
  0xa5   :  { %2668 = vmatprep.subr.bf16.mxu1 %v11160_v55  ;;  %2698 = vmatprep.mubr.bf16.mxu1 %v12236_v1  ;;  %v11242_v55 = vld [vmem:[%s16271_s1 + $0x740] ss:$40 sps:$4 sm:$0xff]  }
  0xa7   :  { %2726 = vmatpush1.bf16.msra.mxu0 %v11161_v58  ;;  %v11253_v58 = vld [vmem:[%s16271_s1 + $0x29c] ss:$40 sps:$4 sm:$0xff]  }
  0xa8   :  { %2669 = vmatpush1.bf16.msra.mxu1 %v11158_v57  ;;  %2727 = vmatprep.subr.bf16.mxu0 %v11169_v60  ;;  %v11250_v57 = vld [vmem:[%s16271_s1 + $0x794] ss:$40 sps:$4 sm:$0xff]   ;;  %v11251_v60 = vld [vmem:[%s16271_s1 + $0x298] ss:$40 sps:$4 sm:$0xff]  }
  0xa9   :  { %2670 = vmatprep.subr.bf16.mxu1 %v11166_v59  ;;  %v11248_v59 = vld [vmem:[%s16271_s1 + $0x790] ss:$40 sps:$4 sm:$0xff]  }
  0xab   :  { %2728 = vmatpush1.bf16.msra.mxu0 %v11167_v62  ;;  %v11259_v62 = vld [vmem:[%s16271_s1 + $0x2ec] ss:$40 sps:$4 sm:$0xff]  }
  0xac   :  { %2671 = vmatpush1.bf16.msra.mxu1 %v11164_v61  ;;  %2729 = vmatprep.subr.bf16.mxu0 %v11175_v0  ;;  %v11256_v61 = vld [vmem:[%s16271_s1 + $0x7e4] ss:$40 sps:$4 sm:$0xff]   ;;  %v11257_v0 = vld [vmem:[%s16271_s1 + $0x2e8] ss:$40 sps:$4 sm:$0xff]  }
  0xad   :  { %2672 = vmatprep.subr.bf16.mxu1 %v11172_v63  ;;  %v11254_v63 = vld [vmem:[%s16271_s1 + $0x7e0] ss:$40 sps:$4 sm:$0xff]  }
  0xaf   :  { %2730 = vmatpush1.bf16.msra.mxu0 %v11173_v3  ;;  %v11265_v3 = vld [vmem:[%s16271_s1 + $0x33c] ss:$40 sps:$4 sm:$0xff]  }
  0xb0   :  { %2673 = vmatpush1.bf16.msra.mxu1 %v11170_v2  ;;  %2731 = vmatprep.subr.bf16.mxu0 %v11181_v5  ;;  %v11262_v2 = vld [vmem:[%s16271_s1 + $0x834] ss:$40 sps:$4 sm:$0xff]   ;;  %v11263_v5 = vld [vmem:[%s16271_s1 + $0x338] ss:$40 sps:$4 sm:$0xff]  }
  0xb1   :  { %2674 = vmatprep.subr.bf16.mxu1 %v11178_v4  ;;  %v11260_v4 = vld [vmem:[%s16271_s1 + $0x830] ss:$40 sps:$4 sm:$0xff]  }
  0xb3   :  { %2732 = vmatpush1.bf16.msra.mxu0 %v11179_v7  ;;  %v11271_v7 = vld [vmem:[%s16271_s1 + $0x38c] ss:$40 sps:$4 sm:$0xff]  }
  0xb4   :  { %2675 = vmatpush1.bf16.msra.mxu1 %v11176_v6  ;;  %2733 = vmatprep.subr.bf16.mxu0 %v11187_v9  ;;  %v11268_v6 = vld [vmem:[%s16271_s1 + $0x884] ss:$40 sps:$4 sm:$0xff]   ;;  %v11269_v9 = vld [vmem:[%s16271_s1 + $0x388] ss:$40 sps:$4 sm:$0xff]  }
  0xb5   :  { %2676 = vmatprep.subr.bf16.mxu1 %v11184_v8  ;;  %v11266_v8 = vld [vmem:[%s16271_s1 + $0x880] ss:$40 sps:$4 sm:$0xff]  }
  0xb7   :  { %2734 = vmatpush1.bf16.msra.mxu0 %v11185_v12  ;;  %v11277_v12 = vld [vmem:[%s16271_s1 + $0x3dc] ss:$40 sps:$4 sm:$0xff]  }
  0xb8   :  { %2677 = vmatpush1.bf16.msra.mxu1 %v11182_v11  ;;  %2735 = vmatprep.subr.bf16.mxu0 %v11193_v14  ;;  %v11274_v11 = vld [vmem:[%s16271_s1 + $0x8d4] ss:$40 sps:$4 sm:$0xff]   ;;  %v11275_v14 = vld [vmem:[%s16271_s1 + $0x3d8] ss:$40 sps:$4 sm:$0xff]  }
  0xb9   :  { %2678 = vmatprep.subr.bf16.mxu1 %v11190_v13  ;;  %v11272_v13 = vld [vmem:[%s16271_s1 + $0x8d0] ss:$40 sps:$4 sm:$0xff]  }
  0xbb   :  { %2736 = vmatpush1.bf16.msra.mxu0 %v11191_v16  ;;  %v11283_v16 = vld [vmem:[%s16271_s1 + $0x42c] ss:$40 sps:$4 sm:$0xff]  }
  0xbc   :  { %2679 = vmatpush1.bf16.msra.mxu1 %v11188_v15  ;;  %2737 = vmatprep.subr.bf16.mxu0 %v11199_v19  ;;  %v11280_v15 = vld [vmem:[%s16271_s1 + $0x924] ss:$40 sps:$4 sm:$0xff]   ;;  %v11281_v19 = vld [vmem:[%s16271_s1 + $0x428] ss:$40 sps:$4 sm:$0xff]  }
  0xbd   :  { %2680 = vmatprep.subr.bf16.mxu1 %v11196_v18  ;;  %v11278_v18 = vld [vmem:[%s16271_s1 + $0x920] ss:$40 sps:$4 sm:$0xff]  }
  0xbf   :  { %2738 = vmatpush1.bf16.msra.mxu0 %v11197_v21  ;;  %v11289_v21 = vld [vmem:[%s16271_s1 + $0x47c] ss:$40 sps:$4 sm:$0xff]  }
  0xc0   :  { %2681 = vmatpush1.bf16.msra.mxu1 %v11194_v20  ;;  %2748 = vmatprep.subr.bf16.mxu0 %v11202_v22  ;;  %v11286_v20 = vld [vmem:[%s16271_s1 + $0x974] ss:$40 sps:$4 sm:$0xff]   ;;  %v11284_v22 = vld [vmem:[%s16271_s1 + $0x970] ss:$40 sps:$4 sm:$0xff]  }
  0xc1   :  { %2830 = vmatprep.subr.bf16.mxu1 %v11205_v23  ;;  %v11287_v23 = vld [vmem:[%s16271_s1 + $0x478] ss:$40 sps:$4 sm:$0xff]  }
  0xc2   :  { %2740 = vmatmul.mubr.bf16.vlgmr.msra.gmra.mrb[4].mxu0 %v12537_v10 }
  0xc3   :  { %2699 = vmatmul.mubr.bf16.vlgmr.msra.gmra.mrb[4].mxu1 %v12431_v38  ;;  %2749 = vmatpush1.bf16.msra.mxu0 %v11200_v24 }
  0xc4   :  { %2831 = vmatpush1.bf16.msra.mxu1 %v11203_v25  ;;  %2750 = vmatprep.subr.bf16.mxu0 %v11208_v26  ;;  %v11292_v26 = vld [vmem:[%s16271_s1 + $0x9c4] ss:$40 sps:$4 sm:$0xff]  }
  0xc5   :  { %2832 = vmatprep.subr.bf16.mxu1 %v11211_v27  ;;  %2780 = vmatprep.mubr.bf16.mxu0 %v12615_v36  ;;  %v11295_v27 = vld [vmem:[%s16271_s1 + $0x4cc] ss:$40 sps:$4 sm:$0xff]  }
  0xc6   :  { %2862 = vmatprep.mubr.bf16.mxu1 %v12473_v52 }
  0xc7   :  { %2751 = vmatpush1.bf16.msra.mxu0 %v11206_v28 }
  0xc8   :  { %2833 = vmatpush1.bf16.msra.mxu1 %v11209_v29  ;;  %2752 = vmatprep.subr.bf16.mxu0 %v11214_v30  ;;  %v11290_v30 = vld [vmem:[%s16271_s1 + $0x9c0] ss:$40 sps:$4 sm:$0xff]  }
  0xc9   :  { %2834 = vmatprep.subr.bf16.mxu1 %v11217_v31  ;;  %v11293_v31 = vld [vmem:[%s16271_s1 + $0x4c8] ss:$40 sps:$4 sm:$0xff]  }
  0xcb   :  { %2753 = vmatpush1.bf16.msra.mxu0 %v11212_v32  ;;  %v11298_v32 = vld [vmem:[%s16271_s1 + $0xa14] ss:$40 sps:$4 sm:$0xff]  }
  0xcc   :  { %2835 = vmatpush1.bf16.msra.mxu1 %v11215_v33  ;;  %2754 = vmatprep.subr.bf16.mxu0 %v11220_v34  ;;  %v11301_v33 = vld [vmem:[%s16271_s1 + $0x51c] ss:$40 sps:$4 sm:$0xff]   ;;  %v11296_v34 = vld [vmem:[%s16271_s1 + $0xa10] ss:$40 sps:$4 sm:$0xff]  }
  0xcd   :  { %2836 = vmatprep.subr.bf16.mxu1 %v11223_v35  ;;  %v11299_v35 = vld [vmem:[%s16271_s1 + $0x518] ss:$40 sps:$4 sm:$0xff]  }
  0xcf   :  { %2755 = vmatpush1.bf16.msra.mxu0 %v11218_v37  ;;  %v11304_v37 = vld [vmem:[%s16271_s1 + $0xa64] ss:$40 sps:$4 sm:$0xff]  }
  0xd0   :  { %2837 = vmatpush1.bf16.msra.mxu1 %v11221_v39  ;;  %2756 = vmatprep.subr.bf16.mxu0 %v11226_v40  ;;  %v11307_v39 = vld [vmem:[%s16271_s1 + $0x56c] ss:$40 sps:$4 sm:$0xff]   ;;  %v11302_v40 = vld [vmem:[%s16271_s1 + $0xa60] ss:$40 sps:$4 sm:$0xff]  }
  0xd1   :  { %2838 = vmatprep.subr.bf16.mxu1 %v11229_v41  ;;  %v11305_v41 = vld [vmem:[%s16271_s1 + $0x568] ss:$40 sps:$4 sm:$0xff]  }
  0xd3   :  { %2757 = vmatpush1.bf16.msra.mxu0 %v11224_v42  ;;  %v11310_v42 = vld [vmem:[%s16271_s1 + $0xab4] ss:$40 sps:$4 sm:$0xff]  }
  0xd4   :  { %2839 = vmatpush1.bf16.msra.mxu1 %v11227_v43  ;;  %2758 = vmatprep.subr.bf16.mxu0 %v11232_v44  ;;  %v11313_v43 = vld [vmem:[%s16271_s1 + $0x5bc] ss:$40 sps:$4 sm:$0xff]   ;;  %v11308_v44 = vld [vmem:[%s16271_s1 + $0xab0] ss:$40 sps:$4 sm:$0xff]  }
  0xd5   :  { %2840 = vmatprep.subr.bf16.mxu1 %v11235_v45  ;;  %v11311_v45 = vld [vmem:[%s16271_s1 + $0x5b8] ss:$40 sps:$4 sm:$0xff]  }
  0xd7   :  { %2759 = vmatpush1.bf16.msra.mxu0 %v11230_v46  ;;  %v11316_v46 = vld [vmem:[%s16271_s1 + $0xb04] ss:$40 sps:$4 sm:$0xff]  }
  0xd8   :  { %2841 = vmatpush1.bf16.msra.mxu1 %v11233_v47  ;;  %2760 = vmatprep.subr.bf16.mxu0 %v11238_v48  ;;  %v11319_v47 = vld [vmem:[%s16271_s1 + $0x60c] ss:$40 sps:$4 sm:$0xff]   ;;  %v11314_v48 = vld [vmem:[%s16271_s1 + $0xb00] ss:$40 sps:$4 sm:$0xff]  }
  0xd9   :  { %2842 = vmatprep.subr.bf16.mxu1 %v11241_v49  ;;  %v11317_v49 = vld [vmem:[%s16271_s1 + $0x608] ss:$40 sps:$4 sm:$0xff]  }
  0xdb   :  { %2761 = vmatpush1.bf16.msra.mxu0 %v11236_v50  ;;  %v11322_v50 = vld [vmem:[%s16271_s1 + $0xb54] ss:$40 sps:$4 sm:$0xff]  }
  0xdc   :  { %2843 = vmatpush1.bf16.msra.mxu1 %v11239_v51  ;;  %2762 = vmatprep.subr.bf16.mxu0 %v11244_v53  ;;  %v11325_v51 = vld [vmem:[%s16271_s1 + $0x65c] ss:$40 sps:$4 sm:$0xff]   ;;  %v11320_v53 = vld [vmem:[%s16271_s1 + $0xb50] ss:$40 sps:$4 sm:$0xff]  }
  0xdd   :  { %2844 = vmatprep.subr.bf16.mxu1 %v11247_v54  ;;  %v11323_v54 = vld [vmem:[%s16271_s1 + $0x658] ss:$40 sps:$4 sm:$0xff]  }
  0xdf   :  { %2763 = vmatpush1.bf16.msra.mxu0 %v11242_v55  ;;  %v11328_v55 = vld [vmem:[%s16271_s1 + $0xba4] ss:$40 sps:$4 sm:$0xff]  }
  0xe0   :  { %2845 = vmatpush1.bf16.msra.mxu1 %v11245_v56  ;;  %2764 = vmatprep.subr.bf16.mxu0 %v11250_v57  ;;  %v11331_v56 = vld [vmem:[%s16271_s1 + $0x6ac] ss:$40 sps:$4 sm:$0xff]   ;;  %v11326_v57 = vld [vmem:[%s16271_s1 + $0xba0] ss:$40 sps:$4 sm:$0xff]  }
  0xe1   :  { %2846 = vmatprep.subr.bf16.mxu1 %v11253_v58  ;;  %v11329_v58 = vld [vmem:[%s16271_s1 + $0x6a8] ss:$40 sps:$4 sm:$0xff]  }
  0xe3   :  { %2765 = vmatpush1.bf16.msra.mxu0 %v11248_v59  ;;  %v11334_v59 = vld [vmem:[%s16271_s1 + $0xbf4] ss:$40 sps:$4 sm:$0xff]  }
  0xe4   :  { %2847 = vmatpush1.bf16.msra.mxu1 %v11251_v60  ;;  %2766 = vmatprep.subr.bf16.mxu0 %v11256_v61  ;;  %v11337_v60 = vld [vmem:[%s16271_s1 + $0x6fc] ss:$40 sps:$4 sm:$0xff]   ;;  %v11332_v61 = vld [vmem:[%s16271_s1 + $0xbf0] ss:$40 sps:$4 sm:$0xff]  }
  0xe5   :  { %2848 = vmatprep.subr.bf16.mxu1 %v11259_v62  ;;  %v11335_v62 = vld [vmem:[%s16271_s1 + $0x6f8] ss:$40 sps:$4 sm:$0xff]  }
  0xe7   :  { %2767 = vmatpush1.bf16.msra.mxu0 %v11254_v63  ;;  %v11340_v63 = vld [vmem:[%s16271_s1 + $0xc44] ss:$40 sps:$4 sm:$0xff]  }
  0xe8   :  { %2849 = vmatpush1.bf16.msra.mxu1 %v11257_v0  ;;  %2768 = vmatprep.subr.bf16.mxu0 %v11262_v2  ;;  %v11343_v0 = vld [vmem:[%s16271_s1 + $0x74c] ss:$40 sps:$4 sm:$0xff]   ;;  %v11338_v2 = vld [vmem:[%s16271_s1 + $0xc40] ss:$40 sps:$4 sm:$0xff]  }
  0xe9   :  { %2850 = vmatprep.subr.bf16.mxu1 %v11265_v3  ;;  %v11341_v3 = vld [vmem:[%s16271_s1 + $0x748] ss:$40 sps:$4 sm:$0xff]  }
  0xeb   :  { %2769 = vmatpush1.bf16.msra.mxu0 %v11260_v4  ;;  %v11346_v4 = vld [vmem:[%s16271_s1 + $0x79c] ss:$40 sps:$4 sm:$0xff]  }
  0xec   :  { %2851 = vmatpush1.bf16.msra.mxu1 %v11263_v5  ;;  %2770 = vmatprep.subr.bf16.mxu0 %v11268_v6  ;;  %v11349_v5 = vld [vmem:[%s16271_s1 + $0x24] ss:$40 sps:$4 sm:$0xff]   ;;  %v11344_v6 = vld [vmem:[%s16271_s1 + $0x798] ss:$40 sps:$4 sm:$0xff]  }
  0xed   :  { %2852 = vmatprep.subr.bf16.mxu1 %v11271_v7  ;;  %v11347_v7 = vld [vmem:[%s16271_s1 + $0x20] ss:$40 sps:$4 sm:$0xff]  }
  0xef   :  { %2771 = vmatpush1.bf16.msra.mxu0 %v11266_v8  ;;  %v11352_v8 = vld [vmem:[%s16271_s1 + $0x7ec] ss:$40 sps:$4 sm:$0xff]  }
  0xf0   :  { %2853 = vmatpush1.bf16.msra.mxu1 %v11269_v9  ;;  %2772 = vmatprep.subr.bf16.mxu0 %v11274_v11  ;;  %v11355_v9 = vld [vmem:[%s16271_s1 + $0x74] ss:$40 sps:$4 sm:$0xff]   ;;  %v11350_v11 = vld [vmem:[%s16271_s1 + $0x7e8] ss:$40 sps:$4 sm:$0xff]  }
  0xf1   :  { %2854 = vmatprep.subr.bf16.mxu1 %v11277_v12  ;;  %v11353_v12 = vld [vmem:[%s16271_s1 + $0x70] ss:$40 sps:$4 sm:$0xff]  }
  0xf3   :  { %2773 = vmatpush1.bf16.msra.mxu0 %v11272_v13  ;;  %v11358_v13 = vld [vmem:[%s16271_s1 + $0x83c] ss:$40 sps:$4 sm:$0xff]  }
  0xf4   :  { %2855 = vmatpush1.bf16.msra.mxu1 %v11275_v14  ;;  %2774 = vmatprep.subr.bf16.mxu0 %v11280_v15  ;;  %v11361_v14 = vld [vmem:[%s16271_s1 + $0xc4] ss:$40 sps:$4 sm:$0xff]   ;;  %v11356_v15 = vld [vmem:[%s16271_s1 + $0x838] ss:$40 sps:$4 sm:$0xff]  }
  0xf5   :  { %2856 = vmatprep.subr.bf16.mxu1 %v11283_v16  ;;  %v11359_v16 = vld [vmem:[%s16271_s1 + $0xc0] ss:$40 sps:$4 sm:$0xff]  }
  0xf6   :  { %v13116_v24 = vpop.f32.mrb[0].mxu1 }
  0xf7   :  { %v13118_v25 = vpop.f32.mrb[1].mxu1  ;;  %2775 = vmatpush1.bf16.msra.mxu0 %v11278_v18  ;;  %v11364_v18 = vld [vmem:[%s16271_s1 + $0x88c] ss:$40 sps:$4 sm:$0xff]  }
  0xf8   :  { %2857 = vmatpush1.bf16.msra.mxu1 %v11281_v19  ;;  %v2581_v28 = vpop.f32.mrb[2].mxu1  ;;  %2776 = vmatprep.subr.bf16.mxu0 %v11286_v20  ;;  %v11362_v19 = vld [vmem:[%s16271_s1 + $0x888] ss:$40 sps:$4 sm:$0xff]  }
  0xf9   :  { %2858 = vmatprep.subr.bf16.mxu1 %v11289_v21  ;;  %v2582_v29 = vpop.f32.mrb[3].mxu1  ;;  %v11365_v20 = vld [vmem:[%s16271_s1 + $0x110] ss:$40 sps:$4 sm:$0xff]   ;;  %v11370_v21 = vld [vmem:[%s16271_s1 + $0x8dc] ss:$40 sps:$4 sm:$0xff]  }
  0xfa   :  { %v11379_v28 = vld [vmem:[%s16271_s1 + $0x1b4] ss:$40 sps:$4 sm:$0xff]   ;;  %v11374_v29 = vld [vmem:[%s16271_s1 + $0x928] ss:$40 sps:$4 sm:$0xff]  }
  0xfb   :  { %2777 = vmatpush1.bf16.msra.mxu0 %v11284_v22  ;;  %v11373_v22 = vld [vmem:[%s16271_s1 + $0x164] ss:$40 sps:$4 sm:$0xff]  }
  0xfc   :  { %2859 = vmatpush1.bf16.msra.mxu1 %v11287_v23  ;;  %2778 = vmatprep.subr.bf16.mxu0 %v11292_v26  ;;  %v11368_v23 = vld [vmem:[%s16271_s1 + $0x8d8] ss:$40 sps:$4 sm:$0xff]  }
  0xfd   :  { %2860 = vmatprep.subr.bf16.mxu1 %v11295_v27  ;;  %v11371_v26 = vld [vmem:[%s16271_s1 + $0x160] ss:$40 sps:$4 sm:$0xff]   ;;  %v11376_v27 = vld [vmem:[%s16271_s1 + $0x92c] ss:$40 sps:$4 sm:$0xff]  }
  0xff   :  { %2779 = vmatpush1.bf16.msra.mxu0 %v11290_v30  ;;  %v11377_v30 = vld [vmem:[%s16271_s1 + $0x1b0] ss:$40 sps:$4 sm:$0xff]  }
 0x100   :  { %2861 = vmatpush1.bf16.msra.mxu1 %v11293_v31  ;;  %2789 = vmatprep.subr.bf16.mxu0 %v11298_v32  ;;  %v11382_v31 = vld [vmem:[%s16271_s1 + $0x97c] ss:$40 sps:$4 sm:$0xff]  }
 0x101   :  { %2871 = vmatprep.subr.bf16.mxu1 %v11301_v33  ;;  %v11385_v32 = vld [vmem:[%s16271_s1 + $0x204] ss:$40 sps:$4 sm:$0xff]   ;;  %v11380_v33 = vld [vmem:[%s16271_s1 + $0x978] ss:$40 sps:$4 sm:$0xff]  }
 0x102   :  { %2781 = vmatmul.mubr.bf16.vlgmr.msra.gmra.mrb[4].mxu0 %v12740_v17 }
 0x103   :  { %2863 = vmatmul.mubr.bf16.vlgmr.msra.gmra.mrb[8].mxu1 %v12537_v10  ;;  %2790 = vmatpush1.bf16.msra.mxu0 %v11296_v34  ;;  %v11383_v34 = vld [vmem:[%s16271_s1 + $0x200] ss:$40 sps:$4 sm:$0xff]  }
 0x104   :  { %2872 = vmatpush1.bf16.msra.mxu1 %v11299_v35  ;;  %2791 = vmatprep.subr.bf16.mxu0 %v11304_v37  ;;  %v11388_v35 = vld [vmem:[%s16271_s1 + $0x9cc] ss:$40 sps:$4 sm:$0xff]  }
 0x105   :  { %2873 = vmatprep.subr.bf16.mxu1 %v11307_v39  ;;  %2821 = vmatprep.mubr.bf16.mxu0 %v12236_v1  ;;  %v11391_v37 = vld [vmem:[%s16271_s1 + $0x254] ss:$40 sps:$4 sm:$0xff]   ;;  %v11386_v39 = vld [vmem:[%s16271_s1 + $0x9c8] ss:$40 sps:$4 sm:$0xff]  }
 0x106   :  { %2903 = vmatprep.mubr.bf16.mxu1 %v12615_v36 }
 0x107   :  { %2792 = vmatpush1.bf16.msra.mxu0 %v11302_v40  ;;  %v11389_v40 = vld [vmem:[%s16271_s1 + $0x250] ss:$40 sps:$4 sm:$0xff]  }
 0x108   :  { %2874 = vmatpush1.bf16.msra.mxu1 %v11305_v41  ;;  %2793 = vmatprep.subr.bf16.mxu0 %v11310_v42  ;;  %v11394_v41 = vld [vmem:[%s16271_s1 + $0xa1c] ss:$40 sps:$4 sm:$0xff]  }
 0x109   :  { %2875 = vmatprep.subr.bf16.mxu1 %v11313_v43  ;;  %v11397_v42 = vld [vmem:[%s16271_s1 + $0x2a4] ss:$40 sps:$4 sm:$0xff]   ;;  %v11392_v43 = vld [vmem:[%s16271_s1 + $0xa18] ss:$40 sps:$4 sm:$0xff]  }
 0x10b   :  { %2794 = vmatpush1.bf16.msra.mxu0 %v11308_v44  ;;  %v11395_v44 = vld [vmem:[%s16271_s1 + $0x2a0] ss:$40 sps:$4 sm:$0xff]  }
 0x10c   :  { %2876 = vmatpush1.bf16.msra.mxu1 %v11311_v45  ;;  %2795 = vmatprep.subr.bf16.mxu0 %v11316_v46  ;;  %v11400_v45 = vld [vmem:[%s16271_s1 + $0xa6c] ss:$40 sps:$4 sm:$0xff]  }
 0x10d   :  { %2877 = vmatprep.subr.bf16.mxu1 %v11319_v47  ;;  %v11403_v46 = vld [vmem:[%s16271_s1 + $0x2f4] ss:$40 sps:$4 sm:$0xff]   ;;  %v11398_v47 = vld [vmem:[%s16271_s1 + $0xa68] ss:$40 sps:$4 sm:$0xff]  }
 0x10f   :  { %2796 = vmatpush1.bf16.msra.mxu0 %v11314_v48  ;;  %v11401_v48 = vld [vmem:[%s16271_s1 + $0x2f0] ss:$40 sps:$4 sm:$0xff]  }
 0x110   :  { %2878 = vmatpush1.bf16.msra.mxu1 %v11317_v49  ;;  %2797 = vmatprep.subr.bf16.mxu0 %v11322_v50  ;;  %v11406_v49 = vld [vmem:[%s16271_s1 + $0xabc] ss:$40 sps:$4 sm:$0xff]  }
 0x111   :  { %2879 = vmatprep.subr.bf16.mxu1 %v11325_v51  ;;  %v11409_v50 = vld [vmem:[%s16271_s1 + $0x344] ss:$40 sps:$4 sm:$0xff]   ;;  %v11404_v51 = vld [vmem:[%s16271_s1 + $0xab8] ss:$40 sps:$4 sm:$0xff]  }
 0x113   :  { %2798 = vmatpush1.bf16.msra.mxu0 %v11320_v53  ;;  %v11407_v53 = vld [vmem:[%s16271_s1 + $0x340] ss:$40 sps:$4 sm:$0xff]  }
 0x114   :  { %2880 = vmatpush1.bf16.msra.mxu1 %v11323_v54  ;;  %2799 = vmatprep.subr.bf16.mxu0 %v11328_v55  ;;  %v11412_v54 = vld [vmem:[%s16271_s1 + $0xb0c] ss:$40 sps:$4 sm:$0xff]  }
 0x115   :  { %2881 = vmatprep.subr.bf16.mxu1 %v11331_v56  ;;  %v11415_v55 = vld [vmem:[%s16271_s1 + $0x394] ss:$40 sps:$4 sm:$0xff]   ;;  %v11410_v56 = vld [vmem:[%s16271_s1 + $0xb08] ss:$40 sps:$4 sm:$0xff]  }
 0x117   :  { %2800 = vmatpush1.bf16.msra.mxu0 %v11326_v57  ;;  %v11413_v57 = vld [vmem:[%s16271_s1 + $0x390] ss:$40 sps:$4 sm:$0xff]  }
 0x118   :  { %2882 = vmatpush1.bf16.msra.mxu1 %v11329_v58  ;;  %2801 = vmatprep.subr.bf16.mxu0 %v11334_v59  ;;  %v11418_v58 = vld [vmem:[%s16271_s1 + $0xb5c] ss:$40 sps:$4 sm:$0xff]  }
 0x119   :  { %2883 = vmatprep.subr.bf16.mxu1 %v11337_v60  ;;  %v11421_v59 = vld [vmem:[%s16271_s1 + $0x3e4] ss:$40 sps:$4 sm:$0xff]   ;;  %v11416_v60 = vld [vmem:[%s16271_s1 + $0xb58] ss:$40 sps:$4 sm:$0xff]  }
 0x11b   :  { %2802 = vmatpush1.bf16.msra.mxu0 %v11332_v61  ;;  %v11419_v61 = vld [vmem:[%s16271_s1 + $0x3e0] ss:$40 sps:$4 sm:$0xff]  }
 0x11c   :  { %2884 = vmatpush1.bf16.msra.mxu1 %v11335_v62  ;;  %2803 = vmatprep.subr.bf16.mxu0 %v11340_v63  ;;  %v11424_v62 = vld [vmem:[%s16271_s1 + $0xbac] ss:$40 sps:$4 sm:$0xff]  }
 0x11d   :  { %2885 = vmatprep.subr.bf16.mxu1 %v11343_v0  ;;  %v11427_v63 = vld [vmem:[%s16271_s1 + $0x434] ss:$40 sps:$4 sm:$0xff]   ;;  %v11422_v0 = vld [vmem:[%s16271_s1 + $0xba8] ss:$40 sps:$4 sm:$0xff]  }
 0x11f   :  { %2804 = vmatpush1.bf16.msra.mxu0 %v11338_v2  ;;  %v11425_v2 = vld [vmem:[%s16271_s1 + $0x430] ss:$40 sps:$4 sm:$0xff]  }
 0x120   :  { %2886 = vmatpush1.bf16.msra.mxu1 %v11341_v3  ;;  %2953 = vmatprep.subr.bf16.mxu0 %v11349_v5  ;;  %v11430_v3 = vld [vmem:[%s16271_s1 + $0xbfc] ss:$40 sps:$4 sm:$0xff]  }
 0x121   :  { %2887 = vmatprep.subr.bf16.mxu1 %v11346_v4  ;;  %v11433_v4 = vld [vmem:[%s16271_s1 + $0x484] ss:$40 sps:$4 sm:$0xff]  }
 0x122   :  { %2822 = vmatmul.mubr.bf16.vlgmr.msra.gmra.mrb[4].mxu0 %v12431_v38 }
 0x123   :  { %2954 = vmatpush1.bf16.msra.mxu0 %v11347_v7  ;;  %2985 = vmatprep.mubr.bf16.mxu0 %v12473_v52  ;;  %v11367_v52 = vld [vmem:[%s16271_s1 + $0x114] ss:$40 sps:$4 sm:$0xff]  }
 0x124   :  { %2888 = vmatpush1.bf16.msra.mxu1 %v11344_v6  ;;  %2955 = vmatprep.subr.bf16.mxu0 %v11355_v9 }
 0x125   :  { %2889 = vmatprep.subr.bf16.mxu1 %v11352_v8 }
 0x127   :  { %2956 = vmatpush1.bf16.msra.mxu0 %v11353_v12  ;;  %v11431_v12 = vld [vmem:[%s16271_s1 + $0x480] ss:$40 sps:$4 sm:$0xff]  }
 0x128   :  { %2890 = vmatpush1.bf16.msra.mxu1 %v11350_v11  ;;  %2957 = vmatprep.subr.bf16.mxu0 %v11361_v14  ;;  %v11428_v11 = vld [vmem:[%s16271_s1 + $0xbf8] ss:$40 sps:$4 sm:$0xff]   ;;  %v11434_v14 = vld [vmem:[%s16271_s1 + $0xc48] ss:$40 sps:$4 sm:$0xff]  }
 0x129   :  { %2891 = vmatprep.subr.bf16.mxu1 %v11358_v13 }
 0x12b   :  { %2958 = vmatpush1.bf16.msra.mxu0 %v11359_v16  ;;  %v11442_v16 = vld [vmem:[%s16271_s1 + $0x524] ss:$40 sps:$4 sm:$0xff]  }
 0x12c   :  { %2892 = vmatpush1.bf16.msra.mxu1 %v11356_v15  ;;  %2959 = vmatprep.subr.bf16.mxu0 %v11367_v52  ;;  %v11437_v15 = vld [vmem:[%s16271_s1 + $0x4d0] ss:$40 sps:$4 sm:$0xff]   ;;  %v11445_v52 = vld [vmem:[%s16271_s1 + $0x574] ss:$40 sps:$4 sm:$0xff]  }
 0x12d   :  { %2893 = vmatprep.subr.bf16.mxu1 %v11364_v18  ;;  %v11440_v18 = vld [vmem:[%s16271_s1 + $0x520] ss:$40 sps:$4 sm:$0xff]  }
 0x12f   :  { %2960 = vmatpush1.bf16.msra.mxu0 %v11365_v20  ;;  %v11448_v20 = vld [vmem:[%s16271_s1 + $0x5c4] ss:$40 sps:$4 sm:$0xff]  }
 0x130   :  { %2894 = vmatpush1.bf16.msra.mxu1 %v11362_v19  ;;  %2961 = vmatprep.subr.bf16.mxu0 %v11373_v22  ;;  %v11443_v19 = vld [vmem:[%s16271_s1 + $0x570] ss:$40 sps:$4 sm:$0xff]   ;;  %v11454_v22 = vld [vmem:[%s16271_s1 + $0x664] ss:$40 sps:$4 sm:$0xff]  }
 0x131   :  { %2895 = vmatprep.subr.bf16.mxu1 %v11370_v21  ;;  %v11446_v21 = vld [vmem:[%s16271_s1 + $0x5c0] ss:$40 sps:$4 sm:$0xff]  }
 0x133   :  { %2962 = vmatpush1.bf16.msra.mxu0 %v11371_v26  ;;  %v11457_v26 = vld [vmem:[%s16271_s1 + $0x6b4] ss:$40 sps:$4 sm:$0xff]  }
 0x134   :  { %2896 = vmatpush1.bf16.msra.mxu1 %v11368_v23  ;;  %2963 = vmatprep.subr.bf16.mxu0 %v11379_v28  ;;  %v11452_v23 = vld [vmem:[%s16271_s1 + $0x660] ss:$40 sps:$4 sm:$0xff]   ;;  %v11460_v28 = vld [vmem:[%s16271_s1 + $0x704] ss:$40 sps:$4 sm:$0xff]  }
 0x135   :  { %2897 = vmatprep.subr.bf16.mxu1 %v11376_v27  ;;  %v11455_v27 = vld [vmem:[%s16271_s1 + $0x6b0] ss:$40 sps:$4 sm:$0xff]  }
 0x137   :  { %2964 = vmatpush1.bf16.msra.mxu0 %v11377_v30  ;;  %v11463_v30 = vld [vmem:[%s16271_s1 + $0x754] ss:$40 sps:$4 sm:$0xff]  }
 0x138   :  { %2898 = vmatpush1.bf16.msra.mxu1 %v11374_v29  ;;  %2965 = vmatprep.subr.bf16.mxu0 %v11385_v32  ;;  %v11458_v29 = vld [vmem:[%s16271_s1 + $0x700] ss:$40 sps:$4 sm:$0xff]   ;;  %v11466_v32 = vld [vmem:[%s16271_s1 + $0x7a4] ss:$40 sps:$4 sm:$0xff]  }
 0x139   :  { %2899 = vmatprep.subr.bf16.mxu1 %v11382_v31  ;;  %v11461_v31 = vld [vmem:[%s16271_s1 + $0x750] ss:$40 sps:$4 sm:$0xff]  }
 0x13b   :  { %2966 = vmatpush1.bf16.msra.mxu0 %v11383_v34  ;;  %v11469_v34 = vld [vmem:[%s16271_s1 + $0x7f4] ss:$40 sps:$4 sm:$0xff]  }
 0x13c   :  { %2900 = vmatpush1.bf16.msra.mxu1 %v11380_v33  ;;  %2967 = vmatprep.subr.bf16.mxu0 %v11391_v37  ;;  %v11464_v33 = vld [vmem:[%s16271_s1 + $0x7a0] ss:$40 sps:$4 sm:$0xff]   ;;  %v11514_v37 = vld [vmem:[%s16273_s3 + $0x4] ss:$40 sps:$4 sm:$0xff]  }
 0x13d   :  { %2901 = vmatprep.subr.bf16.mxu1 %v11388_v35  ;;  %v11512_v35 = vld [vmem:[%s16273_s3] ss:$40 sps:$4 sm:$0xff]  }
 0x13f   :  { %2968 = vmatpush1.bf16.msra.mxu0 %v11389_v40  ;;  %v11520_v40 = vld [vmem:[%s16273_s3 + $0x54] ss:$40 sps:$4 sm:$0xff]  }
 0x140   :  { %2902 = vmatpush1.bf16.msra.mxu1 %v11386_v39  ;;  %2969 = vmatprep.subr.bf16.mxu0 %v11397_v42  ;;  %v11467_v39 = vld [vmem:[%s16271_s1 + $0x7f0] ss:$40 sps:$4 sm:$0xff]   ;;  %v11472_v42 = vld [vmem:[%s16271_s1 + $0x844] ss:$40 sps:$4 sm:$0xff]  }
 0x141   :  { %2912 = vmatprep.subr.bf16.mxu1 %v11394_v41  ;;  %v11518_v41 = vld [vmem:[%s16273_s3 + $0x50] ss:$40 sps:$4 sm:$0xff]  }
 0x143   :  { %2904 = vmatmul.mubr.bf16.vlgmr.msra.gmra.mrb[8].mxu1 %v12740_v17  ;;  %2970 = vmatpush1.bf16.msra.mxu0 %v11395_v44  ;;  %v11470_v44 = vld [vmem:[%s16271_s1 + $0x840] ss:$40 sps:$4 sm:$0xff]  }
 0x144   :  { %2913 = vmatpush1.bf16.msra.mxu1 %v11392_v43  ;;  %2971 = vmatprep.subr.bf16.mxu0 %v11403_v46  ;;  %v11526_v43 = vld [vmem:[%s16273_s3 + $0xa4] ss:$40 sps:$4 sm:$0xff]   ;;  %v11524_v46 = vld [vmem:[%s16273_s3 + $0xa0] ss:$40 sps:$4 sm:$0xff]  }
 0x145   :  { %2914 = vmatprep.subr.bf16.mxu1 %v11400_v45  ;;  %2944 = vmatprep.mubr.bf16.mxu1 %v12236_v1  ;;  %v11475_v45 = vld [vmem:[%s16271_s1 + $0x894] ss:$40 sps:$4 sm:$0xff]  }
 0x147   :  { %2972 = vmatpush1.bf16.msra.mxu0 %v11401_v48  ;;  %v11473_v48 = vld [vmem:[%s16271_s1 + $0x890] ss:$40 sps:$4 sm:$0xff]  }
 0x148   :  { %2915 = vmatpush1.bf16.msra.mxu1 %v11398_v47  ;;  %2973 = vmatprep.subr.bf16.mxu0 %v11409_v50  ;;  %v11532_v47 = vld [vmem:[%s16273_s3 + $0xf4] ss:$40 sps:$4 sm:$0xff]   ;;  %v11530_v50 = vld [vmem:[%s16273_s3 + $0xf0] ss:$40 sps:$4 sm:$0xff]  }
 0x149   :  { %2916 = vmatprep.subr.bf16.mxu1 %v11406_v49  ;;  %v11478_v49 = vld [vmem:[%s16271_s1 + $0x8e4] ss:$40 sps:$4 sm:$0xff]  }
 0x14b   :  { %2974 = vmatpush1.bf16.msra.mxu0 %v11407_v53  ;;  %v11476_v53 = vld [vmem:[%s16271_s1 + $0x8e0] ss:$40 sps:$4 sm:$0xff]  }
 0x14c   :  { %2917 = vmatpush1.bf16.msra.mxu1 %v11404_v51  ;;  %2975 = vmatprep.subr.bf16.mxu0 %v11415_v55  ;;  %v11538_v51 = vld [vmem:[%s16273_s3 + $0x144] ss:$40 sps:$4 sm:$0xff]   ;;  %v11536_v55 = vld [vmem:[%s16273_s3 + $0x140] ss:$40 sps:$4 sm:$0xff]  }
 0x14d   :  { %2918 = vmatprep.subr.bf16.mxu1 %v11412_v54  ;;  %v11481_v54 = vld [vmem:[%s16271_s1 + $0x934] ss:$40 sps:$4 sm:$0xff]  }
 0x14f   :  { %2976 = vmatpush1.bf16.msra.mxu0 %v11413_v57  ;;  %v11479_v57 = vld [vmem:[%s16271_s1 + $0x930] ss:$40 sps:$4 sm:$0xff]  }
 0x150   :  { %2919 = vmatpush1.bf16.msra.mxu1 %v11410_v56  ;;  %2977 = vmatprep.subr.bf16.mxu0 %v11421_v59  ;;  %v11544_v56 = vld [vmem:[%s16273_s3 + $0x194] ss:$40 sps:$4 sm:$0xff]   ;;  %v11542_v59 = vld [vmem:[%s16273_s3 + $0x190] ss:$40 sps:$4 sm:$0xff]  }
 0x151   :  { %2920 = vmatprep.subr.bf16.mxu1 %v11418_v58  ;;  %v11484_v58 = vld [vmem:[%s16271_s1 + $0x984] ss:$40 sps:$4 sm:$0xff]  }
 0x153   :  { %2978 = vmatpush1.bf16.msra.mxu0 %v11419_v61 }
 0x154   :  { %2921 = vmatpush1.bf16.msra.mxu1 %v11416_v60  ;;  %2979 = vmatprep.subr.bf16.mxu0 %v11427_v63  ;;  %v11550_v60 = vld [vmem:[%s16273_s3 + $0x1e4] ss:$40 sps:$4 sm:$0xff]   ;;  %v11482_v63 = vld [vmem:[%s16271_s1 + $0x980] ss:$40 sps:$4 sm:$0xff]  }
 0x155   :  { %2922 = vmatprep.subr.bf16.mxu1 %v11424_v62  ;;  %v2536_v5 = vpop.f32.mrb[0].mxu0 }
 0x156   :  { %v13411_v6 = vadd.f32 %v13116_v24, %v2536_v5  ;;  %v2538_v7 = vpop.f32.mrb[1].mxu0  ;;  %v11436_v24 = vld [vmem:[%s16271_s1 + $0xc4c] ss:$40 sps:$4 sm:$0xff]  }
 0x157   :  { %v13414_v8 = vadd.f32 %v13118_v25, %v2538_v7  ;;  %v2540_v9 = vpop.f32.mrb[2].mxu0  ;;  %2980 = vmatpush1.bf16.msra.mxu0 %v11425_v2  ;;  %v11439_v25 = vld [vmem:[%s16271_s1 + $0x4d4] ss:$40 sps:$4 sm:$0xff]   ;;  %v11485_v7 = vld [vmem:[%s16271_s1 + $0x9d0] ss:$40 sps:$4 sm:$0xff]  }
 0x158   :  { %2923 = vmatpush1.bf16.msra.mxu1 %v11422_v0  ;;  %v2541_v13 = vpop.f32.mrb[3].mxu0  ;;  %2981 = vmatprep.subr.bf16.mxu0 %v11433_v4  ;;  %v11487_v0 = vld [vmem:[%s16271_s1 + $0x9d4] ss:$40 sps:$4 sm:$0xff]   ;;  %v11490_v9 = vld [vmem:[%s16271_s1 + $0xa24] ss:$40 sps:$4 sm:$0xff]  }
 0x159   :  { %2924 = vmatprep.subr.bf16.mxu1 %v11430_v3  ;;  %v11548_v3 = vld [vmem:[%s16273_s3 + $0x1e0] ss:$40 sps:$4 sm:$0xff]   ;;  %v11556_v5 = vld [vmem:[%s16273_s3 + $0x234] ss:$40 sps:$4 sm:$0xff]  }
 0x15a   :  { %v11488_v13 = vld [vmem:[%s16271_s1 + $0xa20] ss:$40 sps:$4 sm:$0xff]  }
 0x15b   :  { %2982 = vmatpush1.bf16.msra.mxu0 %v11431_v12  ;;  %v11562_v12 = vld [vmem:[%s16273_s3 + $0x284] ss:$40 sps:$4 sm:$0xff]  }
 0x15c   :  { %2925 = vmatpush1.bf16.msra.mxu1 %v11428_v11  ;;  %2983 = vmatprep.subr.bf16.mxu0 %v11439_v25  ;;  %v11554_v11 = vld [vmem:[%s16273_s3 + $0x230] ss:$40 sps:$4 sm:$0xff]   ;;  %v11560_v25 = vld [vmem:[%s16273_s3 + $0x280] ss:$40 sps:$4 sm:$0xff]  }
 0x15d   :  { %2926 = vmatprep.subr.bf16.mxu1 %v11436_v24  ;;  %v11493_v24 = vld [vmem:[%s16271_s1 + $0xa74] ss:$40 sps:$4 sm:$0xff]  }
 0x15f   :  { %2984 = vmatpush1.bf16.msra.mxu0 %v11437_v15  ;;  %v11568_v15 = vld [vmem:[%s16273_s3 + $0x2d4] ss:$40 sps:$4 sm:$0xff]  }
 0x160   :  { %2927 = vmatpush1.bf16.msra.mxu1 %v11434_v14  ;;  %2994 = vmatprep.subr.bf16.mxu0 %v11442_v16  ;;  %v11491_v14 = vld [vmem:[%s16271_s1 + $0xa70] ss:$40 sps:$4 sm:$0xff]   ;;  %v11496_v16 = vld [vmem:[%s16271_s1 + $0xac4] ss:$40 sps:$4 sm:$0xff]  }
 0x161   :  { %5528 = vmatprep.subr.bf16.mxu1 %v11514_v37  ;;  %v11596_v37 = vld [vmem:[%s16273_s3 + $0x460] ss:$40 sps:$4 sm:$0xff]  }
 0x162   :  { %2986 = vmatmul.mubr.bf16.vlgmr.msra.gmra.mrb[8].mxu0 %v12537_v10  ;;  %v11451_v10 = vld [vmem:[%s16271_s1 + $0x614] ss:$40 sps:$4 sm:$0xff]  }
 0x163   :  { %2945 = vmatmul.mubr.bf16.vlgmr.msra.gmra.mrb[8].mxu1 %v12431_v38  ;;  %2995 = vmatpush1.bf16.msra.mxu0 %v11440_v18  ;;  %v11566_v18 = vld [vmem:[%s16273_s3 + $0x2d0] ss:$40 sps:$4 sm:$0xff]  }
 0x164   :  { %3026 = vmatprep.mubr.bf16.mxu0 %v12615_v36  ;;  %2996 = vmatprep.subr.bf16.mxu0 %v11445_v52  ;;  %v11449_v36 = vld [vmem:[%s16271_s1 + $0x610] ss:$40 sps:$4 sm:$0xff]   ;;  %v11574_v52 = vld [vmem:[%s16273_s3 + $0x324] ss:$40 sps:$4 sm:$0xff]  }
 0x165   :  { %5529 = vmatpush1.bf16.msra.mxu1 %v11512_v35  ;;  %v11511_v35 = vld [vmem:[%s16271_s1 + $0xc54] ss:$40 sps:$4 sm:$0xff]  }
 0x166   :  { %5530 = vmatprep.subr.bf16.mxu1 %v11520_v40  ;;  %v11604_v40 = vld [vmem:[%s16273_s3 + $0x4b4] ss:$40 sps:$4 sm:$0xff]  }
 0x167   :  { %2997 = vmatpush1.bf16.msra.mxu0 %v11443_v19  ;;  %v11499_v19 = vld [vmem:[%s16271_s1 + $0xb14] ss:$40 sps:$4 sm:$0xff]  }
 0x168   :  { %2998 = vmatprep.subr.bf16.mxu0 %v11448_v20  ;;  %v11572_v20 = vld [vmem:[%s16273_s3 + $0x320] ss:$40 sps:$4 sm:$0xff]  }
 0x169   :  { %5531 = vmatpush1.bf16.msra.mxu1 %v11518_v41  ;;  %v11517_v41 = vld [vmem:[%s16273_s3 + $0xc] ss:$40 sps:$4 sm:$0xff]  }
 0x16a   :  { %5532 = vmatprep.subr.bf16.mxu1 %v11526_v43  ;;  %v11515_v43 = vld [vmem:[%s16273_s3 + $0x8] ss:$40 sps:$4 sm:$0xff]  }
 0x16b   :  { %2999 = vmatpush1.bf16.msra.mxu0 %v11446_v21  ;;  %v11580_v21 = vld [vmem:[%s16273_s3 + $0x374] ss:$40 sps:$4 sm:$0xff]  }
 0x16c   :  { %3000 = vmatprep.subr.bf16.mxu0 %v11451_v10  ;;  %v11497_v10 = vld [vmem:[%s16271_s1 + $0xb10] ss:$40 sps:$4 sm:$0xff]  }
 0x16d   :  { %5533 = vmatpush1.bf16.msra.mxu1 %v11524_v46  ;;  %v11521_v46 = vld [vmem:[%s16273_s3 + $0x58] ss:$40 sps:$4 sm:$0xff]  }
 0x16e   :  { %5534 = vmatprep.subr.bf16.mxu1 %v11532_v47  ;;  %v11529_v47 = vld [vmem:[%s16273_s3 + $0xac] ss:$40 sps:$4 sm:$0xff]  }
 0x16f   :  { %3001 = vmatpush1.bf16.msra.mxu0 %v11449_v36  ;;  %v11502_v36 = vld [vmem:[%s16271_s1 + $0xb64] ss:$40 sps:$4 sm:$0xff]  }
 0x170   :  { %3002 = vmatprep.subr.bf16.mxu0 %v11454_v22  ;;  %v11578_v22 = vld [vmem:[%s16273_s3 + $0x370] ss:$40 sps:$4 sm:$0xff]  }
 0x171   :  { %5535 = vmatpush1.bf16.msra.mxu1 %v11530_v50  ;;  %v11541_v50 = vld [vmem:[%s16273_s3 + $0x14c] ss:$40 sps:$4 sm:$0xff]  }
 0x172   :  { %5536 = vmatprep.subr.bf16.mxu1 %v11538_v51  ;;  %v11539_v51 = vld [vmem:[%s16273_s3 + $0x148] ss:$40 sps:$4 sm:$0xff]  }
 0x173   :  { %3003 = vmatpush1.bf16.msra.mxu0 %v11452_v23  ;;  %v11586_v23 = vld [vmem:[%s16273_s3 + $0x3c4] ss:$40 sps:$4 sm:$0xff]  }
 0x174   :  { %3004 = vmatprep.subr.bf16.mxu0 %v11457_v26  ;;  %v11500_v26 = vld [vmem:[%s16271_s1 + $0xb60] ss:$40 sps:$4 sm:$0xff]  }
 0x175   :  { %5537 = vmatpush1.bf16.msra.mxu1 %v11536_v55  ;;  %v11553_v55 = vld [vmem:[%s16273_s3 + $0x1ec] ss:$40 sps:$4 sm:$0xff]  }
 0x176   :  { %5538 = vmatprep.subr.bf16.mxu1 %v11544_v56  ;;  %v11551_v56 = vld [vmem:[%s16273_s3 + $0x1e8] ss:$40 sps:$4 sm:$0xff]  }
 0x177   :  { %3005 = vmatpush1.bf16.msra.mxu0 %v11455_v27  ;;  %v11505_v27 = vld [vmem:[%s16271_s1 + $0xbb4] ss:$40 sps:$4 sm:$0xff]  }
 0x178   :  { %3006 = vmatprep.subr.bf16.mxu0 %v11460_v28  ;;  %v11584_v28 = vld [vmem:[%s16273_s3 + $0x3c0] ss:$40 sps:$4 sm:$0xff]  }
 0x179   :  { %5539 = vmatpush1.bf16.msra.mxu1 %v11542_v59  ;;  %v11565_v59 = vld [vmem:[%s16273_s3 + $0x28c] ss:$40 sps:$4 sm:$0xff]  }
 0x17a   :  { %5540 = vmatprep.subr.bf16.mxu1 %v11550_v60  ;;  %v11563_v60 = vld [vmem:[%s16273_s3 + $0x288] ss:$40 sps:$4 sm:$0xff]  }
 0x17b   :  { %3007 = vmatpush1.bf16.msra.mxu0 %v11458_v29  ;;  %v11503_v29 = vld [vmem:[%s16271_s1 + $0xbb0] ss:$40 sps:$4 sm:$0xff]  }
 0x17c   :  { %3008 = vmatprep.subr.bf16.mxu0 %v11463_v30  ;;  %v11592_v30 = vld [vmem:[%s16273_s3 + $0x414] ss:$40 sps:$4 sm:$0xff]  }
 0x17d   :  { %5541 = vmatpush1.bf16.msra.mxu1 %v11548_v3  ;;  %v11575_v3 = vld [vmem:[%s16273_s3 + $0x328] ss:$40 sps:$4 sm:$0xff]  }
 0x17e   :  { %5542 = vmatprep.subr.bf16.mxu1 %v11556_v5  ;;  %v11581_v5 = vld [vmem:[%s16273_s3 + $0x378] ss:$40 sps:$4 sm:$0xff]  }
 0x17f   :  { %3009 = vmatpush1.bf16.msra.mxu0 %v11461_v31  ;;  %v11508_v31 = vld [vmem:[%s16271_s1 + $0xc04] ss:$40 sps:$4 sm:$0xff]  }
 0x180   :  { %3010 = vmatprep.subr.bf16.mxu0 %v11466_v32  ;;  %v11590_v32 = vld [vmem:[%s16273_s3 + $0x410] ss:$40 sps:$4 sm:$0xff]  }
 0x181   :  { %5543 = vmatpush1.bf16.msra.mxu1 %v11554_v11  ;;  %v11595_v11 = vld [vmem:[%s16273_s3 + $0x41c] ss:$40 sps:$4 sm:$0xff]  }
 0x182   :  { %5544 = vmatprep.subr.bf16.mxu1 %v11562_v12  ;;  %v11593_v12 = vld [vmem:[%s16273_s3 + $0x418] ss:$40 sps:$4 sm:$0xff]  }
 0x183   :  { %3011 = vmatpush1.bf16.msra.mxu0 %v11464_v33  ;;  %v11506_v33 = vld [vmem:[%s16271_s1 + $0xc00] ss:$40 sps:$4 sm:$0xff]  }
 0x184   :  { %3012 = vmatprep.subr.bf16.mxu0 %v11469_v34  ;;  %v11598_v34 = vld [vmem:[%s16273_s3 + $0x464] ss:$40 sps:$4 sm:$0xff]  }
 0x185   :  { %5545 = vmatpush1.bf16.msra.mxu1 %v11560_v25  ;;  %v11599_v25 = vld [vmem:[%s16273_s3 + $0x468] ss:$40 sps:$4 sm:$0xff]  }
 0x186   :  { %5546 = vmatprep.subr.bf16.mxu1 %v11568_v15  ;;  %v11607_v15 = vld [vmem:[%s16273_s3 + $0x4bc] ss:$40 sps:$4 sm:$0xff]  }
 0x187   :  { %3013 = vmatpush1.bf16.msra.mxu0 %v11467_v39  ;;  %v11509_v39 = vld [vmem:[%s16271_s1 + $0xc50] ss:$40 sps:$4 sm:$0xff]  }
 0x188   :  { %3014 = vmatprep.subr.bf16.mxu0 %v11472_v42  ;;  %v11602_v42 = vld [vmem:[%s16273_s3 + $0x4b0] ss:$40 sps:$4 sm:$0xff]  }
 0x189   :  { %5547 = vmatpush1.bf16.msra.mxu1 %v11566_v18 }
 0x18a   :  { %5548 = vmatprep.subr.bf16.mxu1 %v11574_v52 }
 0x18b   :  { %3015 = vmatpush1.bf16.msra.mxu0 %v11470_v44  ;;  %v11523_v44 = vld [vmem:[%s16273_s3 + $0x5c] ss:$40 sps:$4 sm:$0xff]  }
 0x18c   :  { %3016 = vmatprep.subr.bf16.mxu0 %v11475_v45  ;;  %v11610_v45 = vld [vmem:[%s16273_s3 + $0x504] ss:$40 sps:$4 sm:$0xff]  }
 0x18d   :  { %5549 = vmatpush1.bf16.msra.mxu1 %v11572_v20  ;;  %v3083_v20 = vlaneseq }
 0x18e   :  { %5550 = vmatprep.subr.bf16.mxu1 %v11580_v21 }
 0x18f   :  { %3017 = vmatpush1.bf16.msra.mxu0 %v11473_v48  ;;  %v11527_v48 = vld [vmem:[%s16273_s3 + $0xa8] ss:$40 sps:$4 sm:$0xff]   ;;  %v13789_v21 = vshrl.u32 %v3083_v20, 7  ;;  %v11673_v20 = vld [vmem:[%s16273_s3 + $0x82c] ss:$40 sps:$4 sm:$0xff]  }
 0x190   :  { %3018 = vmatprep.subr.bf16.mxu0 %v11478_v49  ;;  %v11533_v49 = vld [vmem:[%s16273_s3 + $0xf8] ss:$40 sps:$4 sm:$0xff]  }
 0x191   :  { %5551 = vmatpush1.bf16.msra.mxu1 %v11578_v22  ;;  %v13802_v22 = vsub.s32 1, %v13789_v21 }
 0x192   :  { %5552 = vmatprep.subr.bf16.mxu1 %v11586_v23 }
 0x193   :  { %3019 = vmatpush1.bf16.msra.mxu0 %v11476_v53  ;;  %v11547_v53 = vld [vmem:[%s16273_s3 + $0x19c] ss:$40 sps:$4 sm:$0xff]  }
 0x194   :  { %3020 = vmatprep.subr.bf16.mxu0 %v11481_v54  ;;  %v11545_v54 = vld [vmem:[%s16273_s3 + $0x198] ss:$40 sps:$4 sm:$0xff]  }
 0x195   :  { %5553 = vmatpush1.bf16.msra.mxu1 %v11584_v28 }
 0x196   :  { %v13563_v61 = vpop.f32.mrb[4].mxu1  ;;  %5554 = vmatprep.subr.bf16.mxu1 %v11592_v30 }
 0x197   :  { %v13565_v62 = vpop.f32.mrb[5].mxu1  ;;  %3021 = vmatpush1.bf16.msra.mxu0 %v11479_v57  ;;  %v11559_v57 = vld [vmem:[%s16273_s3 + $0x23c] ss:$40 sps:$4 sm:$0xff]  }
 0x198   :  { %v2704_v2 = vpop.f32.mrb[6].mxu1  ;;  %3022 = vmatprep.subr.bf16.mxu0 %v11484_v58  ;;  %v11557_v58 = vld [vmem:[%s16273_s3 + $0x238] ss:$40 sps:$4 sm:$0xff]  }
 0x199   :  { %v2705_v4 = vpop.f32.mrb[7].mxu1  ;;  %5555 = vmatpush1.bf16.msra.mxu1 %v11590_v32  ;;  %v11577_v2 = vld [vmem:[%s16273_s3 + $0x32c] ss:$40 sps:$4 sm:$0xff]  }
 0x19a   :  { %5556 = vmatprep.subr.bf16.mxu1 %v11598_v34  ;;  %v11583_v4 = vld [vmem:[%s16273_s3 + $0x37c] ss:$40 sps:$4 sm:$0xff]  }
 0x19b   :  { %3023 = vmatpush1.bf16.msra.mxu0 %v11482_v63  ;;  %v11571_v63 = vld [vmem:[%s16273_s3 + $0x2dc] ss:$40 sps:$4 sm:$0xff]  }
 0x19c   :  { %3024 = vmatprep.subr.bf16.mxu0 %v11487_v0  ;;  %v11569_v0 = vld [vmem:[%s16273_s3 + $0x2d8] ss:$40 sps:$4 sm:$0xff]  }
 0x19d   :  { %5557 = vmatpush1.bf16.msra.mxu1 %v11596_v37 }
 0x19e   :  { %5558 = vmatprep.subr.bf16.mxu1 %v11604_v40 }
 0x19f   :  { %3025 = vmatpush1.bf16.msra.mxu0 %v11485_v7  ;;  %v11589_v7 = vld [vmem:[%s16273_s3 + $0x3cc] ss:$40 sps:$4 sm:$0xff]  }
 0x1a0   :  { %3035 = vmatprep.subr.bf16.mxu0 %v11490_v9  ;;  %v11587_v9 = vld [vmem:[%s16273_s3 + $0x3c8] ss:$40 sps:$4 sm:$0xff]  }
 0x1a1   :  { %5559 = vmatpush1.bf16.msra.mxu1 %v11602_v42 }
 0x1a2   :  { %3027 = vmatmul.mubr.bf16.vlgmr.msra.gmra.mrb[8].mxu0 %v12740_v17  ;;  %v11494_v17 = vld [vmem:[%s16271_s1 + $0xac0] ss:$40 sps:$4 sm:$0xff]   ;;  %5569 = vmatprep.subr.bf16.mxu1 %v11610_v45  ;;  %v11614_v45 = vld [vmem:[%s16273_s3 + $0x550] ss:$40 sps:$4 sm:$0xff]  }
 0x1a3   :  { %3036 = vmatpush1.bf16.msra.mxu0 %v11488_v13  ;;  %3067 = vmatprep.mubr.bf16.mxu0 %v12236_v1  ;;  %v11601_v13 = vld [vmem:[%s16273_s3 + $0x46c] ss:$40 sps:$4 sm:$0xff]  }
 0x1a4   :  { %3037 = vmatprep.subr.bf16.mxu0 %v11493_v24 }
 0x1a7   :  { %3038 = vmatpush1.bf16.msra.mxu0 %v11491_v14 }
 0x1a8   :  { %3039 = vmatprep.subr.bf16.mxu0 %v11496_v16 }
 0x1ab   :  { %3040 = vmatpush1.bf16.msra.mxu0 %v11494_v17  ;;  %v11605_v17 = vld [vmem:[%s16273_s3 + $0x4b8] ss:$40 sps:$4 sm:$0xff]  }
 0x1ac   :  { %3041 = vmatprep.subr.bf16.mxu0 %v11499_v19  ;;  %v11613_v19 = vld [vmem:[%s16273_s3 + $0x50c] ss:$40 sps:$4 sm:$0xff]  }
 0x1af   :  { %3042 = vmatpush1.bf16.msra.mxu0 %v11497_v10  ;;  %v13797_v10 = vsub.s32 0, %v13789_v21 }
 0x1b0   :  { %3043 = vmatprep.subr.bf16.mxu0 %v11502_v36 }
 0x1b3   :  { %3044 = vmatpush1.bf16.msra.mxu0 %v11500_v26 }
 0x1b4   :  { %3045 = vmatprep.subr.bf16.mxu0 %v11505_v27 }
 0x1b7   :  { %3046 = vmatpush1.bf16.msra.mxu0 %v11503_v29 }
 0x1b8   :  { %3047 = vmatprep.subr.bf16.mxu0 %v11508_v31 }
 0x1bb   :  { %3048 = vmatpush1.bf16.msra.mxu0 %v11506_v33 }
 0x1bc   :  { %3049 = vmatprep.subr.bf16.mxu0 %v11511_v35 }
 0x1bf   :  { %3050 = vmatpush1.bf16.msra.mxu0 %v11509_v39 }
 0x1c0   :  { %5651 = vmatprep.subr.bf16.mxu0 %v11517_v41  ;;  %v11608_v41 = vld [vmem:[%s16273_s3 + $0x500] ss:$40 sps:$4 sm:$0xff]  }
 0x1c2   :  { %3068 = vmatmul.mubr.bf16.vlgmr.msra.gmra.mrb[8].mxu0 %v12431_v38  ;;  %v11535_v38 = vld [vmem:[%s16273_s3 + $0xfc] ss:$40 sps:$4 sm:$0xff]  }
 0x1c3   :  { %5652 = vmatpush1.bf16.msra.mxu0 %v11515_v43  ;;  %v11616_v43 = vld [vmem:[%s16273_s3 + $0x554] ss:$40 sps:$4 sm:$0xff]  }
 0x1c4   :  { %5653 = vmatprep.subr.bf16.mxu0 %v11523_v44  ;;  %v11619_v44 = vld [vmem:[%s16273_s3 + $0x55c] ss:$40 sps:$4 sm:$0xff]  }
 0x1c7   :  { %5654 = vmatpush1.bf16.msra.mxu0 %v11521_v46  ;;  %v11617_v46 = vld [vmem:[%s16273_s3 + $0x558] ss:$40 sps:$4 sm:$0xff]  }
 0x1c8   :  { %5655 = vmatprep.subr.bf16.mxu0 %v11529_v47  ;;  %v11622_v47 = vld [vmem:[%s16273_s3 + $0x5a4] ss:$40 sps:$4 sm:$0xff]  }
 0x1cb   :  { %5656 = vmatpush1.bf16.msra.mxu0 %v11527_v48  ;;  %v11625_v48 = vld [vmem:[%s16273_s3 + $0x5ac] ss:$40 sps:$4 sm:$0xff]  }
 0x1cc   :  { %5657 = vmatprep.subr.bf16.mxu0 %v11535_v38  ;;  %v11620_v38 = vld [vmem:[%s16273_s3 + $0x5a0] ss:$40 sps:$4 sm:$0xff]  }
 0x1cf   :  { %5658 = vmatpush1.bf16.msra.mxu0 %v11533_v49  ;;  %v11623_v49 = vld [vmem:[%s16273_s3 + $0x5a8] ss:$40 sps:$4 sm:$0xff]  }
 0x1d0   :  { %5659 = vmatprep.subr.bf16.mxu0 %v11541_v50  ;;  %v11628_v50 = vld [vmem:[%s16273_s3 + $0x5f4] ss:$40 sps:$4 sm:$0xff]  }
 0x1d3   :  { %5660 = vmatpush1.bf16.msra.mxu0 %v11539_v51  ;;  %v11631_v51 = vld [vmem:[%s16273_s3 + $0x5fc] ss:$40 sps:$4 sm:$0xff]  }
 0x1d4   :  { %5661 = vmatprep.subr.bf16.mxu0 %v11547_v53  ;;  %v11626_v53 = vld [vmem:[%s16273_s3 + $0x5f0] ss:$40 sps:$4 sm:$0xff]  }
 0x1d7   :  { %5662 = vmatpush1.bf16.msra.mxu0 %v11545_v54  ;;  %v11629_v54 = vld [vmem:[%s16273_s3 + $0x5f8] ss:$40 sps:$4 sm:$0xff]  }
 0x1d8   :  { %5663 = vmatprep.subr.bf16.mxu0 %v11553_v55  ;;  %v11634_v55 = vld [vmem:[%s16273_s3 + $0x644] ss:$40 sps:$4 sm:$0xff]  }
 0x1db   :  { %5664 = vmatpush1.bf16.msra.mxu0 %v11551_v56  ;;  %v11637_v56 = vld [vmem:[%s16273_s3 + $0x64c] ss:$40 sps:$4 sm:$0xff]  }
 0x1dc   :  { %5665 = vmatprep.subr.bf16.mxu0 %v11559_v57  ;;  %v11632_v57 = vld [vmem:[%s16273_s3 + $0x640] ss:$40 sps:$4 sm:$0xff]  }
 0x1df   :  { %5666 = vmatpush1.bf16.msra.mxu0 %v11557_v58  ;;  %v11635_v58 = vld [vmem:[%s16273_s3 + $0x648] ss:$40 sps:$4 sm:$0xff]  }
 0x1e0   :  { %5667 = vmatprep.subr.bf16.mxu0 %v11565_v59  ;;  %v11640_v59 = vld [vmem:[%s16273_s3 + $0x694] ss:$40 sps:$4 sm:$0xff]  }
 0x1e3   :  { %5668 = vmatpush1.bf16.msra.mxu0 %v11563_v60  ;;  %v11643_v60 = vld [vmem:[%s16273_s3 + $0x69c] ss:$40 sps:$4 sm:$0xff]  }
 0x1e4   :  { %5669 = vmatprep.subr.bf16.mxu0 %v11571_v63  ;;  %v11638_v63 = vld [vmem:[%s16273_s3 + $0x690] ss:$40 sps:$4 sm:$0xff]  }
 0x1e7   :  { %5670 = vmatpush1.bf16.msra.mxu0 %v11569_v0  ;;  %v11641_v0 = vld [vmem:[%s16273_s3 + $0x698] ss:$40 sps:$4 sm:$0xff]  }
 0x1e8   :  { %5671 = vmatprep.subr.bf16.mxu0 %v11577_v2  ;;  %v11646_v2 = vld [vmem:[%s16273_s3 + $0x6e4] ss:$40 sps:$4 sm:$0xff]  }
 0x1eb   :  { %5672 = vmatpush1.bf16.msra.mxu0 %v11575_v3  ;;  %v11649_v3 = vld [vmem:[%s16273_s3 + $0x6ec] ss:$40 sps:$4 sm:$0xff]  }
 0x1ec   :  { %5673 = vmatprep.subr.bf16.mxu0 %v11583_v4  ;;  %v11644_v4 = vld [vmem:[%s16273_s3 + $0x6e0] ss:$40 sps:$4 sm:$0xff]  }
 0x1ef   :  { %5674 = vmatpush1.bf16.msra.mxu0 %v11581_v5  ;;  %v11647_v5 = vld [vmem:[%s16273_s3 + $0x6e8] ss:$40 sps:$4 sm:$0xff]  }
 0x1f0   :  { %5675 = vmatprep.subr.bf16.mxu0 %v11589_v7  ;;  %v11652_v7 = vld [vmem:[%s16273_s3 + $0x734] ss:$40 sps:$4 sm:$0xff]  }
 0x1f3   :  { %5676 = vmatpush1.bf16.msra.mxu0 %v11587_v9  ;;  %v11655_v9 = vld [vmem:[%s16273_s3 + $0x73c] ss:$40 sps:$4 sm:$0xff]  }
 0x1f4   :  { %5677 = vmatprep.subr.bf16.mxu0 %v11595_v11  ;;  %v11650_v11 = vld [vmem:[%s16273_s3 + $0x730] ss:$40 sps:$4 sm:$0xff]  }
 0x1f5   :  { %v13774_v24 = vpop.f32.mrb[4].mxu0 }
 0x1f6   :  { %v2825_v14 = vpop.f32.mrb[5].mxu0 }
 0x1f7   :  { %v3076_v16 = vmax.f32 %v13411_v6, %v2825_v14  ;;  %v2827_v18 = vpop.f32.mrb[6].mxu0  ;;  %5678 = vmatpush1.bf16.msra.mxu0 %v11593_v12  ;;  %v13794_v6 = vld [vmem:[%s16274_s2] sm:$0x1f] }
 0x1f8   :  { %v2828_v52 = vpop.f32.mrb[7].mxu0  ;;  %5679 = vmatprep.subr.bf16.mxu0 %v11601_v13  ;;  %v3086_v36 = vrot.slane %v13794_v6, %v13797_v10  ;;  %v3090_v26 = vrot.slane %v13794_v6, %v13802_v22  ;;  %v11653_v12 = vld [vmem:[%s16273_s3 + $0x738] ss:$40 sps:$4 sm:$0xff]   ;;  %v11658_v13 = vld [vmem:[%s16273_s3 + $0x784] ss:$40 sps:$4 sm:$0xff]  }
 0x1f9   :  { %v11656_v14 = vld [vmem:[%s16273_s3 + $0x780] ss:$40 sps:$4 sm:$0xff]   ;;  %v11667_v18 = vld [vmem:[%s16273_s3 + $0x7dc] ss:$40 sps:$4 sm:$0xff]   ;;  %v11662_v52 = vld [vmem:[%s16273_s3 + $0x7d0] ss:$40 sps:$4 sm:$0xff]  }
 0x1fa   :  { %v3108_v23 = vadd.f32 %v3086_v36, %v3076_v16  ;;  %v11664_v16 = vld [vmem:[%s16273_s3 + $0x7d4] ss:$40 sps:$4 sm:$0xff]   ;;  %v11668_v36 = vld [vmem:[%s16273_s3 + $0x820] ss:$40 sps:$4 sm:$0xff]  }
 0x1fb   :  { %5680 = vmatpush1.bf16.msra.mxu0 %v11599_v25  ;;  %v11661_v25 = vld [vmem:[%s16273_s3 + $0x78c] ss:$40 sps:$4 sm:$0xff]  }
 0x1fc   :  { %5681 = vmatprep.subr.bf16.mxu0 %v11607_v15  ;;  %v3113_v30 = vmul.f32 0.01, %v3108_v23  ;;  %v11659_v15 = vld [vmem:[%s16273_s3 + $0x788] ss:$40 sps:$4 sm:$0xff]  }
 0x1fe   :  { %v3118_v37 = vmax.f32 %v3108_v23, %v3113_v30  ;;  %v11671_v23 = vld [vmem:[%s16273_s3 + $0x828] ss:$40 sps:$4 sm:$0xff]   ;;  %v11677_v30 = vld [vmem:[%s16273_s3 + $0x878] ss:$40 sps:$4 sm:$0xff]  }
 0x1ff   :  { %5682 = vmatpush1.bf16.msra.mxu0 %v11605_v17  ;;  %v11665_v17 = vld [vmem:[%s16273_s3 + $0x7d8] ss:$40 sps:$4 sm:$0xff]  }
 0x200   :  { %5692 = vmatprep.subr.bf16.mxu0 %v11613_v19  ;;  %v13819_v42 = vpack.c.bf16 %v3118_v37, %v3118_v37  ;;  %v11670_v19 = vld [vmem:[%s16273_s3 + $0x824] ss:$40 sps:$4 sm:$0xff]   ;;  %v11688_v37 = vld [vmem:[%s16273_s3 + $0x914] ss:$40 sps:$4 sm:$0xff]  }
 0x236   :  { %v2946_v27 = vpop.f32.mrb[8].mxu1 }
 0x237   :  { %v3077_v28 = vmax.f32 %v13414_v8, %v2946_v27  ;;  %v13807_v29 = vpop.f32.mrb[9].mxu1  ;;  %v11611_v8 = vld [vmem:[%s16273_s3 + $0x508] ss:$40 sps:$4 sm:$0xff]   ;;  %v11679_v27 = vld [vmem:[%s16273_s3 + $0x87c] ss:$40 sps:$4 sm:$0xff]  }
 0x238   :  { %v3078_v31 = vmax.f32 %v13563_v61, %v13807_v29  ;;  %v2950_v32 = vpop.f32.mrb[10].mxu1  ;;  %v11704_v61 = vld [vmem:[%s16273_s3 + $0xa00] ss:$40 sps:$4 sm:$0xff]  }
 0x239   :  { %v3109_v33 = vadd.f32 %v3090_v26, %v3077_v28  ;;  %v2951_v34 = vpop.f32.mrb[11].mxu1  ;;  %v11676_v26 = vld [vmem:[%s16273_s3 + $0x874] ss:$40 sps:$4 sm:$0xff]   ;;  %v11674_v28 = vld [vmem:[%s16273_s3 + $0x870] ss:$40 sps:$4 sm:$0xff]  }
 0x23a   :  { %v11682_v32 = vld [vmem:[%s16273_s3 + $0x8c4] ss:$40 sps:$4 sm:$0xff]   ;;  %v11680_v34 = vld [vmem:[%s16273_s3 + $0x8c0] ss:$40 sps:$4 sm:$0xff]  }
 0x23b   :  { %v3114_v35 = vmul.f32 0.01, %v3109_v33 }
 0x23d   :  { %v3119_v39 = vmax.f32 %v3109_v33, %v3114_v35  ;;  %v11685_v33 = vld [vmem:[%s16273_s3 + $0x8cc] ss:$40 sps:$4 sm:$0xff]   ;;  %v11683_v35 = vld [vmem:[%s16273_s3 + $0x8c8] ss:$40 sps:$4 sm:$0xff]  }
 0x23f   :  { %v13811_v40 = vpack.c.bf16 %v3119_v39, %v3119_v39  ;;  %v11691_v39 = vld [vmem:[%s16273_s3 + $0x91c] ss:$40 sps:$4 sm:$0xff]  }
 0x241   :  { %5560 = vmatprep.mubr.bf16.mxu1 %v13811_v40  ;;  %5683 = vmatprep.mubr.bf16.mxu0 %v13811_v40 }
 0x242   :  { %5561 = vmatmul.mubr.bf16.vlgmr.msra.gmra.mrb[12].mxu1 %v13819_v42  ;;  %5684 = vmatmul.mubr.bf16.vlgmr.msra.gmra.mrb[12].mxu0 %v13819_v42 }
 0x243   :  { %5570 = vmatpush1.bf16.msra.mxu1 %v11608_v41  ;;  %5693 = vmatpush1.bf16.msra.mxu0 %v11611_v8  ;;  %v11686_v41 = vld [vmem:[%s16273_s3 + $0x910] ss:$40 sps:$4 sm:$0xff]  }
 0x244   :  { %5571 = vmatprep.subr.bf16.mxu1 %v11616_v43  ;;  %5694 = vmatprep.subr.bf16.mxu0 %v11619_v44  ;;  %v11689_v8 = vld [vmem:[%s16273_s3 + $0x918] ss:$40 sps:$4 sm:$0xff]   ;;  %v11694_v43 = vld [vmem:[%s16273_s3 + $0x964] ss:$40 sps:$4 sm:$0xff]  }
 0x245   :  { %v11697_v44 = vld [vmem:[%s16273_s3 + $0x96c] ss:$40 sps:$4 sm:$0xff]  }
 0x247   :  { %5572 = vmatpush1.bf16.msra.mxu1 %v11614_v45  ;;  %5695 = vmatpush1.bf16.msra.mxu0 %v11617_v46  ;;  %v11692_v45 = vld [vmem:[%s16273_s3 + $0x960] ss:$40 sps:$4 sm:$0xff]  }
 0x248   :  { %5573 = vmatprep.subr.bf16.mxu1 %v11622_v47  ;;  %5696 = vmatprep.subr.bf16.mxu0 %v11625_v48  ;;  %v11695_v46 = vld [vmem:[%s16273_s3 + $0x968] ss:$40 sps:$4 sm:$0xff]   ;;  %v11700_v47 = vld [vmem:[%s16273_s3 + $0x9b4] ss:$40 sps:$4 sm:$0xff]  }
 0x249   :  { %v11703_v48 = vld [vmem:[%s16273_s3 + $0x9bc] ss:$40 sps:$4 sm:$0xff]  }
 0x24b   :  { %5574 = vmatpush1.bf16.msra.mxu1 %v11620_v38  ;;  %5697 = vmatpush1.bf16.msra.mxu0 %v11623_v49  ;;  %v11698_v38 = vld [vmem:[%s16273_s3 + $0x9b0] ss:$40 sps:$4 sm:$0xff]  }
 0x24c   :  { %5575 = vmatprep.subr.bf16.mxu1 %v11628_v50  ;;  %5698 = vmatprep.subr.bf16.mxu0 %v11631_v51  ;;  %v11701_v49 = vld [vmem:[%s16273_s3 + $0x9b8] ss:$40 sps:$4 sm:$0xff]   ;;  %v11706_v50 = vld [vmem:[%s16273_s3 + $0xa04] ss:$40 sps:$4 sm:$0xff]  }
 0x24d   :  { %v11709_v51 = vld [vmem:[%s16273_s3 + $0xa0c] ss:$40 sps:$4 sm:$0xff]  }
 0x24f   :  { %5576 = vmatpush1.bf16.msra.mxu1 %v11626_v53  ;;  %5699 = vmatpush1.bf16.msra.mxu0 %v11629_v54  ;;  %v14012_v53 = vsub.s32 2, %v13789_v21 }
 0x250   :  { %5577 = vmatprep.subr.bf16.mxu1 %v11634_v55  ;;  %5700 = vmatprep.subr.bf16.mxu0 %v11637_v56  ;;  %v14017_v55 = vsub.s32 3, %v13789_v21 }
 0x251   :  { %v3094_v54 = vrot.slane %v13794_v6, %v14012_v53 }
 0x253   :  { %5578 = vmatpush1.bf16.msra.mxu1 %v11632_v57  ;;  %5701 = vmatpush1.bf16.msra.mxu0 %v11635_v58  ;;  %v3110_v56 = vadd.f32 %v3094_v54, %v3078_v31  ;;  %v3098_v57 = vrot.slane %v13794_v6, %v14017_v55  ;;  %v11715_v31 = vld [vmem:[%s16273_s3 + $0xa5c] ss:$40 sps:$4 sm:$0xff]  }
 0x254   :  { %5579 = vmatprep.subr.bf16.mxu1 %v11640_v59  ;;  %5702 = vmatprep.subr.bf16.mxu0 %v11643_v60  ;;  %v11760_v54 = vld [vmem:[%s16273_s3 + $0x64] ss:$40 sps:$4 sm:$0xff]  }
 0x257   :  { %5580 = vmatpush1.bf16.msra.mxu1 %v11638_v63  ;;  %5703 = vmatpush1.bf16.msra.mxu0 %v11641_v0  ;;  %v3115_v63 = vmul.f32 0.01, %v3110_v56 }
 0x258   :  { %5581 = vmatprep.subr.bf16.mxu1 %v11646_v2  ;;  %5704 = vmatprep.subr.bf16.mxu0 %v11649_v3 }
 0x25b   :  { %5582 = vmatpush1.bf16.msra.mxu1 %v11644_v4  ;;  %5705 = vmatpush1.bf16.msra.mxu0 %v11647_v5 }
 0x25c   :  { %5583 = vmatprep.subr.bf16.mxu1 %v11652_v7  ;;  %5706 = vmatprep.subr.bf16.mxu0 %v11655_v9  ;;  %v3120_v7 = vmax.f32 %v3110_v56, %v3115_v63  ;;  %v11763_v56 = vld [vmem:[%s16273_s3 + $0x6c] ss:$40 sps:$4 sm:$0xff]   ;;  %v11764_v63 = vld [vmem:[%s16273_s3 + $0xb0] ss:$40 sps:$4 sm:$0xff]  }
 0x25e   :  { %v14034_v29 = vpack.c.bf16 %v3120_v7, %v3120_v7  ;;  %v11778_v7 = vld [vmem:[%s16273_s3 + $0x154] ss:$40 sps:$4 sm:$0xff]  }
 0x25f   :  { %5584 = vmatpush1.bf16.msra.mxu1 %v11650_v11  ;;  %5707 = vmatpush1.bf16.msra.mxu0 %v11653_v12  ;;  %v11710_v12 = vld [vmem:[%s16273_s3 + $0xa50] ss:$40 sps:$4 sm:$0xff]  }
 0x260   :  { %5585 = vmatprep.subr.bf16.mxu1 %v11658_v13  ;;  %5708 = vmatprep.subr.bf16.mxu0 %v11661_v25  ;;  %v11713_v13 = vld [vmem:[%s16273_s3 + $0xa58] ss:$40 sps:$4 sm:$0xff]   ;;  %v11718_v25 = vld [vmem:[%s16273_s3 + $0xaa4] ss:$40 sps:$4 sm:$0xff]  }
 0x263   :  { %5586 = vmatpush1.bf16.msra.mxu1 %v11656_v14  ;;  %5709 = vmatpush1.bf16.msra.mxu0 %v11659_v15  ;;  %v11721_v14 = vld [vmem:[%s16273_s3 + $0xaac] ss:$40 sps:$4 sm:$0xff]   ;;  %v11716_v15 = vld [vmem:[%s16273_s3 + $0xaa0] ss:$40 sps:$4 sm:$0xff]  }
 0x264   :  { %5587 = vmatprep.subr.bf16.mxu1 %v11664_v16  ;;  %5710 = vmatprep.subr.bf16.mxu0 %v11667_v18  ;;  %v11719_v16 = vld [vmem:[%s16273_s3 + $0xaa8] ss:$40 sps:$4 sm:$0xff]   ;;  %v11724_v18 = vld [vmem:[%s16273_s3 + $0xaf4] ss:$40 sps:$4 sm:$0xff]  }
 0x267   :  { %5588 = vmatpush1.bf16.msra.mxu1 %v11662_v52  ;;  %5711 = vmatpush1.bf16.msra.mxu0 %v11665_v17  ;;  %v11727_v52 = vld [vmem:[%s16273_s3 + $0xafc] ss:$40 sps:$4 sm:$0xff]   ;;  %v11722_v17 = vld [vmem:[%s16273_s3 + $0xaf0] ss:$40 sps:$4 sm:$0xff]  }
 0x268   :  { %5589 = vmatprep.subr.bf16.mxu1 %v11670_v19  ;;  %5712 = vmatprep.subr.bf16.mxu0 %v11673_v20  ;;  %v11725_v19 = vld [vmem:[%s16273_s3 + $0xaf8] ss:$40 sps:$4 sm:$0xff]   ;;  %v3101_v20 = vsub.s32 4, %v13789_v21  ;;  %v6504_v21 = vld [vmem:[%s16275_s5 + $0x9a8] sm:$0xff] }
 0x26b   :  { %5590 = vmatpush1.bf16.msra.mxu1 %v11668_v36  ;;  %5713 = vmatpush1.bf16.msra.mxu0 %v11671_v23  ;;  %v11730_v36 = vld [vmem:[%s16273_s3 + $0xb44] ss:$40 sps:$4 sm:$0xff]  }
 0x26c   :  { %5591 = vmatprep.subr.bf16.mxu1 %v11676_v26  ;;  %5714 = vmatprep.subr.bf16.mxu0 %v11679_v27  ;;  %v11733_v23 = vld [vmem:[%s16273_s3 + $0xb4c] ss:$40 sps:$4 sm:$0xff]   ;;  %v11728_v26 = vld [vmem:[%s16273_s3 + $0xb40] ss:$40 sps:$4 sm:$0xff]  }
 0x26d   :  { %v11731_v27 = vld [vmem:[%s16273_s3 + $0xb48] ss:$40 sps:$4 sm:$0xff]  }
 0x26f   :  { %5592 = vmatpush1.bf16.msra.mxu1 %v11674_v28  ;;  %5715 = vmatpush1.bf16.msra.mxu0 %v11677_v30  ;;  %v3102_v28 = vrot.slane %v13794_v6, %v3101_v20  ;;  %v11736_v30 = vld [vmem:[%s16273_s3 + $0xb94] ss:$40 sps:$4 sm:$0xff]   ;;  %v11737_v6 = vld [vmem:[%s16273_s3 + $0xb98] ss:$40 sps:$4 sm:$0xff]  }
 0x270   :  { %5593 = vmatprep.subr.bf16.mxu1 %v11682_v32  ;;  %5716 = vmatprep.subr.bf16.mxu0 %v11685_v33  ;;  %v11739_v32 = vld [vmem:[%s16273_s3 + $0xb9c] ss:$40 sps:$4 sm:$0xff]   ;;  %v11734_v33 = vld [vmem:[%s16273_s3 + $0xb90] ss:$40 sps:$4 sm:$0xff]  }
 0x273   :  { %5594 = vmatpush1.bf16.msra.mxu1 %v11680_v34  ;;  %5717 = vmatpush1.bf16.msra.mxu0 %v11683_v35  ;;  %v11742_v35 = vld [vmem:[%s16273_s3 + $0xbe4] ss:$40 sps:$4 sm:$0xff]  }
 0x274   :  { %5595 = vmatprep.subr.bf16.mxu1 %v11688_v37  ;;  %5718 = vmatprep.subr.bf16.mxu0 %v11691_v39  ;;  %v11745_v37 = vld [vmem:[%s16273_s3 + $0xbec] ss:$40 sps:$4 sm:$0xff]   ;;  %v11740_v39 = vld [vmem:[%s16273_s3 + $0xbe0] ss:$40 sps:$4 sm:$0xff]  }
 0x277   :  { %5596 = vmatpush1.bf16.msra.mxu1 %v11686_v41  ;;  %5719 = vmatpush1.bf16.msra.mxu0 %v11689_v8  ;;  %v11743_v41 = vld [vmem:[%s16273_s3 + $0xbe8] ss:$40 sps:$4 sm:$0xff]  }
 0x278   :  { %5597 = vmatprep.subr.bf16.mxu1 %v11694_v43  ;;  %5720 = vmatprep.subr.bf16.mxu0 %v11697_v44  ;;  %v11748_v43 = vld [vmem:[%s16273_s3 + $0xc34] ss:$40 sps:$4 sm:$0xff]  }
 0x279   :  { %v11751_v44 = vld [vmem:[%s16273_s3 + $0xc3c] ss:$40 sps:$4 sm:$0xff]  }
 0x27b   :  { %5598 = vmatpush1.bf16.msra.mxu1 %v11692_v45  ;;  %5721 = vmatpush1.bf16.msra.mxu0 %v11695_v46  ;;  %v11746_v45 = vld [vmem:[%s16273_s3 + $0xc30] ss:$40 sps:$4 sm:$0xff]  }
 0x27c   :  { %5599 = vmatprep.subr.bf16.mxu1 %v11700_v47  ;;  %5722 = vmatprep.subr.bf16.mxu0 %v11703_v48  ;;  %v11749_v46 = vld [vmem:[%s16273_s3 + $0xc38] ss:$40 sps:$4 sm:$0xff]   ;;  %v11754_v48 = vld [vmem:[%s16273_s3 + $0x14] ss:$40 sps:$4 sm:$0xff]  }
 0x27f   :  { %5600 = vmatpush1.bf16.msra.mxu1 %v11698_v38  ;;  %5723 = vmatpush1.bf16.msra.mxu0 %v11701_v49  ;;  %v11757_v38 = vld [vmem:[%s16273_s3 + $0x1c] ss:$40 sps:$4 sm:$0xff]   ;;  %v11752_v49 = vld [vmem:[%s16273_s3 + $0x10] ss:$40 sps:$4 sm:$0xff]  }
 0x280   :  { %5610 = vmatprep.subr.bf16.mxu1 %v11706_v50  ;;  %5733 = vmatprep.subr.bf16.mxu0 %v11709_v51  ;;  %v11755_v51 = vld [vmem:[%s16273_s3 + $0x18] ss:$40 sps:$4 sm:$0xff]  }
 0x295   :  { %v3069_v58 = vpop.f32.mrb[8].mxu0 }
 0x296   :  { %v3079_v59 = vmax.f32 %v13565_v62, %v3069_v58  ;;  %v3071_v60 = vpop.f32.mrb[9].mxu0  ;;  %v11707_v62 = vld [vmem:[%s16273_s3 + $0xa08] ss:$40 sps:$4 sm:$0xff]  }
 0x297   :  { %v3080_v0 = vmax.f32 %v13774_v24, %v3071_v60  ;;  %v3073_v2 = vpop.f32.mrb[10].mxu0  ;;  %v11712_v24 = vld [vmem:[%s16273_s3 + $0xa54] ss:$40 sps:$4 sm:$0xff]   ;;  %v11761_v58 = vld [vmem:[%s16273_s3 + $0x68] ss:$40 sps:$4 sm:$0xff]  }
 0x298   :  { %v3111_v3 = vadd.f32 %v3098_v57, %v3079_v59  ;;  %v3074_v4 = vpop.f32.mrb[11].mxu0  ;;  %v11758_v57 = vld [vmem:[%s16273_s3 + $0x60] ss:$40 sps:$4 sm:$0xff]   ;;  %v11766_v59 = vld [vmem:[%s16273_s3 + $0xb4] ss:$40 sps:$4 sm:$0xff]  }
 0x299   :  { %v3112_v34 = vadd.f32 %v3102_v28, %v3080_v0  ;;  %v11769_v60 = vld [vmem:[%s16273_s3 + $0xbc] ss:$40 sps:$4 sm:$0xff]   ;;  %v11767_v0 = vld [vmem:[%s16273_s3 + $0xb8] ss:$40 sps:$4 sm:$0xff]  }
 0x29a   :  { %v3116_v5 = vmul.f32 0.01, %v3111_v3  ;;  %v11772_v2 = vld [vmem:[%s16273_s3 + $0x104] ss:$40 sps:$4 sm:$0xff]   ;;  %v11770_v4 = vld [vmem:[%s16273_s3 + $0x100] ss:$40 sps:$4 sm:$0xff]  }
 0x29b   :  { %v3117_v8 = vmul.f32 0.01, %v3112_v34  ;;  %v11808_v28 = vld [vmem:[%s16273_s3 + $0x2e4] ss:$40 sps:$4 sm:$0xff]  }
 0x29c   :  { %v3121_v9 = vmax.f32 %v3111_v3, %v3116_v5  ;;  %v11775_v3 = vld [vmem:[%s16273_s3 + $0x10c] ss:$40 sps:$4 sm:$0xff]   ;;  %v11773_v5 = vld [vmem:[%s16273_s3 + $0x108] ss:$40 sps:$4 sm:$0xff]  }
 0x29d   :  { %v3122_v47 = vmax.f32 %v3112_v34, %v3117_v8  ;;  %v11817_v34 = vld [vmem:[%s16273_s3 + $0x33c] ss:$40 sps:$4 sm:$0xff]   ;;  %v11818_v8 = vld [vmem:[%s16273_s3 + $0x380] ss:$40 sps:$4 sm:$0xff]  }
 0x29e   :  { %v14026_v11 = vpack.c.bf16 %v3121_v9, %v3121_v9  ;;  %v11781_v9 = vld [vmem:[%s16273_s3 + $0x15c] ss:$40 sps:$4 sm:$0xff]  }
 0x29f   :  { %v14139_v50 = vpack.c.bf16 %v3122_v47, %v3122_v47  ;;  %v11827_v47 = vld [vmem:[%s16273_s3 + $0x3d8] ss:$40 sps:$4 sm:$0xff]  }
 0x2a0   :  { %5601 = vmatprep.mubr.bf16.mxu1 %v14026_v11  ;;  %5724 = vmatprep.mubr.bf16.mxu0 %v14026_v11 }
 0x2a1   :  { %5602 = vmatmul.mubr.bf16.vlgmr.msra.gmra.mrb[12].mxu1 %v14034_v29  ;;  %5725 = vmatmul.mubr.bf16.vlgmr.msra.gmra.mrb[12].mxu0 %v14034_v29 }
 0x2a2   :  { %5611 = vmatpush1.bf16.msra.mxu1 %v11704_v61  ;;  %5734 = vmatpush1.bf16.msra.mxu0 %v11707_v62  ;;  %v11776_v61 = vld [vmem:[%s16273_s3 + $0x150] ss:$40 sps:$4 sm:$0xff]  }
 0x2a3   :  { %5612 = vmatprep.subr.bf16.mxu1 %v11712_v24  ;;  %5735 = vmatprep.subr.bf16.mxu0 %v11715_v31  ;;  %v11779_v62 = vld [vmem:[%s16273_s3 + $0x158] ss:$40 sps:$4 sm:$0xff]   ;;  %v11784_v24 = vld [vmem:[%s16273_s3 + $0x1a4] ss:$40 sps:$4 sm:$0xff]  }
 0x2a4   :  { %5642 = vmatprep.mubr.bf16.mxu1 %v12236_v1  ;;  %5765 = vmatprep.mubr.bf16.mxu0 %v12236_v1  ;;  %v11787_v31 = vld [vmem:[%s16273_s3 + $0x1ac] ss:$40 sps:$4 sm:$0xff]  }
 0x2a6   :  { %5613 = vmatpush1.bf16.msra.mxu1 %v11710_v12  ;;  %5736 = vmatpush1.bf16.msra.mxu0 %v11713_v13  ;;  %v11782_v12 = vld [vmem:[%s16273_s3 + $0x1a0] ss:$40 sps:$4 sm:$0xff]  }
 0x2a7   :  { %5614 = vmatprep.subr.bf16.mxu1 %v11718_v25  ;;  %5737 = vmatprep.subr.bf16.mxu0 %v11721_v14  ;;  %v11785_v13 = vld [vmem:[%s16273_s3 + $0x1a8] ss:$40 sps:$4 sm:$0xff]   ;;  %v11790_v25 = vld [vmem:[%s16273_s3 + $0x1f4] ss:$40 sps:$4 sm:$0xff]  }
 0x2a8   :  { %v11793_v14 = vld [vmem:[%s16273_s3 + $0x1fc] ss:$40 sps:$4 sm:$0xff]  }
 0x2aa   :  { %5615 = vmatpush1.bf16.msra.mxu1 %v11716_v15  ;;  %5738 = vmatpush1.bf16.msra.mxu0 %v11719_v16  ;;  %v11788_v15 = vld [vmem:[%s16273_s3 + $0x1f0] ss:$40 sps:$4 sm:$0xff]  }
 0x2ab   :  { %5616 = vmatprep.subr.bf16.mxu1 %v11724_v18  ;;  %5739 = vmatprep.subr.bf16.mxu0 %v11727_v52  ;;  %v11791_v16 = vld [vmem:[%s16273_s3 + $0x1f8] ss:$40 sps:$4 sm:$0xff]   ;;  %v11796_v18 = vld [vmem:[%s16273_s3 + $0x244] ss:$40 sps:$4 sm:$0xff]  }
 0x2ac   :  { %v11799_v52 = vld [vmem:[%s16273_s3 + $0x24c] ss:$40 sps:$4 sm:$0xff]  }
 0x2ae   :  { %5617 = vmatpush1.bf16.msra.mxu1 %v11722_v17  ;;  %5740 = vmatpush1.bf16.msra.mxu0 %v11725_v19  ;;  %v11794_v17 = vld [vmem:[%s16273_s3 + $0x240] ss:$40 sps:$4 sm:$0xff]  }
 0x2af   :  { %5618 = vmatprep.subr.bf16.mxu1 %v11730_v36  ;;  %5741 = vmatprep.subr.bf16.mxu0 %v11733_v23  ;;  %v11797_v19 = vld [vmem:[%s16273_s3 + $0x248] ss:$40 sps:$4 sm:$0xff]   ;;  %v11802_v36 = vld [vmem:[%s16273_s3 + $0x294] ss:$40 sps:$4 sm:$0xff]  }
 0x2b0   :  { %v11805_v23 = vld [vmem:[%s16273_s3 + $0x29c] ss:$40 sps:$4 sm:$0xff]  }
 0x2b2   :  { %5619 = vmatpush1.bf16.msra.mxu1 %v11728_v26  ;;  %5742 = vmatpush1.bf16.msra.mxu0 %v11731_v27  ;;  %v11800_v26 = vld [vmem:[%s16273_s3 + $0x290] ss:$40 sps:$4 sm:$0xff]  }
 0x2b3   :  { %5620 = vmatprep.subr.bf16.mxu1 %v11736_v30  ;;  %5743 = vmatprep.subr.bf16.mxu0 %v11739_v32  ;;  %v11803_v27 = vld [vmem:[%s16273_s3 + $0x298] ss:$40 sps:$4 sm:$0xff]   ;;  %v11811_v30 = vld [vmem:[%s16273_s3 + $0x2ec] ss:$40 sps:$4 sm:$0xff]  }
 0x2b4   :  { %v11806_v32 = vld [vmem:[%s16273_s3 + $0x2e0] ss:$40 sps:$4 sm:$0xff]  }
 0x2b6   :  { %5621 = vmatpush1.bf16.msra.mxu1 %v11734_v33  ;;  %5744 = vmatpush1.bf16.msra.mxu0 %v11737_v6  ;;  %v11809_v33 = vld [vmem:[%s16273_s3 + $0x2e8] ss:$40 sps:$4 sm:$0xff]   ;;  %v11814_v6 = vld [vmem:[%s16273_s3 + $0x334] ss:$40 sps:$4 sm:$0xff]  }
 0x2b7   :  { %5622 = vmatprep.subr.bf16.mxu1 %v11742_v35  ;;  %5745 = vmatprep.subr.bf16.mxu0 %v11745_v37  ;;  %v11812_v35 = vld [vmem:[%s16273_s3 + $0x330] ss:$40 sps:$4 sm:$0xff]  }
 0x2b8   :  { %v11815_v37 = vld [vmem:[%s16273_s3 + $0x338] ss:$40 sps:$4 sm:$0xff]  }
 0x2ba   :  { %5623 = vmatpush1.bf16.msra.mxu1 %v11740_v39  ;;  %5746 = vmatpush1.bf16.msra.mxu0 %v11743_v41  ;;  %v11820_v39 = vld [vmem:[%s16273_s3 + $0x384] ss:$40 sps:$4 sm:$0xff]  }
 0x2bb   :  { %5624 = vmatprep.subr.bf16.mxu1 %v11748_v43  ;;  %5747 = vmatprep.subr.bf16.mxu0 %v11751_v44  ;;  %v11823_v41 = vld [vmem:[%s16273_s3 + $0x38c] ss:$40 sps:$4 sm:$0xff]   ;;  %v11821_v43 = vld [vmem:[%s16273_s3 + $0x388] ss:$40 sps:$4 sm:$0xff]  }
 0x2bc   :  { %v11826_v44 = vld [vmem:[%s16273_s3 + $0x3d4] ss:$40 sps:$4 sm:$0xff]  }
 0x2be   :  { %5625 = vmatpush1.bf16.msra.mxu1 %v11746_v45  ;;  %5748 = vmatpush1.bf16.msra.mxu0 %v11749_v46  ;;  %v11829_v45 = vld [vmem:[%s16273_s3 + $0x3dc] ss:$40 sps:$4 sm:$0xff]   ;;  %v11824_v46 = vld [vmem:[%s16273_s3 + $0x3d0] ss:$40 sps:$4 sm:$0xff]  }
 0x2bf   :  { %5774 = vmatprep.subr.bf16.mxu1 %v11754_v48  ;;  %5897 = vmatprep.subr.bf16.mxu0 %v11757_v38  ;;  %v11832_v48 = vld [vmem:[%s16273_s3 + $0x424] ss:$40 sps:$4 sm:$0xff]  }
 0x2c0   :  { %v11835_v38 = vld [vmem:[%s16273_s3 + $0x42c] ss:$40 sps:$4 sm:$0xff]  }
 0x2c1   :  { %5643 = vmatmul.mubr.bf16.vlgmr.msra.gmra.mrb[12].mxu1 %v14139_v50  ;;  %5766 = vmatmul.mubr.bf16.vlgmr.msra.gmra.mrb[12].mxu0 %v14139_v50 }
 0x2c2   :  { %5775 = vmatpush1.bf16.msra.mxu1 %v11752_v49  ;;  %5806 = vmatprep.mubr.bf16.mxu1 %v13811_v40  ;;  %v11830_v49 = vld [vmem:[%s16273_s3 + $0x420] ss:$40 sps:$4 sm:$0xff]  }
 0x2c3   :  { %5898 = vmatpush1.bf16.msra.mxu0 %v11755_v51  ;;  %5929 = vmatprep.mubr.bf16.mxu0 %v13811_v40  ;;  %v11833_v51 = vld [vmem:[%s16273_s3 + $0x428] ss:$40 sps:$4 sm:$0xff]  }
 0x2c4   :  { %5776 = vmatprep.subr.bf16.mxu1 %v11760_v54  ;;  %5899 = vmatprep.subr.bf16.mxu0 %v11763_v56  ;;  %v11838_v54 = vld [vmem:[%s16273_s3 + $0x474] ss:$40 sps:$4 sm:$0xff]  }
 0x2c5   :  { %v11841_v56 = vld [vmem:[%s16273_s3 + $0x47c] ss:$40 sps:$4 sm:$0xff]  }
 0x2c6   :  { %5777 = vmatpush1.bf16.msra.mxu1 %v11758_v57  ;;  %v11836_v57 = vld [vmem:[%s16273_s3 + $0x470] ss:$40 sps:$4 sm:$0xff]  }
 0x2c7   :  { %5900 = vmatpush1.bf16.msra.mxu0 %v11761_v58  ;;  %5778 = vmatprep.subr.bf16.mxu1 %v11766_v59  ;;  %v11839_v58 = vld [vmem:[%s16273_s3 + $0x478] ss:$40 sps:$4 sm:$0xff]   ;;  %v11844_v59 = vld [vmem:[%s16273_s3 + $0x4c4] ss:$40 sps:$4 sm:$0xff]  }
 0x2c8   :  { %5901 = vmatprep.subr.bf16.mxu0 %v11769_v60  ;;  %v11847_v60 = vld [vmem:[%s16273_s3 + $0x4cc] ss:$40 sps:$4 sm:$0xff]  }
 0x2ca   :  { %5779 = vmatpush1.bf16.msra.mxu1 %v11764_v63  ;;  %v11842_v63 = vld [vmem:[%s16273_s3 + $0x4c0] ss:$40 sps:$4 sm:$0xff]  }
 0x2cb   :  { %5902 = vmatpush1.bf16.msra.mxu0 %v11767_v0  ;;  %5780 = vmatprep.subr.bf16.mxu1 %v11772_v2  ;;  %v11845_v0 = vld [vmem:[%s16273_s3 + $0x4c8] ss:$40 sps:$4 sm:$0xff]   ;;  %v11850_v2 = vld [vmem:[%s16273_s3 + $0x514] ss:$40 sps:$4 sm:$0xff]  }
 0x2cc   :  { %5903 = vmatprep.subr.bf16.mxu0 %v11775_v3  ;;  %v11853_v3 = vld [vmem:[%s16273_s3 + $0x51c] ss:$40 sps:$4 sm:$0xff]  }
 0x2ce   :  { %5781 = vmatpush1.bf16.msra.mxu1 %v11770_v4  ;;  %v11848_v4 = vld [vmem:[%s16273_s3 + $0x510] ss:$40 sps:$4 sm:$0xff]  }
 0x2cf   :  { %5904 = vmatpush1.bf16.msra.mxu0 %v11773_v5  ;;  %5782 = vmatprep.subr.bf16.mxu1 %v11778_v7  ;;  %v11851_v5 = vld [vmem:[%s16273_s3 + $0x518] ss:$40 sps:$4 sm:$0xff]   ;;  %v11856_v7 = vld [vmem:[%s16273_s3 + $0x564] ss:$40 sps:$4 sm:$0xff]  }
 0x2d0   :  { %5905 = vmatprep.subr.bf16.mxu0 %v11781_v9  ;;  %v11859_v9 = vld [vmem:[%s16273_s3 + $0x56c] ss:$40 sps:$4 sm:$0xff]  }
 0x2d2   :  { %5783 = vmatpush1.bf16.msra.mxu1 %v11776_v61  ;;  %v11854_v61 = vld [vmem:[%s16273_s3 + $0x560] ss:$40 sps:$4 sm:$0xff]  }
 0x2d3   :  { %5906 = vmatpush1.bf16.msra.mxu0 %v11779_v62  ;;  %5784 = vmatprep.subr.bf16.mxu1 %v11784_v24  ;;  %v11857_v62 = vld [vmem:[%s16273_s3 + $0x568] ss:$40 sps:$4 sm:$0xff]   ;;  %v11862_v24 = vld [vmem:[%s16273_s3 + $0x5b4] ss:$40 sps:$4 sm:$0xff]  }
 0x2d4   :  { %5907 = vmatprep.subr.bf16.mxu0 %v11787_v31  ;;  %v11865_v31 = vld [vmem:[%s16273_s3 + $0x5bc] ss:$40 sps:$4 sm:$0xff]  }
 0x2d6   :  { %5785 = vmatpush1.bf16.msra.mxu1 %v11782_v12  ;;  %v11860_v12 = vld [vmem:[%s16273_s3 + $0x5b0] ss:$40 sps:$4 sm:$0xff]  }
 0x2d7   :  { %5908 = vmatpush1.bf16.msra.mxu0 %v11785_v13  ;;  %5786 = vmatprep.subr.bf16.mxu1 %v11790_v25  ;;  %v11863_v13 = vld [vmem:[%s16273_s3 + $0x5b8] ss:$40 sps:$4 sm:$0xff]   ;;  %v11868_v25 = vld [vmem:[%s16273_s3 + $0x604] ss:$40 sps:$4 sm:$0xff]  }
 0x2d8   :  { %5909 = vmatprep.subr.bf16.mxu0 %v11793_v14  ;;  %v11871_v14 = vld [vmem:[%s16273_s3 + $0x60c] ss:$40 sps:$4 sm:$0xff]  }
 0x2da   :  { %5787 = vmatpush1.bf16.msra.mxu1 %v11788_v15  ;;  %v11866_v15 = vld [vmem:[%s16273_s3 + $0x600] ss:$40 sps:$4 sm:$0xff]  }
 0x2db   :  { %5910 = vmatpush1.bf16.msra.mxu0 %v11791_v16  ;;  %5788 = vmatprep.subr.bf16.mxu1 %v11796_v18  ;;  %v11869_v16 = vld [vmem:[%s16273_s3 + $0x608] ss:$40 sps:$4 sm:$0xff]   ;;  %v11874_v18 = vld [vmem:[%s16273_s3 + $0x654] ss:$40 sps:$4 sm:$0xff]  }
 0x2dc   :  { %5911 = vmatprep.subr.bf16.mxu0 %v11799_v52  ;;  %v11877_v52 = vld [vmem:[%s16273_s3 + $0x65c] ss:$40 sps:$4 sm:$0xff]  }
 0x2de   :  { %5789 = vmatpush1.bf16.msra.mxu1 %v11794_v17  ;;  %v11872_v17 = vld [vmem:[%s16273_s3 + $0x650] ss:$40 sps:$4 sm:$0xff]  }
 0x2df   :  { %5912 = vmatpush1.bf16.msra.mxu0 %v11797_v19  ;;  %5790 = vmatprep.subr.bf16.mxu1 %v11802_v36  ;;  %v11875_v19 = vld [vmem:[%s16273_s3 + $0x658] ss:$40 sps:$4 sm:$0xff]   ;;  %v11880_v36 = vld [vmem:[%s16273_s3 + $0x6a4] ss:$40 sps:$4 sm:$0xff]  }
 0x2e0   :  { %5913 = vmatprep.subr.bf16.mxu0 %v11805_v23  ;;  %v11883_v23 = vld [vmem:[%s16273_s3 + $0x6ac] ss:$40 sps:$4 sm:$0xff]  }
 0x2e2   :  { %5791 = vmatpush1.bf16.msra.mxu1 %v11800_v26  ;;  %v11878_v26 = vld [vmem:[%s16273_s3 + $0x6a0] ss:$40 sps:$4 sm:$0xff]  }
 0x2e3   :  { %5914 = vmatpush1.bf16.msra.mxu0 %v11803_v27  ;;  %5792 = vmatprep.subr.bf16.mxu1 %v11808_v28  ;;  %v11881_v27 = vld [vmem:[%s16273_s3 + $0x6a8] ss:$40 sps:$4 sm:$0xff]   ;;  %v11886_v28 = vld [vmem:[%s16273_s3 + $0x6f4] ss:$40 sps:$4 sm:$0xff]  }
 0x2e4   :  { %5915 = vmatprep.subr.bf16.mxu0 %v11811_v30  ;;  %v11889_v30 = vld [vmem:[%s16273_s3 + $0x6fc] ss:$40 sps:$4 sm:$0xff]  }
 0x2e6   :  { %5793 = vmatpush1.bf16.msra.mxu1 %v11806_v32  ;;  %v11884_v32 = vld [vmem:[%s16273_s3 + $0x6f0] ss:$40 sps:$4 sm:$0xff]  }
 0x2e7   :  { %5916 = vmatpush1.bf16.msra.mxu0 %v11809_v33  ;;  %5794 = vmatprep.subr.bf16.mxu1 %v11814_v6  ;;  %v11887_v33 = vld [vmem:[%s16273_s3 + $0x6f8] ss:$40 sps:$4 sm:$0xff]   ;;  %v11892_v6 = vld [vmem:[%s16273_s3 + $0x744] ss:$40 sps:$4 sm:$0xff]  }
 0x2e8   :  { %5917 = vmatprep.subr.bf16.mxu0 %v11817_v34  ;;  %v11895_v34 = vld [vmem:[%s16273_s3 + $0x74c] ss:$40 sps:$4 sm:$0xff]  }
 0x2ea   :  { %5795 = vmatpush1.bf16.msra.mxu1 %v11812_v35  ;;  %v11890_v35 = vld [vmem:[%s16273_s3 + $0x740] ss:$40 sps:$4 sm:$0xff]  }
 0x2eb   :  { %5918 = vmatpush1.bf16.msra.mxu0 %v11815_v37  ;;  %5796 = vmatprep.subr.bf16.mxu1 %v11820_v39  ;;  %v11893_v37 = vld [vmem:[%s16273_s3 + $0x748] ss:$40 sps:$4 sm:$0xff]   ;;  %v11898_v39 = vld [vmem:[%s16273_s3 + $0x794] ss:$40 sps:$4 sm:$0xff]  }
 0x2ec   :  { %5919 = vmatprep.subr.bf16.mxu0 %v11823_v41  ;;  %v11901_v41 = vld [vmem:[%s16273_s3 + $0x79c] ss:$40 sps:$4 sm:$0xff]  }
 0x2ee   :  { %5797 = vmatpush1.bf16.msra.mxu1 %v11818_v8  ;;  %v11896_v8 = vld [vmem:[%s16273_s3 + $0x790] ss:$40 sps:$4 sm:$0xff]  }
 0x2ef   :  { %5920 = vmatpush1.bf16.msra.mxu0 %v11821_v43  ;;  %5798 = vmatprep.subr.bf16.mxu1 %v11826_v44  ;;  %v11899_v43 = vld [vmem:[%s16273_s3 + $0x798] ss:$40 sps:$4 sm:$0xff]   ;;  %v11904_v44 = vld [vmem:[%s16273_s3 + $0x7e4] ss:$40 sps:$4 sm:$0xff]  }
 0x2f0   :  { %5921 = vmatprep.subr.bf16.mxu0 %v11829_v45  ;;  %v11907_v45 = vld [vmem:[%s16273_s3 + $0x7ec] ss:$40 sps:$4 sm:$0xff]  }
 0x2f2   :  { %5799 = vmatpush1.bf16.msra.mxu1 %v11824_v46  ;;  %v11902_v46 = vld [vmem:[%s16273_s3 + $0x7e0] ss:$40 sps:$4 sm:$0xff]  }
 0x2f3   :  { %5922 = vmatpush1.bf16.msra.mxu0 %v11827_v47  ;;  %5800 = vmatprep.subr.bf16.mxu1 %v11832_v48  ;;  %v11905_v47 = vld [vmem:[%s16273_s3 + $0x7e8] ss:$40 sps:$4 sm:$0xff]   ;;  %v11910_v48 = vld [vmem:[%s16273_s3 + $0x834] ss:$40 sps:$4 sm:$0xff]  }
 0x2f4   :  { %5923 = vmatprep.subr.bf16.mxu0 %v11835_v38  ;;  %v11913_v38 = vld [vmem:[%s16273_s3 + $0x83c] ss:$40 sps:$4 sm:$0xff]  }
 0x2f6   :  { %5801 = vmatpush1.bf16.msra.mxu1 %v11830_v49  ;;  %v11908_v49 = vld [vmem:[%s16273_s3 + $0x830] ss:$40 sps:$4 sm:$0xff]  }
 0x2f7   :  { %5924 = vmatpush1.bf16.msra.mxu0 %v11833_v51  ;;  %5802 = vmatprep.subr.bf16.mxu1 %v11838_v54  ;;  %v11911_v51 = vld [vmem:[%s16273_s3 + $0x838] ss:$40 sps:$4 sm:$0xff]   ;;  %v11916_v54 = vld [vmem:[%s16273_s3 + $0x884] ss:$40 sps:$4 sm:$0xff]  }
 0x2f8   :  { %5925 = vmatprep.subr.bf16.mxu0 %v11841_v56  ;;  %v11919_v56 = vld [vmem:[%s16273_s3 + $0x88c] ss:$40 sps:$4 sm:$0xff]  }
 0x2fa   :  { %5803 = vmatpush1.bf16.msra.mxu1 %v11836_v57  ;;  %v11914_v57 = vld [vmem:[%s16273_s3 + $0x880] ss:$40 sps:$4 sm:$0xff]  }
 0x2fb   :  { %5926 = vmatpush1.bf16.msra.mxu0 %v11839_v58  ;;  %5804 = vmatprep.subr.bf16.mxu1 %v11844_v59  ;;  %v11917_v58 = vld [vmem:[%s16273_s3 + $0x888] ss:$40 sps:$4 sm:$0xff]   ;;  %v11922_v59 = vld [vmem:[%s16273_s3 + $0x8d4] ss:$40 sps:$4 sm:$0xff]  }
 0x2fc   :  { %5927 = vmatprep.subr.bf16.mxu0 %v11847_v60  ;;  %v11925_v60 = vld [vmem:[%s16273_s3 + $0x8dc] ss:$40 sps:$4 sm:$0xff]  }
 0x2fe   :  { %5805 = vmatpush1.bf16.msra.mxu1 %v11842_v63  ;;  %v11920_v63 = vld [vmem:[%s16273_s3 + $0x8d0] ss:$40 sps:$4 sm:$0xff]  }
 0x2ff   :  { %5928 = vmatpush1.bf16.msra.mxu0 %v11845_v0  ;;  %5815 = vmatprep.subr.bf16.mxu1 %v11850_v2  ;;  %v11923_v0 = vld [vmem:[%s16273_s3 + $0x8d8] ss:$40 sps:$4 sm:$0xff]   ;;  %v11928_v2 = vld [vmem:[%s16273_s3 + $0x924] ss:$40 sps:$4 sm:$0xff]  }
 0x300   :  { %5938 = vmatprep.subr.bf16.mxu0 %v11853_v3  ;;  %v11931_v3 = vld [vmem:[%s16273_s3 + $0x92c] ss:$40 sps:$4 sm:$0xff]  }
 0x301   :  { %5807 = vmatmul.mubr.bf16.vlgmr.msra.gmra.mrb[16].mxu1 %v13819_v42 }
 0x302   :  { %5930 = vmatmul.mubr.bf16.vlgmr.msra.gmra.mrb[16].mxu0 %v13819_v42  ;;  %5816 = vmatpush1.bf16.msra.mxu1 %v11848_v4  ;;  %v11926_v4 = vld [vmem:[%s16273_s3 + $0x920] ss:$40 sps:$4 sm:$0xff]  }
 0x303   :  { %5847 = vmatprep.mubr.bf16.mxu1 %v14026_v11  ;;  %5939 = vmatpush1.bf16.msra.mxu0 %v11851_v5  ;;  %v11929_v5 = vld [vmem:[%s16273_s3 + $0x928] ss:$40 sps:$4 sm:$0xff]  }
 0x304   :  { %5970 = vmatprep.mubr.bf16.mxu0 %v14026_v11  ;;  %5817 = vmatprep.subr.bf16.mxu1 %v11856_v7  ;;  %v11934_v7 = vld [vmem:[%s16273_s3 + $0x974] ss:$40 sps:$4 sm:$0xff]  }
 0x305   :  { %5940 = vmatprep.subr.bf16.mxu0 %v11859_v9  ;;  %v11937_v9 = vld [vmem:[%s16273_s3 + $0x97c] ss:$40 sps:$4 sm:$0xff]  }
 0x306   :  { %5818 = vmatpush1.bf16.msra.mxu1 %v11854_v61  ;;  %v11932_v61 = vld [vmem:[%s16273_s3 + $0x970] ss:$40 sps:$4 sm:$0xff]  }
 0x307   :  { %5941 = vmatpush1.bf16.msra.mxu0 %v11857_v62  ;;  %5819 = vmatprep.subr.bf16.mxu1 %v11862_v24  ;;  %v11935_v62 = vld [vmem:[%s16273_s3 + $0x978] ss:$40 sps:$4 sm:$0xff]   ;;  %v11940_v24 = vld [vmem:[%s16273_s3 + $0x9c4] ss:$40 sps:$4 sm:$0xff]  }
 0x308   :  { %5942 = vmatprep.subr.bf16.mxu0 %v11865_v31  ;;  %v11943_v31 = vld [vmem:[%s16273_s3 + $0x9cc] ss:$40 sps:$4 sm:$0xff]  }
 0x30a   :  { %5820 = vmatpush1.bf16.msra.mxu1 %v11860_v12  ;;  %v11938_v12 = vld [vmem:[%s16273_s3 + $0x9c0] ss:$40 sps:$4 sm:$0xff]  }
 0x30b   :  { %5943 = vmatpush1.bf16.msra.mxu0 %v11863_v13  ;;  %5821 = vmatprep.subr.bf16.mxu1 %v11868_v25  ;;  %v11941_v13 = vld [vmem:[%s16273_s3 + $0x9c8] ss:$40 sps:$4 sm:$0xff]   ;;  %v11946_v25 = vld [vmem:[%s16273_s3 + $0xa14] ss:$40 sps:$4 sm:$0xff]  }
 0x30c   :  { %5944 = vmatprep.subr.bf16.mxu0 %v11871_v14  ;;  %v11949_v14 = vld [vmem:[%s16273_s3 + $0xa1c] ss:$40 sps:$4 sm:$0xff]  }
 0x30e   :  { %5822 = vmatpush1.bf16.msra.mxu1 %v11866_v15  ;;  %v11944_v15 = vld [vmem:[%s16273_s3 + $0xa10] ss:$40 sps:$4 sm:$0xff]  }
 0x30f   :  { %5945 = vmatpush1.bf16.msra.mxu0 %v11869_v16  ;;  %5823 = vmatprep.subr.bf16.mxu1 %v11874_v18  ;;  %v11947_v16 = vld [vmem:[%s16273_s3 + $0xa18] ss:$40 sps:$4 sm:$0xff]   ;;  %v11952_v18 = vld [vmem:[%s16273_s3 + $0xa64] ss:$40 sps:$4 sm:$0xff]  }
 0x310   :  { %5946 = vmatprep.subr.bf16.mxu0 %v11877_v52  ;;  %v11955_v52 = vld [vmem:[%s16273_s3 + $0xa6c] ss:$40 sps:$4 sm:$0xff]  }
 0x312   :  { %5824 = vmatpush1.bf16.msra.mxu1 %v11872_v17  ;;  %v11950_v17 = vld [vmem:[%s16273_s3 + $0xa60] ss:$40 sps:$4 sm:$0xff]  }
 0x313   :  { %5947 = vmatpush1.bf16.msra.mxu0 %v11875_v19  ;;  %5825 = vmatprep.subr.bf16.mxu1 %v11880_v36  ;;  %v11953_v19 = vld [vmem:[%s16273_s3 + $0xa68] ss:$40 sps:$4 sm:$0xff]   ;;  %v11958_v36 = vld [vmem:[%s16273_s3 + $0xab4] ss:$40 sps:$4 sm:$0xff]  }
 0x314   :  { %5948 = vmatprep.subr.bf16.mxu0 %v11883_v23  ;;  %v11961_v23 = vld [vmem:[%s16273_s3 + $0xabc] ss:$40 sps:$4 sm:$0xff]  }
 0x316   :  { %5826 = vmatpush1.bf16.msra.mxu1 %v11878_v26  ;;  %v11956_v26 = vld [vmem:[%s16273_s3 + $0xab0] ss:$40 sps:$4 sm:$0xff]  }
 0x317   :  { %5949 = vmatpush1.bf16.msra.mxu0 %v11881_v27  ;;  %5827 = vmatprep.subr.bf16.mxu1 %v11886_v28  ;;  %v11959_v27 = vld [vmem:[%s16273_s3 + $0xab8] ss:$40 sps:$4 sm:$0xff]   ;;  %v11964_v28 = vld [vmem:[%s16273_s3 + $0xb04] ss:$40 sps:$4 sm:$0xff]  }
 0x318   :  { %5950 = vmatprep.subr.bf16.mxu0 %v11889_v30  ;;  %v11967_v30 = vld [vmem:[%s16273_s3 + $0xb0c] ss:$40 sps:$4 sm:$0xff]  }
 0x31a   :  { %5828 = vmatpush1.bf16.msra.mxu1 %v11884_v32  ;;  %v11962_v32 = vld [vmem:[%s16273_s3 + $0xb00] ss:$40 sps:$4 sm:$0xff]  }
 0x31b   :  { %5951 = vmatpush1.bf16.msra.mxu0 %v11887_v33  ;;  %5829 = vmatprep.subr.bf16.mxu1 %v11892_v6  ;;  %v11965_v33 = vld [vmem:[%s16273_s3 + $0xb08] ss:$40 sps:$4 sm:$0xff]   ;;  %v11970_v6 = vld [vmem:[%s16273_s3 + $0xb54] ss:$40 sps:$4 sm:$0xff]  }
 0x31c   :  { %5952 = vmatprep.subr.bf16.mxu0 %v11895_v34  ;;  %v11973_v34 = vld [vmem:[%s16273_s3 + $0xb5c] ss:$40 sps:$4 sm:$0xff]  }
 0x31e   :  { %5830 = vmatpush1.bf16.msra.mxu1 %v11890_v35  ;;  %v11968_v35 = vld [vmem:[%s16273_s3 + $0xb50] ss:$40 sps:$4 sm:$0xff]  }
 0x31f   :  { %5953 = vmatpush1.bf16.msra.mxu0 %v11893_v37  ;;  %5831 = vmatprep.subr.bf16.mxu1 %v11898_v39  ;;  %v11971_v37 = vld [vmem:[%s16273_s3 + $0xb58] ss:$40 sps:$4 sm:$0xff]   ;;  %v11976_v39 = vld [vmem:[%s16273_s3 + $0xba4] ss:$40 sps:$4 sm:$0xff]  }
 0x320   :  { %5954 = vmatprep.subr.bf16.mxu0 %v11901_v41  ;;  %v11979_v41 = vld [vmem:[%s16273_s3 + $0xbac] ss:$40 sps:$4 sm:$0xff]  }
 0x322   :  { %5832 = vmatpush1.bf16.msra.mxu1 %v11896_v8  ;;  %v11974_v8 = vld [vmem:[%s16273_s3 + $0xba0] ss:$40 sps:$4 sm:$0xff]  }
 0x323   :  { %5955 = vmatpush1.bf16.msra.mxu0 %v11899_v43  ;;  %5833 = vmatprep.subr.bf16.mxu1 %v11904_v44  ;;  %v11977_v43 = vld [vmem:[%s16273_s3 + $0xba8] ss:$40 sps:$4 sm:$0xff]   ;;  %v11982_v44 = vld [vmem:[%s16273_s3 + $0xbf4] ss:$40 sps:$4 sm:$0xff]  }
 0x324   :  { %5956 = vmatprep.subr.bf16.mxu0 %v11907_v45  ;;  %v11985_v45 = vld [vmem:[%s16273_s3 + $0xbfc] ss:$40 sps:$4 sm:$0xff]  }
 0x326   :  { %5834 = vmatpush1.bf16.msra.mxu1 %v11902_v46  ;;  %v11980_v46 = vld [vmem:[%s16273_s3 + $0xbf0] ss:$40 sps:$4 sm:$0xff]  }
 0x327   :  { %5957 = vmatpush1.bf16.msra.mxu0 %v11905_v47  ;;  %5835 = vmatprep.subr.bf16.mxu1 %v11910_v48  ;;  %v11983_v47 = vld [vmem:[%s16273_s3 + $0xbf8] ss:$40 sps:$4 sm:$0xff]   ;;  %v11988_v48 = vld [vmem:[%s16273_s3 + $0xc44] ss:$40 sps:$4 sm:$0xff]  }
 0x328   :  { %5958 = vmatprep.subr.bf16.mxu0 %v11913_v38  ;;  %v11991_v38 = vld [vmem:[%s16273_s3 + $0xc4c] ss:$40 sps:$4 sm:$0xff]  }
 0x32a   :  { %5836 = vmatpush1.bf16.msra.mxu1 %v11908_v49  ;;  %v11986_v49 = vld [vmem:[%s16273_s3 + $0xc40] ss:$40 sps:$4 sm:$0xff]  }
 0x32b   :  { %5959 = vmatpush1.bf16.msra.mxu0 %v11911_v51  ;;  %5837 = vmatprep.subr.bf16.mxu1 %v11916_v54  ;;  %v11989_v51 = vld [vmem:[%s16273_s3 + $0xc48] ss:$40 sps:$4 sm:$0xff]   ;;  %v11994_v54 = vld [vmem:[%s16273_s3 + $0x24] ss:$40 sps:$4 sm:$0xff]  }
 0x32c   :  { %5960 = vmatprep.subr.bf16.mxu0 %v11919_v56  ;;  %v11992_v56 = vld [vmem:[%s16273_s3 + $0x20] ss:$40 sps:$4 sm:$0xff]  }
 0x32e   :  { %5838 = vmatpush1.bf16.msra.mxu1 %v11914_v57  ;;  %v11997_v57 = vld [vmem:[%s16273_s3 + $0x74] ss:$40 sps:$4 sm:$0xff]  }
 0x32f   :  { %5961 = vmatpush1.bf16.msra.mxu0 %v11917_v58  ;;  %5839 = vmatprep.subr.bf16.mxu1 %v11922_v59  ;;  %v11995_v58 = vld [vmem:[%s16273_s3 + $0x70] ss:$40 sps:$4 sm:$0xff]   ;;  %v12000_v59 = vld [vmem:[%s16273_s3 + $0xc4] ss:$40 sps:$4 sm:$0xff]  }
 0x330   :  { %5962 = vmatprep.subr.bf16.mxu0 %v11925_v60  ;;  %v11998_v60 = vld [vmem:[%s16273_s3 + $0xc0] ss:$40 sps:$4 sm:$0xff]  }
 0x332   :  { %5840 = vmatpush1.bf16.msra.mxu1 %v11920_v63  ;;  %v12003_v63 = vld [vmem:[%s16273_s3 + $0x114] ss:$40 sps:$4 sm:$0xff]  }
 0x333   :  { %5963 = vmatpush1.bf16.msra.mxu0 %v11923_v0  ;;  %5841 = vmatprep.subr.bf16.mxu1 %v11928_v2  ;;  %v12006_v0 = vld [vmem:[%s16273_s3 + $0x164] ss:$40 sps:$4 sm:$0xff]   ;;  %v12004_v2 = vld [vmem:[%s16273_s3 + $0x160] ss:$40 sps:$4 sm:$0xff]  }
 0x334   :  { %5964 = vmatprep.subr.bf16.mxu0 %v11931_v3  ;;  %v12009_v3 = vld [vmem:[%s16273_s3 + $0x1b4] ss:$40 sps:$4 sm:$0xff]  }
 0x336   :  { %5842 = vmatpush1.bf16.msra.mxu1 %v11926_v4  ;;  %v12007_v4 = vld [vmem:[%s16273_s3 + $0x1b0] ss:$40 sps:$4 sm:$0xff]  }
 0x337   :  { %5965 = vmatpush1.bf16.msra.mxu0 %v11929_v5  ;;  %5843 = vmatprep.subr.bf16.mxu1 %v11934_v7  ;;  %v12012_v5 = vld [vmem:[%s16273_s3 + $0x204] ss:$40 sps:$4 sm:$0xff]   ;;  %v12010_v7 = vld [vmem:[%s16273_s3 + $0x200] ss:$40 sps:$4 sm:$0xff]  }
 0x338   :  { %5966 = vmatprep.subr.bf16.mxu0 %v11937_v9  ;;  %v12015_v9 = vld [vmem:[%s16273_s3 + $0x254] ss:$40 sps:$4 sm:$0xff]  }
 0x33a   :  { %5844 = vmatpush1.bf16.msra.mxu1 %v11932_v61  ;;  %v12013_v61 = vld [vmem:[%s16273_s3 + $0x250] ss:$40 sps:$4 sm:$0xff]  }
 0x33b   :  { %5967 = vmatpush1.bf16.msra.mxu0 %v11935_v62  ;;  %5845 = vmatprep.subr.bf16.mxu1 %v11940_v24  ;;  %v12018_v62 = vld [vmem:[%s16273_s3 + $0x2a4] ss:$40 sps:$4 sm:$0xff]   ;;  %v12016_v24 = vld [vmem:[%s16273_s3 + $0x2a0] ss:$40 sps:$4 sm:$0xff]  }
 0x33c   :  { %5968 = vmatprep.subr.bf16.mxu0 %v11943_v31  ;;  %v12021_v31 = vld [vmem:[%s16273_s3 + $0x2f4] ss:$40 sps:$4 sm:$0xff]  }
 0x33e   :  { %5846 = vmatpush1.bf16.msra.mxu1 %v11938_v12  ;;  %v6195_v12 = vld [vmem:[%s16275_s5] sm:$0xff] }
 0x33f   :  { %5969 = vmatpush1.bf16.msra.mxu0 %v11941_v13  ;;  %5856 = vmatprep.subr.bf16.mxu1 %v11946_v25  ;;  %v6199_v13 = vld [vmem:[%s16275_s5 + $0x20] sm:$0xff] }
 0x340   :  { %5979 = vmatprep.subr.bf16.mxu0 %v11949_v14  ;;  %v10309_v25 = vcombine.low %v6195_v12, %v6199_v13  ;;  %v10310_v14 = vcombine.high %v6195_v12, %v6199_v13  ;;  %v12040_v13 = vld [vmem:[%s16273_s3 + $0x520] ss:$40 sps:$4 sm:$0xff]  }
 0x341   :  { %5848 = vmatmul.mubr.bf16.vlgmr.msra.gmra.mrb[16].mxu1 %v14034_v29 }
 0x342   :  { %5971 = vmatmul.mubr.bf16.vlgmr.msra.gmra.mrb[16].mxu0 %v14034_v29  ;;  %5857 = vmatpush1.bf16.msra.mxu1 %v11944_v15  ;;  %v12019_v15 = vld [vmem:[%s16273_s3 + $0x2f0] ss:$40 sps:$4 sm:$0xff]  }
 0x343   :  { %5980 = vmatpush1.bf16.msra.mxu0 %v11947_v16  ;;  %5858 = vmatprep.subr.bf16.mxu1 %v11952_v18  ;;  %v6203_v16 = vld [vmem:[%s16275_s5 + $0x40] sm:$0xff] }
 0x344   :  { %5981 = vmatprep.subr.bf16.mxu0 %v11955_v52  ;;  %5888 = vmatprep.mubr.bf16.mxu1 %v12236_v1  ;;  %v6207_v18 = vld [vmem:[%s16275_s5 + $0x60] sm:$0xff] }
 0x345   :  { %6011 = vmatprep.mubr.bf16.mxu0 %v12236_v1  ;;  %v12024_v52 = vld [vmem:[%s16273_s3 + $0x344] ss:$40 sps:$4 sm:$0xff]  }
 0x346   :  { %5859 = vmatpush1.bf16.msra.mxu1 %v11950_v17  ;;  %v10317_v17 = vcombine.low %v6203_v16, %v6207_v18 }
 0x347   :  { %5982 = vmatpush1.bf16.msra.mxu0 %v11953_v19  ;;  %5860 = vmatprep.subr.bf16.mxu1 %v11958_v36  ;;  %v10318_v19 = vcombine.high %v6203_v16, %v6207_v18  ;;  %v12022_v36 = vld [vmem:[%s16273_s3 + $0x340] ss:$40 sps:$4 sm:$0xff]  }
 0x348   :  { %5983 = vmatprep.subr.bf16.mxu0 %v11961_v23  ;;  %v6211_v23 = vld [vmem:[%s16275_s5 + $0x80] sm:$0xff] }
 0x34a   :  { %5861 = vmatpush1.bf16.msra.mxu1 %v11956_v26  ;;  %v6215_v26 = vld [vmem:[%s16275_s5 + $0xa0] sm:$0xff] }
 0x34b   :  { %5984 = vmatpush1.bf16.msra.mxu0 %v11959_v27  ;;  %5862 = vmatprep.subr.bf16.mxu1 %v11964_v28  ;;  %v12027_v27 = vld [vmem:[%s16273_s3 + $0x394] ss:$40 sps:$4 sm:$0xff]   ;;  %v10325_v28 = vcombine.low %v6211_v23, %v6215_v26 }
 0x34c   :  { %5985 = vmatprep.subr.bf16.mxu0 %v11967_v30  ;;  %v10326_v30 = vcombine.high %v6211_v23, %v6215_v26  ;;  %v12046_v23 = vld [vmem:[%s16273_s3 + $0x5c0] ss:$40 sps:$4 sm:$0xff]  }
 0x34d   :  { %v6275_v26 = vld [vmem:[%s16275_s5 + $0x280] sm:$0xff] }
 0x34e   :  { %5863 = vmatpush1.bf16.msra.mxu1 %v11962_v32  ;;  %v12025_v32 = vld [vmem:[%s16273_s3 + $0x390] ss:$40 sps:$4 sm:$0xff]  }
 0x34f   :  { %5986 = vmatpush1.bf16.msra.mxu0 %v11965_v33  ;;  %5864 = vmatprep.subr.bf16.mxu1 %v11970_v6  ;;  %v6219_v33 = vld [vmem:[%s16275_s5 + $0xc0] sm:$0xff] }
 0x350   :  { %5987 = vmatprep.subr.bf16.mxu0 %v11973_v34  ;;  %v6223_v6 = vld [vmem:[%s16275_s5 + $0xe0] sm:$0xff] }
 0x351   :  { %v12030_v34 = vld [vmem:[%s16273_s3 + $0x3e4] ss:$40 sps:$4 sm:$0xff]  }
 0x352   :  { %5865 = vmatpush1.bf16.msra.mxu1 %v11968_v35  ;;  %v10333_v35 = vcombine.low %v6219_v33, %v6223_v6 }
 0x353   :  { %5988 = vmatpush1.bf16.msra.mxu0 %v11971_v37  ;;  %5866 = vmatprep.subr.bf16.mxu1 %v11976_v39  ;;  %v10334_v37 = vcombine.high %v6219_v33, %v6223_v6  ;;  %v12028_v39 = vld [vmem:[%s16273_s3 + $0x3e0] ss:$40 sps:$4 sm:$0xff]   ;;  %v12049_v33 = vld [vmem:[%s16273_s3 + $0x610] ss:$40 sps:$4 sm:$0xff]  }
 0x354   :  { %5989 = vmatprep.subr.bf16.mxu0 %v11979_v41  ;;  %v6227_v41 = vld [vmem:[%s16275_s5 + $0x100] sm:$0xff] }
 0x355   :  { %v6283_v6 = vld [vmem:[%s16275_s5 + $0x2c0] sm:$0xff] }
 0x356   :  { %5867 = vmatpush1.bf16.msra.mxu1 %v11974_v8  ;;  %v6231_v8 = vld [vmem:[%s16275_s5 + $0x120] sm:$0xff] }
 0x357   :  { %5990 = vmatpush1.bf16.msra.mxu0 %v11977_v43  ;;  %5868 = vmatprep.subr.bf16.mxu1 %v11982_v44  ;;  %v12033_v43 = vld [vmem:[%s16273_s3 + $0x434] ss:$40 sps:$4 sm:$0xff]   ;;  %v10341_v44 = vcombine.low %v6227_v41, %v6231_v8 }
 0x358   :  { %5991 = vmatprep.subr.bf16.mxu0 %v11985_v45  ;;  %v10342_v45 = vcombine.high %v6227_v41, %v6231_v8  ;;  %v12052_v41 = vld [vmem:[%s16273_s3 + $0x660] ss:$40 sps:$4 sm:$0xff]  }
 0x359   :  { %v6291_v8 = vld [vmem:[%s16275_s5 + $0x300] sm:$0xff] }
 0x35a   :  { %5869 = vmatpush1.bf16.msra.mxu1 %v11980_v46  ;;  %v12031_v46 = vld [vmem:[%s16273_s3 + $0x430] ss:$40 sps:$4 sm:$0xff]  }
 0x35b   :  { %5992 = vmatpush1.bf16.msra.mxu0 %v11983_v47  ;;  %5870 = vmatprep.subr.bf16.mxu1 %v11988_v48  ;;  %v6235_v47 = vld [vmem:[%s16275_s5 + $0x140] sm:$0xff] }
 0x35c   :  { %5993 = vmatprep.subr.bf16.mxu0 %v11991_v38  ;;  %v6239_v48 = vld [vmem:[%s16275_s5 + $0x160] sm:$0xff] }
 0x35d   :  { %v12036_v38 = vld [vmem:[%s16273_s3 + $0x484] ss:$40 sps:$4 sm:$0xff]  }
 0x35e   :  { %5871 = vmatpush1.bf16.msra.mxu1 %v11986_v49  ;;  %v10349_v49 = vcombine.low %v6235_v47, %v6239_v48 }
 0x35f   :  { %5994 = vmatpush1.bf16.msra.mxu0 %v11989_v51  ;;  %6020 = vmatprep.subr.bf16.mxu1 %v11994_v54  ;;  %v10350_v51 = vcombine.high %v6235_v47, %v6239_v48  ;;  %v12055_v47 = vld [vmem:[%s16273_s3 + $0x6b0] ss:$40 sps:$4 sm:$0xff]   ;;  %v12060_v48 = vld [vmem:[%s16273_s3 + $0x704] ss:$40 sps:$4 sm:$0xff]  }
 0x360   :  { %8115 = vmatprep.subr.bf16.mxu0 %v10310_v14  ;;  %v6263_v14 = vld [vmem:[%s16275_s5 + $0x220] sm:$0xff] }
 0x361   :  { %5889 = vmatmul.mubr.bf16.vlgmr.msra.gmra.mrb[16].mxu1 %v14139_v50 }
 0x362   :  { %6012 = vmatmul.mubr.bf16.vlgmr.msra.gmra.mrb[16].mxu0 %v14139_v50  ;;  %6021 = vmatpush1.bf16.msra.mxu1 %v11992_v56 }
 0x363   :  { %6052 = vmatprep.mubr.bf16.mxu1 %v13811_v40  ;;  %6022 = vmatprep.subr.bf16.mxu1 %v11997_v57  ;;  %v12001_v40 = vld [vmem:[%s16273_s3 + $0x110] ss:$40 sps:$4 sm:$0xff]  }
 0x364   :  { %8116 = vmatpush1.bf16.msra.mxu0 %v10309_v25  ;;  %v6259_v25 = vld [vmem:[%s16275_s5 + $0x200] sm:$0xff] }
 0x365   :  { %8117 = vmatprep.subr.bf16.mxu0 %v10318_v19  ;;  %v10373_v16 = vcombine.low %v6259_v25, %v6263_v14  ;;  %v10374_v18 = vcombine.high %v6259_v25, %v6263_v14  ;;  %v6271_v19 = vld [vmem:[%s16275_s5 + $0x260] sm:$0xff]  ;;  %v12067_v25 = vld [vmem:[%s16273_s3 + $0x7f0] ss:$40 sps:$4 sm:$0xff]  }
 0x366   :  { %6023 = vmatpush1.bf16.msra.mxu1 %v11995_v58 }
 0x367   :  { %6024 = vmatprep.subr.bf16.mxu1 %v12000_v59 }
 0x368   :  { %8118 = vmatpush1.bf16.msra.mxu0 %v10317_v17  ;;  %v6267_v17 = vld [vmem:[%s16275_s5 + $0x240] sm:$0xff] }
 0x369   :  { %8119 = vmatprep.subr.bf16.mxu0 %v10326_v30 }
 0x36a   :  { %6025 = vmatpush1.bf16.msra.mxu1 %v11998_v60 }
 0x36b   :  { %6026 = vmatprep.subr.bf16.mxu1 %v12003_v63  ;;  %v12034_v63 = vld [vmem:[%s16273_s3 + $0x480] ss:$40 sps:$4 sm:$0xff]  }
 0x36c   :  { %8120 = vmatpush1.bf16.msra.mxu0 %v10325_v28  ;;  %v12051_v28 = vld [vmem:[%s16273_s3 + $0x614] ss:$40 sps:$4 sm:$0xff]  }
 0x36d   :  { %8121 = vmatprep.subr.bf16.mxu0 %v10334_v37 }
 0x36e   :  { %6027 = vmatpush1.bf16.msra.mxu1 %v12001_v40  ;;  %v6243_v40 = vld [vmem:[%s16275_s5 + $0x180] sm:$0xff] }
 0x36f   :  { %6028 = vmatprep.subr.bf16.mxu1 %v12006_v0  ;;  %v6247_v0 = vld [vmem:[%s16275_s5 + $0x1a0] sm:$0xff] }
 0x370   :  { %8122 = vmatpush1.bf16.msra.mxu0 %v10333_v35  ;;  %v12054_v35 = vld [vmem:[%s16273_s3 + $0x664] ss:$40 sps:$4 sm:$0xff]  }
 0x371   :  { %8123 = vmatprep.subr.bf16.mxu0 %v10342_v45 }
 0x372   :  { %6029 = vmatpush1.bf16.msra.mxu1 %v12004_v2 }
 0x373   :  { %6030 = vmatprep.subr.bf16.mxu1 %v12009_v3 }
 0x374   :  { %8124 = vmatpush1.bf16.msra.mxu0 %v10341_v44  ;;  %v12057_v44 = vld [vmem:[%s16273_s3 + $0x6b4] ss:$40 sps:$4 sm:$0xff]  }
 0x375   :  { %8125 = vmatprep.subr.bf16.mxu0 %v10350_v51 }
 0x376   :  { %6031 = vmatpush1.bf16.msra.mxu1 %v12007_v4  ;;  %v12039_v4 = vld [vmem:[%s16273_s3 + $0x4d4] ss:$40 sps:$4 sm:$0xff]  }
 0x377   :  { %6032 = vmatprep.subr.bf16.mxu1 %v12012_v5  ;;  %v10357_v5 = vcombine.low %v6243_v40, %v6247_v0 }
 0x378   :  { %8126 = vmatpush1.bf16.msra.mxu0 %v10349_v49  ;;  %v6303_v49 = vld [vmem:[%s16275_s5 + $0x360] sm:$0xff] }
 0x37a   :  { %6033 = vmatpush1.bf16.msra.mxu1 %v12010_v7  ;;  %v10358_v7 = vcombine.high %v6243_v40, %v6247_v0  ;;  %v6307_v40 = vld [vmem:[%s16275_s5 + $0x380] sm:$0xff] }
 0x37b   :  { %6034 = vmatprep.subr.bf16.mxu1 %v12015_v9  ;;  %v12037_v9 = vld [vmem:[%s16273_s3 + $0x4d0] ss:$40 sps:$4 sm:$0xff]   ;;  %v6311_v0 = vld [vmem:[%s16275_s5 + $0x3a0] sm:$0xff] }
 0x37c   :  { %8127 = vmatprep.subr.bf16.mxu0 %v10358_v7  ;;  %v6315_v7 = vld [vmem:[%s16275_s5 + $0x3c0] sm:$0xff] }
 0x37d   :  { %8128 = vmatpush1.bf16.msra.mxu0 %v10357_v5  ;;  %v12066_v5 = vld [vmem:[%s16273_s3 + $0x7a4] ss:$40 sps:$4 sm:$0xff]  }
 0x37e   :  { %6035 = vmatpush1.bf16.msra.mxu1 %v12013_v61  ;;  %v6251_v61 = vld [vmem:[%s16275_s5 + $0x1c0] sm:$0xff] }
 0x37f   :  { %6036 = vmatprep.subr.bf16.mxu1 %v12018_v62  ;;  %v6255_v62 = vld [vmem:[%s16275_s5 + $0x1e0] sm:$0xff] }
 0x380   :  { %v10366_v12 = vcombine.high %v6251_v61, %v6255_v62 }
 0x382   :  { %6037 = vmatpush1.bf16.msra.mxu1 %v12016_v24  ;;  %v12042_v24 = vld [vmem:[%s16273_s3 + $0x524] ss:$40 sps:$4 sm:$0xff]   ;;  %8129 = vmatprep.subr.bf16.mxu0 %v10366_v12 }
 0x383   :  { %6038 = vmatprep.subr.bf16.mxu1 %v12021_v31  ;;  %v10365_v31 = vcombine.low %v6251_v61, %v6255_v62  ;;  %v14889_v12 = vld [vmem:[%s16275_s5 + $0x400] sm:$0xff] }
 0x385   :  { %8130 = vmatpush1.bf16.msra.mxu0 %v10365_v31  ;;  %v12069_v31 = vld [vmem:[%s16273_s3 + $0x7f4] ss:$40 sps:$4 sm:$0xff]  }
 0x386   :  { %6039 = vmatpush1.bf16.msra.mxu1 %v12019_v15  ;;  %v12045_v15 = vld [vmem:[%s16273_s3 + $0x574] ss:$40 sps:$4 sm:$0xff]   ;;  %8131 = vmatprep.subr.bf16.mxu0 %v10374_v18  ;;  %v12070_v18 = vld [vmem:[%s16273_s3 + $0x840] ss:$40 sps:$4 sm:$0xff]  }
 0x387   :  { %6040 = vmatprep.subr.bf16.mxu1 %v12024_v52  ;;  %v12043_v52 = vld [vmem:[%s16273_s3 + $0x570] ss:$40 sps:$4 sm:$0xff]  }
 0x389   :  { %8132 = vmatpush1.bf16.msra.mxu0 %v10373_v16  ;;  %v12072_v16 = vld [vmem:[%s16273_s3 + $0x844] ss:$40 sps:$4 sm:$0xff]  }
 0x38a   :  { %6041 = vmatpush1.bf16.msra.mxu1 %v12022_v36  ;;  %v10381_v36 = vcombine.low %v6267_v17, %v6271_v19 }
 0x38b   :  { %6042 = vmatprep.subr.bf16.mxu1 %v12027_v27  ;;  %v6279_v27 = vld [vmem:[%s16275_s5 + $0x2a0] sm:$0xff] }
 0x38c   :  { %v10389_v30 = vcombine.low %v6275_v26, %v6279_v27 }
 0x38e   :  { %6043 = vmatpush1.bf16.msra.mxu1 %v12025_v32  ;;  %v10390_v32 = vcombine.high %v6275_v26, %v6279_v27  ;;  %v12082_v26 = vld [vmem:[%s16273_s3 + $0x980] ss:$40 sps:$4 sm:$0xff]   ;;  %v12087_v27 = vld [vmem:[%s16273_s3 + $0x9d4] ss:$40 sps:$4 sm:$0xff]  }
 0x38f   :  { %6044 = vmatprep.subr.bf16.mxu1 %v12030_v34  ;;  %v6287_v34 = vld [vmem:[%s16275_s5 + $0x2e0] sm:$0xff] }
 0x390   :  { %v10397_v37 = vcombine.low %v6283_v6, %v6287_v34 }
 0x392   :  { %6045 = vmatpush1.bf16.msra.mxu1 %v12028_v39  ;;  %v10398_v39 = vcombine.high %v6283_v6, %v6287_v34  ;;  %v12091_v6 = vld [vmem:[%s16273_s3 + $0xa70] ss:$40 sps:$4 sm:$0xff]   ;;  %v12096_v34 = vld [vmem:[%s16273_s3 + $0xac4] ss:$40 sps:$4 sm:$0xff]  }
 0x393   :  { %6046 = vmatprep.subr.bf16.mxu1 %v12033_v43  ;;  %v6295_v43 = vld [vmem:[%s16275_s5 + $0x320] sm:$0xff] }
 0x394   :  { %v14750_v54 = vpop.f32.mrb[12].mxu1  ;;  %v14752_v56 = vpop.f32.mrb[12].mxu0  ;;  %v10405_v45 = vcombine.low %v6291_v8, %v6295_v43 }
 0x395   :  { %v14754_v57 = vpop.f32.mrb[13].mxu1  ;;  %v14756_v58 = vpop.f32.mrb[13].mxu0 }
 0x396   :  { %v5648_v59 = vpop.f32.mrb[14].mxu1  ;;  %v5771_v60 = vpop.f32.mrb[14].mxu0  ;;  %6047 = vmatpush1.bf16.msra.mxu1 %v12031_v46  ;;  %v10406_v46 = vcombine.high %v6291_v8, %v6295_v43  ;;  %v12105_v8 = vld [vmem:[%s16273_s3 + $0xbb4] ss:$40 sps:$4 sm:$0xff]   ;;  %v12103_v43 = vld [vmem:[%s16273_s3 + $0xbb0] ss:$40 sps:$4 sm:$0xff]  }
 0x397   :  { %v5649_v2 = vpop.f32.mrb[15].mxu1  ;;  %v5772_v3 = vpop.f32.mrb[15].mxu0  ;;  %6048 = vmatprep.subr.bf16.mxu1 %v12036_v38  ;;  %v6299_v38 = vld [vmem:[%s16275_s5 + $0x340] sm:$0xff] }
 0x398   :  { %v10414_v51 = vcombine.high %v6299_v38, %v6303_v49  ;;  %v10413_v59 = vcombine.low %v6299_v38, %v6303_v49  ;;  %v12058_v60 = vld [vmem:[%s16273_s3 + $0x700] ss:$40 sps:$4 sm:$0xff]   ;;  %v10422_v2 = vcombine.high %v6307_v40, %v6311_v0  ;;  %v10421_v3 = vcombine.low %v6307_v40, %v6311_v0  ;;  %v12109_v38 = vld [vmem:[%s16273_s3 + $0xc50] ss:$40 sps:$4 sm:$0xff]  }
 0x399   :  { %v6212_v40 = vld [vmem:[%s16275_s5 + $0x88] sm:$0xff] }
 0x39a   :  { %6049 = vmatpush1.bf16.msra.mxu1 %v12034_v63  ;;  %v12063_v63 = vld [vmem:[%s16273_s3 + $0x754] ss:$40 sps:$4 sm:$0xff]   ;;  %v6216_v0 = vld [vmem:[%s16275_s5 + $0xa8] sm:$0xff] }
 0x39b   :  { %6050 = vmatprep.subr.bf16.mxu1 %v12039_v4  ;;  %v12061_v4 = vld [vmem:[%s16273_s3 + $0x750] ss:$40 sps:$4 sm:$0xff]  }
 0x39e   :  { %6051 = vmatpush1.bf16.msra.mxu1 %v12037_v9  ;;  %v6319_v9 = vld [vmem:[%s16275_s5 + $0x3e0] sm:$0xff] }
 0x39f   :  { %6061 = vmatprep.subr.bf16.mxu1 %v12042_v24  ;;  %v10430_v61 = vcombine.high %v6315_v7, %v6319_v9  ;;  %v10429_v62 = vcombine.low %v6315_v7, %v6319_v9  ;;  %v12064_v24 = vld [vmem:[%s16273_s3 + $0x7a0] ss:$40 sps:$4 sm:$0xff]   ;;  %v10327_v7 = vcombine.low %v6212_v40, %v6216_v0 }
 0x3a1   :  { %6053 = vmatmul.mubr.bf16.vlgmr.msra.gmra.mrb[20].mxu1 %v13819_v42  ;;  %v12048_v42 = vld [vmem:[%s16273_s3 + $0x5c4] ss:$40 sps:$4 sm:$0xff]  }
 0x3a2   :  { %6062 = vmatpush1.bf16.msra.mxu1 %v12040_v13  ;;  %6093 = vmatprep.mubr.bf16.mxu1 %v14026_v11  ;;  %v10382_v11 = vcombine.high %v6267_v17, %v6271_v19  ;;  %v14894_v13 = vld [vmem:[%s16275_s5 + $0x420] sm:$0xff]  ;;  %v12073_v17 = vld [vmem:[%s16273_s3 + $0x890] ss:$40 sps:$4 sm:$0xff]  }
 0x3a3   :  { %6063 = vmatprep.subr.bf16.mxu1 %v12045_v15  ;;  %v10437_v14 = vcombine.low %v14889_v12, %v14894_v13  ;;  %v10438_v15 = vcombine.high %v14889_v12, %v14894_v13  ;;  %v12078_v19 = vld [vmem:[%s16273_s3 + $0x8e4] ss:$40 sps:$4 sm:$0xff]  }
 0x3a4   :  { %8133 = vmatprep.subr.bf16.mxu0 %v10382_v11  ;;  %v12079_v11 = vld [vmem:[%s16273_s3 + $0x930] ss:$40 sps:$4 sm:$0xff]   ;;  %v6348_v12 = vld [vmem:[%s16275_s5 + $0x4c8] sm:$0xff] }
 0x3a5   :  { %8134 = vmatpush1.bf16.msra.mxu0 %v10381_v36  ;;  %v12081_v36 = vld [vmem:[%s16273_s3 + $0x934] ss:$40 sps:$4 sm:$0xff]   ;;  %v6352_v13 = vld [vmem:[%s16275_s5 + $0x4e8] sm:$0xff] }
 0x3a6   :  { %6064 = vmatpush1.bf16.msra.mxu1 %v12043_v52  ;;  %8135 = vmatprep.subr.bf16.mxu0 %v10390_v32  ;;  %v12075_v52 = vld [vmem:[%s16273_s3 + $0x894] ss:$40 sps:$4 sm:$0xff]   ;;  %v12088_v32 = vld [vmem:[%s16273_s3 + $0xa20] ss:$40 sps:$4 sm:$0xff]  }
 0x3a7   :  { %6065 = vmatprep.subr.bf16.mxu1 %v12048_v42  ;;  %v12076_v42 = vld [vmem:[%s16273_s3 + $0x8e0] ss:$40 sps:$4 sm:$0xff]  }
 0x3a9   :  { %8136 = vmatpush1.bf16.msra.mxu0 %v10389_v30  ;;  %v12090_v30 = vld [vmem:[%s16273_s3 + $0xa24] ss:$40 sps:$4 sm:$0xff]  }
 0x3aa   :  { %6066 = vmatpush1.bf16.msra.mxu1 %v12046_v23  ;;  %8137 = vmatprep.subr.bf16.mxu0 %v10398_v39  ;;  %v12084_v23 = vld [vmem:[%s16273_s3 + $0x984] ss:$40 sps:$4 sm:$0xff]  }
 0x3ab   :  { %6067 = vmatprep.subr.bf16.mxu1 %v12051_v28  ;;  %v12085_v28 = vld [vmem:[%s16273_s3 + $0x9d0] ss:$40 sps:$4 sm:$0xff]   ;;  %v12102_v39 = vld [vmem:[%s16273_s3 + $0xb64] ss:$40 sps:$4 sm:$0xff]  }
 0x3ad   :  { %8138 = vmatpush1.bf16.msra.mxu0 %v10397_v37  ;;  %v12097_v37 = vld [vmem:[%s16273_s3 + $0xb10] ss:$40 sps:$4 sm:$0xff]  }
 0x3ae   :  { %6068 = vmatpush1.bf16.msra.mxu1 %v12049_v33  ;;  %8139 = vmatprep.subr.bf16.mxu0 %v10406_v46  ;;  %v12093_v33 = vld [vmem:[%s16273_s3 + $0xa74] ss:$40 sps:$4 sm:$0xff]  }
 0x3af   :  { %6069 = vmatprep.subr.bf16.mxu1 %v12054_v35  ;;  %v12094_v35 = vld [vmem:[%s16273_s3 + $0xac0] ss:$40 sps:$4 sm:$0xff]   ;;  %v12111_v46 = vld [vmem:[%s16273_s3 + $0xc54] ss:$40 sps:$4 sm:$0xff]  }
 0x3b1   :  { %8140 = vmatpush1.bf16.msra.mxu0 %v10405_v45  ;;  %v12106_v45 = vld [vmem:[%s16273_s3 + $0xc00] ss:$40 sps:$4 sm:$0xff]  }
 0x3b2   :  { %6070 = vmatpush1.bf16.msra.mxu1 %v12052_v41  ;;  %8141 = vmatprep.subr.bf16.mxu0 %v10414_v51  ;;  %v12100_v41 = vld [vmem:[%s16273_s3 + $0xb60] ss:$40 sps:$4 sm:$0xff]  }
 0x3b3   :  { %6071 = vmatprep.subr.bf16.mxu1 %v12057_v44  ;;  %v12108_v44 = vld [vmem:[%s16273_s3 + $0xc04] ss:$40 sps:$4 sm:$0xff]  }
 0x3b4   :  { %v6204_v51 = vld [vmem:[%s16275_s5 + $0x48] sm:$0xff] }
 0x3b5   :  { %8142 = vmatpush1.bf16.msra.mxu0 %v10413_v59  ;;  %v6208_v59 = vld [vmem:[%s16275_s5 + $0x68] sm:$0xff] }
 0x3b6   :  { %6072 = vmatpush1.bf16.msra.mxu1 %v12055_v47  ;;  %8143 = vmatprep.subr.bf16.mxu0 %v10422_v2  ;;  %v6196_v47 = vld [vmem:[%s16275_s5 + $0x8] sm:$0xff]  ;;  %v10319_v2 = vcombine.low %v6204_v51, %v6208_v59 }
 0x3b7   :  { %6073 = vmatprep.subr.bf16.mxu1 %v12060_v48  ;;  %v6200_v48 = vld [vmem:[%s16275_s5 + $0x28] sm:$0xff] }
 0x3b8   :  { %v10312_v49 = vcombine.high %v6196_v47, %v6200_v48 }
 0x3b9   :  { %8144 = vmatpush1.bf16.msra.mxu0 %v10421_v3  ;;  %v10328_v3 = vcombine.high %v6212_v40, %v6216_v0  ;;  %v15083_v40 = vld [vmem:[%s16276_s4] sm:$0x1f] }
 0x3ba   :  { %6074 = vmatpush1.bf16.msra.mxu1 %v12058_v60  ;;  %8145 = vmatprep.subr.bf16.mxu0 %v10430_v61  ;;  %v10311_v60 = vcombine.low %v6196_v47, %v6200_v48  ;;  %v6232_v61 = vld [vmem:[%s16275_s5 + $0x128] sm:$0xff] }
 0x3bb   :  { %6075 = vmatprep.subr.bf16.mxu1 %v12063_v63  ;;  %v10320_v63 = vcombine.high %v6204_v51, %v6208_v59 }
 0x3bd   :  { %8146 = vmatpush1.bf16.msra.mxu0 %v10429_v62 }
 0x3be   :  { %6076 = vmatpush1.bf16.msra.mxu1 %v12061_v4  ;;  %8156 = vmatprep.subr.bf16.mxu0 %v10438_v15  ;;  %v6220_v4 = vld [vmem:[%s16275_s5 + $0xc8] sm:$0xff] }
 0x3bf   :  { %6077 = vmatprep.subr.bf16.mxu1 %v12066_v5  ;;  %v6224_v5 = vld [vmem:[%s16275_s5 + $0xe8] sm:$0xff] }
 0x3c0   :  { %v10336_v9 = vcombine.high %v6220_v4, %v6224_v5  ;;  %v10335_v62 = vcombine.low %v6220_v4, %v6224_v5  ;;  %v6157_v4 = vrot.slane %v15083_v40, %v13802_v22  ;;  %v6153_v5 = vrot.slane %v15083_v40, %v13797_v10 }
 0x3c2   :  { %6078 = vmatpush1.bf16.msra.mxu1 %v12064_v24 }
 0x3c3   :  { %6079 = vmatprep.subr.bf16.mxu1 %v12069_v31  ;;  %v6236_v31 = vld [vmem:[%s16275_s5 + $0x148] sm:$0xff] }
 0x3c6   :  { %6080 = vmatpush1.bf16.msra.mxu1 %v12067_v25  ;;  %v6240_v25 = vld [vmem:[%s16275_s5 + $0x168] sm:$0xff] }
 0x3c7   :  { %6081 = vmatprep.subr.bf16.mxu1 %v12072_v16  ;;  %v10352_v16 = vcombine.high %v6236_v31, %v6240_v25 }
 0x3ca   :  { %6082 = vmatpush1.bf16.msra.mxu1 %v12070_v18  ;;  %v6244_v18 = vld [vmem:[%s16275_s5 + $0x188] sm:$0xff] }
 0x3cb   :  { %6083 = vmatprep.subr.bf16.mxu1 %v12075_v52  ;;  %v6248_v52 = vld [vmem:[%s16275_s5 + $0x1a8] sm:$0xff] }
 0x3ce   :  { %6084 = vmatpush1.bf16.msra.mxu1 %v12073_v17  ;;  %v10351_v17 = vcombine.low %v6236_v31, %v6240_v25 }
 0x3cf   :  { %6085 = vmatprep.subr.bf16.mxu1 %v12078_v19  ;;  %v10360_v19 = vcombine.high %v6244_v18, %v6248_v52 }
 0x3d2   :  { %6086 = vmatpush1.bf16.msra.mxu1 %v12076_v42  ;;  %v6252_v42 = vld [vmem:[%s16275_s5 + $0x1c8] sm:$0xff] }
 0x3d3   :  { %6087 = vmatprep.subr.bf16.mxu1 %v12081_v36  ;;  %v6256_v36 = vld [vmem:[%s16275_s5 + $0x1e8] sm:$0xff] }
 0x3d6   :  { %6088 = vmatpush1.bf16.msra.mxu1 %v12079_v11  ;;  %v10359_v11 = vcombine.low %v6244_v18, %v6248_v52 }
 0x3d7   :  { %6089 = vmatprep.subr.bf16.mxu1 %v12084_v23  ;;  %v10368_v23 = vcombine.high %v6252_v42, %v6256_v36 }
 0x3da   :  { %6090 = vmatpush1.bf16.msra.mxu1 %v12082_v26  ;;  %v6260_v26 = vld [vmem:[%s16275_s5 + $0x208] sm:$0xff] }
 0x3db   :  { %6091 = vmatprep.subr.bf16.mxu1 %v12087_v27  ;;  %v6264_v27 = vld [vmem:[%s16275_s5 + $0x228] sm:$0xff] }
 0x3de   :  { %6092 = vmatpush1.bf16.msra.mxu1 %v12085_v28  ;;  %v10367_v28 = vcombine.low %v6252_v42, %v6256_v36 }
 0x3df   :  { %6102 = vmatprep.subr.bf16.mxu1 %v12090_v30  ;;  %v10376_v30 = vcombine.high %v6260_v26, %v6264_v27 }
 0x3e1   :  { %6094 = vmatmul.mubr.bf16.vlgmr.msra.gmra.mrb[20].mxu1 %v14034_v29  ;;  %v12099_v29 = vld [vmem:[%s16273_s3 + $0xb14] ss:$40 sps:$4 sm:$0xff]  }
 0x3e2   :  { %6103 = vmatpush1.bf16.msra.mxu1 %v12088_v32  ;;  %6134 = vmatprep.mubr.bf16.mxu1 %v12236_v1  ;;  %v6268_v32 = vld [vmem:[%s16275_s5 + $0x248] sm:$0xff] }
 0x3e3   :  { %6104 = vmatprep.subr.bf16.mxu1 %v12093_v33  ;;  %v6272_v33 = vld [vmem:[%s16275_s5 + $0x268] sm:$0xff] }
 0x3e6   :  { %6105 = vmatpush1.bf16.msra.mxu1 %v12091_v6  ;;  %v10375_v6 = vcombine.low %v6260_v26, %v6264_v27 }
 0x3e7   :  { %6106 = vmatprep.subr.bf16.mxu1 %v12096_v34  ;;  %v10384_v34 = vcombine.high %v6268_v32, %v6272_v33 }
 0x3ea   :  { %6107 = vmatpush1.bf16.msra.mxu1 %v12094_v35  ;;  %v6276_v35 = vld [vmem:[%s16275_s5 + $0x288] sm:$0xff] }
 0x3eb   :  { %6108 = vmatprep.subr.bf16.mxu1 %v12099_v29  ;;  %v6280_v29 = vld [vmem:[%s16275_s5 + $0x2a8] sm:$0xff] }
 0x3ee   :  { %6109 = vmatpush1.bf16.msra.mxu1 %v12097_v37  ;;  %v10383_v37 = vcombine.low %v6268_v32, %v6272_v33  ;;  %v6335_v33 = vld [vmem:[%s16275_s5 + $0x460] sm:$0xff] }
 0x3ef   :  { %6110 = vmatprep.subr.bf16.mxu1 %v12102_v39  ;;  %v10392_v39 = vcombine.high %v6276_v35, %v6280_v29 }
 0x3f2   :  { %6111 = vmatpush1.bf16.msra.mxu1 %v12100_v41  ;;  %v6284_v41 = vld [vmem:[%s16275_s5 + $0x2c8] sm:$0xff] }
 0x3f3   :  { %6112 = vmatprep.subr.bf16.mxu1 %v12105_v8  ;;  %v6288_v8 = vld [vmem:[%s16275_s5 + $0x2e8] sm:$0xff] }
 0x3f4   :  { %v10399_v47 = vcombine.low %v6284_v41, %v6288_v8 }
 0x3f6   :  { %6113 = vmatpush1.bf16.msra.mxu1 %v12103_v43  ;;  %v10391_v43 = vcombine.low %v6276_v35, %v6280_v29 }
 0x3f7   :  { %6114 = vmatprep.subr.bf16.mxu1 %v12108_v44  ;;  %v10400_v44 = vcombine.high %v6284_v41, %v6288_v8  ;;  %v6339_v8 = vld [vmem:[%s16275_s5 + $0x480] sm:$0xff] }
 0x3fa   :  { %6115 = vmatpush1.bf16.msra.mxu1 %v12106_v45  ;;  %v6292_v45 = vld [vmem:[%s16275_s5 + $0x308] sm:$0xff] }
 0x3fb   :  { %6116 = vmatprep.subr.bf16.mxu1 %v12111_v46  ;;  %v6296_v46 = vld [vmem:[%s16275_s5 + $0x328] sm:$0xff] }
 0x3fc   :  { %v10408_v48 = vcombine.high %v6292_v45, %v6296_v46  ;;  %v10407_v51 = vcombine.low %v6292_v45, %v6296_v46  ;;  %v6344_v45 = vld [vmem:[%s16275_s5 + $0x4a8] sm:$0xff] }
 0x3fe   :  { %6117 = vmatpush1.bf16.msra.mxu1 %v12109_v38  ;;  %v6300_v38 = vld [vmem:[%s16275_s5 + $0x348] sm:$0xff] }
 0x3ff   :  { %8238 = vmatprep.subr.bf16.mxu1 %v10312_v49  ;;  %v6304_v49 = vld [vmem:[%s16275_s5 + $0x368] sm:$0xff] }
 0x400   :  { %v10416_v59 = vcombine.high %v6300_v38, %v6304_v49  ;;  %v10415_v0 = vcombine.low %v6300_v38, %v6304_v49  ;;  %v6347_v49 = vld [vmem:[%s16275_s5 + $0x4c0] sm:$0xff] }
 0x401   :  { %6135 = vmatmul.mubr.bf16.vlgmr.msra.gmra.mrb[20].mxu1 %v14139_v50  ;;  %v6228_v50 = vld [vmem:[%s16275_s5 + $0x108] sm:$0xff] }
 0x402   :  { %8239 = vmatpush1.bf16.msra.mxu1 %v10311_v60  ;;  %v10344_v24 = vcombine.high %v6228_v50, %v6232_v61  ;;  %v10343_v15 = vcombine.low %v6228_v50, %v6232_v61  ;;  %v6308_v60 = vld [vmem:[%s16275_s5 + $0x388] sm:$0xff] }
 0x403   :  { %8240 = vmatprep.subr.bf16.mxu1 %v10320_v63  ;;  %v6312_v63 = vld [vmem:[%s16275_s5 + $0x3a8] sm:$0xff] }
 0x406   :  { %8241 = vmatpush1.bf16.msra.mxu1 %v10319_v2  ;;  %v10424_v2 = vcombine.high %v6308_v60, %v6312_v63 }
 0x407   :  { %8242 = vmatprep.subr.bf16.mxu1 %v10328_v3 }
 0x40a   :  { %8243 = vmatpush1.bf16.msra.mxu1 %v10327_v7  ;;  %v6316_v7 = vld [vmem:[%s16275_s5 + $0x3c8] sm:$0xff] }
 0x40b   :  { %8244 = vmatprep.subr.bf16.mxu1 %v10336_v9  ;;  %v6320_v9 = vld [vmem:[%s16275_s5 + $0x3e8] sm:$0xff] }
 0x40c   :  { %v10431_v26 = vcombine.low %v6316_v7, %v6320_v9 }
 0x40e   :  { %8245 = vmatpush1.bf16.msra.mxu1 %v10335_v62 }
 0x40f   :  { %8246 = vmatprep.subr.bf16.mxu1 %v10344_v24 }
 0x412   :  { %8247 = vmatpush1.bf16.msra.mxu1 %v10343_v15  ;;  %v10423_v15 = vcombine.low %v6308_v60, %v6312_v63  ;;  %v10464_v63 = vcombine.high %v6348_v12, %v6352_v13 }
 0x413   :  { %8248 = vmatprep.subr.bf16.mxu1 %v10352_v16 }
 0x416   :  { %8249 = vmatpush1.bf16.msra.mxu1 %v10351_v17  ;;  %v10432_v17 = vcombine.high %v6316_v7, %v6320_v9  ;;  %v10463_v9 = vcombine.low %v6348_v12, %v6352_v13  ;;  %v6400_v12 = vld [vmem:[%s16275_s5 + $0x668] sm:$0xff] }
 0x417   :  { %8250 = vmatprep.subr.bf16.mxu1 %v10360_v19 }
 0x41a   :  { %8251 = vmatpush1.bf16.msra.mxu1 %v10359_v11 }
 0x41b   :  { %8252 = vmatprep.subr.bf16.mxu1 %v10368_v23 }
 0x41e   :  { %8253 = vmatpush1.bf16.msra.mxu1 %v10367_v28  ;;  %v6331_v28 = vld [vmem:[%s16275_s5 + $0x440] sm:$0xff] }
 0x41f   :  { %8254 = vmatprep.subr.bf16.mxu1 %v10376_v30  ;;  %v10445_v46 = vcombine.low %v6331_v28, %v6335_v33 }
 0x422   :  { %8255 = vmatpush1.bf16.msra.mxu1 %v10375_v6  ;;  %v6332_v6 = vld [vmem:[%s16275_s5 + $0x448] sm:$0xff] }
 0x423   :  { %8256 = vmatprep.subr.bf16.mxu1 %v10384_v34  ;;  %v6336_v34 = vld [vmem:[%s16275_s5 + $0x468] sm:$0xff] }
 0x424   :  { %v10448_v41 = vcombine.high %v6332_v6, %v6336_v34 }
 0x426   :  { %8257 = vmatpush1.bf16.msra.mxu1 %v10383_v37 }
 0x427   :  { %8258 = vmatprep.subr.bf16.mxu1 %v10392_v39  ;;  %v10446_v39 = vcombine.high %v6331_v28, %v6335_v33  ;;  %v6379_v28 = vld [vmem:[%s16275_s5 + $0x5c0] sm:$0xff]  ;;  %v6384_v33 = vld [vmem:[%s16275_s5 + $0x5e8] sm:$0xff] }
 0x42a   :  { %8259 = vmatpush1.bf16.msra.mxu1 %v10391_v43  ;;  %v6343_v43 = vld [vmem:[%s16275_s5 + $0x4a0] sm:$0xff] }
 0x42b   :  { %8260 = vmatprep.subr.bf16.mxu1 %v10400_v44  ;;  %v6340_v44 = vld [vmem:[%s16275_s5 + $0x488] sm:$0xff] }
 0x42c   :  { %v10456_v38 = vcombine.high %v6340_v44, %v6344_v45 }
 0x42e   :  { %8261 = vmatpush1.bf16.msra.mxu1 %v10399_v47  ;;  %v10447_v47 = vcombine.low %v6332_v6, %v6336_v34 }
 0x42f   :  { %8262 = vmatprep.subr.bf16.mxu1 %v10408_v48  ;;  %v10454_v48 = vcombine.high %v6339_v8, %v6343_v43 }
 0x432   :  { %8263 = vmatpush1.bf16.msra.mxu1 %v10407_v51  ;;  %v6351_v51 = vld [vmem:[%s16275_s5 + $0x4e0] sm:$0xff] }
 0x433   :  { %8264 = vmatprep.subr.bf16.mxu1 %v10416_v59  ;;  %v10455_v59 = vcombine.low %v6340_v44, %v6344_v45  ;;  %v10462_v60 = vcombine.high %v6347_v49, %v6351_v51  ;;  %v10461_v7 = vcombine.low %v6347_v49, %v6351_v51  ;;  %v6392_v44 = vld [vmem:[%s16275_s5 + $0x628] sm:$0xff]  ;;  %v6399_v49 = vld [vmem:[%s16275_s5 + $0x660] sm:$0xff] }
 0x434   :  { %v15085_v3 = vpop.f32.mrb[16].mxu1  ;;  %v6396_v51 = vld [vmem:[%s16275_s5 + $0x648] sm:$0xff] }
 0x435   :  { %v6013_v50 = vpop.f32.mrb[16].mxu0  ;;  %v5892_v61 = vpop.f32.mrb[17].mxu1 }
 0x436   :  { %v6144_v62 = vmax.f32 %v14754_v57, %v6013_v50  ;;  %v6143_v24 = vmax.f32 %v14750_v54, %v5892_v61  ;;  %v15099_v31 = vpop.f32.mrb[17].mxu0  ;;  %v5894_v25 = vpop.f32.mrb[18].mxu1  ;;  %8265 = vmatpush1.bf16.msra.mxu1 %v10415_v0  ;;  %v6324_v57 = vld [vmem:[%s16275_s5 + $0x408] sm:$0xff]  ;;  %v6355_v0 = vld [vmem:[%s16275_s5 + $0x500] sm:$0xff] }
 0x437   :  { %v6145_v16 = vmax.f32 %v14752_v56, %v15099_v31  ;;  %v6017_v18 = vpop.f32.mrb[18].mxu0  ;;  %v5895_v52 = vpop.f32.mrb[19].mxu1  ;;  %8266 = vmatprep.subr.bf16.mxu1 %v10424_v2  ;;  %v6328_v54 = vld [vmem:[%s16275_s5 + $0x428] sm:$0xff]  ;;  %v6359_v2 = vld [vmem:[%s16275_s5 + $0x520] sm:$0xff] }
 0x438   :  { %v6176_v19 = vadd.f32 %v6157_v4, %v6144_v62  ;;  %v6175_v42 = vadd.f32 %v6153_v5, %v6143_v24  ;;  %v6018_v36 = vpop.f32.mrb[19].mxu0  ;;  %v10440_v27 = vcombine.high %v6324_v57, %v6328_v54  ;;  %v10439_v37 = vcombine.low %v6324_v57, %v6328_v54  ;;  %v6356_v4 = vld [vmem:[%s16275_s5 + $0x508] sm:$0xff]  ;;  %v6363_v62 = vld [vmem:[%s16275_s5 + $0x540] sm:$0xff] }
 0x439   :  { %v6360_v5 = vld [vmem:[%s16275_s5 + $0x528] sm:$0xff]  ;;  %v10470_v50 = vcombine.high %v6355_v0, %v6359_v2  ;;  %v6367_v24 = vld [vmem:[%s16275_s5 + $0x560] sm:$0xff]  ;;  %v10469_v18 = vcombine.low %v6355_v0, %v6359_v2  ;;  %v10512_v2 = vcombine.high %v6396_v51, %v6400_v12 }
 0x43a   :  { %v6181_v11 = vmul.f32 0.01, %v6176_v19  ;;  %v6180_v23 = vmul.f32 0.01, %v6175_v42  ;;  %8267 = vmatpush1.bf16.msra.mxu1 %v10423_v15  ;;  %v10472_v61 = vcombine.high %v6356_v4, %v6360_v5  ;;  %v6364_v25 = vld [vmem:[%s16275_s5 + $0x548] sm:$0xff]  ;;  %v10471_v52 = vcombine.low %v6356_v4, %v6360_v5  ;;  %v6375_v36 = vld [vmem:[%s16275_s5 + $0x5a0] sm:$0xff] }
 0x43b   :  { %8268 = vmatprep.subr.bf16.mxu1 %v10432_v17  ;;  %v6368_v15 = vld [vmem:[%s16275_s5 + $0x568] sm:$0xff]  ;;  %v10478_v17 = vcombine.high %v6363_v62, %v6367_v24  ;;  %v6403_v4 = vld [vmem:[%s16275_s5 + $0x680] sm:$0xff] }
 0x43c   :  { %v6186_v30 = vmax.f32 %v6176_v19, %v6181_v11  ;;  %v6185_v32 = vmax.f32 %v6175_v42, %v6180_v23  ;;  %v10480_v19 = vcombine.high %v6364_v25, %v6368_v15  ;;  %v6371_v42 = vld [vmem:[%s16275_s5 + $0x580] sm:$0xff]  ;;  %v6372_v57 = vld [vmem:[%s16275_s5 + $0x588] sm:$0xff]  ;;  %v10477_v11 = vcombine.low %v6363_v62, %v6367_v24 }
 0x43d   :  { %v6376_v54 = vld [vmem:[%s16275_s5 + $0x5a8] sm:$0xff]  ;;  %v10479_v23 = vcombine.low %v6364_v25, %v6368_v15  ;;  %v10485_v6 = vcombine.low %v6371_v42, %v6375_v36  ;;  %v10511_v25 = vcombine.low %v6396_v51, %v6400_v12  ;;  %v6459_v56 = vld [vmem:[%s16275_s5 + $0x840] sm:$0xff] }
 0x43e   :  { %v15121_v35 = vpack.c.bf16 %v6186_v30, %v6186_v30  ;;  %v15123_v29 = vpack.c.bf16 %v6185_v32, %v6185_v32  ;;  %8269 = vmatpush1.bf16.msra.mxu1 %v10431_v26  ;;  %v10486_v26 = vcombine.high %v6371_v42, %v6375_v36  ;;  %v6383_v30 = vld [vmem:[%s16275_s5 + $0x5e0] sm:$0xff]  ;;  %v6380_v32 = vld [vmem:[%s16275_s5 + $0x5c8] sm:$0xff]  ;;  %v10487_v34 = vcombine.low %v6372_v57, %v6376_v54 }
 0x43f   :  { %8279 = vmatprep.subr.bf16.mxu1 %v10440_v27  ;;  %v10488_v27 = vcombine.high %v6372_v57, %v6376_v54  ;;  %v10493_v45 = vcombine.low %v6379_v28, %v6383_v30  ;;  %v6416_v42 = vld [vmem:[%s16275_s5 + $0x6e8] sm:$0xff] }
 0x440   :  { %8147 = vmatprep.mubr.bf16.mxu0 %v15121_v35  ;;  %8270 = vmatprep.mubr.bf16.mxu1 %v15121_v35 }
 0x441   :  { %8148 = vmatmul.mubr.bf16.vlgmr.msra.gmra.mrb[20].mxu0 %v15123_v29  ;;  %8271 = vmatmul.mubr.bf16.vlgmr.msra.gmra.mrb[24].mxu1 %v15123_v29 }
 0x442   :  { %8157 = vmatpush1.bf16.msra.mxu0 %v10437_v14  ;;  %8280 = vmatpush1.bf16.msra.mxu1 %v10439_v37  ;;  %v10453_v14 = vcombine.low %v6339_v8, %v6343_v43  ;;  %v10494_v37 = vcombine.high %v6379_v28, %v6383_v30  ;;  %v6391_v8 = vld [vmem:[%s16275_s5 + $0x620] sm:$0xff]  ;;  %v6388_v43 = vld [vmem:[%s16275_s5 + $0x608] sm:$0xff] }
 0x443   :  { %8158 = vmatprep.subr.bf16.mxu0 %v10446_v39  ;;  %8281 = vmatprep.subr.bf16.mxu1 %v10448_v41  ;;  %v10496_v39 = vcombine.high %v6380_v32, %v6384_v33  ;;  %v6387_v41 = vld [vmem:[%s16275_s5 + $0x600] sm:$0xff]  ;;  %v6424_v28 = vld [vmem:[%s16275_s5 + $0x728] sm:$0xff] }
 0x444   :  { %v10501_v13 = vcombine.low %v6387_v41, %v6391_v8 }
 0x446   :  { %8159 = vmatpush1.bf16.msra.mxu0 %v10445_v46  ;;  %8282 = vmatpush1.bf16.msra.mxu1 %v10447_v47  ;;  %v10495_v46 = vcombine.low %v6380_v32, %v6384_v33  ;;  %v10502_v47 = vcombine.high %v6387_v41, %v6391_v8  ;;  %v6432_v41 = vld [vmem:[%s16275_s5 + $0x768] sm:$0xff] }
 0x447   :  { %8160 = vmatprep.subr.bf16.mxu0 %v10454_v48  ;;  %8283 = vmatprep.subr.bf16.mxu1 %v10456_v38  ;;  %v10504_v48 = vcombine.high %v6388_v43, %v6392_v44  ;;  %v6395_v38 = vld [vmem:[%s16275_s5 + $0x640] sm:$0xff] }
 0x448   :  { %v10510_v0 = vcombine.high %v6395_v38, %v6399_v49  ;;  %v10509_v24 = vcombine.low %v6395_v38, %v6399_v49  ;;  %v6440_v38 = vld [vmem:[%s16275_s5 + $0x7a8] sm:$0xff] }
 0x44a   :  { %8161 = vmatpush1.bf16.msra.mxu0 %v10453_v14  ;;  %8284 = vmatpush1.bf16.msra.mxu1 %v10455_v59  ;;  %v10503_v14 = vcombine.low %v6388_v43, %v6392_v44  ;;  %v15231_v59 = vld [vmem:[%s16275_s5 + $0x800] sm:$0xff] }
 0x44b   :  { %8162 = vmatprep.subr.bf16.mxu0 %v10462_v60  ;;  %8285 = vmatprep.subr.bf16.mxu1 %v10464_v63  ;;  %v15236_v60 = vld [vmem:[%s16275_s5 + $0x820] sm:$0xff]  ;;  %v15241_v63 = vld [vmem:[%s16275_s5 + $0x808] sm:$0xff] }
 0x44c   :  { %v10565_v5 = vcombine.low %v15231_v59, %v15236_v60 }
 0x44e   :  { %8163 = vmatpush1.bf16.msra.mxu0 %v10461_v7  ;;  %8286 = vmatpush1.bf16.msra.mxu1 %v10463_v9  ;;  %v15251_v7 = vld [vmem:[%s16275_s5 + $0x828] sm:$0xff]  ;;  %v6407_v9 = vld [vmem:[%s16275_s5 + $0x6a0] sm:$0xff] }
 0x44f   :  { %8164 = vmatprep.subr.bf16.mxu0 %v10470_v50  ;;  %8287 = vmatprep.subr.bf16.mxu1 %v10472_v61  ;;  %v6404_v50 = vld [vmem:[%s16275_s5 + $0x688] sm:$0xff]  ;;  %v10567_v62 = vcombine.low %v15241_v63, %v15251_v7  ;;  %v10518_v15 = vcombine.high %v6403_v4, %v6407_v9  ;;  %v10517_v36 = vcombine.low %v6403_v4, %v6407_v9 }
 0x450   :  { %v6408_v61 = vld [vmem:[%s16275_s5 + $0x6a8] sm:$0xff] }
 0x451   :  { %v10519_v57 = vcombine.low %v6404_v50, %v6408_v61  ;;  %v6448_v4 = vld [vmem:[%s16275_s5 + $0x7e8] sm:$0xff] }
 0x452   :  { %8165 = vmatpush1.bf16.msra.mxu0 %v10469_v18  ;;  %8288 = vmatpush1.bf16.msra.mxu1 %v10471_v52  ;;  %v10520_v18 = vcombine.high %v6404_v50, %v6408_v61  ;;  %v6411_v52 = vld [vmem:[%s16275_s5 + $0x6c0] sm:$0xff] }
 0x453   :  { %8166 = vmatprep.subr.bf16.mxu0 %v10478_v17  ;;  %8289 = vmatprep.subr.bf16.mxu1 %v10480_v19  ;;  %v6415_v17 = vld [vmem:[%s16275_s5 + $0x6e0] sm:$0xff]  ;;  %v6412_v19 = vld [vmem:[%s16275_s5 + $0x6c8] sm:$0xff] }
 0x454   :  { %v10526_v54 = vcombine.high %v6411_v52, %v6415_v17  ;;  %v10525_v30 = vcombine.low %v6411_v52, %v6415_v17  ;;  %v10527_v32 = vcombine.low %v6412_v19, %v6416_v42  ;;  %v10568_v52 = vcombine.high %v15241_v63, %v15251_v7 }
 0x455   :  { %v6161_v17 = vrot.slane %v15083_v40, %v14012_v53 }
 0x456   :  { %8167 = vmatpush1.bf16.msra.mxu0 %v10477_v11  ;;  %8290 = vmatpush1.bf16.msra.mxu1 %v10479_v23  ;;  %v10528_v11 = vcombine.high %v6412_v19, %v6416_v42  ;;  %v6419_v23 = vld [vmem:[%s16275_s5 + $0x700] sm:$0xff]  ;;  %v6165_v42 = vrot.slane %v15083_v40, %v14017_v55 }
 0x457   :  { %8168 = vmatprep.subr.bf16.mxu0 %v10486_v26  ;;  %8291 = vmatprep.subr.bf16.mxu1 %v10488_v27  ;;  %v6423_v26 = vld [vmem:[%s16275_s5 + $0x720] sm:$0xff]  ;;  %v6420_v27 = vld [vmem:[%s16275_s5 + $0x708] sm:$0xff]  ;;  %v6177_v19 = vadd.f32 %v6161_v17, %v6145_v16 }
 0x458   :  { %v10534_v33 = vcombine.high %v6419_v23, %v6423_v26  ;;  %v10533_v8 = vcombine.low %v6419_v23, %v6423_v26  ;;  %v10535_v43 = vcombine.low %v6420_v27, %v6424_v28  ;;  %v6460_v16 = vld [vmem:[%s16275_s5 + $0x848] sm:$0xff] }
 0x45a   :  { %8169 = vmatpush1.bf16.msra.mxu0 %v10485_v6  ;;  %8292 = vmatpush1.bf16.msra.mxu1 %v10487_v34  ;;  %v10536_v6 = vcombine.high %v6420_v27, %v6424_v28  ;;  %v6427_v34 = vld [vmem:[%s16275_s5 + $0x740] sm:$0xff] }
 0x45b   :  { %8170 = vmatprep.subr.bf16.mxu0 %v10494_v37  ;;  %8293 = vmatprep.subr.bf16.mxu1 %v10496_v39  ;;  %v6431_v37 = vld [vmem:[%s16275_s5 + $0x760] sm:$0xff]  ;;  %v6428_v39 = vld [vmem:[%s16275_s5 + $0x748] sm:$0xff] }
 0x45c   :  { %v10542_v44 = vcombine.high %v6427_v34, %v6431_v37  ;;  %v10541_v49 = vcombine.low %v6427_v34, %v6431_v37  ;;  %v10543_v51 = vcombine.low %v6428_v39, %v6432_v41 }
 0x45e   :  { %8171 = vmatpush1.bf16.msra.mxu0 %v10493_v45  ;;  %8294 = vmatpush1.bf16.msra.mxu1 %v10495_v46  ;;  %v10544_v45 = vcombine.high %v6428_v39, %v6432_v41  ;;  %v6435_v46 = vld [vmem:[%s16275_s5 + $0x780] sm:$0xff] }
 0x45f   :  { %8172 = vmatprep.subr.bf16.mxu0 %v10502_v47  ;;  %8295 = vmatprep.subr.bf16.mxu1 %v10504_v48  ;;  %v6439_v47 = vld [vmem:[%s16275_s5 + $0x7a0] sm:$0xff]  ;;  %v6436_v48 = vld [vmem:[%s16275_s5 + $0x788] sm:$0xff] }
 0x460   :  { %v10550_v12 = vcombine.high %v6435_v46, %v6439_v47  ;;  %v10549_v9 = vcombine.low %v6435_v46, %v6439_v47  ;;  %v10551_v50 = vcombine.low %v6436_v48, %v6440_v38  ;;  %v6467_v41 = vld [vmem:[%s16275_s5 + $0x880] sm:$0xff] }
 0x462   :  { %8173 = vmatpush1.bf16.msra.mxu0 %v10501_v13  ;;  %8296 = vmatpush1.bf16.msra.mxu1 %v10503_v14  ;;  %v10552_v13 = vcombine.high %v6436_v48, %v6440_v38  ;;  %v6443_v14 = vld [vmem:[%s16275_s5 + $0x7c0] sm:$0xff] }
 0x463   :  { %8174 = vmatprep.subr.bf16.mxu0 %v10510_v0  ;;  %8297 = vmatprep.subr.bf16.mxu1 %v10512_v2  ;;  %v6447_v0 = vld [vmem:[%s16275_s5 + $0x7e0] sm:$0xff]  ;;  %v6444_v2 = vld [vmem:[%s16275_s5 + $0x7c8] sm:$0xff] }
 0x464   :  { %v10558_v61 = vcombine.high %v6443_v14, %v6447_v0  ;;  %v6475_v38 = vld [vmem:[%s16275_s5 + $0x8c0] sm:$0xff] }
 0x466   :  { %8175 = vmatpush1.bf16.msra.mxu0 %v10509_v24  ;;  %8298 = vmatpush1.bf16.msra.mxu1 %v10511_v25  ;;  %v10560_v24 = vcombine.high %v6444_v2, %v6448_v4  ;;  %v10557_v25 = vcombine.low %v6443_v14, %v6447_v0  ;;  %v6488_v14 = vld [vmem:[%s16275_s5 + $0x928] sm:$0xff] }
 0x467   :  { %8176 = vmatprep.subr.bf16.mxu0 %v10518_v15  ;;  %8299 = vmatprep.subr.bf16.mxu1 %v10520_v18  ;;  %v10559_v15 = vcombine.low %v6444_v2, %v6448_v4  ;;  %v10566_v18 = vcombine.high %v15231_v59, %v15236_v60  ;;  %v6476_v59 = vld [vmem:[%s16275_s5 + $0x8c8] sm:$0xff] }
 0x468   :  { %v6480_v60 = vld [vmem:[%s16275_s5 + $0x8e8] sm:$0xff] }
 0x469   :  { %v10591_v2 = vcombine.low %v6476_v59, %v6480_v60 }
 0x46a   :  { %8177 = vmatpush1.bf16.msra.mxu0 %v10517_v36  ;;  %8300 = vmatpush1.bf16.msra.mxu1 %v10519_v57 }
 0x46b   :  { %8178 = vmatprep.subr.bf16.mxu0 %v10526_v54  ;;  %8301 = vmatprep.subr.bf16.mxu1 %v10528_v11  ;;  %v6182_v11 = vmul.f32 0.01, %v6177_v19 }
 0x46e   :  { %8179 = vmatpush1.bf16.msra.mxu0 %v10525_v30  ;;  %8302 = vmatpush1.bf16.msra.mxu1 %v10527_v32  ;;  %v6187_v32 = vmax.f32 %v6177_v19, %v6182_v11 }
 0x46f   :  { %8180 = vmatprep.subr.bf16.mxu0 %v10534_v33  ;;  %8303 = vmatprep.subr.bf16.mxu1 %v10536_v6  ;;  %v6464_v33 = vld [vmem:[%s16275_s5 + $0x868] sm:$0xff] }
 0x470   :  { %v15354_v34 = vpack.c.bf16 %v6187_v32, %v6187_v32  ;;  %v10576_v39 = vcombine.high %v6460_v16, %v6464_v33  ;;  %v10575_v46 = vcombine.low %v6460_v16, %v6464_v33  ;;  %v6508_v32 = vld [vmem:[%s16275_s5 + $0x9c8] sm:$0xff]  ;;  %v6197_v16 = vld [vmem:[%s16275_s5 + $0x10] sm:$0xff] }
 0x471   :  { %v6201_v33 = vld [vmem:[%s16275_s5 + $0x30] sm:$0xff] }
 0x472   :  { %8181 = vmatpush1.bf16.msra.mxu0 %v10533_v8  ;;  %8304 = vmatpush1.bf16.msra.mxu1 %v10535_v43  ;;  %v6471_v8 = vld [vmem:[%s16275_s5 + $0x8a0] sm:$0xff]  ;;  %v6468_v43 = vld [vmem:[%s16275_s5 + $0x888] sm:$0xff] }
 0x473   :  { %8182 = vmatprep.subr.bf16.mxu0 %v10542_v44  ;;  %8305 = vmatprep.subr.bf16.mxu1 %v10544_v45  ;;  %v6472_v44 = vld [vmem:[%s16275_s5 + $0x8a8] sm:$0xff]  ;;  %v10582_v47 = vcombine.high %v6467_v41, %v6471_v8  ;;  %v10581_v63 = vcombine.low %v6467_v41, %v6471_v8 }
 0x474   :  { %v10584_v48 = vcombine.high %v6468_v43, %v6472_v44 }
 0x476   :  { %8183 = vmatpush1.bf16.msra.mxu0 %v10541_v49  ;;  %8306 = vmatpush1.bf16.msra.mxu1 %v10543_v51  ;;  %v6479_v49 = vld [vmem:[%s16275_s5 + $0x8e0] sm:$0xff] }
 0x477   :  { %8184 = vmatprep.subr.bf16.mxu0 %v10550_v12  ;;  %8307 = vmatprep.subr.bf16.mxu1 %v10552_v13  ;;  %v10590_v7 = vcombine.high %v6475_v38, %v6479_v49  ;;  %v6483_v51 = vld [vmem:[%s16275_s5 + $0x900] sm:$0xff]  ;;  %v6484_v13 = vld [vmem:[%s16275_s5 + $0x908] sm:$0xff]  ;;  %v10589_v0 = vcombine.low %v6475_v38, %v6479_v49  ;;  %v6210_v38 = vld [vmem:[%s16275_s5 + $0x78] sm:$0xff]  ;;  %v10313_v49 = vcombine.low %v6197_v16, %v6201_v33 }
 0x478   :  { %v6487_v12 = vld [vmem:[%s16275_s5 + $0x920] sm:$0xff] }
 0x479   :  { %v10598_v4 = vcombine.high %v6483_v51, %v6487_v12 }
 0x47a   :  { %8185 = vmatpush1.bf16.msra.mxu0 %v10549_v9  ;;  %8308 = vmatpush1.bf16.msra.mxu1 %v10551_v50  ;;  %v10600_v9 = vcombine.high %v6484_v13, %v6488_v14  ;;  %v6491_v50 = vld [vmem:[%s16275_s5 + $0x940] sm:$0xff] }
 0x47b   :  { %8186 = vmatprep.subr.bf16.mxu0 %v10558_v61  ;;  %8309 = vmatprep.subr.bf16.mxu1 %v10560_v24  ;;  %v6495_v61 = vld [vmem:[%s16275_s5 + $0x960] sm:$0xff]  ;;  %v6492_v24 = vld [vmem:[%s16275_s5 + $0x948] sm:$0xff] }
 0x47c   :  { %v10606_v17 = vcombine.high %v6491_v50, %v6495_v61 }
 0x47e   :  { %8187 = vmatpush1.bf16.msra.mxu0 %v10557_v25  ;;  %8310 = vmatpush1.bf16.msra.mxu1 %v10559_v15  ;;  %v6496_v25 = vld [vmem:[%s16275_s5 + $0x968] sm:$0xff]  ;;  %v10597_v15 = vcombine.low %v6483_v51, %v6487_v12  ;;  %v6214_v51 = vld [vmem:[%s16275_s5 + $0x98] sm:$0xff] }
 0x47f   :  { %8197 = vmatprep.subr.bf16.mxu0 %v10566_v18  ;;  %8320 = vmatprep.subr.bf16.mxu1 %v10568_v52  ;;  %v10599_v18 = vcombine.low %v6484_v13, %v6488_v14  ;;  %v6169_v52 = vrot.slane %v15083_v40, %v3101_v20  ;;  %v10608_v19 = vcombine.high %v6492_v24, %v6496_v25  ;;  %v6218_v12 = vld [vmem:[%s16275_s5 + $0xb8] sm:$0xff] }
 0x480   :  { %v10605_v20 = vcombine.low %v6491_v50, %v6495_v61  ;;  %v10607_v40 = vcombine.low %v6492_v24, %v6496_v25  ;;  %v6222_v50 = vld [vmem:[%s16275_s5 + $0xd8] sm:$0xff]  ;;  %v10331_v24 = vcombine.low %v6214_v51, %v6218_v12 }
 0x4d4   :  { %v6136_v36 = vpop.f32.mrb[20].mxu1 }
 0x4d5   :  { %v6146_v57 = vmax.f32 %v14756_v58, %v6136_v36  ;;  %v15336_v54 = vpop.f32.mrb[21].mxu1  ;;  %v6463_v58 = vld [vmem:[%s16275_s5 + $0x860] sm:$0xff] }
 0x4d6   :  { %v6147_v23 = vmax.f32 %v15085_v3, %v15336_v54  ;;  %v6140_v26 = vpop.f32.mrb[22].mxu1  ;;  %v10574_v37 = vcombine.high %v6459_v56, %v6463_v58  ;;  %v10573_v45 = vcombine.low %v6459_v56, %v6463_v58  ;;  %v6503_v36 = vld [vmem:[%s16275_s5 + $0x9a0] sm:$0xff]  ;;  %v6512_v3 = vld [vmem:[%s16275_s5 + $0x9e8] sm:$0xff] }
 0x4d7   :  { %v6178_v27 = vadd.f32 %v6165_v42, %v6146_v57  ;;  %v6141_v28 = vpop.f32.mrb[23].mxu1  ;;  %v6499_v42 = vld [vmem:[%s16275_s5 + $0x980] sm:$0xff]  ;;  %v6500_v57 = vld [vmem:[%s16275_s5 + $0x988] sm:$0xff]  ;;  %v10624_v58 = vcombine.high %v6508_v32, %v6512_v3  ;;  %v10623_v8 = vcombine.low %v6508_v32, %v6512_v3  ;;  %v6245_v3 = vld [vmem:[%s16275_s5 + $0x190] sm:$0xff] }
 0x4d8   :  { %v6179_v11 = vadd.f32 %v6169_v52, %v6147_v23  ;;  %v10614_v26 = vcombine.high %v6499_v42, %v6503_v36  ;;  %v6507_v28 = vld [vmem:[%s16275_s5 + $0x9c0] sm:$0xff]  ;;  %v10613_v54 = vcombine.low %v6499_v42, %v6503_v36  ;;  %v10615_v23 = vcombine.low %v6500_v57, %v6504_v21  ;;  %v6233_v52 = vld [vmem:[%s16275_s5 + $0x130] sm:$0xff] }
 0x4d9   :  { %v6183_v30 = vmul.f32 0.01, %v6178_v27 }
 0x4da   :  { %v6184_v56 = vmul.f32 0.01, %v6179_v11 }
 0x4db   :  { %v6188_v31 = vmax.f32 %v6178_v27, %v6183_v30  ;;  %v10616_v27 = vcombine.high %v6500_v57, %v6504_v21  ;;  %v6511_v30 = vld [vmem:[%s16275_s5 + $0x9e0] sm:$0xff] }
 0x4dc   :  { %v10621_v41 = vcombine.low %v6507_v28, %v6511_v30 }
 0x4dd   :  { %v15352_v6 = vpack.c.bf16 %v6188_v31, %v6188_v31  ;;  %v10622_v31 = vcombine.high %v6507_v28, %v6511_v30 }
 0x4df   :  { %8188 = vmatprep.mubr.bf16.mxu0 %v15352_v6  ;;  %8311 = vmatprep.mubr.bf16.mxu1 %v15352_v6 }
 0x4e0   :  { %8189 = vmatmul.mubr.bf16.vlgmr.msra.gmra.mrb[20].mxu0 %v15354_v34  ;;  %8312 = vmatmul.mubr.bf16.vlgmr.msra.gmra.mrb[24].mxu1 %v15354_v34 }
 0x4e1   :  { %8198 = vmatpush1.bf16.msra.mxu0 %v10565_v5  ;;  %8321 = vmatpush1.bf16.msra.mxu1 %v10567_v62  ;;  %v10583_v5 = vcombine.low %v6468_v43, %v6472_v44  ;;  %v10592_v62 = vcombine.high %v6476_v59, %v6480_v60  ;;  %v6189_v43 = vmax.f32 %v6179_v11, %v6184_v56  ;;  %v6238_v11 = vld [vmem:[%s16275_s5 + $0x158] sm:$0xff] }
 0x4e2   :  { %8199 = vmatprep.subr.bf16.mxu0 %v10574_v37  ;;  %8322 = vmatprep.subr.bf16.mxu1 %v10576_v39  ;;  %v6198_v37 = vld [vmem:[%s16275_s5 + $0x18] sm:$0xff]  ;;  %v10314_v44 = vcombine.high %v6197_v16, %v6201_v33 }
 0x4e3   :  { %8229 = vmatprep.mubr.bf16.mxu0 %v12236_v1  ;;  %8352 = vmatprep.mubr.bf16.mxu1 %v12236_v1  ;;  %v6202_v39 = vld [vmem:[%s16275_s5 + $0x38] sm:$0xff]  ;;  %v15470_v59 = vpack.c.bf16 %v6189_v43, %v6189_v43 }
 0x4e4   :  { %v10315_v60 = vcombine.low %v6198_v37, %v6202_v39  ;;  %v6250_v56 = vld [vmem:[%s16275_s5 + $0x1b8] sm:$0xff] }
 0x4e5   :  { %8200 = vmatpush1.bf16.msra.mxu0 %v10573_v45  ;;  %8323 = vmatpush1.bf16.msra.mxu1 %v10575_v46  ;;  %v10316_v45 = vcombine.high %v6198_v37, %v6202_v39  ;;  %v6205_v46 = vld [vmem:[%s16275_s5 + $0x50] sm:$0xff] }
 0x4e6   :  { %8201 = vmatprep.subr.bf16.mxu0 %v10582_v47  ;;  %8324 = vmatprep.subr.bf16.mxu1 %v10584_v48  ;;  %v6209_v47 = vld [vmem:[%s16275_s5 + $0x70] sm:$0xff]  ;;  %v6206_v48 = vld [vmem:[%s16275_s5 + $0x58] sm:$0xff] }
 0x4e7   :  { %v10321_v13 = vcombine.low %v6205_v46, %v6209_v47  ;;  %v10323_v14 = vcombine.low %v6206_v48, %v6210_v38  ;;  %v6253_v37 = vld [vmem:[%s16275_s5 + $0x1d0] sm:$0xff] }
 0x4e8   :  { %v6257_v39 = vld [vmem:[%s16275_s5 + $0x1f0] sm:$0xff] }
 0x4e9   :  { %8202 = vmatpush1.bf16.msra.mxu0 %v10581_v63  ;;  %8325 = vmatpush1.bf16.msra.mxu1 %v10583_v5  ;;  %v10322_v63 = vcombine.high %v6205_v46, %v6209_v47  ;;  %v10324_v5 = vcombine.high %v6206_v48, %v6210_v38  ;;  %v6261_v47 = vld [vmem:[%s16275_s5 + $0x210] sm:$0xff]  ;;  %v6262_v38 = vld [vmem:[%s16275_s5 + $0x218] sm:$0xff] }
 0x4ea   :  { %8203 = vmatprep.subr.bf16.mxu0 %v10590_v7  ;;  %8326 = vmatprep.subr.bf16.mxu1 %v10592_v62  ;;  %v6213_v7 = vld [vmem:[%s16275_s5 + $0x90] sm:$0xff] }
 0x4eb   :  { %v6217_v62 = vld [vmem:[%s16275_s5 + $0xb0] sm:$0xff] }
 0x4ec   :  { %v10329_v61 = vcombine.low %v6213_v7, %v6217_v62  ;;  %v6265_v48 = vld [vmem:[%s16275_s5 + $0x230] sm:$0xff] }
 0x4ed   :  { %8204 = vmatpush1.bf16.msra.mxu0 %v10589_v0  ;;  %8327 = vmatpush1.bf16.msra.mxu1 %v10591_v2  ;;  %v10330_v0 = vcombine.high %v6213_v7, %v6217_v62  ;;  %v10332_v2 = vcombine.high %v6214_v51, %v6218_v12  ;;  %v6269_v62 = vld [vmem:[%s16275_s5 + $0x250] sm:$0xff]  ;;  %v6270_v12 = vld [vmem:[%s16275_s5 + $0x258] sm:$0xff] }
 0x4ee   :  { %8205 = vmatprep.subr.bf16.mxu0 %v10598_v4  ;;  %8328 = vmatprep.subr.bf16.mxu1 %v10600_v9  ;;  %v6221_v4 = vld [vmem:[%s16275_s5 + $0xd0] sm:$0xff] }
 0x4ef   :  { %v6225_v9 = vld [vmem:[%s16275_s5 + $0xf0] sm:$0xff] }
 0x4f0   :  { %v10338_v25 = vcombine.high %v6221_v4, %v6225_v9  ;;  %v10337_v42 = vcombine.low %v6221_v4, %v6225_v9  ;;  %v6273_v51 = vld [vmem:[%s16275_s5 + $0x270] sm:$0xff] }
 0x4f1   :  { %8206 = vmatpush1.bf16.msra.mxu0 %v10597_v15  ;;  %8329 = vmatpush1.bf16.msra.mxu1 %v10599_v18  ;;  %v6229_v18 = vld [vmem:[%s16275_s5 + $0x110] sm:$0xff] }
 0x4f2   :  { %8207 = vmatprep.subr.bf16.mxu0 %v10606_v17  ;;  %8330 = vmatprep.subr.bf16.mxu1 %v10608_v19  ;;  %v6230_v17 = vld [vmem:[%s16275_s5 + $0x118] sm:$0xff]  ;;  %v10346_v57 = vcombine.high %v6229_v18, %v6233_v52  ;;  %v6277_v9 = vld [vmem:[%s16275_s5 + $0x290] sm:$0xff] }
 0x4f3   :  { %v6234_v19 = vld [vmem:[%s16275_s5 + $0x138] sm:$0xff] }
 0x4f4   :  { %v10348_v21 = vcombine.high %v6230_v17, %v6234_v19  ;;  %v10347_v28 = vcombine.low %v6230_v17, %v6234_v19  ;;  %v6289_v17 = vld [vmem:[%s16275_s5 + $0x2f0] sm:$0xff]  ;;  %v6286_v19 = vld [vmem:[%s16275_s5 + $0x2d8] sm:$0xff] }
 0x4f5   :  { %8208 = vmatpush1.bf16.msra.mxu0 %v10605_v20  ;;  %8331 = vmatpush1.bf16.msra.mxu1 %v10607_v40  ;;  %v6237_v20 = vld [vmem:[%s16275_s5 + $0x150] sm:$0xff] }
 0x4f6   :  { %8209 = vmatprep.subr.bf16.mxu0 %v10614_v26  ;;  %8332 = vmatprep.subr.bf16.mxu1 %v10616_v27  ;;  %v6241_v40 = vld [vmem:[%s16275_s5 + $0x170] sm:$0xff]  ;;  %v6242_v26 = vld [vmem:[%s16275_s5 + $0x178] sm:$0xff]  ;;  %v10345_v27 = vcombine.low %v6229_v18, %v6233_v52 }
 0x4f7   :  { %v10354_v30 = vcombine.high %v6237_v20, %v6241_v40  ;;  %v10356_v32 = vcombine.high %v6238_v11, %v6242_v26  ;;  %v6285_v52 = vld [vmem:[%s16275_s5 + $0x2d0] sm:$0xff] }
 0x4f9   :  { %8210 = vmatpush1.bf16.msra.mxu0 %v10613_v54  ;;  %8333 = vmatpush1.bf16.msra.mxu1 %v10615_v23  ;;  %v6249_v54 = vld [vmem:[%s16275_s5 + $0x1b0] sm:$0xff]  ;;  %v6246_v23 = vld [vmem:[%s16275_s5 + $0x198] sm:$0xff] }
 0x4fa   :  { %8211 = vmatprep.subr.bf16.mxu0 %v10622_v31  ;;  %8334 = vmatprep.subr.bf16.mxu1 %v10624_v58  ;;  %v10353_v31 = vcombine.low %v6237_v20, %v6241_v40  ;;  %v10355_v58 = vcombine.low %v6238_v11, %v6242_v26  ;;  %v10362_v16 = vcombine.high %v6245_v3, %v6249_v54  ;;  %v6293_v40 = vld [vmem:[%s16275_s5 + $0x310] sm:$0xff]  ;;  %v6294_v26 = vld [vmem:[%s16275_s5 + $0x318] sm:$0xff] }
 0x4fb   :  { %v10364_v33 = vcombine.high %v6246_v23, %v6250_v56  ;;  %v10361_v43 = vcombine.low %v6245_v3, %v6249_v54  ;;  %v6297_v11 = vld [vmem:[%s16275_s5 + $0x330] sm:$0xff] }
 0x4fc   :  { %v6301_v54 = vld [vmem:[%s16275_s5 + $0x350] sm:$0xff] }
 0x4fd   :  { %8212 = vmatpush1.bf16.msra.mxu0 %v10621_v41  ;;  %8335 = vmatpush1.bf16.msra.mxu1 %v10623_v8  ;;  %v6254_v41 = vld [vmem:[%s16275_s5 + $0x1d8] sm:$0xff] }
 0x4fe   :  { %8361 = vmatprep.subr.bf16.mxu0 %v10314_v44  ;;  %8484 = vmatprep.subr.bf16.mxu1 %v10316_v45  ;;  %v6258_v8 = vld [vmem:[%s16275_s5 + $0x1f8] sm:$0xff]  ;;  %v10363_v44 = vcombine.low %v6246_v23, %v6250_v56  ;;  %v10370_v45 = vcombine.high %v6253_v37, %v6257_v39  ;;  %v6305_v23 = vld [vmem:[%s16275_s5 + $0x370] sm:$0xff] }
 0x4ff   :  { %v10372_v46 = vcombine.high %v6254_v41, %v6258_v8  ;;  %v6302_v56 = vld [vmem:[%s16275_s5 + $0x358] sm:$0xff] }
 0x500   :  { %8230 = vmatmul.mubr.bf16.vlgmr.msra.gmra.mrb[20].mxu0 %v15470_v59  ;;  %8353 = vmatmul.mubr.bf16.vlgmr.msra.gmra.mrb[24].mxu1 %v15470_v59 }
 0x501   :  { %8362 = vmatpush1.bf16.msra.mxu0 %v10313_v49  ;;  %8393 = vmatprep.mubr.bf16.mxu0 %v15121_v35  ;;  %v6266_v49 = vld [vmem:[%s16275_s5 + $0x238] sm:$0xff] }
 0x502   :  { %8485 = vmatpush1.bf16.msra.mxu1 %v10315_v60  ;;  %8516 = vmatprep.mubr.bf16.mxu1 %v15121_v35  ;;  %v6226_v35 = vld [vmem:[%s16275_s5 + $0xf8] sm:$0xff]  ;;  %v10369_v60 = vcombine.low %v6253_v37, %v6257_v39  ;;  %v10380_v7 = vcombine.high %v6262_v38, %v6266_v49  ;;  %v6309_v39 = vld [vmem:[%s16275_s5 + $0x390] sm:$0xff] }
 0x503   :  { %8363 = vmatprep.subr.bf16.mxu0 %v10322_v63  ;;  %8486 = vmatprep.subr.bf16.mxu1 %v10324_v5  ;;  %v10340_v15 = vcombine.high %v6222_v50, %v6226_v35  ;;  %v10339_v36 = vcombine.low %v6222_v50, %v6226_v35  ;;  %v10371_v63 = vcombine.low %v6254_v41, %v6258_v8  ;;  %v6281_v50 = vld [vmem:[%s16275_s5 + $0x2b0] sm:$0xff]  ;;  %v6278_v35 = vld [vmem:[%s16275_s5 + $0x298] sm:$0xff] }
 0x504   :  { %v10378_v5 = vcombine.high %v6261_v47, %v6265_v48  ;;  %v6313_v41 = vld [vmem:[%s16275_s5 + $0x3b0] sm:$0xff]  ;;  %v6310_v8 = vld [vmem:[%s16275_s5 + $0x398] sm:$0xff] }
 0x505   :  { %8364 = vmatpush1.bf16.msra.mxu0 %v10321_v13  ;;  %v6274_v13 = vld [vmem:[%s16275_s5 + $0x278] sm:$0xff] }
 0x506   :  { %8487 = vmatpush1.bf16.msra.mxu1 %v10323_v14  ;;  %8365 = vmatprep.subr.bf16.mxu0 %v10330_v0  ;;  %v10377_v14 = vcombine.low %v6261_v47, %v6265_v48  ;;  %v10379_v0 = vcombine.low %v6262_v38, %v6266_v49  ;;  %v10388_v4 = vcombine.high %v6270_v12, %v6274_v13  ;;  %v6317_v48 = vld [vmem:[%s16275_s5 + $0x3d0] sm:$0xff]  ;;  %v6318_v49 = vld [vmem:[%s16275_s5 + $0x3d8] sm:$0xff] }
 0x507   :  { %8488 = vmatprep.subr.bf16.mxu1 %v10332_v2  ;;  %v10386_v2 = vcombine.high %v6269_v62, %v6273_v51  ;;  %v6321_v38 = vld [vmem:[%s16275_s5 + $0x3f0] sm:$0xff] }
 0x509   :  { %8366 = vmatpush1.bf16.msra.mxu0 %v10329_v61  ;;  %v6282_v61 = vld [vmem:[%s16275_s5 + $0x2b8] sm:$0xff] }
 0x50a   :  { %8489 = vmatpush1.bf16.msra.mxu1 %v10331_v24  ;;  %8367 = vmatprep.subr.bf16.mxu0 %v10338_v25  ;;  %v10385_v24 = vcombine.low %v6269_v62, %v6273_v51  ;;  %v10387_v25 = vcombine.low %v6270_v12, %v6274_v13  ;;  %v10396_v18 = vcombine.high %v6278_v35, %v6282_v61  ;;  %v6325_v51 = vld [vmem:[%s16275_s5 + $0x410] sm:$0xff]  ;;  %v6326_v13 = vld [vmem:[%s16275_s5 + $0x418] sm:$0xff] }
 0x50b   :  { %8490 = vmatprep.subr.bf16.mxu1 %v10340_v15  ;;  %v10394_v15 = vcombine.high %v6277_v9, %v6281_v50  ;;  %v6329_v12 = vld [vmem:[%s16275_s5 + $0x430] sm:$0xff] }
 0x50d   :  { %8368 = vmatpush1.bf16.msra.mxu0 %v10337_v42  ;;  %v6290_v42 = vld [vmem:[%s16275_s5 + $0x2f8] sm:$0xff] }
 0x50e   :  { %8491 = vmatpush1.bf16.msra.mxu1 %v10339_v36  ;;  %8369 = vmatprep.subr.bf16.mxu0 %v10346_v57  ;;  %v10393_v36 = vcombine.low %v6277_v9, %v6281_v50  ;;  %v10395_v57 = vcombine.low %v6278_v35, %v6282_v61  ;;  %v10404_v20 = vcombine.high %v6286_v19, %v6290_v42  ;;  %v6333_v50 = vld [vmem:[%s16275_s5 + $0x450] sm:$0xff] }
 0x50f   :  { %8492 = vmatprep.subr.bf16.mxu1 %v10348_v21  ;;  %v10402_v21 = vcombine.high %v6285_v52, %v6289_v17  ;;  %v6337_v35 = vld [vmem:[%s16275_s5 + $0x470] sm:$0xff]  ;;  %v10441_v61 = vcombine.low %v6325_v51, %v6329_v12 }
 0x511   :  { %8370 = vmatpush1.bf16.msra.mxu0 %v10345_v27  ;;  %v6298_v27 = vld [vmem:[%s16275_s5 + $0x338] sm:$0xff] }
 0x512   :  { %8493 = vmatpush1.bf16.msra.mxu1 %v10347_v28  ;;  %8371 = vmatprep.subr.bf16.mxu0 %v10354_v30  ;;  %v10401_v28 = vcombine.low %v6285_v52, %v6289_v17  ;;  %v10403_v30 = vcombine.low %v6286_v19, %v6290_v42  ;;  %v10412_v3 = vcombine.high %v6294_v26, %v6298_v27  ;;  %v6341_v52 = vld [vmem:[%s16275_s5 + $0x490] sm:$0xff]  ;;  %v6342_v42 = vld [vmem:[%s16275_s5 + $0x498] sm:$0xff] }
 0x513   :  { %8494 = vmatprep.subr.bf16.mxu1 %v10356_v32  ;;  %v10410_v32 = vcombine.high %v6293_v40, %v6297_v11  ;;  %v6345_v17 = vld [vmem:[%s16275_s5 + $0x4b0] sm:$0xff] }
 0x515   :  { %8372 = vmatpush1.bf16.msra.mxu0 %v10353_v31  ;;  %v6306_v31 = vld [vmem:[%s16275_s5 + $0x378] sm:$0xff] }
 0x516   :  { %8495 = vmatpush1.bf16.msra.mxu1 %v10355_v58  ;;  %8373 = vmatprep.subr.bf16.mxu0 %v10362_v16  ;;  %v10409_v58 = vcombine.low %v6293_v40, %v6297_v11  ;;  %v10411_v16 = vcombine.low %v6294_v26, %v6298_v27  ;;  %v10420_v37 = vcombine.high %v6302_v56, %v6306_v31  ;;  %v6349_v11 = vld [vmem:[%s16275_s5 + $0x4d0] sm:$0xff]  ;;  %v6354_v27 = vld [vmem:[%s16275_s5 + $0x4f8] sm:$0xff] }
 0x517   :  { %8496 = vmatprep.subr.bf16.mxu1 %v10364_v33  ;;  %v10418_v33 = vcombine.high %v6301_v54, %v6305_v23  ;;  %v6353_v26 = vld [vmem:[%s16275_s5 + $0x4f0] sm:$0xff] }
 0x519   :  { %8374 = vmatpush1.bf16.msra.mxu0 %v10361_v43  ;;  %v6314_v43 = vld [vmem:[%s16275_s5 + $0x3b8] sm:$0xff] }
 0x51a   :  { %8497 = vmatpush1.bf16.msra.mxu1 %v10363_v44  ;;  %8375 = vmatprep.subr.bf16.mxu0 %v10370_v45  ;;  %v10417_v44 = vcombine.low %v6301_v54, %v6305_v23  ;;  %v10419_v45 = vcombine.low %v6302_v56, %v6306_v31  ;;  %v10428_v47 = vcombine.high %v6310_v8, %v6314_v43  ;;  %v6361_v54 = vld [vmem:[%s16275_s5 + $0x530] sm:$0xff]  ;;  %v6358_v23 = vld [vmem:[%s16275_s5 + $0x518] sm:$0xff] }
 0x51b   :  { %8498 = vmatprep.subr.bf16.mxu1 %v10372_v46  ;;  %v10426_v46 = vcombine.high %v6309_v39, %v6313_v41  ;;  %v6362_v56 = vld [vmem:[%s16275_s5 + $0x538] sm:$0xff]  ;;  %v10465_v31 = vcombine.low %v6349_v11, %v6353_v26 }
 0x51d   :  { %8376 = vmatpush1.bf16.msra.mxu0 %v10369_v60  ;;  %v6322_v60 = vld [vmem:[%s16275_s5 + $0x3f8] sm:$0xff] }
 0x51e   :  { %8499 = vmatpush1.bf16.msra.mxu1 %v10371_v63  ;;  %8377 = vmatprep.subr.bf16.mxu0 %v10378_v5  ;;  %v10425_v63 = vcombine.low %v6309_v39, %v6313_v41  ;;  %v10427_v5 = vcombine.low %v6310_v8, %v6314_v43  ;;  %v10436_v62 = vcombine.high %v6318_v49, %v6322_v60  ;;  %v6369_v39 = vld [vmem:[%s16275_s5 + $0x570] sm:$0xff]  ;;  %v6366_v41 = vld [vmem:[%s16275_s5 + $0x558] sm:$0xff] }
 0x51f   :  { %8500 = vmatprep.subr.bf16.mxu1 %v10380_v7  ;;  %v10434_v7 = vcombine.high %v6317_v48, %v6321_v38  ;;  %v6370_v8 = vld [vmem:[%s16275_s5 + $0x578] sm:$0xff] }
 0x521   :  { %8378 = vmatpush1.bf16.msra.mxu0 %v10377_v14  ;;  %v6330_v14 = vld [vmem:[%s16275_s5 + $0x438] sm:$0xff] }
 0x522   :  { %8501 = vmatpush1.bf16.msra.mxu1 %v10379_v0  ;;  %8379 = vmatprep.subr.bf16.mxu0 %v10386_v2  ;;  %v10433_v0 = vcombine.low %v6317_v48, %v6321_v38  ;;  %v10435_v2 = vcombine.low %v6318_v49, %v6322_v60  ;;  %v10444_v9 = vcombine.high %v6326_v13, %v6330_v14  ;;  %v6377_v48 = vld [vmem:[%s16275_s5 + $0x5b0] sm:$0xff]  ;;  %v6374_v38 = vld [vmem:[%s16275_s5 + $0x598] sm:$0xff] }
 0x523   :  { %8502 = vmatprep.subr.bf16.mxu1 %v10388_v4  ;;  %v10442_v4 = vcombine.high %v6325_v51, %v6329_v12  ;;  %v6378_v49 = vld [vmem:[%s16275_s5 + $0x5b8] sm:$0xff]  ;;  %v6385_v51 = vld [vmem:[%s16275_s5 + $0x5f0] sm:$0xff] }
 0x524   :  { %v6382_v12 = vld [vmem:[%s16275_s5 + $0x5d8] sm:$0xff] }
 0x525   :  { %8380 = vmatpush1.bf16.msra.mxu0 %v10385_v24  ;;  %v6334_v24 = vld [vmem:[%s16275_s5 + $0x458] sm:$0xff] }
 0x526   :  { %8503 = vmatpush1.bf16.msra.mxu1 %v10387_v25  ;;  %8381 = vmatprep.subr.bf16.mxu0 %v10394_v15  ;;  %v6338_v25 = vld [vmem:[%s16275_s5 + $0x478] sm:$0xff]  ;;  %v10443_v15 = vcombine.low %v6326_v13, %v6330_v14 }
 0x527   :  { %8504 = vmatprep.subr.bf16.mxu1 %v10396_v18  ;;  %v10450_v18 = vcombine.high %v6333_v50, %v6337_v35  ;;  %v10452_v19 = vcombine.high %v6334_v24, %v6338_v25  ;;  %v6386_v13 = vld [vmem:[%s16275_s5 + $0x5f8] sm:$0xff] }
 0x529   :  { %8382 = vmatpush1.bf16.msra.mxu0 %v10393_v36  ;;  %v6346_v36 = vld [vmem:[%s16275_s5 + $0x4b8] sm:$0xff] }
 0x52a   :  { %8505 = vmatpush1.bf16.msra.mxu1 %v10395_v57  ;;  %8383 = vmatprep.subr.bf16.mxu0 %v10402_v21  ;;  %v10449_v57 = vcombine.low %v6333_v50, %v6337_v35  ;;  %v10451_v21 = vcombine.low %v6334_v24, %v6338_v25  ;;  %v10460_v40 = vcombine.high %v6342_v42, %v6346_v36  ;;  %v6390_v35 = vld [vmem:[%s16275_s5 + $0x618] sm:$0xff] }
 0x52b   :  { %8506 = vmatprep.subr.bf16.mxu1 %v10404_v20  ;;  %v10458_v20 = vcombine.high %v6341_v52, %v6345_v17  ;;  %v10500_v50 = vcombine.high %v6382_v12, %v6386_v13  ;;  %v10499_v25 = vcombine.low %v6382_v12, %v6386_v13 }
 0x52d   :  { %8384 = vmatpush1.bf16.msra.mxu0 %v10401_v28  ;;  %v10459_v28 = vcombine.low %v6342_v42, %v6346_v36  ;;  %v6402_v42 = vld [vmem:[%s16275_s5 + $0x678] sm:$0xff] }
 0x52e   :  { %8507 = vmatpush1.bf16.msra.mxu1 %v10403_v30  ;;  %8385 = vmatprep.subr.bf16.mxu0 %v10410_v32  ;;  %v10466_v30 = vcombine.high %v6349_v11, %v6353_v26  ;;  %v6406_v26 = vld [vmem:[%s16275_s5 + $0x698] sm:$0xff] }
 0x52f   :  { %8508 = vmatprep.subr.bf16.mxu1 %v10412_v3  ;;  %v6357_v3 = vld [vmem:[%s16275_s5 + $0x510] sm:$0xff] }
 0x530   :  { %v10473_v43 = vcombine.low %v6357_v3, %v6361_v54 }
 0x531   :  { %8386 = vmatpush1.bf16.msra.mxu0 %v10409_v58 }
 0x532   :  { %8509 = vmatpush1.bf16.msra.mxu1 %v10411_v16  ;;  %8387 = vmatprep.subr.bf16.mxu0 %v10418_v33  ;;  %v10474_v16 = vcombine.high %v6357_v3, %v6361_v54  ;;  %v10476_v33 = vcombine.high %v6358_v23, %v6362_v56  ;;  %v6414_v54 = vld [vmem:[%s16275_s5 + $0x6d8] sm:$0xff] }
 0x533   :  { %8510 = vmatprep.subr.bf16.mxu1 %v10420_v37  ;;  %v6365_v37 = vld [vmem:[%s16275_s5 + $0x550] sm:$0xff] }
 0x534   :  { %v10481_v60 = vcombine.low %v6365_v37, %v6369_v39 }
 0x535   :  { %8388 = vmatpush1.bf16.msra.mxu0 %v10417_v44  ;;  %v10475_v44 = vcombine.low %v6358_v23, %v6362_v56  ;;  %v6418_v23 = vld [vmem:[%s16275_s5 + $0x6f8] sm:$0xff] }
 0x536   :  { %8511 = vmatpush1.bf16.msra.mxu1 %v10419_v45  ;;  %8389 = vmatprep.subr.bf16.mxu0 %v10426_v46  ;;  %v10482_v45 = vcombine.high %v6365_v37, %v6369_v39  ;;  %v10484_v46 = vcombine.high %v6366_v41, %v6370_v8  ;;  %v10532_v37 = vcombine.high %v6414_v54, %v6418_v23  ;;  %v6422_v39 = vld [vmem:[%s16275_s5 + $0x718] sm:$0xff] }
 0x537   :  { %8512 = vmatprep.subr.bf16.mxu1 %v10428_v47  ;;  %v6373_v47 = vld [vmem:[%s16275_s5 + $0x590] sm:$0xff] }
 0x538   :  { %v10489_v14 = vcombine.low %v6373_v47, %v6377_v48 }
 0x539   :  { %8390 = vmatpush1.bf16.msra.mxu0 %v10425_v63  ;;  %v10483_v63 = vcombine.low %v6366_v41, %v6370_v8  ;;  %v6426_v41 = vld [vmem:[%s16275_s5 + $0x738] sm:$0xff] }
 0x53a   :  { %8513 = vmatpush1.bf16.msra.mxu1 %v10427_v5  ;;  %8391 = vmatprep.subr.bf16.mxu0 %v10434_v7  ;;  %v10490_v5 = vcombine.high %v6373_v47, %v6377_v48  ;;  %v10492_v7 = vcombine.high %v6374_v38, %v6378_v49  ;;  %v6430_v47 = vld [vmem:[%s16275_s5 + $0x758] sm:$0xff] }
 0x53b   :  { %8514 = vmatprep.subr.bf16.mxu1 %v10436_v62  ;;  %v6381_v62 = vld [vmem:[%s16275_s5 + $0x5d0] sm:$0xff]  ;;  %v6434_v48 = vld [vmem:[%s16275_s5 + $0x778] sm:$0xff] }
 0x53c   :  { %v10497_v24 = vcombine.low %v6381_v62, %v6385_v51  ;;  %v10548_v12 = vcombine.high %v6430_v47, %v6434_v48 }
 0x53d   :  { %8392 = vmatpush1.bf16.msra.mxu0 %v10433_v0  ;;  %v10491_v0 = vcombine.low %v6374_v38, %v6378_v49  ;;  %v10540_v38 = vcombine.high %v6422_v39, %v6426_v41 }
 0x53e   :  { %8515 = vmatpush1.bf16.msra.mxu1 %v10435_v2  ;;  %8402 = vmatprep.subr.bf16.mxu0 %v10442_v4  ;;  %v10498_v2 = vcombine.high %v6381_v62, %v6385_v51  ;;  %v6389_v4 = vld [vmem:[%s16275_s5 + $0x610] sm:$0xff]  ;;  %v6438_v62 = vld [vmem:[%s16275_s5 + $0x798] sm:$0xff] }
 0x53f   :  { %8525 = vmatprep.subr.bf16.mxu1 %v10444_v9  ;;  %v6393_v9 = vld [vmem:[%s16275_s5 + $0x630] sm:$0xff]  ;;  %v6442_v51 = vld [vmem:[%s16275_s5 + $0x7b8] sm:$0xff] }
 0x540   :  { %8394 = vmatmul.mubr.bf16.vlgmr.msra.gmra.mrb[24].mxu0 %v15123_v29  ;;  %v10505_v36 = vcombine.low %v6389_v4, %v6393_v9 }
 0x541   :  { %8517 = vmatmul.mubr.bf16.vlgmr.msra.gmra.mrb[28].mxu1 %v15123_v29  ;;  %8403 = vmatpush1.bf16.msra.mxu0 %v10441_v61  ;;  %v6350_v29 = vld [vmem:[%s16275_s5 + $0x4d8] sm:$0xff] }
 0x542   :  { %8434 = vmatprep.mubr.bf16.mxu0 %v15352_v6  ;;  %8526 = vmatpush1.bf16.msra.mxu1 %v10443_v15  ;;  %v10468_v32 = vcombine.high %v6350_v29, %v6354_v27  ;;  %v10467_v58 = vcombine.low %v6350_v29, %v6354_v27  ;;  %v6394_v61 = vld [vmem:[%s16275_s5 + $0x638] sm:$0xff]  ;;  %v10506_v15 = vcombine.high %v6389_v4, %v6393_v9 }
 0x543   :  { %8557 = vmatprep.mubr.bf16.mxu1 %v15352_v6  ;;  %8404 = vmatprep.subr.bf16.mxu0 %v10450_v18  ;;  %v10457_v6 = vcombine.low %v6341_v52, %v6345_v17  ;;  %v6397_v18 = vld [vmem:[%s16275_s5 + $0x650] sm:$0xff]  ;;  %v10508_v17 = vcombine.high %v6390_v35, %v6394_v61  ;;  %v6410_v29 = vld [vmem:[%s16275_s5 + $0x6b8] sm:$0xff] }
 0x544   :  { %8527 = vmatprep.subr.bf16.mxu1 %v10452_v19  ;;  %v6401_v52 = vld [vmem:[%s16275_s5 + $0x670] sm:$0xff]  ;;  %v6398_v19 = vld [vmem:[%s16275_s5 + $0x658] sm:$0xff]  ;;  %v10524_v3 = vcombine.high %v6406_v26, %v6410_v29 }
 0x545   :  { %8405 = vmatpush1.bf16.msra.mxu0 %v10449_v57  ;;  %v10507_v57 = vcombine.low %v6390_v35, %v6394_v61  ;;  %v10516_v11 = vcombine.high %v6398_v19, %v6402_v42  ;;  %v10513_v27 = vcombine.low %v6397_v18, %v6401_v52  ;;  %v6446_v9 = vld [vmem:[%s16275_s5 + $0x7d8] sm:$0xff]  ;;  %v10556_v35 = vcombine.high %v6438_v62, %v6442_v51 }
 0x546   :  { %8528 = vmatpush1.bf16.msra.mxu1 %v10451_v21  ;;  %8406 = vmatprep.subr.bf16.mxu0 %v10458_v20  ;;  %v10514_v21 = vcombine.high %v6397_v18, %v6401_v52  ;;  %v6405_v20 = vld [vmem:[%s16275_s5 + $0x690] sm:$0xff] }
 0x547   :  { %8529 = vmatprep.subr.bf16.mxu1 %v10460_v40  ;;  %v6409_v40 = vld [vmem:[%s16275_s5 + $0x6b0] sm:$0xff] }
 0x548   :  { %v10521_v56 = vcombine.low %v6405_v20, %v6409_v40  ;;  %v6453_v18 = vld [vmem:[%s16275_s5 + $0x810] sm:$0xff] }
 0x549   :  { %8407 = vmatpush1.bf16.msra.mxu0 %v10457_v6  ;;  %v10515_v6 = vcombine.low %v6398_v19, %v6402_v42  ;;  %v6457_v52 = vld [vmem:[%s16275_s5 + $0x830] sm:$0xff]  ;;  %v6458_v19 = vld [vmem:[%s16275_s5 + $0x838] sm:$0xff] }
 0x54a   :  { %8530 = vmatpush1.bf16.msra.mxu1 %v10459_v28  ;;  %8408 = vmatprep.subr.bf16.mxu0 %v10466_v30  ;;  %v10522_v28 = vcombine.high %v6405_v20, %v6409_v40  ;;  %v6413_v30 = vld [vmem:[%s16275_s5 + $0x6d0] sm:$0xff] }
 0x54b   :  { %8531 = vmatprep.subr.bf16.mxu1 %v10468_v32  ;;  %v6417_v32 = vld [vmem:[%s16275_s5 + $0x6f0] sm:$0xff] }
 0x54c   :  { %v10529_v8 = vcombine.low %v6413_v30, %v6417_v32  ;;  %v6461_v20 = vld [vmem:[%s16275_s5 + $0x850] sm:$0xff] }
 0x54d   :  { %8409 = vmatpush1.bf16.msra.mxu0 %v10465_v31  ;;  %v10523_v31 = vcombine.low %v6406_v26, %v6410_v29  ;;  %v6465_v40 = vld [vmem:[%s16275_s5 + $0x870] sm:$0xff]  ;;  %v6466_v26 = vld [vmem:[%s16275_s5 + $0x878] sm:$0xff]  ;;  %v10569_v29 = vcombine.low %v6453_v18, %v6457_v52 }
 0x54e   :  { %8532 = vmatpush1.bf16.msra.mxu1 %v10467_v58  ;;  %8410 = vmatprep.subr.bf16.mxu0 %v10474_v16  ;;  %v10530_v58 = vcombine.high %v6413_v30, %v6417_v32  ;;  %v6421_v16 = vld [vmem:[%s16275_s5 + $0x710] sm:$0xff] }
 0x54f   :  { %8533 = vmatprep.subr.bf16.mxu1 %v10476_v33  ;;  %v6425_v33 = vld [vmem:[%s16275_s5 + $0x730] sm:$0xff] }
 0x550   :  { %v10537_v49 = vcombine.low %v6421_v16, %v6425_v33  ;;  %v6469_v30 = vld [vmem:[%s16275_s5 + $0x890] sm:$0xff] }
 0x551   :  { %8411 = vmatpush1.bf16.msra.mxu0 %v10473_v43  ;;  %v6429_v43 = vld [vmem:[%s16275_s5 + $0x750] sm:$0xff] }
 0x552   :  { %8534 = vmatpush1.bf16.msra.mxu1 %v10475_v44  ;;  %8412 = vmatprep.subr.bf16.mxu0 %v10482_v45  ;;  %v6433_v44 = vld [vmem:[%s16275_s5 + $0x770] sm:$0xff]  ;;  %v10531_v45 = vcombine.low %v6414_v54, %v6418_v23  ;;  %v6474_v54 = vld [vmem:[%s16275_s5 + $0x8b8] sm:$0xff]  ;;  %v10577_v23 = vcombine.low %v6461_v20, %v6465_v40 }
 0x553   :  { %8535 = vmatprep.subr.bf16.mxu1 %v10484_v46  ;;  %v10538_v46 = vcombine.high %v6421_v16, %v6425_v33  ;;  %v10545_v13 = vcombine.low %v6429_v43, %v6433_v44  ;;  %v6473_v32 = vld [vmem:[%s16275_s5 + $0x8b0] sm:$0xff] }
 0x554   :  { %v6477_v16 = vld [vmem:[%s16275_s5 + $0x8d0] sm:$0xff] }
 0x555   :  { %8413 = vmatpush1.bf16.msra.mxu0 %v10481_v60  ;;  %v6437_v60 = vld [vmem:[%s16275_s5 + $0x790] sm:$0xff] }
 0x556   :  { %8536 = vmatpush1.bf16.msra.mxu1 %v10483_v63  ;;  %8414 = vmatprep.subr.bf16.mxu0 %v10490_v5  ;;  %v6441_v63 = vld [vmem:[%s16275_s5 + $0x7b0] sm:$0xff]  ;;  %v10539_v5 = vcombine.low %v6422_v39, %v6426_v41  ;;  %v10585_v39 = vcombine.low %v6469_v30, %v6473_v32 }
 0x557   :  { %8537 = vmatprep.subr.bf16.mxu1 %v10492_v7  ;;  %v10546_v7 = vcombine.high %v6429_v43, %v6433_v44  ;;  %v10554_v4 = vcombine.high %v6437_v60, %v6441_v63  ;;  %v10553_v61 = vcombine.low %v6437_v60, %v6441_v63  ;;  %v6481_v33 = vld [vmem:[%s16275_s5 + $0x8f0] sm:$0xff] }
 0x558   :  { %v6485_v44 = vld [vmem:[%s16275_s5 + $0x910] sm:$0xff] }
 0x559   :  { %8415 = vmatpush1.bf16.msra.mxu0 %v10489_v14  ;;  %v6445_v14 = vld [vmem:[%s16275_s5 + $0x7d0] sm:$0xff] }
 0x55a   :  { %8538 = vmatpush1.bf16.msra.mxu1 %v10491_v0  ;;  %8416 = vmatprep.subr.bf16.mxu0 %v10498_v2  ;;  %v6449_v0 = vld [vmem:[%s16275_s5 + $0x7f0] sm:$0xff]  ;;  %v10547_v2 = vcombine.low %v6430_v47, %v6434_v48  ;;  %v10593_v47 = vcombine.low %v6477_v16, %v6481_v33 }
 0x55b   :  { %8539 = vmatprep.subr.bf16.mxu1 %v10500_v50  ;;  %v6450_v50 = vld [vmem:[%s16275_s5 + $0x7f8] sm:$0xff]  ;;  %v10561_v42 = vcombine.low %v6445_v14, %v6449_v0  ;;  %v6493_v60 = vld [vmem:[%s16275_s5 + $0x950] sm:$0xff] }
 0x55c   :  { %v6497_v63 = vld [vmem:[%s16275_s5 + $0x970] sm:$0xff] }
 0x55d   :  { %8417 = vmatpush1.bf16.msra.mxu0 %v10497_v24  ;;  %v10555_v24 = vcombine.low %v6438_v62, %v6442_v51 }
 0x55e   :  { %8540 = vmatpush1.bf16.msra.mxu1 %v10499_v25  ;;  %8418 = vmatprep.subr.bf16.mxu0 %v10506_v15  ;;  %v10562_v25 = vcombine.high %v6445_v14, %v6449_v0  ;;  %v10564_v15 = vcombine.high %v6446_v9, %v6450_v50  ;;  %v6501_v14 = vld [vmem:[%s16275_s5 + $0x990] sm:$0xff] }
 0x55f   :  { %8541 = vmatprep.subr.bf16.mxu1 %v10508_v17  ;;  %v6454_v17 = vld [vmem:[%s16275_s5 + $0x818] sm:$0xff]  ;;  %v6505_v0 = vld [vmem:[%s16275_s5 + $0x9b0] sm:$0xff] }
 0x561   :  { %8419 = vmatpush1.bf16.msra.mxu0 %v10505_v36  ;;  %v10563_v36 = vcombine.low %v6446_v9, %v6450_v50  ;;  %v10609_v9 = vcombine.low %v6493_v60, %v6497_v63 }
 0x562   :  { %8542 = vmatpush1.bf16.msra.mxu1 %v10507_v57  ;;  %8420 = vmatprep.subr.bf16.mxu0 %v10514_v21  ;;  %v10570_v57 = vcombine.high %v6453_v18, %v6457_v52  ;;  %v10572_v21 = vcombine.high %v6454_v17, %v6458_v19  ;;  %v6514_v18 = vld [vmem:[%s16275_s5 + $0x9f8] sm:$0xff]  ;;  %v10617_v52 = vcombine.low %v6501_v14, %v6505_v0 }
 0x563   :  { %8543 = vmatprep.subr.bf16.mxu1 %v10516_v11  ;;  %v6462_v11 = vld [vmem:[%s16275_s5 + $0x858] sm:$0xff] }
 0x565   :  { %8421 = vmatpush1.bf16.msra.mxu0 %v10513_v27  ;;  %v10571_v27 = vcombine.low %v6454_v17, %v6458_v19 }
 0x566   :  { %8544 = vmatpush1.bf16.msra.mxu1 %v10515_v6  ;;  %8422 = vmatprep.subr.bf16.mxu0 %v10522_v28  ;;  %v10578_v6 = vcombine.high %v6461_v20, %v6465_v40  ;;  %v10580_v28 = vcombine.high %v6462_v11, %v6466_v26  ;;  %v12112_v20 = vld [vmem:[%s16277_s7] ss:$8 sps:$4 sm:$0xff]   ;;  %v12117_v40 = vld [vmem:[%s16277_s7 + $0x14] ss:$8 sps:$4 sm:$0xff]  }
 0x567   :  { %8545 = vmatprep.subr.bf16.mxu1 %v10524_v3  ;;  %v6470_v3 = vld [vmem:[%s16275_s5 + $0x898] sm:$0xff] }
 0x568   :  { %v10587_v41 = vcombine.low %v6470_v3, %v6474_v54 }
 0x569   :  { %8423 = vmatpush1.bf16.msra.mxu0 %v10521_v56  ;;  %v10579_v56 = vcombine.low %v6462_v11, %v6466_v26  ;;  %v12115_v11 = vld [vmem:[%s16277_s7 + $0x10] ss:$8 sps:$4 sm:$0xff]   ;;  %v12120_v26 = vld [vmem:[%s16277_s7 + $0x24] ss:$8 sps:$4 sm:$0xff]  }
 0x56a   :  { %8546 = vmatpush1.bf16.msra.mxu1 %v10523_v31  ;;  %8424 = vmatprep.subr.bf16.mxu0 %v10530_v58  ;;  %v10586_v31 = vcombine.high %v6469_v30, %v6473_v32  ;;  %v10588_v58 = vcombine.high %v6470_v3, %v6474_v54  ;;  %v12129_v30 = vld [vmem:[%s16277_s7 + $0x54] ss:$8 sps:$4 sm:$0xff]   ;;  %v12127_v32 = vld [vmem:[%s16277_s7 + $0x50] ss:$8 sps:$4 sm:$0xff]   ;;  %v12132_v3 = vld [vmem:[%s16277_s7 + $0x64] ss:$8 sps:$4 sm:$0xff]  }
 0x56b   :  { %8547 = vmatprep.subr.bf16.mxu1 %v10532_v37  ;;  %v6482_v37 = vld [vmem:[%s16275_s5 + $0x8f8] sm:$0xff]  ;;  %v12130_v54 = vld [vmem:[%s16277_s7 + $0x60] ss:$8 sps:$4 sm:$0xff]  }
 0x56d   :  { %8425 = vmatpush1.bf16.msra.mxu0 %v10529_v8  ;;  %v10594_v8 = vcombine.high %v6477_v16, %v6481_v33  ;;  %v12141_v16 = vld [vmem:[%s16277_s7 + $0x94] ss:$8 sps:$4 sm:$0xff]   ;;  %v12139_v33 = vld [vmem:[%s16277_s7 + $0x90] ss:$8 sps:$4 sm:$0xff]  }
 0x56e   :  { %8548 = vmatpush1.bf16.msra.mxu1 %v10531_v45  ;;  %8426 = vmatprep.subr.bf16.mxu0 %v10538_v46  ;;  %v6489_v45 = vld [vmem:[%s16275_s5 + $0x930] sm:$0xff]  ;;  %v6490_v46 = vld [vmem:[%s16275_s5 + $0x938] sm:$0xff] }
 0x56f   :  { %8549 = vmatprep.subr.bf16.mxu1 %v10540_v38  ;;  %v10602_v38 = vcombine.high %v6485_v44, %v6489_v45  ;;  %v10601_v62 = vcombine.low %v6485_v44, %v6489_v45 }
 0x571   :  { %8427 = vmatpush1.bf16.msra.mxu0 %v10537_v49 }
 0x572   :  { %8550 = vmatpush1.bf16.msra.mxu1 %v10539_v5  ;;  %8428 = vmatprep.subr.bf16.mxu0 %v10546_v7  ;;  %v6494_v5 = vld [vmem:[%s16275_s5 + $0x958] sm:$0xff] }
 0x573   :  { %8551 = vmatprep.subr.bf16.mxu1 %v10548_v12  ;;  %v6498_v7 = vld [vmem:[%s16275_s5 + $0x978] sm:$0xff]  ;;  %v10610_v12 = vcombine.high %v6493_v60, %v6497_v63 }
 0x574   :  { %v10611_v50 = vcombine.low %v6494_v5, %v6498_v7  ;;  %v12153_v60 = vld [vmem:[%s16277_s7 + $0xd4] ss:$8 sps:$4 sm:$0xff]   ;;  %v12151_v63 = vld [vmem:[%s16277_s7 + $0xd0] ss:$8 sps:$4 sm:$0xff]  }
 0x575   :  { %8429 = vmatpush1.bf16.msra.mxu0 %v10545_v13  ;;  %v10612_v13 = vcombine.high %v6494_v5, %v6498_v7  ;;  %v12156_v5 = vld [vmem:[%s16277_s7 + $0xe4] ss:$8 sps:$4 sm:$0xff]   ;;  %v12154_v7 = vld [vmem:[%s16277_s7 + $0xe0] ss:$8 sps:$4 sm:$0xff]  }
 0x576   :  { %8552 = vmatpush1.bf16.msra.mxu1 %v10547_v2  ;;  %8430 = vmatprep.subr.bf16.mxu0 %v10554_v4  ;;  %v6502_v2 = vld [vmem:[%s16275_s5 + $0x998] sm:$0xff] }
 0x577   :  { %8553 = vmatprep.subr.bf16.mxu1 %v10556_v35  ;;  %v6506_v4 = vld [vmem:[%s16275_s5 + $0x9b8] sm:$0xff]  ;;  %v10618_v35 = vcombine.high %v6501_v14, %v6505_v0  ;;  %v12209_v14 = vld [vmem:[%s16278_s9] sm:$0xff]   ;;  %v12210_v0 = vld [vmem:[%s16278_s9 + $0x48] sm:$0xff]  }
 0x578   :  { %v10619_v17 = vcombine.low %v6502_v2, %v6506_v4 }
 0x579   :  { %8431 = vmatpush1.bf16.msra.mxu0 %v10553_v61  ;;  %v10620_v61 = vcombine.high %v6502_v2, %v6506_v4  ;;  %v12211_v2 = vld [vmem:[%s16278_s9 + $0x8] sm:$0xff]   ;;  %v12212_v4 = vld [vmem:[%s16278_s9 + $0x50] sm:$0xff]  }
 0x57a   :  { %8554 = vmatpush1.bf16.msra.mxu1 %v10555_v24  ;;  %8432 = vmatprep.subr.bf16.mxu0 %v10562_v25  ;;  %v6509_v24 = vld [vmem:[%s16275_s5 + $0x9d0] sm:$0xff] }
 0x57b   :  { %8555 = vmatprep.subr.bf16.mxu1 %v10564_v15  ;;  %v6513_v25 = vld [vmem:[%s16275_s5 + $0x9f0] sm:$0xff]  ;;  %v6510_v15 = vld [vmem:[%s16275_s5 + $0x9d8] sm:$0xff] }
 0x57c   :  { %v10626_v19 = vcombine.high %v6509_v24, %v6513_v25 }
 0x57d   :  { %8433 = vmatpush1.bf16.msra.mxu0 %v10561_v42  ;;  %v10628_v42 = vcombine.high %v6510_v15, %v6514_v18 }
 0x57e   :  { %8556 = vmatpush1.bf16.msra.mxu1 %v10563_v36  ;;  %8443 = vmatprep.subr.bf16.mxu0 %v10570_v57  ;;  %v10625_v36 = vcombine.low %v6509_v24, %v6513_v25  ;;  %v10627_v57 = vcombine.low %v6510_v15, %v6514_v18  ;;  %v12217_v24 = vld [vmem:[%s16278_s9 + $0x20] sm:$0xff]   ;;  %v12218_v25 = vld [vmem:[%s16278_s9 + $0x68] sm:$0xff]  }
 0x57f   :  { %8566 = vmatprep.subr.bf16.mxu1 %v10572_v21  ;;  %v12114_v21 = vld [vmem:[%s16277_s7 + $0x4] ss:$8 sps:$4 sm:$0xff]   ;;  %v8611_v18 = vld [vmem:[%s16279_s6] sm:$0xf] }
 0x580   :  { %8435 = vmatmul.mubr.bf16.vlgmr.msra.gmra.mrb[24].mxu0 %v15354_v34  ;;  %v12219_v15 = vld [vmem:[%s16278_s9 + $0x28] sm:$0xff]  }
 0x581   :  { %8558 = vmatmul.mubr.bf16.vlgmr.msra.gmra.mrb[28].mxu1 %v15354_v34  ;;  %8444 = vmatpush1.bf16.msra.mxu0 %v10569_v29  ;;  %v6478_v34 = vld [vmem:[%s16275_s5 + $0x8d8] sm:$0xff]  ;;  %v12118_v29 = vld [vmem:[%s16277_s7 + $0x20] ss:$8 sps:$4 sm:$0xff]  }
 0x582   :  { %8567 = vmatpush1.bf16.msra.mxu1 %v10571_v27  ;;  %8445 = vmatprep.subr.bf16.mxu0 %v10578_v6  ;;  %v10596_v43 = vcombine.high %v6478_v34, %v6482_v37  ;;  %v10595_v48 = vcombine.low %v6478_v34, %v6482_v37  ;;  %v12121_v27 = vld [vmem:[%s16277_s7 + $0x30] ss:$8 sps:$4 sm:$0xff]   ;;  %v12126_v6 = vld [vmem:[%s16277_s7 + $0x44] ss:$8 sps:$4 sm:$0xff]   ;;  %v12142_v37 = vld [vmem:[%s16277_s7 + $0xa0] ss:$8 sps:$4 sm:$0xff]  }
 0x583   :  { %8568 = vmatprep.subr.bf16.mxu1 %v10580_v28  ;;  %8475 = vmatprep.mubr.bf16.mxu0 %v12236_v1  ;;  %v12124_v28 = vld [vmem:[%s16277_s7 + $0x40] ss:$8 sps:$4 sm:$0xff]   ;;  %v12144_v34 = vld [vmem:[%s16277_s7 + $0xa4] ss:$8 sps:$4 sm:$0xff]  }
 0x584   :  { %8598 = vmatprep.mubr.bf16.mxu1 %v12236_v1  ;;  %v6486_v1 = vld [vmem:[%s16275_s5 + $0x918] sm:$0xff] }
 0x585   :  { %8446 = vmatpush1.bf16.msra.mxu0 %v10577_v23  ;;  %v10604_v49 = vcombine.high %v6486_v1, %v6490_v46  ;;  %v10603_v51 = vcombine.low %v6486_v1, %v6490_v46  ;;  %v12135_v23 = vld [vmem:[%s16277_s7 + $0x74] ss:$8 sps:$4 sm:$0xff]  }
 0x586   :  { %8569 = vmatpush1.bf16.msra.mxu1 %v10579_v56  ;;  %8447 = vmatprep.subr.bf16.mxu0 %v10586_v31  ;;  %v12133_v56 = vld [vmem:[%s16277_s7 + $0x70] ss:$8 sps:$4 sm:$0xff]   ;;  %v12138_v31 = vld [vmem:[%s16277_s7 + $0x84] ss:$8 sps:$4 sm:$0xff]  }
 0x587   :  { %8570 = vmatprep.subr.bf16.mxu1 %v10588_v58  ;;  %v12136_v58 = vld [vmem:[%s16277_s7 + $0x80] ss:$8 sps:$4 sm:$0xff]  }
 0x589   :  { %8448 = vmatpush1.bf16.msra.mxu0 %v10585_v39  ;;  %v12147_v39 = vld [vmem:[%s16277_s7 + $0xb4] ss:$8 sps:$4 sm:$0xff]  }
 0x58a   :  { %8571 = vmatpush1.bf16.msra.mxu1 %v10587_v41  ;;  %8449 = vmatprep.subr.bf16.mxu0 %v10594_v8  ;;  %v12145_v41 = vld [vmem:[%s16277_s7 + $0xb0] ss:$8 sps:$4 sm:$0xff]   ;;  %v12150_v8 = vld [vmem:[%s16277_s7 + $0xc4] ss:$8 sps:$4 sm:$0xff]  }
 0x58b   :  { %8572 = vmatprep.subr.bf16.mxu1 %v10596_v43  ;;  %v12148_v43 = vld [vmem:[%s16277_s7 + $0xc0] ss:$8 sps:$4 sm:$0xff]  }
 0x58d   :  { %8450 = vmatpush1.bf16.msra.mxu0 %v10593_v47 }
 0x58e   :  { %8573 = vmatpush1.bf16.msra.mxu1 %v10595_v48  ;;  %8451 = vmatprep.subr.bf16.mxu0 %v10602_v38 }
 0x58f   :  { %8574 = vmatprep.subr.bf16.mxu1 %v10604_v49 }
 0x591   :  { %8452 = vmatpush1.bf16.msra.mxu0 %v10601_v62  ;;  %v12159_v62 = vld [vmem:[%s16277_s7 + $0xf4] ss:$8 sps:$4 sm:$0xff]  }
 0x592   :  { %8575 = vmatpush1.bf16.msra.mxu1 %v10603_v51  ;;  %8453 = vmatprep.subr.bf16.mxu0 %v10610_v12  ;;  %v12157_v51 = vld [vmem:[%s16277_s7 + $0xf0] ss:$8 sps:$4 sm:$0xff]   ;;  %v12162_v12 = vld [vmem:[%s16277_s7 + $0x104] ss:$8 sps:$4 sm:$0xff]  }
 0x593   :  { %8576 = vmatprep.subr.bf16.mxu1 %v10612_v13  ;;  %v12208_v13 = vld [vmem:[%s16278_s9 + $0x40] sm:$0xff]  }
 0x595   :  { %8454 = vmatpush1.bf16.msra.mxu0 %v10609_v9  ;;  %v12213_v9 = vld [vmem:[%s16278_s9 + $0x10] sm:$0xff]  }
 0x596   :  { %8577 = vmatpush1.bf16.msra.mxu1 %v10611_v50  ;;  %8455 = vmatprep.subr.bf16.mxu0 %v10618_v35  ;;  %v12214_v50 = vld [vmem:[%s16278_s9 + $0x58] sm:$0xff]  }
 0x597   :  { %8578 = vmatprep.subr.bf16.mxu1 %v10620_v61  ;;  %v12215_v35 = vld [vmem:[%s16278_s9 + $0x18] sm:$0xff]   ;;  %v12216_v61 = vld [vmem:[%s16278_s9 + $0x60] sm:$0xff]  }
 0x599   :  { %8456 = vmatpush1.bf16.msra.mxu0 %v10617_v52  ;;  %v8616_v52 = vrot.slane %v8611_v18, %v13797_v10 }
 0x59a   :  { %8579 = vmatpush1.bf16.msra.mxu1 %v10619_v17  ;;  %8457 = vmatprep.subr.bf16.mxu0 %v10626_v19  ;;  %v8624_v19 = vrot.slane %v8611_v18, %v14012_v53 }
 0x59b   :  { %8580 = vmatprep.subr.bf16.mxu1 %v10628_v42  ;;  %v8620_v42 = vrot.slane %v8611_v18, %v13802_v22 }
 0x59d   :  { %8458 = vmatpush1.bf16.msra.mxu0 %v10625_v36 }
 0x59e   :  { %8581 = vmatpush1.bf16.msra.mxu1 %v10627_v57  ;;  %9045 = vmatprep.subr.bf16.mxu0 %v12114_v21 }
 0x59f   :  { %10725 = vmatprep.subr.bf16.mxu1 %v12208_v13  ;;  %v12190_v13 = vld [vmem:[%s16277_s7 + $0x1a0] ss:$8 sps:$4 sm:$0xff]  }
 0x5a0   :  { %8476 = vmatmul.mubr.bf16.vlgmr.msra.gmra.mrb[24].mxu0 %v15470_v59 }
 0x5a1   :  { %8599 = vmatmul.mubr.bf16.vlgmr.msra.gmra.mrb[28].mxu1 %v15470_v59  ;;  %9046 = vmatpush1.bf16.msra.mxu0 %v12112_v20  ;;  %v12123_v59 = vld [vmem:[%s16277_s7 + $0x34] ss:$8 sps:$4 sm:$0xff]   ;;  %v8628_v20 = vrot.slane %v8611_v18, %v14017_v55 }
 0x5a2   :  { %9047 = vmatprep.subr.bf16.mxu0 %v12117_v40  ;;  %10726 = vmatpush3.bf16.msra.mxu1 %v12209_v14  ;;  %v12195_v14 = vld [vmem:[%s16277_s7 + $0x1b4] ss:$8 sps:$4 sm:$0xff]  }
 0x5a3   :  { %10727 = vmatprep.subr.bf16.mxu1 %v12210_v0  ;;  %v12193_v0 = vld [vmem:[%s16277_s7 + $0x1b0] ss:$8 sps:$4 sm:$0xff]  }
 0x5a5   :  { %9048 = vmatpush1.bf16.msra.mxu0 %v12115_v11 }
 0x5a6   :  { %9049 = vmatprep.subr.bf16.mxu0 %v12120_v26  ;;  %10728 = vmatpush3.bf16.msra.mxu1 %v12211_v2  ;;  %v12198_v2 = vld [vmem:[%s16277_s7 + $0x1c4] ss:$8 sps:$4 sm:$0xff]  }
 0x5a7   :  { %10729 = vmatprep.subr.bf16.mxu1 %v12212_v4  ;;  %v12196_v4 = vld [vmem:[%s16277_s7 + $0x1c0] ss:$8 sps:$4 sm:$0xff]  }
 0x5a9   :  { %9050 = vmatpush1.bf16.msra.mxu0 %v12118_v29 }
 0x5aa   :  { %9051 = vmatprep.subr.bf16.mxu0 %v12123_v59  ;;  %10730 = vmatpush3.bf16.msra.mxu1 %v12213_v9  ;;  %v12201_v9 = vld [vmem:[%s16277_s7 + $0x1d4] ss:$8 sps:$4 sm:$0xff]  }
 0x5ab   :  { %10731 = vmatprep.subr.bf16.mxu1 %v12214_v50  ;;  %v12199_v50 = vld [vmem:[%s16277_s7 + $0x1d0] ss:$8 sps:$4 sm:$0xff]  }
 0x5ad   :  { %9052 = vmatpush1.bf16.msra.mxu0 %v12121_v27 }
 0x5ae   :  { %9053 = vmatprep.subr.bf16.mxu0 %v12126_v6  ;;  %10732 = vmatpush3.bf16.msra.mxu1 %v12215_v35  ;;  %v12204_v35 = vld [vmem:[%s16277_s7 + $0x1e4] ss:$8 sps:$4 sm:$0xff]  }
 0x5af   :  { %10733 = vmatprep.subr.bf16.mxu1 %v12216_v61  ;;  %v12202_v61 = vld [vmem:[%s16277_s7 + $0x1e0] ss:$8 sps:$4 sm:$0xff]  }
 0x5b1   :  { %9054 = vmatpush1.bf16.msra.mxu0 %v12124_v28 }
 0x5b2   :  { %9055 = vmatprep.subr.bf16.mxu0 %v12129_v30  ;;  %10734 = vmatpush3.bf16.msra.mxu1 %v12217_v24 }
 0x5b3   :  { %10735 = vmatprep.subr.bf16.mxu1 %v12218_v25  ;;  %v12207_v25 = vld [vmem:[%s16277_s7 + $0x1f4] ss:$8 sps:$4 sm:$0xff]  }
 0x5b5   :  { %9056 = vmatpush1.bf16.msra.mxu0 %v12127_v32 }
 0x5b6   :  { %9057 = vmatprep.subr.bf16.mxu0 %v12132_v3  ;;  %10736 = vmatpush3.bf16.msra.mxu1 %v12219_v15  ;;  %v12205_v15 = vld [vmem:[%s16277_s7 + $0x1f0] ss:$8 sps:$4 sm:$0xff]  }
 0x5b9   :  { %9058 = vmatpush1.bf16.msra.mxu0 %v12130_v54 }
 0x5ba   :  { %9059 = vmatprep.subr.bf16.mxu0 %v12135_v23 }
 0x5bd   :  { %9060 = vmatpush1.bf16.msra.mxu0 %v12133_v56 }
 0x5be   :  { %9061 = vmatprep.subr.bf16.mxu0 %v12138_v31 }
 0x5c1   :  { %9062 = vmatpush1.bf16.msra.mxu0 %v12136_v58 }
 0x5c2   :  { %9063 = vmatprep.subr.bf16.mxu0 %v12141_v16 }
 0x5c5   :  { %9064 = vmatpush1.bf16.msra.mxu0 %v12139_v33  ;;  %v12160_v33 = vld [vmem:[%s16277_s7 + $0x100] ss:$8 sps:$4 sm:$0xff]  }
 0x5c6   :  { %9065 = vmatprep.subr.bf16.mxu0 %v12144_v34 }
 0x5c9   :  { %9066 = vmatpush1.bf16.msra.mxu0 %v12142_v37  ;;  %v12165_v37 = vld [vmem:[%s16277_s7 + $0x114] ss:$8 sps:$4 sm:$0xff]  }
 0x5ca   :  { %9067 = vmatprep.subr.bf16.mxu0 %v12147_v39 }
 0x5cd   :  { %9068 = vmatpush1.bf16.msra.mxu0 %v12145_v41  ;;  %v12163_v41 = vld [vmem:[%s16277_s7 + $0x110] ss:$8 sps:$4 sm:$0xff]  }
 0x5ce   :  { %9069 = vmatprep.subr.bf16.mxu0 %v12150_v8  ;;  %v12168_v8 = vld [vmem:[%s16277_s7 + $0x124] ss:$8 sps:$4 sm:$0xff]  }
 0x5d1   :  { %9070 = vmatpush1.bf16.msra.mxu0 %v12148_v43  ;;  %v12166_v43 = vld [vmem:[%s16277_s7 + $0x120] ss:$8 sps:$4 sm:$0xff]  }
 0x5d2   :  { %9071 = vmatprep.subr.bf16.mxu0 %v12153_v60  ;;  %v12183_v60 = vld [vmem:[%s16277_s7 + $0x174] ss:$8 sps:$4 sm:$0xff]  }
 0x5d3   :  { %v8231_v44 = vpop.f32.mrb[20].mxu0  ;;  %v16020_v45 = vpop.f32.mrb[24].mxu1 }
 0x5d4   :  { %v16022_v1 = vpop.f32.mrb[21].mxu0  ;;  %v16024_v46 = vpop.f32.mrb[25].mxu1 }
 0x5d5   :  { %v8235_v47 = vpop.f32.mrb[22].mxu0  ;;  %v8358_v48 = vpop.f32.mrb[26].mxu1  ;;  %9072 = vmatpush1.bf16.msra.mxu0 %v12151_v63  ;;  %v12181_v63 = vld [vmem:[%s16277_s7 + $0x170] ss:$8 sps:$4 sm:$0xff]  }
 0x5d6   :  { %v8236_v38 = vpop.f32.mrb[23].mxu0  ;;  %v8359_v49 = vpop.f32.mrb[27].mxu1  ;;  %9073 = vmatprep.subr.bf16.mxu0 %v12156_v5  ;;  %v12177_v47 = vld [vmem:[%s16277_s7 + $0x154] ss:$8 sps:$4 sm:$0xff]   ;;  %v12175_v48 = vld [vmem:[%s16277_s7 + $0x150] ss:$8 sps:$4 sm:$0xff]  }
 0x5d7   :  { %v12180_v38 = vld [vmem:[%s16277_s7 + $0x164] ss:$8 sps:$4 sm:$0xff]   ;;  %v12178_v49 = vld [vmem:[%s16277_s7 + $0x160] ss:$8 sps:$4 sm:$0xff]  }
 0x5d8   :  { %v12186_v5 = vld [vmem:[%s16277_s7 + $0x184] ss:$8 sps:$4 sm:$0xff]  }
 0x5d9   :  { %9074 = vmatpush1.bf16.msra.mxu0 %v12154_v7  ;;  %v12184_v7 = vld [vmem:[%s16277_s7 + $0x180] ss:$8 sps:$4 sm:$0xff]  }
 0x5da   :  { %9075 = vmatprep.subr.bf16.mxu0 %v12159_v62  ;;  %v12189_v62 = vld [vmem:[%s16277_s7 + $0x194] ss:$8 sps:$4 sm:$0xff]  }
 0x5dd   :  { %9076 = vmatpush1.bf16.msra.mxu0 %v12157_v51  ;;  %v12187_v51 = vld [vmem:[%s16277_s7 + $0x190] ss:$8 sps:$4 sm:$0xff]  }
 0x5de   :  { %9086 = vmatprep.subr.bf16.mxu0 %v12162_v12  ;;  %v12192_v12 = vld [vmem:[%s16277_s7 + $0x1a4] ss:$8 sps:$4 sm:$0xff]  }
 0x673   :  { %v8477_v17 = vpop.f32.mrb[24].mxu0 }
 0x674   :  { %v8607_v36 = vmax.f32 %v8231_v44, %v8477_v17  ;;  %v8600_v57 = vpop.f32.mrb[28].mxu1  ;;  %v8479_v21 = vpop.f32.mrb[25].mxu0  ;;  %v12171_v44 = vld [vmem:[%s16277_s7 + $0x134] ss:$8 sps:$4 sm:$0xff]  }
 0x675   :  { %v8609_v40 = vmax.f32 %v16020_v45, %v8600_v57  ;;  %v8608_v11 = vmax.f32 %v16022_v1, %v8479_v21  ;;  %v8602_v26 = vpop.f32.mrb[29].mxu1  ;;  %v8481_v29 = vpop.f32.mrb[26].mxu0  ;;  %v12169_v45 = vld [vmem:[%s16277_s7 + $0x130] ss:$8 sps:$4 sm:$0xff]   ;;  %v12174_v1 = vld [vmem:[%s16277_s7 + $0x144] ss:$8 sps:$4 sm:$0xff]  }
 0x676   :  { %v8633_v59 = vadd.f32 %v8616_v52, %v8607_v36  ;;  %v8610_v27 = vmax.f32 %v16024_v46, %v8602_v26  ;;  %v8604_v6 = vpop.f32.mrb[30].mxu1  ;;  %v8482_v28 = vpop.f32.mrb[27].mxu0  ;;  %v12172_v46 = vld [vmem:[%s16277_s7 + $0x140] ss:$8 sps:$4 sm:$0xff]   ;;  %v12220_v17 = vld [vmem:[%s16278_s9 + $0x70] sm:$0xff]   ;;  %v12223_v36 = vld [vmem:[%s16278_s9 + $0x38] sm:$0xff]  }
 0x677   :  { %v16093_v30 = vadd.f32 %v8624_v19, %v8609_v40  ;;  %v8634_v53 = vadd.f32 %v8620_v42, %v8608_v11  ;;  %v8605_v32 = vpop.f32.mrb[31].mxu1  ;;  %v12221_v19 = vld [vmem:[%s16278_s9 + $0x30] sm:$0xff]   ;;  %10737 = vmatprep.subr.bf16.mxu1 %v12220_v17  ;;  %v12222_v42 = vld [vmem:[%s16278_s9 + $0x78] sm:$0xff]   ;;  %v12237_v57 = vmov 0.0   ;;  %v8713_v21 = vld [vmem:[%s16281_s8] sm:$0x3] }
 0x678   :  { %v8637_v3 = vmul.f32 0.01, %v8633_v59  ;;  %v8636_v54 = vadd.f32 %v8628_v20, %v8610_v27  ;;  %10738 = vmatpush3.bf16.msra.mxu1 %v12221_v19  ;;  %v8718_v20 = vrot.slane %v8713_v21, %v13797_v10  ;;  %v8722_v40 = vrot.slane %v8713_v21, %v13802_v22  ;;  %v12224_v32 = vld [vmem:[%s16280_s11] sm:$0xff]   ;;  %v12225_v10 = vld [vmem:[%s16280_s11 + $0x8] sm:$0xff]   ;;  %v12226_v22 = vld [vmem:[%s16280_s11 + $0x10] sm:$0xff]  }
 0x679   :  { %v8638_v23 = vmul.f32 0.01, %v8634_v53  ;;  %v8639_v24 = vmul.f32 0.01, %v16093_v30  ;;  %10739 = vmatprep.subr.bf16.mxu1 %v12222_v42 }
 0x67a   :  { %v8641_v56 = vmax.f32 %v8633_v59, %v8637_v3  ;;  %v8640_v55 = vmul.f32 0.01, %v8636_v54 }
 0x67b   :  { %v8642_v31 = vmax.f32 %v8634_v53, %v8638_v23  ;;  %v8643_v18 = vmax.f32 %v16093_v30, %v8639_v24  ;;  %v12228_v23 = vld [vmem:[%s16280_s11 + $0x20] sm:$0xff]  }
 0x67c   :  { %v8644_v58 = vmax.f32 %v8636_v54, %v8640_v55  ;;  %v8645_v34 = vpack.c.bf16 %v8641_v56, %v8641_v56  ;;  %10740 = vmatpush3.bf16.msra.mxu1 %v12223_v36  ;;  %v12227_v54 = vld [vmem:[%s16280_s11 + $0x18] sm:$0xff]   ;;  %v12229_v56 = vld [vmem:[%s16280_s11 + $0x28] sm:$0xff]   ;;  %v12230_v55 = vld [vmem:[%s16280_s11 + $0x30] sm:$0xff]  }
 0x67d   :  { %v8646_v16 = vpack.c.bf16 %v8642_v31, %v8642_v31  ;;  %v8647_v52 = vpack.c.bf16 %v8643_v18, %v8643_v18  ;;  %10761 = vmatprep.subr.bf16.mxu1 %v12237_v57  ;;  %v12231_v31 = vld [vmem:[%s16280_s11 + $0x38] sm:$0xff]  }
 0x67e   :  { %v8648_v39 = vpack.c.bf16 %v8644_v58, %v8644_v58 }
 0x67f   :  { %9077 = vmatprep.mubr.bf16.mxu0 %v8646_v16  ;;  %v10693_v16 = vld [vmem:[%s16283_s10] ss:$0 sm:$0xff] }
 0x680   :  { %9078 = vmatmul.mubr.bf16.vlgmr.msra.gmra.mrb[28].mxu0 %v8645_v34 }
 0x681   :  { %9087 = vmatpush1.bf16.msra.mxu0 %v12160_v33  ;;  %9118 = vmatprep.mubr.bf16.mxu0 %v8648_v39 }
 0x682   :  { %9088 = vmatprep.subr.bf16.mxu0 %v12165_v37 }
 0x685   :  { %9089 = vmatpush1.bf16.msra.mxu0 %v12163_v41 }
 0x686   :  { %9090 = vmatprep.subr.bf16.mxu0 %v12168_v8 }
 0x689   :  { %9091 = vmatpush1.bf16.msra.mxu0 %v12166_v43  ;;  %v12232_v43 = vld [vmem:[%s16282_s13] sm:$0xff]  }
 0x68a   :  { %9092 = vmatprep.subr.bf16.mxu0 %v12171_v44 }
 0x68d   :  { %9093 = vmatpush1.bf16.msra.mxu0 %v12169_v45  ;;  %v12233_v45 = vld [vmem:[%s16282_s13 + $0x8] sm:$0xff]  }
 0x68e   :  { %9094 = vmatprep.subr.bf16.mxu0 %v12174_v1  ;;  %v12234_v1 = vld [vmem:[%s16282_s13 + $0x10] sm:$0xff]  }
 0x691   :  { %9095 = vmatpush1.bf16.msra.mxu0 %v12172_v46  ;;  %v12235_v46 = vld [vmem:[%s16282_s13 + $0x18] sm:$0xff]  }
 0x692   :  { %9096 = vmatprep.subr.bf16.mxu0 %v12177_v47  ;;  %v10710_v47 = vld [vmem:[%s16284_s12] ss:$0 sm:$0xff] }
 0x695   :  { %9097 = vmatpush1.bf16.msra.mxu0 %v12175_v48 }
 0x696   :  { %9098 = vmatprep.subr.bf16.mxu0 %v12180_v38 }
 0x699   :  { %9099 = vmatpush1.bf16.msra.mxu0 %v12178_v49 }
 0x69a   :  { %9100 = vmatprep.subr.bf16.mxu0 %v12183_v60 }
 0x69d   :  { %9101 = vmatpush1.bf16.msra.mxu0 %v12181_v63 }
 0x69e   :  { %9102 = vmatprep.subr.bf16.mxu0 %v12186_v5 }
 0x6a1   :  { %9103 = vmatpush1.bf16.msra.mxu0 %v12184_v7 }
 0x6a2   :  { %9104 = vmatprep.subr.bf16.mxu0 %v12189_v62  ;;  %v10719_v62 = vld [vmem:[%s16285_s14] ss:$0 sm:$0xff] }
 0x6a5   :  { %9105 = vmatpush1.bf16.msra.mxu0 %v12187_v51 }
 0x6a6   :  { %9106 = vmatprep.subr.bf16.mxu0 %v12192_v12 }
 0x6a9   :  { %9107 = vmatpush1.bf16.msra.mxu0 %v12190_v13 }
 0x6aa   :  { %9108 = vmatprep.subr.bf16.mxu0 %v12195_v14 }
 0x6ad   :  { %9109 = vmatpush1.bf16.msra.mxu0 %v12193_v0 }
 0x6ae   :  { %9110 = vmatprep.subr.bf16.mxu0 %v12198_v2 }
 0x6b1   :  { %9111 = vmatpush1.bf16.msra.mxu0 %v12196_v4 }
 0x6b2   :  { %9112 = vmatprep.subr.bf16.mxu0 %v12201_v9 }
 0x6b5   :  { %9113 = vmatpush1.bf16.msra.mxu0 %v12199_v50 }
 0x6b6   :  { %9114 = vmatprep.subr.bf16.mxu0 %v12204_v35 }
 0x6b9   :  { %9115 = vmatpush1.bf16.msra.mxu0 %v12202_v61 }
 0x6ba   :  { %9116 = vmatprep.subr.bf16.mxu0 %v12207_v25 }
 0x6bd   :  { %9117 = vmatpush1.bf16.msra.mxu0 %v12205_v15 }
 0x6c0   :  { %9119 = vmatmul.mubr.bf16.vlgmr.msra.gmra.mrb[28].mxu0 %v8647_v52 }
 0x793   :  { %v9120_v11 = vpop.f32.mrb[28].mxu0 }
 0x794   :  { %v10795_v26 = vadd.f32 %v9120_v11, %v8718_v20  ;;  %v9122_v29 = vpop.f32.mrb[29].mxu0 }
 0x795   :  { %v10796_v59 = vadd.f32 %v9122_v29, %v8722_v40  ;;  %v9124_v27 = vpop.f32.mrb[30].mxu0 }
 0x796   :  { %v9127_v6 = vmax.f32 %v10795_v26, 0.0  ;;  %v9125_v28 = vpop.f32.mrb[31].mxu0 }
 0x797   :  { %v9128_v30 = vmax.f32 %v10796_v59, 0.0 }
 0x798   :  { %v9129_v3 = vpack.c.bf16 %v9127_v6, %v9127_v6 }
 0x799   :  { %v9130_v53 = vpack.c.bf16 %v9128_v30, %v9128_v30 }
 0x79b   :  { %9298 = vmatprep.mubr.bf16.mxu1 %v9130_v53 }
 0x79c   :  { %9299 = vmatmul.mubr.bf16.vlgmr.msra.gmra.mrb[32].mxu1 %v9129_v3 }
 0x79d   :  { %10762 = vmatpush3.bf16.msra.mxu1 %v12224_v32  ;;  %10777 = vmatprep.mubr.msk.bf16.mxu1 %vm12238_vm0, %v12237_v57 }
 0x79e   :  { %10763 = vmatprep.subr.bf16.mxu1 %v12237_v57 }
 0x7a1   :  { %10764 = vmatpush3.bf16.msra.mxu1 %v12225_v10 }
 0x7a2   :  { %10765 = vmatprep.subr.bf16.mxu1 %v12237_v57 }
 0x7a5   :  { %10766 = vmatpush3.bf16.msra.mxu1 %v12226_v22 }
 0x7a6   :  { %10767 = vmatprep.subr.bf16.mxu1 %v12237_v57 }
 0x7a9   :  { %10768 = vmatpush3.bf16.msra.mxu1 %v12227_v54 }
 0x7aa   :  { %10769 = vmatprep.subr.bf16.mxu1 %v12237_v57 }
 0x7ad   :  { %10770 = vmatpush3.bf16.msra.mxu1 %v12228_v23 }
 0x7ae   :  { %10771 = vmatprep.subr.bf16.mxu1 %v12237_v57 }
 0x7b1   :  { %10772 = vmatpush3.bf16.msra.mxu1 %v12229_v56 }
 0x7b2   :  { %10773 = vmatprep.subr.bf16.mxu1 %v12237_v57 }
 0x7b5   :  { %10774 = vmatpush3.bf16.msra.mxu1 %v12230_v55 }
 0x7b6   :  { %10775 = vmatprep.subr.bf16.mxu1 %v12237_v57 }
 0x7b9   :  { %10776 = vmatpush3.bf16.msra.mxu1 %v12231_v31 }
 0x7ba   :  { %10781 = vmatprep.subr.bf16.mxu1 %v12237_v57 }
 0x86f   :  { %v10741_v58 = vpop.f32.mrb[32].mxu1 }
 0x870   :  { %v10742_v33 = vpop.f32.mrb[33].mxu1 }
 0x871   :  { %v10743_v34 = vadd.f32 %v10742_v33, %v10741_v58  ;;  %v10744_v37 = vpop.f32.mrb[34].mxu1 }
 0x872   :  { %v10745_v39 = vpop.f32.mrb[35].mxu1 }
 0x873   :  { %v9301_v41 = vadd.f32 %v10743_v34, %v10693_v16 }
 0x875   :  { %v9306_v8 = vmax.f32 %v9301_v41, 0.0 }
 0x877   :  { %v9307_v44 = vpack.c.bf16 %v9306_v8, %v9306_v8 }
 0x879   :  { %10778 = vmatmul.mubr.bf16.vlgmr.msra.gmra.mrb[36].mxu1 %v9307_v44 }
 0x87a   :  { %10782 = vmatpush3.bf16.msra.mxu1 %v12232_v43  ;;  %10789 = vmatprep.mubr.msk.bf16.mxu1 %vm12238_vm0, %v12237_v57 }
 0x87b   :  { %10783 = vmatprep.subr.bf16.mxu1 %v12237_v57 }
 0x87e   :  { %10784 = vmatpush3.bf16.msra.mxu1 %v12233_v45 }
 0x87f   :  { %10785 = vmatprep.subr.bf16.mxu1 %v12237_v57 }
 0x882   :  { %10786 = vmatpush3.bf16.msra.mxu1 %v12234_v1 }
 0x883   :  { %10787 = vmatprep.subr.bf16.mxu1 %v12237_v57 }
 0x886   :  { %10788 = vmatpush3.bf16.msra.mxu1 %v12235_v46 }
 0x94c   :  { %v9413_v48 = vpop.f32.mrb[36].mxu1 }
 0x94d   :  { %v9414_v38 = vadd.f32 %v10710_v47, %v9413_v48  ;;  %v10779_v49 = vpop.f32.mrb[37].mxu1 }
 0x94e   :  { %v9416_v60 = vpop.f32.mrb[38].mxu1 }
 0x94f   :  { %v9419_v63 = vmax.f32 %v9414_v38, 0.0  ;;  %v10780_v5 = vpop.f32.mrb[39].mxu1 }
 0x951   :  { %v9420_v7 = vpack.c.bf16 %v9419_v63, %v9419_v63 }
 0x953   :  { %10790 = vmatmul.mubr.msk.bf16.vlgmr.msra.gmra.mrb[40].mxu1 %vm9460_vm1, %v9420_v7 }
 0xa26   :  { %v9498_v51 = vpop.f32.mrb[40].mxu1 }
 0xa27   :  { %v9499_v12 = vadd.f32 %v10719_v62, %v9498_v51  ;;  %v10791_v13 = vpop.f32.mrb[41].mxu1 }
 0xa28   :  { %v9501_v14 = vpop.f32.mrb[42].mxu1 }
 0xa29   :  { %9504 = vst [vmem:[%s16286_s15] sm:$0xff] %v9499_v12  ;;  %v10792_v0 = vpop.f32.mrb[43].mxu1 }

// kernel: _lambda_.1
= control target key start
LH: loop header
LB: loop body
LE: loop exit
PB: predicated region body
PF: predicated region fallthrough
CT: control target
= control target key end

     0   :  { %v12236_v1 = vmov 0   ;;  %vm12238_vm0 = vmmov 0   ;;  %vm9460_vm1 = vcmask 523264   ;;  %s16271_s1 = inlined_call_operand.vmem [shape: bf16[640,1280], index: 1, kind: input, shape index: {}]   ;;  %s16272_s0 = inlined_call_operand.vmem [shape: f32[8,640], index: 0, kind: input, shape index: {}]   ;;  %s16273_s3 = inlined_call_operand.vmem [shape: bf16[640,1280], index: 3, kind: input, shape index: {}]   ;;  %s16274_s2 = inlined_call_operand.vmem [shape: f32[1,640], index: 2, kind: input, shape index: {}]   ;;  %s16275_s5 = inlined_call_operand.vmem [shape: bf16[640,1024], index: 5, kind: input, shape index: {}]   ;;  %s16276_s4 = inlined_call_operand.vmem [shape: f32[1,640], index: 4, kind: input, shape index: {}]   ;;  %s16277_s7 = inlined_call_operand.vmem [shape: bf16[512,256], index: 7, kind: input, shape index: {}]   ;;  %s16278_s9 = inlined_call_operand.vmem [shape: bf16[256,128], index: 9, kind: input, shape index: {}]   ;;  %s16279_s6 = inlined_call_operand.vmem [shape: f32[1,512], index: 6, kind: input, shape index: {}]   ;;  %s16280_s11 = inlined_call_operand.vmem [shape: bf16[128,64], index: 11, kind: input, shape index: {}]   ;;  %s16281_s8 = inlined_call_operand.vmem [shape: f32[1,256], index: 8, kind: input, shape index: {}]   ;;  %s16282_s13 = inlined_call_operand.vmem [shape: bf16[64,128], index: 13, kind: input, shape index: {}]   ;;  %s16283_s10 = inlined_call_operand.vmem [shape: f32[1,128], index: 10, kind: input, shape index: {}]   ;;  %s16284_s12 = inlined_call_operand.vmem [shape: f32[1,64], index: 12, kind: input, shape index: {}]   ;;  %s16285_s14 = inlined_call_operand.vmem [shape: f32[1,128], index: 14, kind: input, shape index: {}]   ;;  %s16286_s15 = inlined_call_operand.vmem [shape: f32[8,128], index: 15, kind: output, shape index: {}]  }
   0x1   :  { %v10912_v0 = vld [vmem:[%s16271_s1 + $0x4] ss:$40 sps:$4 sm:$0xff]   ;;  %2575 = vmatprep.mubr.bf16.mxu1 %v12236_v1  ;;  %v10916_v3 = vld [vmem:[%s16271_s1] ss:$40 sps:$4 sm:$0xff]   ;;  %v10918_v5 = vld [vmem:[%s16271_s1 + $0x54] ss:$40 sps:$4 sm:$0xff]  }
   0x2   :  { %v10914_v2 = vld [vmem:[%s16271_s1 + $0xa04] ss:$40 sps:$4 sm:$0xff]   ;;  %2461 = vmatprep.subr.bf16.mxu0 %v10912_v0  ;;  %v10917_v4 = vld [vmem:[%s16271_s1 + $0xa00] ss:$40 sps:$4 sm:$0xff]   ;;  %v10920_v6 = vld [vmem:[%s16271_s1 + $0xa54] ss:$40 sps:$4 sm:$0xff]  }
   0x3   :  { %2543 = vmatprep.subr.bf16.mxu1 %v10914_v2  ;;  %2462 = vmatpush1.bf16.msra.mxu0 %v10916_v3  ;;  %v10922_v7 = vld [vmem:[%s16271_s1 + $0x50] ss:$40 sps:$4 sm:$0xff]   ;;  %v10924_v9 = vld [vmem:[%s16271_s1 + $0xa4] ss:$40 sps:$4 sm:$0xff]   ;;  %v10928_v11 = vld [vmem:[%s16271_s1 + $0xa0] ss:$40 sps:$4 sm:$0xff]  }
   0x4   :  { %2544 = vmatpush1.bf16.msra.mxu1 %v10917_v4  ;;  %2463 = vmatprep.subr.bf16.mxu0 %v10918_v5  ;;  %v10923_v8 = vld [vmem:[%s16271_s1 + $0xa50] ss:$40 sps:$4 sm:$0xff]   ;;  %v10926_v10 = vld [vmem:[%s16271_s1 + $0xaa4] ss:$40 sps:$4 sm:$0xff]   ;;  %v10929_v12 = vld [vmem:[%s16271_s1 + $0xaa0] ss:$40 sps:$4 sm:$0xff]  }
   0x5   :  { %2545 = vmatprep.subr.bf16.mxu1 %v10920_v6  ;;  %v10930_v13 = vld [vmem:[%s16271_s1 + $0xf4] ss:$40 sps:$4 sm:$0xff]   ;;  %v10934_v15 = vld [vmem:[%s16271_s1 + $0xf0] ss:$40 sps:$4 sm:$0xff]   ;;  %v10936_v17 = vld [vmem:[%s16271_s1 + $0x144] ss:$40 sps:$4 sm:$0xff]  }
   0x6   :  { %v10932_v14 = vld [vmem:[%s16271_s1 + $0xaf4] ss:$40 sps:$4 sm:$0xff]   ;;  %v10935_v16 = vld [vmem:[%s16271_s1 + $0xaf0] ss:$40 sps:$4 sm:$0xff]   ;;  %v10938_v18 = vld [vmem:[%s16271_s1 + $0xb44] ss:$40 sps:$4 sm:$0xff]  }
   0x7   :  { %2464 = vmatpush1.bf16.msra.mxu0 %v10922_v7  ;;  %v10940_v19 = vld [vmem:[%s16271_s1 + $0x140] ss:$40 sps:$4 sm:$0xff]   ;;  %v10942_v21 = vld [vmem:[%s16271_s1 + $0x194] ss:$40 sps:$4 sm:$0xff]   ;;  %v10946_v23 = vld [vmem:[%s16271_s1 + $0x190] ss:$40 sps:$4 sm:$0xff]  }
   0x8   :  { %2546 = vmatpush1.bf16.msra.mxu1 %v10923_v8  ;;  %2465 = vmatprep.subr.bf16.mxu0 %v10924_v9  ;;  %v10941_v20 = vld [vmem:[%s16271_s1 + $0xb40] ss:$40 sps:$4 sm:$0xff]   ;;  %v10944_v22 = vld [vmem:[%s16271_s1 + $0xb94] ss:$40 sps:$4 sm:$0xff]   ;;  %v10947_v24 = vld [vmem:[%s16271_s1 + $0xb90] ss:$40 sps:$4 sm:$0xff]  }
   0x9   :  { %2547 = vmatprep.subr.bf16.mxu1 %v10926_v10  ;;  %v10948_v25 = vld [vmem:[%s16271_s1 + $0x1e4] ss:$40 sps:$4 sm:$0xff]   ;;  %v10952_v27 = vld [vmem:[%s16271_s1 + $0x1e0] ss:$40 sps:$4 sm:$0xff]   ;;  %v10954_v29 = vld [vmem:[%s16271_s1 + $0x234] ss:$40 sps:$4 sm:$0xff]  }
   0xa   :  { %v10950_v26 = vld [vmem:[%s16271_s1 + $0xbe4] ss:$40 sps:$4 sm:$0xff]   ;;  %v10953_v28 = vld [vmem:[%s16271_s1 + $0xbe0] ss:$40 sps:$4 sm:$0xff]   ;;  %v10956_v30 = vld [vmem:[%s16271_s1 + $0xc34] ss:$40 sps:$4 sm:$0xff]  }
   0xb   :  { %2466 = vmatpush1.bf16.msra.mxu0 %v10928_v11  ;;  %v10958_v31 = vld [vmem:[%s16271_s1 + $0x230] ss:$40 sps:$4 sm:$0xff]   ;;  %v55_v33 = vld [vmem:[%s16272_s0 + $0x20] sm:$0xff]  ;;  %v10964_v35 = vld [vmem:[%s16271_s1 + $0xc] ss:$40 sps:$4 sm:$0xff]  }
   0xc   :  { %2548 = vmatpush1.bf16.msra.mxu1 %v10929_v12  ;;  %2467 = vmatprep.subr.bf16.mxu0 %v10930_v13  ;;  %v10959_v32 = vld [vmem:[%s16271_s1 + $0xc30] ss:$40 sps:$4 sm:$0xff]   ;;  %v10960_v34 = vld [vmem:[%s16271_s1 + $0x284] ss:$40 sps:$4 sm:$0xff]   ;;  %v10965_v37 = vld [vmem:[%s16271_s1 + $0x280] ss:$40 sps:$4 sm:$0xff]   ;;  %v12431_v38 = vpack.c.bf16 %v55_v33, %v55_v33 }
   0xd   :  { %2549 = vmatprep.subr.bf16.mxu1 %v10932_v14  ;;  %v10962_v36 = vld [vmem:[%s16271_s1 + $0x8] ss:$40 sps:$4 sm:$0xff]   ;;  %v10966_v39 = vld [vmem:[%s16271_s1 + $0x2d4] ss:$40 sps:$4 sm:$0xff]   ;;  %v10968_v41 = vld [vmem:[%s16271_s1 + $0x58] ss:$40 sps:$4 sm:$0xff]  }
   0xe   :  { %v10970_v40 = vld [vmem:[%s16271_s1 + $0x5c] ss:$40 sps:$4 sm:$0xff]   ;;  %v10971_v42 = vld [vmem:[%s16271_s1 + $0x2d0] ss:$40 sps:$4 sm:$0xff]   ;;  %v10976_v44 = vld [vmem:[%s16271_s1 + $0xac] ss:$40 sps:$4 sm:$0xff]  }
   0xf   :  { %2468 = vmatpush1.bf16.msra.mxu0 %v10934_v15  ;;  %v10972_v43 = vld [vmem:[%s16271_s1 + $0x324] ss:$40 sps:$4 sm:$0xff]   ;;  %v10974_v45 = vld [vmem:[%s16271_s1 + $0xa8] ss:$40 sps:$4 sm:$0xff]   ;;  %v10978_v47 = vld [vmem:[%s16271_s1 + $0x374] ss:$40 sps:$4 sm:$0xff]  }
  0x10   :  { %2550 = vmatpush1.bf16.msra.mxu1 %v10935_v16  ;;  %2469 = vmatprep.subr.bf16.mxu0 %v10936_v17  ;;  %v10977_v46 = vld [vmem:[%s16271_s1 + $0x320] ss:$40 sps:$4 sm:$0xff]   ;;  %v10982_v48 = vld [vmem:[%s16271_s1 + $0xfc] ss:$40 sps:$4 sm:$0xff]   ;;  %v10983_v51 = vld [vmem:[%s16271_s1 + $0x370] ss:$40 sps:$4 sm:$0xff]  }
  0x11   :  { %2551 = vmatprep.subr.bf16.mxu1 %v10938_v18  ;;  %v52_v49 = vld [vmem:[%s16272_s0 + $0x8] sm:$0xff]  ;;  %v10980_v50 = vld [vmem:[%s16271_s1 + $0xf8] ss:$40 sps:$4 sm:$0xff]   ;;  %v10990_v57 = vld [vmem:[%s16271_s1 + $0x414] ss:$40 sps:$4 sm:$0xff]  }
  0x12   :  { %v12473_v52 = vpack.c.bf16 %v52_v49, %v52_v49  ;;  %v10984_v53 = vld [vmem:[%s16271_s1 + $0x3c4] ss:$40 sps:$4 sm:$0xff]   ;;  %v10986_v55 = vld [vmem:[%s16271_s1 + $0x148] ss:$40 sps:$4 sm:$0xff]   ;;  %v10992_v59 = vld [vmem:[%s16271_s1 + $0x198] ss:$40 sps:$4 sm:$0xff]  }
  0x13   :  { %2470 = vmatpush1.bf16.msra.mxu0 %v10940_v19  ;;  %v10988_v54 = vld [vmem:[%s16271_s1 + $0x14c] ss:$40 sps:$4 sm:$0xff]   ;;  %v10989_v56 = vld [vmem:[%s16271_s1 + $0x3c0] ss:$40 sps:$4 sm:$0xff]   ;;  %v10994_v58 = vld [vmem:[%s16271_s1 + $0x19c] ss:$40 sps:$4 sm:$0xff]  }
  0x14   :  { %2552 = vmatpush1.bf16.msra.mxu1 %v10941_v20  ;;  %2471 = vmatprep.subr.bf16.mxu0 %v10942_v21  ;;  %v10995_v60 = vld [vmem:[%s16271_s1 + $0x410] ss:$40 sps:$4 sm:$0xff]   ;;  %v10996_v61 = vld [vmem:[%s16271_s1 + $0x464] ss:$40 sps:$4 sm:$0xff]   ;;  %v11001_v0 = vld [vmem:[%s16271_s1 + $0x460] ss:$40 sps:$4 sm:$0xff]  }
  0x15   :  { %2553 = vmatprep.subr.bf16.mxu1 %v10944_v22  ;;  %2493 = vmatprep.mubr.bf16.mxu0 %v12473_v52  ;;  %v11000_v62 = vld [vmem:[%s16271_s1 + $0x1ec] ss:$40 sps:$4 sm:$0xff]   ;;  %v10998_v63 = vld [vmem:[%s16271_s1 + $0x1e8] ss:$40 sps:$4 sm:$0xff]   ;;  %v11006_v3 = vld [vmem:[%s16271_s1 + $0x23c] ss:$40 sps:$4 sm:$0xff]  }
  0x16   :  { %v11002_v2 = vld [vmem:[%s16271_s1 + $0x4b4] ss:$40 sps:$4 sm:$0xff]   ;;  %v11004_v4 = vld [vmem:[%s16271_s1 + $0x238] ss:$40 sps:$4 sm:$0xff]   ;;  %v11010_v6 = vld [vmem:[%s16271_s1 + $0x504] ss:$40 sps:$4 sm:$0xff]  }
  0x17   :  { %2472 = vmatpush1.bf16.msra.mxu0 %v10946_v23  ;;  %v11007_v5 = vld [vmem:[%s16271_s1 + $0x4b0] ss:$40 sps:$4 sm:$0xff]   ;;  %v51_v7 = vld [vmem:[%s16272_s0] sm:$0xff]  ;;  %v11013_v8 = vld [vmem:[%s16271_s1 + $0x28c] ss:$40 sps:$4 sm:$0xff]  }
  0x18   :  { %2554 = vmatpush1.bf16.msra.mxu1 %v10947_v24  ;;  %2473 = vmatprep.subr.bf16.mxu0 %v10948_v25  ;;  %v11008_v9 = vld [vmem:[%s16271_s1 + $0x500] ss:$40 sps:$4 sm:$0xff]   ;;  %v12537_v10 = vpack.c.bf16 %v51_v7, %v51_v7  ;;  %v11016_v12 = vld [vmem:[%s16271_s1 + $0x554] ss:$40 sps:$4 sm:$0xff]   ;;  %v11014_v14 = vld [vmem:[%s16271_s1 + $0x550] ss:$40 sps:$4 sm:$0xff]  }
  0x19   :  { %2555 = vmatprep.subr.bf16.mxu1 %v10950_v26  ;;  %v11011_v11 = vld [vmem:[%s16271_s1 + $0x288] ss:$40 sps:$4 sm:$0xff]   ;;  %v11019_v13 = vld [vmem:[%s16271_s1 + $0x2dc] ss:$40 sps:$4 sm:$0xff]   ;;  %v11017_v15 = vld [vmem:[%s16271_s1 + $0x2d8] ss:$40 sps:$4 sm:$0xff]  }
  0x1a   :  { %v11022_v16 = vld [vmem:[%s16271_s1 + $0x5a4] ss:$40 sps:$4 sm:$0xff]   ;;  %v11020_v18 = vld [vmem:[%s16271_s1 + $0x5a0] ss:$40 sps:$4 sm:$0xff]   ;;  %v11028_v20 = vld [vmem:[%s16271_s1 + $0x5f4] ss:$40 sps:$4 sm:$0xff]  }
  0x1b   :  { %2474 = vmatpush1.bf16.msra.mxu0 %v10952_v27  ;;  %v11025_v17 = vld [vmem:[%s16271_s1 + $0x32c] ss:$40 sps:$4 sm:$0xff]   ;;  %v11023_v19 = vld [vmem:[%s16271_s1 + $0x328] ss:$40 sps:$4 sm:$0xff]   ;;  %v11031_v21 = vld [vmem:[%s16271_s1 + $0x37c] ss:$40 sps:$4 sm:$0xff]  }
  0x1c   :  { %2556 = vmatpush1.bf16.msra.mxu1 %v10953_v28  ;;  %2475 = vmatprep.subr.bf16.mxu0 %v10954_v29  ;;  %v11026_v22 = vld [vmem:[%s16271_s1 + $0x5f0] ss:$40 sps:$4 sm:$0xff]   ;;  %v11034_v24 = vld [vmem:[%s16271_s1 + $0x644] ss:$40 sps:$4 sm:$0xff]   ;;  %v11032_v26 = vld [vmem:[%s16271_s1 + $0x640] ss:$40 sps:$4 sm:$0xff]  }
  0x1d   :  { %2557 = vmatprep.subr.bf16.mxu1 %v10956_v30  ;;  %v11029_v23 = vld [vmem:[%s16271_s1 + $0x378] ss:$40 sps:$4 sm:$0xff]   ;;  %v11037_v25 = vld [vmem:[%s16271_s1 + $0x3cc] ss:$40 sps:$4 sm:$0xff]   ;;  %v11035_v27 = vld [vmem:[%s16271_s1 + $0x3c8] ss:$40 sps:$4 sm:$0xff]  }
  0x1e   :  { %v11040_v28 = vld [vmem:[%s16271_s1 + $0x694] ss:$40 sps:$4 sm:$0xff]   ;;  %v11038_v30 = vld [vmem:[%s16271_s1 + $0x690] ss:$40 sps:$4 sm:$0xff]   ;;  %v11092_v7 = vld [vmem:[%s16271_s1 + $0x960] ss:$40 sps:$4 sm:$0xff]  }
  0x1f   :  { %2476 = vmatpush1.bf16.msra.mxu0 %v10958_v31  ;;  %v11043_v29 = vld [vmem:[%s16271_s1 + $0x41c] ss:$40 sps:$4 sm:$0xff]   ;;  %v11041_v31 = vld [vmem:[%s16271_s1 + $0x418] ss:$40 sps:$4 sm:$0xff]   ;;  %v11049_v33 = vld [vmem:[%s16271_s1 + $0x46c] ss:$40 sps:$4 sm:$0xff]  }
  0x20   :  { %2558 = vmatpush1.bf16.msra.mxu1 %v10959_v32  ;;  %2477 = vmatprep.subr.bf16.mxu0 %v10960_v34  ;;  %v11046_v32 = vld [vmem:[%s16271_s1 + $0x6e4] ss:$40 sps:$4 sm:$0xff]   ;;  %v54_v34 = vld [vmem:[%s16272_s0 + $0x18] sm:$0xff] }
  0x21   :  { %2584 = vmatprep.subr.bf16.mxu1 %v10964_v35  ;;  %v11044_v35 = vld [vmem:[%s16271_s1 + $0x6e0] ss:$40 sps:$4 sm:$0xff]   ;;  %v11062_v49 = vld [vmem:[%s16271_s1 + $0x7d0] ss:$40 sps:$4 sm:$0xff]  }
  0x23   :  { %2576 = vmatmul.mubr.bf16.vlgmr.msra.gmra.mrb[0].mxu1 %v12431_v38  ;;  %2478 = vmatpush1.bf16.msra.mxu0 %v10965_v37  ;;  %v11047_v37 = vld [vmem:[%s16271_s1 + $0x468] ss:$40 sps:$4 sm:$0xff]  }
  0x24   :  { %2585 = vmatpush1.bf16.msra.mxu1 %v10962_v36  ;;  %2479 = vmatprep.subr.bf16.mxu0 %v10966_v39  ;;  %v12615_v36 = vpack.c.bf16 %v54_v34, %v54_v34  ;;  %v11052_v39 = vld [vmem:[%s16271_s1 + $0x734] ss:$40 sps:$4 sm:$0xff]   ;;  %v11128_v34 = vld [vmem:[%s16271_s1 + $0x8c8] ss:$40 sps:$4 sm:$0xff]  }
  0x25   :  { %2586 = vmatprep.subr.bf16.mxu1 %v10970_v40  ;;  %2616 = vmatprep.mubr.bf16.mxu1 %v12473_v52  ;;  %v11055_v40 = vld [vmem:[%s16271_s1 + $0x4bc] ss:$40 sps:$4 sm:$0xff]  }
  0x27   :  { %2480 = vmatpush1.bf16.msra.mxu0 %v10971_v42  ;;  %v11053_v42 = vld [vmem:[%s16271_s1 + $0x4b8] ss:$40 sps:$4 sm:$0xff]  }
  0x28   :  { %2587 = vmatpush1.bf16.msra.mxu1 %v10968_v41  ;;  %2481 = vmatprep.subr.bf16.mxu0 %v10972_v43  ;;  %v11050_v41 = vld [vmem:[%s16271_s1 + $0x730] ss:$40 sps:$4 sm:$0xff]   ;;  %v11058_v43 = vld [vmem:[%s16271_s1 + $0x784] ss:$40 sps:$4 sm:$0xff]  }
  0x29   :  { %2588 = vmatprep.subr.bf16.mxu1 %v10976_v44  ;;  %v11061_v44 = vld [vmem:[%s16271_s1 + $0x50c] ss:$40 sps:$4 sm:$0xff]  }
  0x2b   :  { %2482 = vmatpush1.bf16.msra.mxu0 %v10977_v46  ;;  %v11059_v46 = vld [vmem:[%s16271_s1 + $0x508] ss:$40 sps:$4 sm:$0xff]  }
  0x2c   :  { %2589 = vmatpush1.bf16.msra.mxu1 %v10974_v45  ;;  %2483 = vmatprep.subr.bf16.mxu0 %v10978_v47  ;;  %v11056_v45 = vld [vmem:[%s16271_s1 + $0x780] ss:$40 sps:$4 sm:$0xff]   ;;  %v11064_v47 = vld [vmem:[%s16271_s1 + $0x7d4] ss:$40 sps:$4 sm:$0xff]  }
  0x2d   :  { %2590 = vmatprep.subr.bf16.mxu1 %v10982_v48  ;;  %v11067_v48 = vld [vmem:[%s16271_s1 + $0x55c] ss:$40 sps:$4 sm:$0xff]  }
  0x2f   :  { %2484 = vmatpush1.bf16.msra.mxu0 %v10983_v51  ;;  %v11070_v51 = vld [vmem:[%s16271_s1 + $0x824] ss:$40 sps:$4 sm:$0xff]  }
  0x30   :  { %2591 = vmatpush1.bf16.msra.mxu1 %v10980_v50  ;;  %2485 = vmatprep.subr.bf16.mxu0 %v10984_v53  ;;  %v11065_v50 = vld [vmem:[%s16271_s1 + $0x558] ss:$40 sps:$4 sm:$0xff]   ;;  %v11073_v53 = vld [vmem:[%s16271_s1 + $0x5ac] ss:$40 sps:$4 sm:$0xff]  }
  0x31   :  { %2592 = vmatprep.subr.bf16.mxu1 %v10988_v54  ;;  %v11068_v54 = vld [vmem:[%s16271_s1 + $0x820] ss:$40 sps:$4 sm:$0xff]  }
  0x33   :  { %2486 = vmatpush1.bf16.msra.mxu0 %v10989_v56  ;;  %v11076_v56 = vld [vmem:[%s16271_s1 + $0x874] ss:$40 sps:$4 sm:$0xff]  }
  0x34   :  { %2593 = vmatpush1.bf16.msra.mxu1 %v10986_v55  ;;  %2487 = vmatprep.subr.bf16.mxu0 %v10990_v57  ;;  %v11071_v55 = vld [vmem:[%s16271_s1 + $0x5a8] ss:$40 sps:$4 sm:$0xff]   ;;  %v11079_v57 = vld [vmem:[%s16271_s1 + $0x5fc] ss:$40 sps:$4 sm:$0xff]  }
  0x35   :  { %2594 = vmatprep.subr.bf16.mxu1 %v10994_v58  ;;  %v11074_v58 = vld [vmem:[%s16271_s1 + $0x870] ss:$40 sps:$4 sm:$0xff]  }
  0x37   :  { %2488 = vmatpush1.bf16.msra.mxu0 %v10995_v60  ;;  %v11082_v60 = vld [vmem:[%s16271_s1 + $0x8c4] ss:$40 sps:$4 sm:$0xff]  }
  0x38   :  { %2595 = vmatpush1.bf16.msra.mxu1 %v10992_v59  ;;  %2489 = vmatprep.subr.bf16.mxu0 %v10996_v61  ;;  %v11077_v59 = vld [vmem:[%s16271_s1 + $0x5f8] ss:$40 sps:$4 sm:$0xff]   ;;  %v11085_v61 = vld [vmem:[%s16271_s1 + $0x64c] ss:$40 sps:$4 sm:$0xff]  }
  0x39   :  { %2596 = vmatprep.subr.bf16.mxu1 %v11000_v62  ;;  %v11080_v62 = vld [vmem:[%s16271_s1 + $0x8c0] ss:$40 sps:$4 sm:$0xff]  }
  0x3b   :  { %2490 = vmatpush1.bf16.msra.mxu0 %v11001_v0  ;;  %v11088_v0 = vld [vmem:[%s16271_s1 + $0x914] ss:$40 sps:$4 sm:$0xff]  }
  0x3c   :  { %2597 = vmatpush1.bf16.msra.mxu1 %v10998_v63  ;;  %2491 = vmatprep.subr.bf16.mxu0 %v11002_v2  ;;  %v11083_v63 = vld [vmem:[%s16271_s1 + $0x648] ss:$40 sps:$4 sm:$0xff]   ;;  %v11091_v2 = vld [vmem:[%s16271_s1 + $0x69c] ss:$40 sps:$4 sm:$0xff]  }
  0x3d   :  { %2598 = vmatprep.subr.bf16.mxu1 %v11006_v3  ;;  %v11086_v3 = vld [vmem:[%s16271_s1 + $0x910] ss:$40 sps:$4 sm:$0xff]  }
  0x3f   :  { %2492 = vmatpush1.bf16.msra.mxu0 %v11007_v5  ;;  %v11094_v5 = vld [vmem:[%s16271_s1 + $0x964] ss:$40 sps:$4 sm:$0xff]  }
  0x40   :  { %2599 = vmatpush1.bf16.msra.mxu1 %v11004_v4  ;;  %2502 = vmatprep.subr.bf16.mxu0 %v11010_v6  ;;  %v11089_v4 = vld [vmem:[%s16271_s1 + $0x698] ss:$40 sps:$4 sm:$0xff]   ;;  %v11097_v6 = vld [vmem:[%s16271_s1 + $0x6ec] ss:$40 sps:$4 sm:$0xff]  }
  0x41   :  { %2600 = vmatprep.subr.bf16.mxu1 %v11013_v8  ;;  %v11095_v8 = vld [vmem:[%s16271_s1 + $0x6e8] ss:$40 sps:$4 sm:$0xff]  }
  0x42   :  { %2494 = vmatmul.mubr.bf16.vlgmr.msra.gmra.mrb[0].mxu0 %v12537_v10 }
  0x43   :  { %2503 = vmatpush1.bf16.msra.mxu0 %v11008_v9  ;;  %2534 = vmatprep.mubr.bf16.mxu0 %v12615_v36  ;;  %v11100_v9 = vld [vmem:[%s16271_s1 + $0x9b4] ss:$40 sps:$4 sm:$0xff]  }
  0x44   :  { %2601 = vmatpush1.bf16.msra.mxu1 %v11011_v11  ;;  %2504 = vmatprep.subr.bf16.mxu0 %v11016_v12  ;;  %v11103_v11 = vld [vmem:[%s16271_s1 + $0x73c] ss:$40 sps:$4 sm:$0xff]   ;;  %v11098_v12 = vld [vmem:[%s16271_s1 + $0x9b0] ss:$40 sps:$4 sm:$0xff]  }
  0x45   :  { %2602 = vmatprep.subr.bf16.mxu1 %v11019_v13  ;;  %v11101_v13 = vld [vmem:[%s16271_s1 + $0x738] ss:$40 sps:$4 sm:$0xff]  }
  0x47   :  { %2505 = vmatpush1.bf16.msra.mxu0 %v11014_v14  ;;  %v53_v14 = vld [vmem:[%s16272_s0 + $0x10] sm:$0xff] }
  0x48   :  { %2603 = vmatpush1.bf16.msra.mxu1 %v11017_v15  ;;  %2506 = vmatprep.subr.bf16.mxu0 %v11022_v16  ;;  %v11106_v15 = vld [vmem:[%s16271_s1 + $0x78c] ss:$40 sps:$4 sm:$0xff]  }
  0x49   :  { %2604 = vmatprep.subr.bf16.mxu1 %v11025_v17  ;;  %v11109_v16 = vld [vmem:[%s16271_s1 + $0x14] ss:$40 sps:$4 sm:$0xff]   ;;  %v12740_v17 = vpack.c.bf16 %v53_v14, %v53_v14 }
  0x4a   :  { %v11193_v14 = vld [vmem:[%s16271_s1 + $0x474] ss:$40 sps:$4 sm:$0xff]  }
  0x4b   :  { %2507 = vmatpush1.bf16.msra.mxu0 %v11020_v18  ;;  %v11104_v18 = vld [vmem:[%s16271_s1 + $0x788] ss:$40 sps:$4 sm:$0xff]  }
  0x4c   :  { %2605 = vmatpush1.bf16.msra.mxu1 %v11023_v19  ;;  %2508 = vmatprep.subr.bf16.mxu0 %v11028_v20  ;;  %v11107_v19 = vld [vmem:[%s16271_s1 + $0x10] ss:$40 sps:$4 sm:$0xff]   ;;  %v11112_v20 = vld [vmem:[%s16271_s1 + $0x7dc] ss:$40 sps:$4 sm:$0xff]  }
  0x4d   :  { %2606 = vmatprep.subr.bf16.mxu1 %v11031_v21  ;;  %v11115_v21 = vld [vmem:[%s16271_s1 + $0x64] ss:$40 sps:$4 sm:$0xff]  }
  0x4f   :  { %2509 = vmatpush1.bf16.msra.mxu0 %v11026_v22  ;;  %v11110_v22 = vld [vmem:[%s16271_s1 + $0x7d8] ss:$40 sps:$4 sm:$0xff]  }
  0x50   :  { %2607 = vmatpush1.bf16.msra.mxu1 %v11029_v23  ;;  %2510 = vmatprep.subr.bf16.mxu0 %v11034_v24  ;;  %v11113_v23 = vld [vmem:[%s16271_s1 + $0x60] ss:$40 sps:$4 sm:$0xff]   ;;  %v11118_v24 = vld [vmem:[%s16271_s1 + $0x82c] ss:$40 sps:$4 sm:$0xff]  }
  0x51   :  { %2608 = vmatprep.subr.bf16.mxu1 %v11037_v25  ;;  %v11121_v25 = vld [vmem:[%s16271_s1 + $0xb4] ss:$40 sps:$4 sm:$0xff]  }
  0x53   :  { %2511 = vmatpush1.bf16.msra.mxu0 %v11032_v26  ;;  %v11116_v26 = vld [vmem:[%s16271_s1 + $0x828] ss:$40 sps:$4 sm:$0xff]  }
  0x54   :  { %2609 = vmatpush1.bf16.msra.mxu1 %v11035_v27  ;;  %2512 = vmatprep.subr.bf16.mxu0 %v11040_v28  ;;  %v11119_v27 = vld [vmem:[%s16271_s1 + $0xb0] ss:$40 sps:$4 sm:$0xff]   ;;  %v11124_v28 = vld [vmem:[%s16271_s1 + $0x87c] ss:$40 sps:$4 sm:$0xff]  }
  0x55   :  { %2610 = vmatprep.subr.bf16.mxu1 %v11043_v29  ;;  %v11127_v29 = vld [vmem:[%s16271_s1 + $0x104] ss:$40 sps:$4 sm:$0xff]  }
  0x57   :  { %2513 = vmatpush1.bf16.msra.mxu0 %v11038_v30  ;;  %v11122_v30 = vld [vmem:[%s16271_s1 + $0x878] ss:$40 sps:$4 sm:$0xff]  }
  0x58   :  { %2611 = vmatpush1.bf16.msra.mxu1 %v11041_v31  ;;  %2514 = vmatprep.subr.bf16.mxu0 %v11046_v32  ;;  %v11125_v31 = vld [vmem:[%s16271_s1 + $0x100] ss:$40 sps:$4 sm:$0xff]   ;;  %v11130_v32 = vld [vmem:[%s16271_s1 + $0x8cc] ss:$40 sps:$4 sm:$0xff]  }
  0x59   :  { %2612 = vmatprep.subr.bf16.mxu1 %v11049_v33  ;;  %v11133_v33 = vld [vmem:[%s16271_s1 + $0x154] ss:$40 sps:$4 sm:$0xff]  }
  0x5b   :  { %2515 = vmatpush1.bf16.msra.mxu0 %v11044_v35  ;;  %v11131_v35 = vld [vmem:[%s16271_s1 + $0x150] ss:$40 sps:$4 sm:$0xff]  }
  0x5c   :  { %2613 = vmatpush1.bf16.msra.mxu1 %v11047_v37  ;;  %2516 = vmatprep.subr.bf16.mxu0 %v11052_v39  ;;  %v11136_v37 = vld [vmem:[%s16271_s1 + $0x91c] ss:$40 sps:$4 sm:$0xff]  }
  0x5d   :  { %2614 = vmatprep.subr.bf16.mxu1 %v11055_v40  ;;  %v11139_v39 = vld [vmem:[%s16271_s1 + $0x1a4] ss:$40 sps:$4 sm:$0xff]   ;;  %v11134_v40 = vld [vmem:[%s16271_s1 + $0x918] ss:$40 sps:$4 sm:$0xff]  }
  0x5f   :  { %2517 = vmatpush1.bf16.msra.mxu0 %v11050_v41  ;;  %v11137_v41 = vld [vmem:[%s16271_s1 + $0x1a0] ss:$40 sps:$4 sm:$0xff]  }
  0x60   :  { %2615 = vmatpush1.bf16.msra.mxu1 %v11053_v42  ;;  %2518 = vmatprep.subr.bf16.mxu0 %v11058_v43  ;;  %v11142_v42 = vld [vmem:[%s16271_s1 + $0x96c] ss:$40 sps:$4 sm:$0xff]  }
  0x61   :  { %2625 = vmatprep.subr.bf16.mxu1 %v11061_v44  ;;  %v11145_v43 = vld [vmem:[%s16271_s1 + $0x1f4] ss:$40 sps:$4 sm:$0xff]   ;;  %v11140_v44 = vld [vmem:[%s16271_s1 + $0x968] ss:$40 sps:$4 sm:$0xff]  }
  0x63   :  { %2617 = vmatmul.mubr.bf16.vlgmr.msra.gmra.mrb[4].mxu1 %v12537_v10  ;;  %2519 = vmatpush1.bf16.msra.mxu0 %v11056_v45  ;;  %v11143_v45 = vld [vmem:[%s16271_s1 + $0x1f0] ss:$40 sps:$4 sm:$0xff]  }
  0x64   :  { %2626 = vmatpush1.bf16.msra.mxu1 %v11059_v46  ;;  %2520 = vmatprep.subr.bf16.mxu0 %v11064_v47  ;;  %v11148_v46 = vld [vmem:[%s16271_s1 + $0x9bc] ss:$40 sps:$4 sm:$0xff]  }
  0x65   :  { %2627 = vmatprep.subr.bf16.mxu1 %v11067_v48  ;;  %2657 = vmatprep.mubr.bf16.mxu1 %v12615_v36  ;;  %v11151_v47 = vld [vmem:[%s16271_s1 + $0x244] ss:$40 sps:$4 sm:$0xff]   ;;  %v11146_v48 = vld [vmem:[%s16271_s1 + $0x9b8] ss:$40 sps:$4 sm:$0xff]  }
  0x67   :  { %2521 = vmatpush1.bf16.msra.mxu0 %v11062_v49  ;;  %v11149_v49 = vld [vmem:[%s16271_s1 + $0x240] ss:$40 sps:$4 sm:$0xff]  }
  0x68   :  { %2628 = vmatpush1.bf16.msra.mxu1 %v11065_v50  ;;  %2522 = vmatprep.subr.bf16.mxu0 %v11070_v51  ;;  %v11154_v50 = vld [vmem:[%s16271_s1 + $0xa0c] ss:$40 sps:$4 sm:$0xff]  }
  0x69   :  { %2629 = vmatprep.subr.bf16.mxu1 %v11073_v53  ;;  %v11157_v51 = vld [vmem:[%s16271_s1 + $0x294] ss:$40 sps:$4 sm:$0xff]   ;;  %v11152_v53 = vld [vmem:[%s16271_s1 + $0xa08] ss:$40 sps:$4 sm:$0xff]  }
  0x6b   :  { %2523 = vmatpush1.bf16.msra.mxu0 %v11068_v54  ;;  %v11155_v54 = vld [vmem:[%s16271_s1 + $0x290] ss:$40 sps:$4 sm:$0xff]  }
  0x6c   :  { %2630 = vmatpush1.bf16.msra.mxu1 %v11071_v55  ;;  %2524 = vmatprep.subr.bf16.mxu0 %v11076_v56  ;;  %v11160_v55 = vld [vmem:[%s16271_s1 + $0xa5c] ss:$40 sps:$4 sm:$0xff]  }
  0x6d   :  { %2631 = vmatprep.subr.bf16.mxu1 %v11079_v57  ;;  %v11163_v56 = vld [vmem:[%s16271_s1 + $0x2e4] ss:$40 sps:$4 sm:$0xff]   ;;  %v11158_v57 = vld [vmem:[%s16271_s1 + $0xa58] ss:$40 sps:$4 sm:$0xff]  }
  0x6f   :  { %2525 = vmatpush1.bf16.msra.mxu0 %v11074_v58  ;;  %v11161_v58 = vld [vmem:[%s16271_s1 + $0x2e0] ss:$40 sps:$4 sm:$0xff]  }
  0x70   :  { %2632 = vmatpush1.bf16.msra.mxu1 %v11077_v59  ;;  %2526 = vmatprep.subr.bf16.mxu0 %v11082_v60  ;;  %v11166_v59 = vld [vmem:[%s16271_s1 + $0xaac] ss:$40 sps:$4 sm:$0xff]  }
  0x71   :  { %2633 = vmatprep.subr.bf16.mxu1 %v11085_v61  ;;  %v11169_v60 = vld [vmem:[%s16271_s1 + $0x334] ss:$40 sps:$4 sm:$0xff]   ;;  %v11164_v61 = vld [vmem:[%s16271_s1 + $0xaa8] ss:$40 sps:$4 sm:$0xff]  }
  0x73   :  { %2527 = vmatpush1.bf16.msra.mxu0 %v11080_v62  ;;  %v11167_v62 = vld [vmem:[%s16271_s1 + $0x330] ss:$40 sps:$4 sm:$0xff]  }
  0x74   :  { %2634 = vmatpush1.bf16.msra.mxu1 %v11083_v63  ;;  %2528 = vmatprep.subr.bf16.mxu0 %v11088_v0  ;;  %v11172_v63 = vld [vmem:[%s16271_s1 + $0xafc] ss:$40 sps:$4 sm:$0xff]  }
  0x75   :  { %2635 = vmatprep.subr.bf16.mxu1 %v11091_v2  ;;  %v11175_v0 = vld [vmem:[%s16271_s1 + $0x384] ss:$40 sps:$4 sm:$0xff]   ;;  %v11170_v2 = vld [vmem:[%s16271_s1 + $0xaf8] ss:$40 sps:$4 sm:$0xff]  }
  0x77   :  { %2529 = vmatpush1.bf16.msra.mxu0 %v11086_v3  ;;  %v11173_v3 = vld [vmem:[%s16271_s1 + $0x380] ss:$40 sps:$4 sm:$0xff]  }
  0x78   :  { %2636 = vmatpush1.bf16.msra.mxu1 %v11089_v4  ;;  %2530 = vmatprep.subr.bf16.mxu0 %v11094_v5  ;;  %v11178_v4 = vld [vmem:[%s16271_s1 + $0xb4c] ss:$40 sps:$4 sm:$0xff]  }
  0x79   :  { %2637 = vmatprep.subr.bf16.mxu1 %v11097_v6  ;;  %v11181_v5 = vld [vmem:[%s16271_s1 + $0x3d4] ss:$40 sps:$4 sm:$0xff]   ;;  %v11176_v6 = vld [vmem:[%s16271_s1 + $0xb48] ss:$40 sps:$4 sm:$0xff]  }
  0x7b   :  { %2531 = vmatpush1.bf16.msra.mxu0 %v11092_v7  ;;  %v11179_v7 = vld [vmem:[%s16271_s1 + $0x3d0] ss:$40 sps:$4 sm:$0xff]  }
  0x7c   :  { %2638 = vmatpush1.bf16.msra.mxu1 %v11095_v8  ;;  %2532 = vmatprep.subr.bf16.mxu0 %v11100_v9  ;;  %v11184_v8 = vld [vmem:[%s16271_s1 + $0xb9c] ss:$40 sps:$4 sm:$0xff]  }
  0x7d   :  { %2639 = vmatprep.subr.bf16.mxu1 %v11103_v11  ;;  %v11187_v9 = vld [vmem:[%s16271_s1 + $0x424] ss:$40 sps:$4 sm:$0xff]   ;;  %v11182_v11 = vld [vmem:[%s16271_s1 + $0xb98] ss:$40 sps:$4 sm:$0xff]  }
  0x7f   :  { %2533 = vmatpush1.bf16.msra.mxu0 %v11098_v12  ;;  %v11185_v12 = vld [vmem:[%s16271_s1 + $0x420] ss:$40 sps:$4 sm:$0xff]  }
  0x80   :  { %2640 = vmatpush1.bf16.msra.mxu1 %v11101_v13  ;;  %2707 = vmatprep.subr.bf16.mxu0 %v11109_v16  ;;  %v11190_v13 = vld [vmem:[%s16271_s1 + $0xbec] ss:$40 sps:$4 sm:$0xff]   ;;  %v11191_v16 = vld [vmem:[%s16271_s1 + $0x470] ss:$40 sps:$4 sm:$0xff]  }
  0x81   :  { %2641 = vmatprep.subr.bf16.mxu1 %v11106_v15  ;;  %v11188_v15 = vld [vmem:[%s16271_s1 + $0xbe8] ss:$40 sps:$4 sm:$0xff]  }
  0x82   :  { %2535 = vmatmul.mubr.bf16.vlgmr.msra.gmra.mrb[0].mxu0 %v12740_v17 }
  0x83   :  { %2708 = vmatpush1.bf16.msra.mxu0 %v11107_v19  ;;  %2739 = vmatprep.mubr.bf16.mxu0 %v12473_v52  ;;  %v11199_v19 = vld [vmem:[%s16271_s1 + $0x4c4] ss:$40 sps:$4 sm:$0xff]  }
  0x84   :  { %2642 = vmatpush1.bf16.msra.mxu1 %v11104_v18  ;;  %2709 = vmatprep.subr.bf16.mxu0 %v11115_v21  ;;  %v11196_v18 = vld [vmem:[%s16271_s1 + $0xc3c] ss:$40 sps:$4 sm:$0xff]   ;;  %v11197_v21 = vld [vmem:[%s16271_s1 + $0x4c0] ss:$40 sps:$4 sm:$0xff]  }
  0x85   :  { %2643 = vmatprep.subr.bf16.mxu1 %v11112_v20  ;;  %v11194_v20 = vld [vmem:[%s16271_s1 + $0xc38] ss:$40 sps:$4 sm:$0xff]  }
  0x87   :  { %2710 = vmatpush1.bf16.msra.mxu0 %v11113_v23  ;;  %v11205_v23 = vld [vmem:[%s16271_s1 + $0x1c] ss:$40 sps:$4 sm:$0xff]  }
  0x88   :  { %2644 = vmatpush1.bf16.msra.mxu1 %v11110_v22  ;;  %2711 = vmatprep.subr.bf16.mxu0 %v11121_v25  ;;  %v11202_v22 = vld [vmem:[%s16271_s1 + $0x514] ss:$40 sps:$4 sm:$0xff]   ;;  %v11203_v25 = vld [vmem:[%s16271_s1 + $0x18] ss:$40 sps:$4 sm:$0xff]  }
  0x89   :  { %2645 = vmatprep.subr.bf16.mxu1 %v11118_v24  ;;  %v11200_v24 = vld [vmem:[%s16271_s1 + $0x510] ss:$40 sps:$4 sm:$0xff]  }
  0x8b   :  { %2712 = vmatpush1.bf16.msra.mxu0 %v11119_v27  ;;  %v11211_v27 = vld [vmem:[%s16271_s1 + $0x6c] ss:$40 sps:$4 sm:$0xff]  }
  0x8c   :  { %2646 = vmatpush1.bf16.msra.mxu1 %v11116_v26  ;;  %2713 = vmatprep.subr.bf16.mxu0 %v11127_v29  ;;  %v11208_v26 = vld [vmem:[%s16271_s1 + $0x564] ss:$40 sps:$4 sm:$0xff]   ;;  %v11209_v29 = vld [vmem:[%s16271_s1 + $0x68] ss:$40 sps:$4 sm:$0xff]  }
  0x8d   :  { %2647 = vmatprep.subr.bf16.mxu1 %v11124_v28  ;;  %v11206_v28 = vld [vmem:[%s16271_s1 + $0x560] ss:$40 sps:$4 sm:$0xff]  }
  0x8f   :  { %2714 = vmatpush1.bf16.msra.mxu0 %v11125_v31  ;;  %v11217_v31 = vld [vmem:[%s16271_s1 + $0xbc] ss:$40 sps:$4 sm:$0xff]  }
  0x90   :  { %2648 = vmatpush1.bf16.msra.mxu1 %v11122_v30  ;;  %2715 = vmatprep.subr.bf16.mxu0 %v11133_v33  ;;  %v11214_v30 = vld [vmem:[%s16271_s1 + $0x5b4] ss:$40 sps:$4 sm:$0xff]   ;;  %v11215_v33 = vld [vmem:[%s16271_s1 + $0xb8] ss:$40 sps:$4 sm:$0xff]  }
  0x91   :  { %2649 = vmatprep.subr.bf16.mxu1 %v11130_v32  ;;  %v11212_v32 = vld [vmem:[%s16271_s1 + $0x5b0] ss:$40 sps:$4 sm:$0xff]  }
  0x93   :  { %2716 = vmatpush1.bf16.msra.mxu0 %v11131_v35  ;;  %v11223_v35 = vld [vmem:[%s16271_s1 + $0x10c] ss:$40 sps:$4 sm:$0xff]  }
  0x94   :  { %2650 = vmatpush1.bf16.msra.mxu1 %v11128_v34  ;;  %2717 = vmatprep.subr.bf16.mxu0 %v11139_v39  ;;  %v11220_v34 = vld [vmem:[%s16271_s1 + $0x604] ss:$40 sps:$4 sm:$0xff]   ;;  %v11221_v39 = vld [vmem:[%s16271_s1 + $0x108] ss:$40 sps:$4 sm:$0xff]  }
  0x95   :  { %2651 = vmatprep.subr.bf16.mxu1 %v11136_v37  ;;  %v11218_v37 = vld [vmem:[%s16271_s1 + $0x600] ss:$40 sps:$4 sm:$0xff]  }
  0x97   :  { %2718 = vmatpush1.bf16.msra.mxu0 %v11137_v41  ;;  %v11229_v41 = vld [vmem:[%s16271_s1 + $0x15c] ss:$40 sps:$4 sm:$0xff]  }
  0x98   :  { %2652 = vmatpush1.bf16.msra.mxu1 %v11134_v40  ;;  %2719 = vmatprep.subr.bf16.mxu0 %v11145_v43  ;;  %v11226_v40 = vld [vmem:[%s16271_s1 + $0x654] ss:$40 sps:$4 sm:$0xff]   ;;  %v11227_v43 = vld [vmem:[%s16271_s1 + $0x158] ss:$40 sps:$4 sm:$0xff]  }
  0x99   :  { %2653 = vmatprep.subr.bf16.mxu1 %v11142_v42  ;;  %v11224_v42 = vld [vmem:[%s16271_s1 + $0x650] ss:$40 sps:$4 sm:$0xff]  }
  0x9b   :  { %2720 = vmatpush1.bf16.msra.mxu0 %v11143_v45  ;;  %v11235_v45 = vld [vmem:[%s16271_s1 + $0x1ac] ss:$40 sps:$4 sm:$0xff]  }
  0x9c   :  { %2654 = vmatpush1.bf16.msra.mxu1 %v11140_v44  ;;  %2721 = vmatprep.subr.bf16.mxu0 %v11151_v47  ;;  %v11232_v44 = vld [vmem:[%s16271_s1 + $0x6a4] ss:$40 sps:$4 sm:$0xff]   ;;  %v11233_v47 = vld [vmem:[%s16271_s1 + $0x1a8] ss:$40 sps:$4 sm:$0xff]  }
  0x9d   :  { %2655 = vmatprep.subr.bf16.mxu1 %v11148_v46  ;;  %v11230_v46 = vld [vmem:[%s16271_s1 + $0x6a0] ss:$40 sps:$4 sm:$0xff]  }
  0x9f   :  { %2722 = vmatpush1.bf16.msra.mxu0 %v11149_v49  ;;  %v11241_v49 = vld [vmem:[%s16271_s1 + $0x1fc] ss:$40 sps:$4 sm:$0xff]  }
  0xa0   :  { %2656 = vmatpush1.bf16.msra.mxu1 %v11146_v48  ;;  %2723 = vmatprep.subr.bf16.mxu0 %v11157_v51  ;;  %v11238_v48 = vld [vmem:[%s16271_s1 + $0x6f4] ss:$40 sps:$4 sm:$0xff]   ;;  %v11239_v51 = vld [vmem:[%s16271_s1 + $0x1f8] ss:$40 sps:$4 sm:$0xff]  }
  0xa1   :  { %2666 = vmatprep.subr.bf16.mxu1 %v11154_v50  ;;  %v11236_v50 = vld [vmem:[%s16271_s1 + $0x6f0] ss:$40 sps:$4 sm:$0xff]  }
  0xa3   :  { %2658 = vmatmul.mubr.bf16.vlgmr.msra.gmra.mrb[4].mxu1 %v12740_v17  ;;  %2724 = vmatpush1.bf16.msra.mxu0 %v11155_v54  ;;  %v11247_v54 = vld [vmem:[%s16271_s1 + $0x24c] ss:$40 sps:$4 sm:$0xff]  }
  0xa4   :  { %2667 = vmatpush1.bf16.msra.mxu1 %v11152_v53  ;;  %2725 = vmatprep.subr.bf16.mxu0 %v11163_v56  ;;  %v11244_v53 = vld [vmem:[%s16271_s1 + $0x744] ss:$40 sps:$4 sm:$0xff]   ;;  %v11245_v56 = vld [vmem:[%s16271_s1 + $0x248] ss:$40 sps:$4 sm:$0xff]  }
  0xa5   :  { %2668 = vmatprep.subr.bf16.mxu1 %v11160_v55  ;;  %2698 = vmatprep.mubr.bf16.mxu1 %v12236_v1  ;;  %v11242_v55 = vld [vmem:[%s16271_s1 + $0x740] ss:$40 sps:$4 sm:$0xff]  }
  0xa7   :  { %2726 = vmatpush1.bf16.msra.mxu0 %v11161_v58  ;;  %v11253_v58 = vld [vmem:[%s16271_s1 + $0x29c] ss:$40 sps:$4 sm:$0xff]  }
  0xa8   :  { %2669 = vmatpush1.bf16.msra.mxu1 %v11158_v57  ;;  %2727 = vmatprep.subr.bf16.mxu0 %v11169_v60  ;;  %v11250_v57 = vld [vmem:[%s16271_s1 + $0x794] ss:$40 sps:$4 sm:$0xff]   ;;  %v11251_v60 = vld [vmem:[%s16271_s1 + $0x298] ss:$40 sps:$4 sm:$0xff]  }
  0xa9   :  { %2670 = vmatprep.subr.bf16.mxu1 %v11166_v59  ;;  %v11248_v59 = vld [vmem:[%s16271_s1 + $0x790] ss:$40 sps:$4 sm:$0xff]  }
  0xab   :  { %2728 = vmatpush1.bf16.msra.mxu0 %v11167_v62  ;;  %v11259_v62 = vld [vmem:[%s16271_s1 + $0x2ec] ss:$40 sps:$4 sm:$0xff]  }
  0xac   :  { %2671 = vmatpush1.bf16.msra.mxu1 %v11164_v61  ;;  %2729 = vmatprep.subr.bf16.mxu0 %v11175_v0  ;;  %v11256_v61 = vld [vmem:[%s16271_s1 + $0x7e4] ss:$40 sps:$4 sm:$0xff]   ;;  %v11257_v0 = vld [vmem:[%s16271_s1 + $0x2e8] ss:$40 sps:$4 sm:$0xff]  }
  0xad   :  { %2672 = vmatprep.subr.bf16.mxu1 %v11172_v63  ;;  %v11254_v63 = vld [vmem:[%s16271_s1 + $0x7e0] ss:$40 sps:$4 sm:$0xff]  }
  0xaf   :  { %2730 = vmatpush1.bf16.msra.mxu0 %v11173_v3  ;;  %v11265_v3 = vld [vmem:[%s16271_s1 + $0x33c] ss:$40 sps:$4 sm:$0xff]  }
  0xb0   :  { %2673 = vmatpush1.bf16.msra.mxu1 %v11170_v2  ;;  %2731 = vmatprep.subr.bf16.mxu0 %v11181_v5  ;;  %v11262_v2 = vld [vmem:[%s16271_s1 + $0x834] ss:$40 sps:$4 sm:$0xff]   ;;  %v11263_v5 = vld [vmem:[%s16271_s1 + $0x338] ss:$40 sps:$4 sm:$0xff]  }
  0xb1   :  { %2674 = vmatprep.subr.bf16.mxu1 %v11178_v4  ;;  %v11260_v4 = vld [vmem:[%s16271_s1 + $0x830] ss:$40 sps:$4 sm:$0xff]  }
  0xb3   :  { %2732 = vmatpush1.bf16.msra.mxu0 %v11179_v7  ;;  %v11271_v7 = vld [vmem:[%s16271_s1 + $0x38c] ss:$40 sps:$4 sm:$0xff]  }
  0xb4   :  { %2675 = vmatpush1.bf16.msra.mxu1 %v11176_v6  ;;  %2733 = vmatprep.subr.bf16.mxu0 %v11187_v9  ;;  %v11268_v6 = vld [vmem:[%s16271_s1 + $0x884] ss:$40 sps:$4 sm:$0xff]   ;;  %v11269_v9 = vld [vmem:[%s16271_s1 + $0x388] ss:$40 sps:$4 sm:$0xff]  }
  0xb5   :  { %2676 = vmatprep.subr.bf16.mxu1 %v11184_v8  ;;  %v11266_v8 = vld [vmem:[%s16271_s1 + $0x880] ss:$40 sps:$4 sm:$0xff]  }
  0xb7   :  { %2734 = vmatpush1.bf16.msra.mxu0 %v11185_v12  ;;  %v11277_v12 = vld [vmem:[%s16271_s1 + $0x3dc] ss:$40 sps:$4 sm:$0xff]  }
  0xb8   :  { %2677 = vmatpush1.bf16.msra.mxu1 %v11182_v11  ;;  %2735 = vmatprep.subr.bf16.mxu0 %v11193_v14  ;;  %v11274_v11 = vld [vmem:[%s16271_s1 + $0x8d4] ss:$40 sps:$4 sm:$0xff]   ;;  %v11275_v14 = vld [vmem:[%s16271_s1 + $0x3d8] ss:$40 sps:$4 sm:$0xff]  }
  0xb9   :  { %2678 = vmatprep.subr.bf16.mxu1 %v11190_v13  ;;  %v11272_v13 = vld [vmem:[%s16271_s1 + $0x8d0] ss:$40 sps:$4 sm:$0xff]  }
  0xbb   :  { %2736 = vmatpush1.bf16.msra.mxu0 %v11191_v16  ;;  %v11283_v16 = vld [vmem:[%s16271_s1 + $0x42c] ss:$40 sps:$4 sm:$0xff]  }
  0xbc   :  { %2679 = vmatpush1.bf16.msra.mxu1 %v11188_v15  ;;  %2737 = vmatprep.subr.bf16.mxu0 %v11199_v19  ;;  %v11280_v15 = vld [vmem:[%s16271_s1 + $0x924] ss:$40 sps:$4 sm:$0xff]   ;;  %v11281_v19 = vld [vmem:[%s16271_s1 + $0x428] ss:$40 sps:$4 sm:$0xff]  }
  0xbd   :  { %2680 = vmatprep.subr.bf16.mxu1 %v11196_v18  ;;  %v11278_v18 = vld [vmem:[%s16271_s1 + $0x920] ss:$40 sps:$4 sm:$0xff]  }
  0xbf   :  { %2738 = vmatpush1.bf16.msra.mxu0 %v11197_v21  ;;  %v11289_v21 = vld [vmem:[%s16271_s1 + $0x47c] ss:$40 sps:$4 sm:$0xff]  }
  0xc0   :  { %2681 = vmatpush1.bf16.msra.mxu1 %v11194_v20  ;;  %2748 = vmatprep.subr.bf16.mxu0 %v11202_v22  ;;  %v11286_v20 = vld [vmem:[%s16271_s1 + $0x974] ss:$40 sps:$4 sm:$0xff]   ;;  %v11284_v22 = vld [vmem:[%s16271_s1 + $0x970] ss:$40 sps:$4 sm:$0xff]  }
  0xc1   :  { %2830 = vmatprep.subr.bf16.mxu1 %v11205_v23  ;;  %v11287_v23 = vld [vmem:[%s16271_s1 + $0x478] ss:$40 sps:$4 sm:$0xff]  }
  0xc2   :  { %2740 = vmatmul.mubr.bf16.vlgmr.msra.gmra.mrb[4].mxu0 %v12537_v10 }
  0xc3   :  { %2699 = vmatmul.mubr.bf16.vlgmr.msra.gmra.mrb[4].mxu1 %v12431_v38  ;;  %2749 = vmatpush1.bf16.msra.mxu0 %v11200_v24 }
  0xc4   :  { %2831 = vmatpush1.bf16.msra.mxu1 %v11203_v25  ;;  %2750 = vmatprep.subr.bf16.mxu0 %v11208_v26  ;;  %v11292_v26 = vld [vmem:[%s16271_s1 + $0x9c4] ss:$40 sps:$4 sm:$0xff]  }
  0xc5   :  { %2832 = vmatprep.subr.bf16.mxu1 %v11211_v27  ;;  %2780 = vmatprep.mubr.bf16.mxu0 %v12615_v36  ;;  %v11295_v27 = vld [vmem:[%s16271_s1 + $0x4cc] ss:$40 sps:$4 sm:$0xff]  }
  0xc6   :  { %2862 = vmatprep.mubr.bf16.mxu1 %v12473_v52 }
  0xc7   :  { %2751 = vmatpush1.bf16.msra.mxu0 %v11206_v28 }
  0xc8   :  { %2833 = vmatpush1.bf16.msra.mxu1 %v11209_v29  ;;  %2752 = vmatprep.subr.bf16.mxu0 %v11214_v30  ;;  %v11290_v30 = vld [vmem:[%s16271_s1 + $0x9c0] ss:$40 sps:$4 sm:$0xff]  }
  0xc9   :  { %2834 = vmatprep.subr.bf16.mxu1 %v11217_v31  ;;  %v11293_v31 = vld [vmem:[%s16271_s1 + $0x4c8] ss:$40 sps:$4 sm:$0xff]  }
  0xcb   :  { %2753 = vmatpush1.bf16.msra.mxu0 %v11212_v32  ;;  %v11298_v32 = vld [vmem:[%s16271_s1 + $0xa14] ss:$40 sps:$4 sm:$0xff]  }
  0xcc   :  { %2835 = vmatpush1.bf16.msra.mxu1 %v11215_v33  ;;  %2754 = vmatprep.subr.bf16.mxu0 %v11220_v34  ;;  %v11301_v33 = vld [vmem:[%s16271_s1 + $0x51c] ss:$40 sps:$4 sm:$0xff]   ;;  %v11296_v34 = vld [vmem:[%s16271_s1 + $0xa10] ss:$40 sps:$4 sm:$0xff]  }
  0xcd   :  { %2836 = vmatprep.subr.bf16.mxu1 %v11223_v35  ;;  %v11299_v35 = vld [vmem:[%s16271_s1 + $0x518] ss:$40 sps:$4 sm:$0xff]  }
  0xcf   :  { %2755 = vmatpush1.bf16.msra.mxu0 %v11218_v37  ;;  %v11304_v37 = vld [vmem:[%s16271_s1 + $0xa64] ss:$40 sps:$4 sm:$0xff]  }
  0xd0   :  { %2837 = vmatpush1.bf16.msra.mxu1 %v11221_v39  ;;  %2756 = vmatprep.subr.bf16.mxu0 %v11226_v40  ;;  %v11307_v39 = vld [vmem:[%s16271_s1 + $0x56c] ss:$40 sps:$4 sm:$0xff]   ;;  %v11302_v40 = vld [vmem:[%s16271_s1 + $0xa60] ss:$40 sps:$4 sm:$0xff]  }
  0xd1   :  { %2838 = vmatprep.subr.bf16.mxu1 %v11229_v41  ;;  %v11305_v41 = vld [vmem:[%s16271_s1 + $0x568] ss:$40 sps:$4 sm:$0xff]  }
  0xd3   :  { %2757 = vmatpush1.bf16.msra.mxu0 %v11224_v42  ;;  %v11310_v42 = vld [vmem:[%s16271_s1 + $0xab4] ss:$40 sps:$4 sm:$0xff]  }
  0xd4   :  { %2839 = vmatpush1.bf16.msra.mxu1 %v11227_v43  ;;  %2758 = vmatprep.subr.bf16.mxu0 %v11232_v44  ;;  %v11313_v43 = vld [vmem:[%s16271_s1 + $0x5bc] ss:$40 sps:$4 sm:$0xff]   ;;  %v11308_v44 = vld [vmem:[%s16271_s1 + $0xab0] ss:$40 sps:$4 sm:$0xff]  }
  0xd5   :  { %2840 = vmatprep.subr.bf16.mxu1 %v11235_v45  ;;  %v11311_v45 = vld [vmem:[%s16271_s1 + $0x5b8] ss:$40 sps:$4 sm:$0xff]  }
  0xd7   :  { %2759 = vmatpush1.bf16.msra.mxu0 %v11230_v46  ;;  %v11316_v46 = vld [vmem:[%s16271_s1 + $0xb04] ss:$40 sps:$4 sm:$0xff]  }
  0xd8   :  { %2841 = vmatpush1.bf16.msra.mxu1 %v11233_v47  ;;  %2760 = vmatprep.subr.bf16.mxu0 %v11238_v48  ;;  %v11319_v47 = vld [vmem:[%s16271_s1 + $0x60c] ss:$40 sps:$4 sm:$0xff]   ;;  %v11314_v48 = vld [vmem:[%s16271_s1 + $0xb00] ss:$40 sps:$4 sm:$0xff]  }
  0xd9   :  { %2842 = vmatprep.subr.bf16.mxu1 %v11241_v49  ;;  %v11317_v49 = vld [vmem:[%s16271_s1 + $0x608] ss:$40 sps:$4 sm:$0xff]  }
  0xdb   :  { %2761 = vmatpush1.bf16.msra.mxu0 %v11236_v50  ;;  %v11322_v50 = vld [vmem:[%s16271_s1 + $0xb54] ss:$40 sps:$4 sm:$0xff]  }
  0xdc   :  { %2843 = vmatpush1.bf16.msra.mxu1 %v11239_v51  ;;  %2762 = vmatprep.subr.bf16.mxu0 %v11244_v53  ;;  %v11325_v51 = vld [vmem:[%s16271_s1 + $0x65c] ss:$40 sps:$4 sm:$0xff]   ;;  %v11320_v53 = vld [vmem:[%s16271_s1 + $0xb50] ss:$40 sps:$4 sm:$0xff]  }
  0xdd   :  { %2844 = vmatprep.subr.bf16.mxu1 %v11247_v54  ;;  %v11323_v54 = vld [vmem:[%s16271_s1 + $0x658] ss:$40 sps:$4 sm:$0xff]  }
  0xdf   :  { %2763 = vmatpush1.bf16.msra.mxu0 %v11242_v55  ;;  %v11328_v55 = vld [vmem:[%s16271_s1 + $0xba4] ss:$40 sps:$4 sm:$0xff]  }
  0xe0   :  { %2845 = vmatpush1.bf16.msra.mxu1 %v11245_v56  ;;  %2764 = vmatprep.subr.bf16.mxu0 %v11250_v57  ;;  %v11331_v56 = vld [vmem:[%s16271_s1 + $0x6ac] ss:$40 sps:$4 sm:$0xff]   ;;  %v11326_v57 = vld [vmem:[%s16271_s1 + $0xba0] ss:$40 sps:$4 sm:$0xff]  }
  0xe1   :  { %2846 = vmatprep.subr.bf16.mxu1 %v11253_v58  ;;  %v11329_v58 = vld [vmem:[%s16271_s1 + $0x6a8] ss:$40 sps:$4 sm:$0xff]  }
  0xe3   :  { %2765 = vmatpush1.bf16.msra.mxu0 %v11248_v59  ;;  %v11334_v59 = vld [vmem:[%s16271_s1 + $0xbf4] ss:$40 sps:$4 sm:$0xff]  }
  0xe4   :  { %2847 = vmatpush1.bf16.msra.mxu1 %v11251_v60  ;;  %2766 = vmatprep.subr.bf16.mxu0 %v11256_v61  ;;  %v11337_v60 = vld [vmem:[%s16271_s1 + $0x6fc] ss:$40 sps:$4 sm:$0xff]   ;;  %v11332_v61 = vld [vmem:[%s16271_s1 + $0xbf0] ss:$40 sps:$4 sm:$0xff]  }
  0xe5   :  { %2848 = vmatprep.subr.bf16.mxu1 %v11259_v62  ;;  %v11335_v62 = vld [vmem:[%s16271_s1 + $0x6f8] ss:$40 sps:$4 sm:$0xff]  }
  0xe7   :  { %2767 = vmatpush1.bf16.msra.mxu0 %v11254_v63  ;;  %v11340_v63 = vld [vmem:[%s16271_s1 + $0xc44] ss:$40 sps:$4 sm:$0xff]  }
  0xe8   :  { %2849 = vmatpush1.bf16.msra.mxu1 %v11257_v0  ;;  %2768 = vmatprep.subr.bf16.mxu0 %v11262_v2  ;;  %v11343_v0 = vld [vmem:[%s16271_s1 + $0x74c] ss:$40 sps:$4 sm:$0xff]   ;;  %v11338_v2 = vld [vmem:[%s16271_s1 + $0xc40] ss:$40 sps:$4 sm:$0xff]  }
  0xe9   :  { %2850 = vmatprep.subr.bf16.mxu1 %v11265_v3  ;;  %v11341_v3 = vld [vmem:[%s16271_s1 + $0x748] ss:$40 sps:$4 sm:$0xff]  }
  0xeb   :  { %2769 = vmatpush1.bf16.msra.mxu0 %v11260_v4  ;;  %v11346_v4 = vld [vmem:[%s16271_s1 + $0x79c] ss:$40 sps:$4 sm:$0xff]  }
  0xec   :  { %2851 = vmatpush1.bf16.msra.mxu1 %v11263_v5  ;;  %2770 = vmatprep.subr.bf16.mxu0 %v11268_v6  ;;  %v11349_v5 = vld [vmem:[%s16271_s1 + $0x24] ss:$40 sps:$4 sm:$0xff]   ;;  %v11344_v6 = vld [vmem:[%s16271_s1 + $0x798] ss:$40 sps:$4 sm:$0xff]  }
  0xed   :  { %2852 = vmatprep.subr.bf16.mxu1 %v11271_v7  ;;  %v11347_v7 = vld [vmem:[%s16271_s1 + $0x20] ss:$40 sps:$4 sm:$0xff]  }
  0xef   :  { %2771 = vmatpush1.bf16.msra.mxu0 %v11266_v8  ;;  %v11352_v8 = vld [vmem:[%s16271_s1 + $0x7ec] ss:$40 sps:$4 sm:$0xff]  }
  0xf0   :  { %2853 = vmatpush1.bf16.msra.mxu1 %v11269_v9  ;;  %2772 = vmatprep.subr.bf16.mxu0 %v11274_v11  ;;  %v11355_v9 = vld [vmem:[%s16271_s1 + $0x74] ss:$40 sps:$4 sm:$0xff]   ;;  %v11350_v11 = vld [vmem:[%s16271_s1 + $0x7e8] ss:$40 sps:$4 sm:$0xff]  }
  0xf1   :  { %2854 = vmatprep.subr.bf16.mxu1 %v11277_v12  ;;  %v11353_v12 = vld [vmem:[%s16271_s1 + $0x70] ss:$40 sps:$4 sm:$0xff]  }
  0xf3   :  { %2773 = vmatpush1.bf16.msra.mxu0 %v11272_v13  ;;  %v11358_v13 = vld [vmem:[%s16271_s1 + $0x83c] ss:$40 sps:$4 sm:$0xff]  }
  0xf4   :  { %2855 = vmatpush1.bf16.msra.mxu1 %v11275_v14  ;;  %2774 = vmatprep.subr.bf16.mxu0 %v11280_v15  ;;  %v11361_v14 = vld [vmem:[%s16271_s1 + $0xc4] ss:$40 sps:$4 sm:$0xff]   ;;  %v11356_v15 = vld [vmem:[%s16271_s1 + $0x838] ss:$40 sps:$4 sm:$0xff]  }
  0xf5   :  { %2856 = vmatprep.subr.bf16.mxu1 %v11283_v16  ;;  %v11359_v16 = vld [vmem:[%s16271_s1 + $0xc0] ss:$40 sps:$4 sm:$0xff]  }
  0xf6   :  { %v13116_v24 = vpop.f32.mrb[0].mxu1 }
  0xf7   :  { %v13118_v25 = vpop.f32.mrb[1].mxu1  ;;  %2775 = vmatpush1.bf16.msra.mxu0 %v11278_v18  ;;  %v11364_v18 = vld [vmem:[%s16271_s1 + $0x88c] ss:$40 sps:$4 sm:$0xff]  }
  0xf8   :  { %2857 = vmatpush1.bf16.msra.mxu1 %v11281_v19  ;;  %v2581_v28 = vpop.f32.mrb[2].mxu1  ;;  %2776 = vmatprep.subr.bf16.mxu0 %v11286_v20  ;;  %v11362_v19 = vld [vmem:[%s16271_s1 + $0x888] ss:$40 sps:$4 sm:$0xff]  }
  0xf9   :  { %2858 = vmatprep.subr.bf16.mxu1 %v11289_v21  ;;  %v2582_v29 = vpop.f32.mrb[3].mxu1  ;;  %v11365_v20 = vld [vmem:[%s16271_s1 + $0x110] ss:$40 sps:$4 sm:$0xff]   ;;  %v11370_v21 = vld [vmem:[%s16271_s1 + $0x8dc] ss:$40 sps:$4 sm:$0xff]  }
  0xfa   :  { %v11379_v28 = vld [vmem:[%s16271_s1 + $0x1b4] ss:$40 sps:$4 sm:$0xff]   ;;  %v11374_v29 = vld [vmem:[%s16271_s1 + $0x928] ss:$40 sps:$4 sm:$0xff]  }
  0xfb   :  { %2777 = vmatpush1.bf16.msra.mxu0 %v11284_v22  ;;  %v11373_v22 = vld [vmem:[%s16271_s1 + $0x164] ss:$40 sps:$4 sm:$0xff]  }
  0xfc   :  { %2859 = vmatpush1.bf16.msra.mxu1 %v11287_v23  ;;  %2778 = vmatprep.subr.bf16.mxu0 %v11292_v26  ;;  %v11368_v23 = vld [vmem:[%s16271_s1 + $0x8d8] ss:$40 sps:$4 sm:$0xff]  }
  0xfd   :  { %2860 = vmatprep.subr.bf16.mxu1 %v11295_v27  ;;  %v11371_v26 = vld [vmem:[%s16271_s1 + $0x160] ss:$40 sps:$4 sm:$0xff]   ;;  %v11376_v27 = vld [vmem:[%s16271_s1 + $0x92c] ss:$40 sps:$4 sm:$0xff]  }
  0xff   :  { %2779 = vmatpush1.bf16.msra.mxu0 %v11290_v30  ;;  %v11377_v30 = vld [vmem:[%s16271_s1 + $0x1b0] ss:$40 sps:$4 sm:$0xff]  }
 0x100   :  { %2861 = vmatpush1.bf16.msra.mxu1 %v11293_v31  ;;  %2789 = vmatprep.subr.bf16.mxu0 %v11298_v32  ;;  %v11382_v31 = vld [vmem:[%s16271_s1 + $0x97c] ss:$40 sps:$4 sm:$0xff]  }
 0x101   :  { %2871 = vmatprep.subr.bf16.mxu1 %v11301_v33  ;;  %v11385_v32 = vld [vmem:[%s16271_s1 + $0x204] ss:$40 sps:$4 sm:$0xff]   ;;  %v11380_v33 = vld [vmem:[%s16271_s1 + $0x978] ss:$40 sps:$4 sm:$0xff]  }
 0x102   :  { %2781 = vmatmul.mubr.bf16.vlgmr.msra.gmra.mrb[4].mxu0 %v12740_v17 }
 0x103   :  { %2863 = vmatmul.mubr.bf16.vlgmr.msra.gmra.mrb[8].mxu1 %v12537_v10  ;;  %2790 = vmatpush1.bf16.msra.mxu0 %v11296_v34  ;;  %v11383_v34 = vld [vmem:[%s16271_s1 + $0x200] ss:$40 sps:$4 sm:$0xff]  }
 0x104   :  { %2872 = vmatpush1.bf16.msra.mxu1 %v11299_v35  ;;  %2791 = vmatprep.subr.bf16.mxu0 %v11304_v37  ;;  %v11388_v35 = vld [vmem:[%s16271_s1 + $0x9cc] ss:$40 sps:$4 sm:$0xff]  }
 0x105   :  { %2873 = vmatprep.subr.bf16.mxu1 %v11307_v39  ;;  %2821 = vmatprep.mubr.bf16.mxu0 %v12236_v1  ;;  %v11391_v37 = vld [vmem:[%s16271_s1 + $0x254] ss:$40 sps:$4 sm:$0xff]   ;;  %v11386_v39 = vld [vmem:[%s16271_s1 + $0x9c8] ss:$40 sps:$4 sm:$0xff]  }
 0x106   :  { %2903 = vmatprep.mubr.bf16.mxu1 %v12615_v36 }
 0x107   :  { %2792 = vmatpush1.bf16.msra.mxu0 %v11302_v40  ;;  %v11389_v40 = vld [vmem:[%s16271_s1 + $0x250] ss:$40 sps:$4 sm:$0xff]  }
 0x108   :  { %2874 = vmatpush1.bf16.msra.mxu1 %v11305_v41  ;;  %2793 = vmatprep.subr.bf16.mxu0 %v11310_v42  ;;  %v11394_v41 = vld [vmem:[%s16271_s1 + $0xa1c] ss:$40 sps:$4 sm:$0xff]  }
 0x109   :  { %2875 = vmatprep.subr.bf16.mxu1 %v11313_v43  ;;  %v11397_v42 = vld [vmem:[%s16271_s1 + $0x2a4] ss:$40 sps:$4 sm:$0xff]   ;;  %v11392_v43 = vld [vmem:[%s16271_s1 + $0xa18] ss:$40 sps:$4 sm:$0xff]  }
 0x10b   :  { %2794 = vmatpush1.bf16.msra.mxu0 %v11308_v44  ;;  %v11395_v44 = vld [vmem:[%s16271_s1 + $0x2a0] ss:$40 sps:$4 sm:$0xff]  }
 0x10c   :  { %2876 = vmatpush1.bf16.msra.mxu1 %v11311_v45  ;;  %2795 = vmatprep.subr.bf16.mxu0 %v11316_v46  ;;  %v11400_v45 = vld [vmem:[%s16271_s1 + $0xa6c] ss:$40 sps:$4 sm:$0xff]  }
 0x10d   :  { %2877 = vmatprep.subr.bf16.mxu1 %v11319_v47  ;;  %v11403_v46 = vld [vmem:[%s16271_s1 + $0x2f4] ss:$40 sps:$4 sm:$0xff]   ;;  %v11398_v47 = vld [vmem:[%s16271_s1 + $0xa68] ss:$40 sps:$4 sm:$0xff]  }
 0x10f   :  { %2796 = vmatpush1.bf16.msra.mxu0 %v11314_v48  ;;  %v11401_v48 = vld [vmem:[%s16271_s1 + $0x2f0] ss:$40 sps:$4 sm:$0xff]  }
 0x110   :  { %2878 = vmatpush1.bf16.msra.mxu1 %v11317_v49  ;;  %2797 = vmatprep.subr.bf16.mxu0 %v11322_v50  ;;  %v11406_v49 = vld [vmem:[%s16271_s1 + $0xabc] ss:$40 sps:$4 sm:$0xff]  }
 0x111   :  { %2879 = vmatprep.subr.bf16.mxu1 %v11325_v51  ;;  %v11409_v50 = vld [vmem:[%s16271_s1 + $0x344] ss:$40 sps:$4 sm:$0xff]   ;;  %v11404_v51 = vld [vmem:[%s16271_s1 + $0xab8] ss:$40 sps:$4 sm:$0xff]  }
 0x113   :  { %2798 = vmatpush1.bf16.msra.mxu0 %v11320_v53  ;;  %v11407_v53 = vld [vmem:[%s16271_s1 + $0x340] ss:$40 sps:$4 sm:$0xff]  }
 0x114   :  { %2880 = vmatpush1.bf16.msra.mxu1 %v11323_v54  ;;  %2799 = vmatprep.subr.bf16.mxu0 %v11328_v55  ;;  %v11412_v54 = vld [vmem:[%s16271_s1 + $0xb0c] ss:$40 sps:$4 sm:$0xff]  }
 0x115   :  { %2881 = vmatprep.subr.bf16.mxu1 %v11331_v56  ;;  %v11415_v55 = vld [vmem:[%s16271_s1 + $0x394] ss:$40 sps:$4 sm:$0xff]   ;;  %v11410_v56 = vld [vmem:[%s16271_s1 + $0xb08] ss:$40 sps:$4 sm:$0xff]  }
 0x117   :  { %2800 = vmatpush1.bf16.msra.mxu0 %v11326_v57  ;;  %v11413_v57 = vld [vmem:[%s16271_s1 + $0x390] ss:$40 sps:$4 sm:$0xff]  }
 0x118   :  { %2882 = vmatpush1.bf16.msra.mxu1 %v11329_v58  ;;  %2801 = vmatprep.subr.bf16.mxu0 %v11334_v59  ;;  %v11418_v58 = vld [vmem:[%s16271_s1 + $0xb5c] ss:$40 sps:$4 sm:$0xff]  }
 0x119   :  { %2883 = vmatprep.subr.bf16.mxu1 %v11337_v60  ;;  %v11421_v59 = vld [vmem:[%s16271_s1 + $0x3e4] ss:$40 sps:$4 sm:$0xff]   ;;  %v11416_v60 = vld [vmem:[%s16271_s1 + $0xb58] ss:$40 sps:$4 sm:$0xff]  }
 0x11b   :  { %2802 = vmatpush1.bf16.msra.mxu0 %v11332_v61  ;;  %v11419_v61 = vld [vmem:[%s16271_s1 + $0x3e0] ss:$40 sps:$4 sm:$0xff]  }
 0x11c   :  { %2884 = vmatpush1.bf16.msra.mxu1 %v11335_v62  ;;  %2803 = vmatprep.subr.bf16.mxu0 %v11340_v63  ;;  %v11424_v62 = vld [vmem:[%s16271_s1 + $0xbac] ss:$40 sps:$4 sm:$0xff]  }
 0x11d   :  { %2885 = vmatprep.subr.bf16.mxu1 %v11343_v0  ;;  %v11427_v63 = vld [vmem:[%s16271_s1 + $0x434] ss:$40 sps:$4 sm:$0xff]   ;;  %v11422_v0 = vld [vmem:[%s16271_s1 + $0xba8] ss:$40 sps:$4 sm:$0xff]  }
 0x11f   :  { %2804 = vmatpush1.bf16.msra.mxu0 %v11338_v2  ;;  %v11425_v2 = vld [vmem:[%s16271_s1 + $0x430] ss:$40 sps:$4 sm:$0xff]  }
 0x120   :  { %2886 = vmatpush1.bf16.msra.mxu1 %v11341_v3  ;;  %2953 = vmatprep.subr.bf16.mxu0 %v11349_v5  ;;  %v11430_v3 = vld [vmem:[%s16271_s1 + $0xbfc] ss:$40 sps:$4 sm:$0xff]  }
 0x121   :  { %2887 = vmatprep.subr.bf16.mxu1 %v11346_v4  ;;  %v11433_v4 = vld [vmem:[%s16271_s1 + $0x484] ss:$40 sps:$4 sm:$0xff]  }
 0x122   :  { %2822 = vmatmul.mubr.bf16.vlgmr.msra.gmra.mrb[4].mxu0 %v12431_v38 }
 0x123   :  { %2954 = vmatpush1.bf16.msra.mxu0 %v11347_v7  ;;  %2985 = vmatprep.mubr.bf16.mxu0 %v12473_v52  ;;  %v11367_v52 = vld [vmem:[%s16271_s1 + $0x114] ss:$40 sps:$4 sm:$0xff]  }
 0x124   :  { %2888 = vmatpush1.bf16.msra.mxu1 %v11344_v6  ;;  %2955 = vmatprep.subr.bf16.mxu0 %v11355_v9 }
 0x125   :  { %2889 = vmatprep.subr.bf16.mxu1 %v11352_v8 }
 0x127   :  { %2956 = vmatpush1.bf16.msra.mxu0 %v11353_v12  ;;  %v11431_v12 = vld [vmem:[%s16271_s1 + $0x480] ss:$40 sps:$4 sm:$0xff]  }
 0x128   :  { %2890 = vmatpush1.bf16.msra.mxu1 %v11350_v11  ;;  %2957 = vmatprep.subr.bf16.mxu0 %v11361_v14  ;;  %v11428_v11 = vld [vmem:[%s16271_s1 + $0xbf8] ss:$40 sps:$4 sm:$0xff]   ;;  %v11434_v14 = vld [vmem:[%s16271_s1 + $0xc48] ss:$40 sps:$4 sm:$0xff]  }
 0x129   :  { %2891 = vmatprep.subr.bf16.mxu1 %v11358_v13 }
 0x12b   :  { %2958 = vmatpush1.bf16.msra.mxu0 %v11359_v16  ;;  %v11442_v16 = vld [vmem:[%s16271_s1 + $0x524] ss:$40 sps:$4 sm:$0xff]  }
 0x12c   :  { %2892 = vmatpush1.bf16.msra.mxu1 %v11356_v15  ;;  %2959 = vmatprep.subr.bf16.mxu0 %v11367_v52  ;;  %v11437_v15 = vld [vmem:[%s16271_s1 + $0x4d0] ss:$40 sps:$4 sm:$0xff]   ;;  %v11445_v52 = vld [vmem:[%s16271_s1 + $0x574] ss:$40 sps:$4 sm:$0xff]  }
 0x12d   :  { %2893 = vmatprep.subr.bf16.mxu1 %v11364_v18  ;;  %v11440_v18 = vld [vmem:[%s16271_s1 + $0x520] ss:$40 sps:$4 sm:$0xff]  }
 0x12f   :  { %2960 = vmatpush1.bf16.msra.mxu0 %v11365_v20  ;;  %v11448_v20 = vld [vmem:[%s16271_s1 + $0x5c4] ss:$40 sps:$4 sm:$0xff]  }
 0x130   :  { %2894 = vmatpush1.bf16.msra.mxu1 %v11362_v19  ;;  %2961 = vmatprep.subr.bf16.mxu0 %v11373_v22  ;;  %v11443_v19 = vld [vmem:[%s16271_s1 + $0x570] ss:$40 sps:$4 sm:$0xff]   ;;  %v11454_v22 = vld [vmem:[%s16271_s1 + $0x664] ss:$40 sps:$4 sm:$0xff]  }
 0x131   :  { %2895 = vmatprep.subr.bf16.mxu1 %v11370_v21  ;;  %v11446_v21 = vld [vmem:[%s16271_s1 + $0x5c0] ss:$40 sps:$4 sm:$0xff]  }
 0x133   :  { %2962 = vmatpush1.bf16.msra.mxu0 %v11371_v26  ;;  %v11457_v26 = vld [vmem:[%s16271_s1 + $0x6b4] ss:$40 sps:$4 sm:$0xff]  }
 0x134   :  { %2896 = vmatpush1.bf16.msra.mxu1 %v11368_v23  ;;  %2963 = vmatprep.subr.bf16.mxu0 %v11379_v28  ;;  %v11452_v23 = vld [vmem:[%s16271_s1 + $0x660] ss:$40 sps:$4 sm:$0xff]   ;;  %v11460_v28 = vld [vmem:[%s16271_s1 + $0x704] ss:$40 sps:$4 sm:$0xff]  }
 0x135   :  { %2897 = vmatprep.subr.bf16.mxu1 %v11376_v27  ;;  %v11455_v27 = vld [vmem:[%s16271_s1 + $0x6b0] ss:$40 sps:$4 sm:$0xff]  }
 0x137   :  { %2964 = vmatpush1.bf16.msra.mxu0 %v11377_v30  ;;  %v11463_v30 = vld [vmem:[%s16271_s1 + $0x754] ss:$40 sps:$4 sm:$0xff]  }
 0x138   :  { %2898 = vmatpush1.bf16.msra.mxu1 %v11374_v29  ;;  %2965 = vmatprep.subr.bf16.mxu0 %v11385_v32  ;;  %v11458_v29 = vld [vmem:[%s16271_s1 + $0x700] ss:$40 sps:$4 sm:$0xff]   ;;  %v11466_v32 = vld [vmem:[%s16271_s1 + $0x7a4] ss:$40 sps:$4 sm:$0xff]  }
 0x139   :  { %2899 = vmatprep.subr.bf16.mxu1 %v11382_v31  ;;  %v11461_v31 = vld [vmem:[%s16271_s1 + $0x750] ss:$40 sps:$4 sm:$0xff]  }
 0x13b   :  { %2966 = vmatpush1.bf16.msra.mxu0 %v11383_v34  ;;  %v11469_v34 = vld [vmem:[%s16271_s1 + $0x7f4] ss:$40 sps:$4 sm:$0xff]  }
 0x13c   :  { %2900 = vmatpush1.bf16.msra.mxu1 %v11380_v33  ;;  %2967 = vmatprep.subr.bf16.mxu0 %v11391_v37  ;;  %v11464_v33 = vld [vmem:[%s16271_s1 + $0x7a0] ss:$40 sps:$4 sm:$0xff]   ;;  %v11514_v37 = vld [vmem:[%s16273_s3 + $0x4] ss:$40 sps:$4 sm:$0xff]  }
 0x13d   :  { %2901 = vmatprep.subr.bf16.mxu1 %v11388_v35  ;;  %v11512_v35 = vld [vmem:[%s16273_s3] ss:$40 sps:$4 sm:$0xff]  }
 0x13f   :  { %2968 = vmatpush1.bf16.msra.mxu0 %v11389_v40  ;;  %v11520_v40 = vld [vmem:[%s16273_s3 + $0x54] ss:$40 sps:$4 sm:$0xff]  }
 0x140   :  { %2902 = vmatpush1.bf16.msra.mxu1 %v11386_v39  ;;  %2969 = vmatprep.subr.bf16.mxu0 %v11397_v42  ;;  %v11467_v39 = vld [vmem:[%s16271_s1 + $0x7f0] ss:$40 sps:$4 sm:$0xff]   ;;  %v11472_v42 = vld [vmem:[%s16271_s1 + $0x844] ss:$40 sps:$4 sm:$0xff]  }
 0x141   :  { %2912 = vmatprep.subr.bf16.mxu1 %v11394_v41  ;;  %v11518_v41 = vld [vmem:[%s16273_s3 + $0x50] ss:$40 sps:$4 sm:$0xff]  }
 0x143   :  { %2904 = vmatmul.mubr.bf16.vlgmr.msra.gmra.mrb[8].mxu1 %v12740_v17  ;;  %2970 = vmatpush1.bf16.msra.mxu0 %v11395_v44  ;;  %v11470_v44 = vld [vmem:[%s16271_s1 + $0x840] ss:$40 sps:$4 sm:$0xff]  }
 0x144   :  { %2913 = vmatpush1.bf16.msra.mxu1 %v11392_v43  ;;  %2971 = vmatprep.subr.bf16.mxu0 %v11403_v46  ;;  %v11526_v43 = vld [vmem:[%s16273_s3 + $0xa4] ss:$40 sps:$4 sm:$0xff]   ;;  %v11524_v46 = vld [vmem:[%s16273_s3 + $0xa0] ss:$40 sps:$4 sm:$0xff]  }
 0x145   :  { %2914 = vmatprep.subr.bf16.mxu1 %v11400_v45  ;;  %2944 = vmatprep.mubr.bf16.mxu1 %v12236_v1  ;;  %v11475_v45 = vld [vmem:[%s16271_s1 + $0x894] ss:$40 sps:$4 sm:$0xff]  }
 0x147   :  { %2972 = vmatpush1.bf16.msra.mxu0 %v11401_v48  ;;  %v11473_v48 = vld [vmem:[%s16271_s1 + $0x890] ss:$40 sps:$4 sm:$0xff]  }
 0x148   :  { %2915 = vmatpush1.bf16.msra.mxu1 %v11398_v47  ;;  %2973 = vmatprep.subr.bf16.mxu0 %v11409_v50  ;;  %v11532_v47 = vld [vmem:[%s16273_s3 + $0xf4] ss:$40 sps:$4 sm:$0xff]   ;;  %v11530_v50 = vld [vmem:[%s16273_s3 + $0xf0] ss:$40 sps:$4 sm:$0xff]  }
 0x149   :  { %2916 = vmatprep.subr.bf16.mxu1 %v11406_v49  ;;  %v11478_v49 = vld [vmem:[%s16271_s1 + $0x8e4] ss:$40 sps:$4 sm:$0xff]  }
 0x14b   :  { %2974 = vmatpush1.bf16.msra.mxu0 %v11407_v53  ;;  %v11476_v53 = vld [vmem:[%s16271_s1 + $0x8e0] ss:$40 sps:$4 sm:$0xff]  }
 0x14c   :  { %2917 = vmatpush1.bf16.msra.mxu1 %v11404_v51  ;;  %2975 = vmatprep.subr.bf16.mxu0 %v11415_v55  ;;  %v11538_v51 = vld [vmem:[%s16273_s3 + $0x144] ss:$40 sps:$4 sm:$0xff]   ;;  %v11536_v55 = vld [vmem:[%s16273_s3 + $0x140] ss:$40 sps:$4 sm:$0xff]  }
 0x14d   :  { %2918 = vmatprep.subr.bf16.mxu1 %v11412_v54  ;;  %v11481_v54 = vld [vmem:[%s16271_s1 + $0x934] ss:$40 sps:$4 sm:$0xff]  }
 0x14f   :  { %2976 = vmatpush1.bf16.msra.mxu0 %v11413_v57  ;;  %v11479_v57 = vld [vmem:[%s16271_s1 + $0x930] ss:$40 sps:$4 sm:$0xff]  }
 0x150   :  { %2919 = vmatpush1.bf16.msra.mxu1 %v11410_v56  ;;  %2977 = vmatprep.subr.bf16.mxu0 %v11421_v59  ;;  %v11544_v56 = vld [vmem:[%s16273_s3 + $0x194] ss:$40 sps:$4 sm:$0xff]   ;;  %v11542_v59 = vld [vmem:[%s16273_s3 + $0x190] ss:$40 sps:$4 sm:$0xff]  }
 0x151   :  { %2920 = vmatprep.subr.bf16.mxu1 %v11418_v58  ;;  %v11484_v58 = vld [vmem:[%s16271_s1 + $0x984] ss:$40 sps:$4 sm:$0xff]  }
 0x153   :  { %2978 = vmatpush1.bf16.msra.mxu0 %v11419_v61 }
 0x154   :  { %2921 = vmatpush1.bf16.msra.mxu1 %v11416_v60  ;;  %2979 = vmatprep.subr.bf16.mxu0 %v11427_v63  ;;  %v11550_v60 = vld [vmem:[%s16273_s3 + $0x1e4] ss:$40 sps:$4 sm:$0xff]   ;;  %v11482_v63 = vld [vmem:[%s16271_s1 + $0x980] ss:$40 sps:$4 sm:$0xff]  }
 0x155   :  { %2922 = vmatprep.subr.bf16.mxu1 %v11424_v62  ;;  %v2536_v5 = vpop.f32.mrb[0].mxu0 }
 0x156   :  { %v13411_v6 = vadd.f32 %v13116_v24, %v2536_v5  ;;  %v2538_v7 = vpop.f32.mrb[1].mxu0  ;;  %v11436_v24 = vld [vmem:[%s16271_s1 + $0xc4c] ss:$40 sps:$4 sm:$0xff]  }
 0x157   :  { %v13414_v8 = vadd.f32 %v13118_v25, %v2538_v7  ;;  %v2540_v9 = vpop.f32.mrb[2].mxu0  ;;  %2980 = vmatpush1.bf16.msra.mxu0 %v11425_v2  ;;  %v11439_v25 = vld [vmem:[%s16271_s1 + $0x4d4] ss:$40 sps:$4 sm:$0xff]   ;;  %v11485_v7 = vld [vmem:[%s16271_s1 + $0x9d0] ss:$40 sps:$4 sm:$0xff]  }
 0x158   :  { %2923 = vmatpush1.bf16.msra.mxu1 %v11422_v0  ;;  %v2541_v13 = vpop.f32.mrb[3].mxu0  ;;  %2981 = vmatprep.subr.bf16.mxu0 %v11433_v4  ;;  %v11487_v0 = vld [vmem:[%s16271_s1 + $0x9d4] ss:$40 sps:$4 sm:$0xff]   ;;  %v11490_v9 = vld [vmem:[%s16271_s1 + $0xa24] ss:$40 sps:$4 sm:$0xff]  }
 0x159   :  { %2924 = vmatprep.subr.bf16.mxu1 %v11430_v3  ;;  %v11548_v3 = vld [vmem:[%s16273_s3 + $0x1e0] ss:$40 sps:$4 sm:$0xff]   ;;  %v11556_v5 = vld [vmem:[%s16273_s3 + $0x234] ss:$40 sps:$4 sm:$0xff]  }
 0x15a   :  { %v11488_v13 = vld [vmem:[%s16271_s1 + $0xa20] ss:$40 sps:$4 sm:$0xff]  }
 0x15b   :  { %2982 = vmatpush1.bf16.msra.mxu0 %v11431_v12  ;;  %v11562_v12 = vld [vmem:[%s16273_s3 + $0x284] ss:$40 sps:$4 sm:$0xff]  }
 0x15c   :  { %2925 = vmatpush1.bf16.msra.mxu1 %v11428_v11  ;;  %2983 = vmatprep.subr.bf16.mxu0 %v11439_v25  ;;  %v11554_v11 = vld [vmem:[%s16273_s3 + $0x230] ss:$40 sps:$4 sm:$0xff]   ;;  %v11560_v25 = vld [vmem:[%s16273_s3 + $0x280] ss:$40 sps:$4 sm:$0xff]  }
 0x15d   :  { %2926 = vmatprep.subr.bf16.mxu1 %v11436_v24  ;;  %v11493_v24 = vld [vmem:[%s16271_s1 + $0xa74] ss:$40 sps:$4 sm:$0xff]  }
 0x15f   :  { %2984 = vmatpush1.bf16.msra.mxu0 %v11437_v15  ;;  %v11568_v15 = vld [vmem:[%s16273_s3 + $0x2d4] ss:$40 sps:$4 sm:$0xff]  }
 0x160   :  { %2927 = vmatpush1.bf16.msra.mxu1 %v11434_v14  ;;  %2994 = vmatprep.subr.bf16.mxu0 %v11442_v16  ;;  %v11491_v14 = vld [vmem:[%s16271_s1 + $0xa70] ss:$40 sps:$4 sm:$0xff]   ;;  %v11496_v16 = vld [vmem:[%s16271_s1 + $0xac4] ss:$40 sps:$4 sm:$0xff]  }
 0x161   :  { %5528 = vmatprep.subr.bf16.mxu1 %v11514_v37  ;;  %v11596_v37 = vld [vmem:[%s16273_s3 + $0x460] ss:$40 sps:$4 sm:$0xff]  }
 0x162   :  { %2986 = vmatmul.mubr.bf16.vlgmr.msra.gmra.mrb[8].mxu0 %v12537_v10  ;;  %v11451_v10 = vld [vmem:[%s16271_s1 + $0x614] ss:$40 sps:$4 sm:$0xff]  }
 0x163   :  { %2945 = vmatmul.mubr.bf16.vlgmr.msra.gmra.mrb[8].mxu1 %v12431_v38  ;;  %2995 = vmatpush1.bf16.msra.mxu0 %v11440_v18  ;;  %v11566_v18 = vld [vmem:[%s16273_s3 + $0x2d0] ss:$40 sps:$4 sm:$0xff]  }
 0x164   :  { %3026 = vmatprep.mubr.bf16.mxu0 %v12615_v36  ;;  %2996 = vmatprep.subr.bf16.mxu0 %v11445_v52  ;;  %v11449_v36 = vld [vmem:[%s16271_s1 + $0x610] ss:$40 sps:$4 sm:$0xff]   ;;  %v11574_v52 = vld [vmem:[%s16273_s3 + $0x324] ss:$40 sps:$4 sm:$0xff]  }
 0x165   :  { %5529 = vmatpush1.bf16.msra.mxu1 %v11512_v35  ;;  %v11511_v35 = vld [vmem:[%s16271_s1 + $0xc54] ss:$40 sps:$4 sm:$0xff]  }
 0x166   :  { %5530 = vmatprep.subr.bf16.mxu1 %v11520_v40  ;;  %v11604_v40 = vld [vmem:[%s16273_s3 + $0x4b4] ss:$40 sps:$4 sm:$0xff]  }
 0x167   :  { %2997 = vmatpush1.bf16.msra.mxu0 %v11443_v19  ;;  %v11499_v19 = vld [vmem:[%s16271_s1 + $0xb14] ss:$40 sps:$4 sm:$0xff]  }
 0x168   :  { %2998 = vmatprep.subr.bf16.mxu0 %v11448_v20  ;;  %v11572_v20 = vld [vmem:[%s16273_s3 + $0x320] ss:$40 sps:$4 sm:$0xff]  }
 0x169   :  { %5531 = vmatpush1.bf16.msra.mxu1 %v11518_v41  ;;  %v11517_v41 = vld [vmem:[%s16273_s3 + $0xc] ss:$40 sps:$4 sm:$0xff]  }
 0x16a   :  { %5532 = vmatprep.subr.bf16.mxu1 %v11526_v43  ;;  %v11515_v43 = vld [vmem:[%s16273_s3 + $0x8] ss:$40 sps:$4 sm:$0xff]  }
 0x16b   :  { %2999 = vmatpush1.bf16.msra.mxu0 %v11446_v21  ;;  %v11580_v21 = vld [vmem:[%s16273_s3 + $0x374] ss:$40 sps:$4 sm:$0xff]  }
 0x16c   :  { %3000 = vmatprep.subr.bf16.mxu0 %v11451_v10  ;;  %v11497_v10 = vld [vmem:[%s16271_s1 + $0xb10] ss:$40 sps:$4 sm:$0xff]  }
 0x16d   :  { %5533 = vmatpush1.bf16.msra.mxu1 %v11524_v46  ;;  %v11521_v46 = vld [vmem:[%s16273_s3 + $0x58] ss:$40 sps:$4 sm:$0xff]  }
 0x16e   :  { %5534 = vmatprep.subr.bf16.mxu1 %v11532_v47  ;;  %v11529_v47 = vld [vmem:[%s16273_s3 + $0xac] ss:$40 sps:$4 sm:$0xff]  }
 0x16f   :  { %3001 = vmatpush1.bf16.msra.mxu0 %v11449_v36  ;;  %v11502_v36 = vld [vmem:[%s16271_s1 + $0xb64] ss:$40 sps:$4 sm:$0xff]  }
 0x170   :  { %3002 = vmatprep.subr.bf16.mxu0 %v11454_v22  ;;  %v11578_v22 = vld [vmem:[%s16273_s3 + $0x370] ss:$40 sps:$4 sm:$0xff]  }
 0x171   :  { %5535 = vmatpush1.bf16.msra.mxu1 %v11530_v50  ;;  %v11541_v50 = vld [vmem:[%s16273_s3 + $0x14c] ss:$40 sps:$4 sm:$0xff]  }
 0x172   :  { %5536 = vmatprep.subr.bf16.mxu1 %v11538_v51  ;;  %v11539_v51 = vld [vmem:[%s16273_s3 + $0x148] ss:$40 sps:$4 sm:$0xff]  }
 0x173   :  { %3003 = vmatpush1.bf16.msra.mxu0 %v11452_v23  ;;  %v11586_v23 = vld [vmem:[%s16273_s3 + $0x3c4] ss:$40 sps:$4 sm:$0xff]  }
 0x174   :  { %3004 = vmatprep.subr.bf16.mxu0 %v11457_v26  ;;  %v11500_v26 = vld [vmem:[%s16271_s1 + $0xb60] ss:$40 sps:$4 sm:$0xff]  }
 0x175   :  { %5537 = vmatpush1.bf16.msra.mxu1 %v11536_v55  ;;  %v11553_v55 = vld [vmem:[%s16273_s3 + $0x1ec] ss:$40 sps:$4 sm:$0xff]  }
 0x176   :  { %5538 = vmatprep.subr.bf16.mxu1 %v11544_v56  ;;  %v11551_v56 = vld [vmem:[%s16273_s3 + $0x1e8] ss:$40 sps:$4 sm:$0xff]  }
 0x177   :  { %3005 = vmatpush1.bf16.msra.mxu0 %v11455_v27  ;;  %v11505_v27 = vld [vmem:[%s16271_s1 + $0xbb4] ss:$40 sps:$4 sm:$0xff]  }
 0x178   :  { %3006 = vmatprep.subr.bf16.mxu0 %v11460_v28  ;;  %v11584_v28 = vld [vmem:[%s16273_s3 + $0x3c0] ss:$40 sps:$4 sm:$0xff]  }
 0x179   :  { %5539 = vmatpush1.bf16.msra.mxu1 %v11542_v59  ;;  %v11565_v59 = vld [vmem:[%s16273_s3 + $0x28c] ss:$40 sps:$4 sm:$0xff]  }
 0x17a   :  { %5540 = vmatprep.subr.bf16.mxu1 %v11550_v60  ;;  %v11563_v60 = vld [vmem:[%s16273_s3 + $0x288] ss:$40 sps:$4 sm:$0xff]  }
 0x17b   :  { %3007 = vmatpush1.bf16.msra.mxu0 %v11458_v29  ;;  %v11503_v29 = vld [vmem:[%s16271_s1 + $0xbb0] ss:$40 sps:$4 sm:$0xff]  }
 0x17c   :  { %3008 = vmatprep.subr.bf16.mxu0 %v11463_v30  ;;  %v11592_v30 = vld [vmem:[%s16273_s3 + $0x414] ss:$40 sps:$4 sm:$0xff]  }
 0x17d   :  { %5541 = vmatpush1.bf16.msra.mxu1 %v11548_v3  ;;  %v11575_v3 = vld [vmem:[%s16273_s3 + $0x328] ss:$40 sps:$4 sm:$0xff]  }
 0x17e   :  { %5542 = vmatprep.subr.bf16.mxu1 %v11556_v5  ;;  %v11581_v5 = vld [vmem:[%s16273_s3 + $0x378] ss:$40 sps:$4 sm:$0xff]  }
 0x17f   :  { %3009 = vmatpush1.bf16.msra.mxu0 %v11461_v31  ;;  %v11508_v31 = vld [vmem:[%s16271_s1 + $0xc04] ss:$40 sps:$4 sm:$0xff]  }
 0x180   :  { %3010 = vmatprep.subr.bf16.mxu0 %v11466_v32  ;;  %v11590_v32 = vld [vmem:[%s16273_s3 + $0x410] ss:$40 sps:$4 sm:$0xff]  }
 0x181   :  { %5543 = vmatpush1.bf16.msra.mxu1 %v11554_v11  ;;  %v11595_v11 = vld [vmem:[%s16273_s3 + $0x41c] ss:$40 sps:$4 sm:$0xff]  }
 0x182   :  { %5544 = vmatprep.subr.bf16.mxu1 %v11562_v12  ;;  %v11593_v12 = vld [vmem:[%s16273_s3 + $0x418] ss:$40 sps:$4 sm:$0xff]  }
 0x183   :  { %3011 = vmatpush1.bf16.msra.mxu0 %v11464_v33  ;;  %v11506_v33 = vld [vmem:[%s16271_s1 + $0xc00] ss:$40 sps:$4 sm:$0xff]  }
 0x184   :  { %3012 = vmatprep.subr.bf16.mxu0 %v11469_v34  ;;  %v11598_v34 = vld [vmem:[%s16273_s3 + $0x464] ss:$40 sps:$4 sm:$0xff]  }
 0x185   :  { %5545 = vmatpush1.bf16.msra.mxu1 %v11560_v25  ;;  %v11599_v25 = vld [vmem:[%s16273_s3 + $0x468] ss:$40 sps:$4 sm:$0xff]  }
 0x186   :  { %5546 = vmatprep.subr.bf16.mxu1 %v11568_v15  ;;  %v11607_v15 = vld [vmem:[%s16273_s3 + $0x4bc] ss:$40 sps:$4 sm:$0xff]  }
 0x187   :  { %3013 = vmatpush1.bf16.msra.mxu0 %v11467_v39  ;;  %v11509_v39 = vld [vmem:[%s16271_s1 + $0xc50] ss:$40 sps:$4 sm:$0xff]  }
 0x188   :  { %3014 = vmatprep.subr.bf16.mxu0 %v11472_v42  ;;  %v11602_v42 = vld [vmem:[%s16273_s3 + $0x4b0] ss:$40 sps:$4 sm:$0xff]  }
 0x189   :  { %5547 = vmatpush1.bf16.msra.mxu1 %v11566_v18 }
 0x18a   :  { %5548 = vmatprep.subr.bf16.mxu1 %v11574_v52 }
 0x18b   :  { %3015 = vmatpush1.bf16.msra.mxu0 %v11470_v44  ;;  %v11523_v44 = vld [vmem:[%s16273_s3 + $0x5c] ss:$40 sps:$4 sm:$0xff]  }
 0x18c   :  { %3016 = vmatprep.subr.bf16.mxu0 %v11475_v45  ;;  %v11610_v45 = vld [vmem:[%s16273_s3 + $0x504] ss:$40 sps:$4 sm:$0xff]  }
 0x18d   :  { %5549 = vmatpush1.bf16.msra.mxu1 %v11572_v20  ;;  %v3083_v20 = vlaneseq }
 0x18e   :  { %5550 = vmatprep.subr.bf16.mxu1 %v11580_v21 }
 0x18f   :  { %3017 = vmatpush1.bf16.msra.mxu0 %v11473_v48  ;;  %v11527_v48 = vld [vmem:[%s16273_s3 + $0xa8] ss:$40 sps:$4 sm:$0xff]   ;;  %v13789_v21 = vshrl.u32 %v3083_v20, 7  ;;  %v11673_v20 = vld [vmem:[%s16273_s3 + $0x82c] ss:$40 sps:$4 sm:$0xff]  }
 0x190   :  { %3018 = vmatprep.subr.bf16.mxu0 %v11478_v49  ;;  %v11533_v49 = vld [vmem:[%s16273_s3 + $0xf8] ss:$40 sps:$4 sm:$0xff]  }
 0x191   :  { %5551 = vmatpush1.bf16.msra.mxu1 %v11578_v22  ;;  %v13802_v22 = vsub.s32 1, %v13789_v21 }
 0x192   :  { %5552 = vmatprep.subr.bf16.mxu1 %v11586_v23 }
 0x193   :  { %3019 = vmatpush1.bf16.msra.mxu0 %v11476_v53  ;;  %v11547_v53 = vld [vmem:[%s16273_s3 + $0x19c] ss:$40 sps:$4 sm:$0xff]  }
 0x194   :  { %3020 = vmatprep.subr.bf16.mxu0 %v11481_v54  ;;  %v11545_v54 = vld [vmem:[%s16273_s3 + $0x198] ss:$40 sps:$4 sm:$0xff]  }
 0x195   :  { %5553 = vmatpush1.bf16.msra.mxu1 %v11584_v28 }
 0x196   :  { %v13563_v61 = vpop.f32.mrb[4].mxu1  ;;  %5554 = vmatprep.subr.bf16.mxu1 %v11592_v30 }
 0x197   :  { %v13565_v62 = vpop.f32.mrb[5].mxu1  ;;  %3021 = vmatpush1.bf16.msra.mxu0 %v11479_v57  ;;  %v11559_v57 = vld [vmem:[%s16273_s3 + $0x23c] ss:$40 sps:$4 sm:$0xff]  }
 0x198   :  { %v2704_v2 = vpop.f32.mrb[6].mxu1  ;;  %3022 = vmatprep.subr.bf16.mxu0 %v11484_v58  ;;  %v11557_v58 = vld [vmem:[%s16273_s3 + $0x238] ss:$40 sps:$4 sm:$0xff]  }
 0x199   :  { %v2705_v4 = vpop.f32.mrb[7].mxu1  ;;  %5555 = vmatpush1.bf16.msra.mxu1 %v11590_v32  ;;  %v11577_v2 = vld [vmem:[%s16273_s3 + $0x32c] ss:$40 sps:$4 sm:$0xff]  }
 0x19a   :  { %5556 = vmatprep.subr.bf16.mxu1 %v11598_v34  ;;  %v11583_v4 = vld [vmem:[%s16273_s3 + $0x37c] ss:$40 sps:$4 sm:$0xff]  }
 0x19b   :  { %3023 = vmatpush1.bf16.msra.mxu0 %v11482_v63  ;;  %v11571_v63 = vld [vmem:[%s16273_s3 + $0x2dc] ss:$40 sps:$4 sm:$0xff]  }
 0x19c   :  { %3024 = vmatprep.subr.bf16.mxu0 %v11487_v0  ;;  %v11569_v0 = vld [vmem:[%s16273_s3 + $0x2d8] ss:$40 sps:$4 sm:$0xff]  }
 0x19d   :  { %5557 = vmatpush1.bf16.msra.mxu1 %v11596_v37 }
 0x19e   :  { %5558 = vmatprep.subr.bf16.mxu1 %v11604_v40 }
 0x19f   :  { %3025 = vmatpush1.bf16.msra.mxu0 %v11485_v7  ;;  %v11589_v7 = vld [vmem:[%s16273_s3 + $0x3cc] ss:$40 sps:$4 sm:$0xff]  }
 0x1a0   :  { %3035 = vmatprep.subr.bf16.mxu0 %v11490_v9  ;;  %v11587_v9 = vld [vmem:[%s16273_s3 + $0x3c8] ss:$40 sps:$4 sm:$0xff]  }
 0x1a1   :  { %5559 = vmatpush1.bf16.msra.mxu1 %v11602_v42 }
 0x1a2   :  { %3027 = vmatmul.mubr.bf16.vlgmr.msra.gmra.mrb[8].mxu0 %v12740_v17  ;;  %v11494_v17 = vld [vmem:[%s16271_s1 + $0xac0] ss:$40 sps:$4 sm:$0xff]   ;;  %5569 = vmatprep.subr.bf16.mxu1 %v11610_v45  ;;  %v11614_v45 = vld [vmem:[%s16273_s3 + $0x550] ss:$40 sps:$4 sm:$0xff]  }
 0x1a3   :  { %3036 = vmatpush1.bf16.msra.mxu0 %v11488_v13  ;;  %3067 = vmatprep.mubr.bf16.mxu0 %v12236_v1  ;;  %v11601_v13 = vld [vmem:[%s16273_s3 + $0x46c] ss:$40 sps:$4 sm:$0xff]  }
 0x1a4   :  { %3037 = vmatprep.subr.bf16.mxu0 %v11493_v24 }
 0x1a7   :  { %3038 = vmatpush1.bf16.msra.mxu0 %v11491_v14 }
 0x1a8   :  { %3039 = vmatprep.subr.bf16.mxu0 %v11496_v16 }
 0x1ab   :  { %3040 = vmatpush1.bf16.msra.mxu0 %v11494_v17  ;;  %v11605_v17 = vld [vmem:[%s16273_s3 + $0x4b8] ss:$40 sps:$4 sm:$0xff]  }
 0x1ac   :  { %3041 = vmatprep.subr.bf16.mxu0 %v11499_v19  ;;  %v11613_v19 = vld [vmem:[%s16273_s3 + $0x50c] ss:$40 sps:$4 sm:$0xff]  }
 0x1af   :  { %3042 = vmatpush1.bf16.msra.mxu0 %v11497_v10  ;;  %v13797_v10 = vsub.s32 0, %v13789_v21 }
 0x1b0   :  { %3043 = vmatprep.subr.bf16.mxu0 %v11502_v36 }
 0x1b3   :  { %3044 = vmatpush1.bf16.msra.mxu0 %v11500_v26 }
 0x1b4   :  { %3045 = vmatprep.subr.bf16.mxu0 %v11505_v27 }
 0x1b7   :  { %3046 = vmatpush1.bf16.msra.mxu0 %v11503_v29 }
 0x1b8   :  { %3047 = vmatprep.subr.bf16.mxu0 %v11508_v31 }
 0x1bb   :  { %3048 = vmatpush1.bf16.msra.mxu0 %v11506_v33 }
 0x1bc   :  { %3049 = vmatprep.subr.bf16.mxu0 %v11511_v35 }
 0x1bf   :  { %3050 = vmatpush1.bf16.msra.mxu0 %v11509_v39 }
 0x1c0   :  { %5651 = vmatprep.subr.bf16.mxu0 %v11517_v41  ;;  %v11608_v41 = vld [vmem:[%s16273_s3 + $0x500] ss:$40 sps:$4 sm:$0xff]  }
 0x1c2   :  { %3068 = vmatmul.mubr.bf16.vlgmr.msra.gmra.mrb[8].mxu0 %v12431_v38  ;;  %v11535_v38 = vld [vmem:[%s16273_s3 + $0xfc] ss:$40 sps:$4 sm:$0xff]  }
 0x1c3   :  { %5652 = vmatpush1.bf16.msra.mxu0 %v11515_v43  ;;  %v11616_v43 = vld [vmem:[%s16273_s3 + $0x554] ss:$40 sps:$4 sm:$0xff]  }
 0x1c4   :  { %5653 = vmatprep.subr.bf16.mxu0 %v11523_v44  ;;  %v11619_v44 = vld [vmem:[%s16273_s3 + $0x55c] ss:$40 sps:$4 sm:$0xff]  }
 0x1c7   :  { %5654 = vmatpush1.bf16.msra.mxu0 %v11521_v46  ;;  %v11617_v46 = vld [vmem:[%s16273_s3 + $0x558] ss:$40 sps:$4 sm:$0xff]  }
 0x1c8   :  { %5655 = vmatprep.subr.bf16.mxu0 %v11529_v47  ;;  %v11622_v47 = vld [vmem:[%s16273_s3 + $0x5a4] ss:$40 sps:$4 sm:$0xff]  }
 0x1cb   :  { %5656 = vmatpush1.bf16.msra.mxu0 %v11527_v48  ;;  %v11625_v48 = vld [vmem:[%s16273_s3 + $0x5ac] ss:$40 sps:$4 sm:$0xff]  }
 0x1cc   :  { %5657 = vmatprep.subr.bf16.mxu0 %v11535_v38  ;;  %v11620_v38 = vld [vmem:[%s16273_s3 + $0x5a0] ss:$40 sps:$4 sm:$0xff]  }
 0x1cf   :  { %5658 = vmatpush1.bf16.msra.mxu0 %v11533_v49  ;;  %v11623_v49 = vld [vmem:[%s16273_s3 + $0x5a8] ss:$40 sps:$4 sm:$0xff]  }
 0x1d0   :  { %5659 = vmatprep.subr.bf16.mxu0 %v11541_v50  ;;  %v11628_v50 = vld [vmem:[%s16273_s3 + $0x5f4] ss:$40 sps:$4 sm:$0xff]  }
 0x1d3   :  { %5660 = vmatpush1.bf16.msra.mxu0 %v11539_v51  ;;  %v11631_v51 = vld [vmem:[%s16273_s3 + $0x5fc] ss:$40 sps:$4 sm:$0xff]  }
 0x1d4   :  { %5661 = vmatprep.subr.bf16.mxu0 %v11547_v53  ;;  %v11626_v53 = vld [vmem:[%s16273_s3 + $0x5f0] ss:$40 sps:$4 sm:$0xff]  }
 0x1d7   :  { %5662 = vmatpush1.bf16.msra.mxu0 %v11545_v54  ;;  %v11629_v54 = vld [vmem:[%s16273_s3 + $0x5f8] ss:$40 sps:$4 sm:$0xff]  }
 0x1d8   :  { %5663 = vmatprep.subr.bf16.mxu0 %v11553_v55  ;;  %v11634_v55 = vld [vmem:[%s16273_s3 + $0x644] ss:$40 sps:$4 sm:$0xff]  }
 0x1db   :  { %5664 = vmatpush1.bf16.msra.mxu0 %v11551_v56  ;;  %v11637_v56 = vld [vmem:[%s16273_s3 + $0x64c] ss:$40 sps:$4 sm:$0xff]  }
 0x1dc   :  { %5665 = vmatprep.subr.bf16.mxu0 %v11559_v57  ;;  %v11632_v57 = vld [vmem:[%s16273_s3 + $0x640] ss:$40 sps:$4 sm:$0xff]  }
 0x1df   :  { %5666 = vmatpush1.bf16.msra.mxu0 %v11557_v58  ;;  %v11635_v58 = vld [vmem:[%s16273_s3 + $0x648] ss:$40 sps:$4 sm:$0xff]  }
 0x1e0   :  { %5667 = vmatprep.subr.bf16.mxu0 %v11565_v59  ;;  %v11640_v59 = vld [vmem:[%s16273_s3 + $0x694] ss:$40 sps:$4 sm:$0xff]  }
 0x1e3   :  { %5668 = vmatpush1.bf16.msra.mxu0 %v11563_v60  ;;  %v11643_v60 = vld [vmem:[%s16273_s3 + $0x69c] ss:$40 sps:$4 sm:$0xff]  }
 0x1e4   :  { %5669 = vmatprep.subr.bf16.mxu0 %v11571_v63  ;;  %v11638_v63 = vld [vmem:[%s16273_s3 + $0x690] ss:$40 sps:$4 sm:$0xff]  }
 0x1e7   :  { %5670 = vmatpush1.bf16.msra.mxu0 %v11569_v0  ;;  %v11641_v0 = vld [vmem:[%s16273_s3 + $0x698] ss:$40 sps:$4 sm:$0xff]  }
 0x1e8   :  { %5671 = vmatprep.subr.bf16.mxu0 %v11577_v2  ;;  %v11646_v2 = vld [vmem:[%s16273_s3 + $0x6e4] ss:$40 sps:$4 sm:$0xff]  }
 0x1eb   :  { %5672 = vmatpush1.bf16.msra.mxu0 %v11575_v3  ;;  %v11649_v3 = vld [vmem:[%s16273_s3 + $0x6ec] ss:$40 sps:$4 sm:$0xff]  }
 0x1ec   :  { %5673 = vmatprep.subr.bf16.mxu0 %v11583_v4  ;;  %v11644_v4 = vld [vmem:[%s16273_s3 + $0x6e0] ss:$40 sps:$4 sm:$0xff]  }
 0x1ef   :  { %5674 = vmatpush1.bf16.msra.mxu0 %v11581_v5  ;;  %v11647_v5 = vld [vmem:[%s16273_s3 + $0x6e8] ss:$40 sps:$4 sm:$0xff]  }
 0x1f0   :  { %5675 = vmatprep.subr.bf16.mxu0 %v11589_v7  ;;  %v11652_v7 = vld [vmem:[%s16273_s3 + $0x734] ss:$40 sps:$4 sm:$0xff]  }
 0x1f3   :  { %5676 = vmatpush1.bf16.msra.mxu0 %v11587_v9  ;;  %v11655_v9 = vld [vmem:[%s16273_s3 + $0x73c] ss:$40 sps:$4 sm:$0xff]  }
 0x1f4   :  { %5677 = vmatprep.subr.bf16.mxu0 %v11595_v11  ;;  %v11650_v11 = vld [vmem:[%s16273_s3 + $0x730] ss:$40 sps:$4 sm:$0xff]  }
 0x1f5   :  { %v13774_v24 = vpop.f32.mrb[4].mxu0 }
 0x1f6   :  { %v2825_v14 = vpop.f32.mrb[5].mxu0 }
 0x1f7   :  { %v3076_v16 = vmax.f32 %v13411_v6, %v2825_v14  ;;  %v2827_v18 = vpop.f32.mrb[6].mxu0  ;;  %5678 = vmatpush1.bf16.msra.mxu0 %v11593_v12  ;;  %v13794_v6 = vld [vmem:[%s16274_s2] sm:$0x1f] }
 0x1f8   :  { %v2828_v52 = vpop.f32.mrb[7].mxu0  ;;  %5679 = vmatprep.subr.bf16.mxu0 %v11601_v13  ;;  %v3086_v36 = vrot.slane %v13794_v6, %v13797_v10  ;;  %v3090_v26 = vrot.slane %v13794_v6, %v13802_v22  ;;  %v11653_v12 = vld [vmem:[%s16273_s3 + $0x738] ss:$40 sps:$4 sm:$0xff]   ;;  %v11658_v13 = vld [vmem:[%s16273_s3 + $0x784] ss:$40 sps:$4 sm:$0xff]  }
 0x1f9   :  { %v11656_v14 = vld [vmem:[%s16273_s3 + $0x780] ss:$40 sps:$4 sm:$0xff]   ;;  %v11667_v18 = vld [vmem:[%s16273_s3 + $0x7dc] ss:$40 sps:$4 sm:$0xff]   ;;  %v11662_v52 = vld [vmem:[%s16273_s3 + $0x7d0] ss:$40 sps:$4 sm:$0xff]  }
 0x1fa   :  { %v3108_v23 = vadd.f32 %v3086_v36, %v3076_v16  ;;  %v11664_v16 = vld [vmem:[%s16273_s3 + $0x7d4] ss:$40 sps:$4 sm:$0xff]   ;;  %v11668_v36 = vld [vmem:[%s16273_s3 + $0x820] ss:$40 sps:$4 sm:$0xff]  }
 0x1fb   :  { %5680 = vmatpush1.bf16.msra.mxu0 %v11599_v25  ;;  %v11661_v25 = vld [vmem:[%s16273_s3 + $0x78c] ss:$40 sps:$4 sm:$0xff]  }
 0x1fc   :  { %5681 = vmatprep.subr.bf16.mxu0 %v11607_v15  ;;  %v3113_v30 = vmul.f32 0.01, %v3108_v23  ;;  %v11659_v15 = vld [vmem:[%s16273_s3 + $0x788] ss:$40 sps:$4 sm:$0xff]  }
 0x1fe   :  { %v3118_v37 = vmax.f32 %v3108_v23, %v3113_v30  ;;  %v11671_v23 = vld [vmem:[%s16273_s3 + $0x828] ss:$40 sps:$4 sm:$0xff]   ;;  %v11677_v30 = vld [vmem:[%s16273_s3 + $0x878] ss:$40 sps:$4 sm:$0xff]  }
 0x1ff   :  { %5682 = vmatpush1.bf16.msra.mxu0 %v11605_v17  ;;  %v11665_v17 = vld [vmem:[%s16273_s3 + $0x7d8] ss:$40 sps:$4 sm:$0xff]  }
 0x200   :  { %5692 = vmatprep.subr.bf16.mxu0 %v11613_v19  ;;  %v13819_v42 = vpack.c.bf16 %v3118_v37, %v3118_v37  ;;  %v11670_v19 = vld [vmem:[%s16273_s3 + $0x824] ss:$40 sps:$4 sm:$0xff]   ;;  %v11688_v37 = vld [vmem:[%s16273_s3 + $0x914] ss:$40 sps:$4 sm:$0xff]  }
 0x236   :  { %v2946_v27 = vpop.f32.mrb[8].mxu1 }
 0x237   :  { %v3077_v28 = vmax.f32 %v13414_v8, %v2946_v27  ;;  %v13807_v29 = vpop.f32.mrb[9].mxu1  ;;  %v11611_v8 = vld [vmem:[%s16273_s3 + $0x508] ss:$40 sps:$4 sm:$0xff]   ;;  %v11679_v27 = vld [vmem:[%s16273_s3 + $0x87c] ss:$40 sps:$4 sm:$0xff]  }
 0x238   :  { %v3078_v31 = vmax.f32 %v13563_v61, %v13807_v29  ;;  %v2950_v32 = vpop.f32.mrb[10].mxu1  ;;  %v11704_v61 = vld [vmem:[%s16273_s3 + $0xa00] ss:$40 sps:$4 sm:$0xff]  }
 0x239   :  { %v3109_v33 = vadd.f32 %v3090_v26, %v3077_v28  ;;  %v2951_v34 = vpop.f32.mrb[11].mxu1  ;;  %v11676_v26 = vld [vmem:[%s16273_s3 + $0x874] ss:$40 sps:$4 sm:$0xff]   ;;  %v11674_v28 = vld [vmem:[%s16273_s3 + $0x870] ss:$40 sps:$4 sm:$0xff]  }
 0x23a   :  { %v11682_v32 = vld [vmem:[%s16273_s3 + $0x8c4] ss:$40 sps:$4 sm:$0xff]   ;;  %v11680_v34 = vld [vmem:[%s16273_s3 + $0x8c0] ss:$40 sps:$4 sm:$0xff]  }
 0x23b   :  { %v3114_v35 = vmul.f32 0.01, %v3109_v33 }
 0x23d   :  { %v3119_v39 = vmax.f32 %v3109_v33, %v3114_v35  ;;  %v11685_v33 = vld [vmem:[%s16273_s3 + $0x8cc] ss:$40 sps:$4 sm:$0xff]   ;;  %v11683_v35 = vld [vmem:[%s16273_s3 + $0x8c8] ss:$40 sps:$4 sm:$0xff]  }
 0x23f   :  { %v13811_v40 = vpack.c.bf16 %v3119_v39, %v3119_v39  ;;  %v11691_v39 = vld [vmem:[%s16273_s3 + $0x91c] ss:$40 sps:$4 sm:$0xff]  }
 0x241   :  { %5560 = vmatprep.mubr.bf16.mxu1 %v13811_v40  ;;  %5683 = vmatprep.mubr.bf16.mxu0 %v13811_v40 }
 0x242   :  { %5561 = vmatmul.mubr.bf16.vlgmr.msra.gmra.mrb[12].mxu1 %v13819_v42  ;;  %5684 = vmatmul.mubr.bf16.vlgmr.msra.gmra.mrb[12].mxu0 %v13819_v42 }
 0x243   :  { %5570 = vmatpush1.bf16.msra.mxu1 %v11608_v41  ;;  %5693 = vmatpush1.bf16.msra.mxu0 %v11611_v8  ;;  %v11686_v41 = vld [vmem:[%s16273_s3 + $0x910] ss:$40 sps:$4 sm:$0xff]  }
 0x244   :  { %5571 = vmatprep.subr.bf16.mxu1 %v11616_v43  ;;  %5694 = vmatprep.subr.bf16.mxu0 %v11619_v44  ;;  %v11689_v8 = vld [vmem:[%s16273_s3 + $0x918] ss:$40 sps:$4 sm:$0xff]   ;;  %v11694_v43 = vld [vmem:[%s16273_s3 + $0x964] ss:$40 sps:$4 sm:$0xff]  }
 0x245   :  { %v11697_v44 = vld [vmem:[%s16273_s3 + $0x96c] ss:$40 sps:$4 sm:$0xff]  }
 0x247   :  { %5572 = vmatpush1.bf16.msra.mxu1 %v11614_v45  ;;  %5695 = vmatpush1.bf16.msra.mxu0 %v11617_v46  ;;  %v11692_v45 = vld [vmem:[%s16273_s3 + $0x960] ss:$40 sps:$4 sm:$0xff]  }
 0x248   :  { %5573 = vmatprep.subr.bf16.mxu1 %v11622_v47  ;;  %5696 = vmatprep.subr.bf16.mxu0 %v11625_v48  ;;  %v11695_v46 = vld [vmem:[%s16273_s3 + $0x968] ss:$40 sps:$4 sm:$0xff]   ;;  %v11700_v47 = vld [vmem:[%s16273_s3 + $0x9b4] ss:$40 sps:$4 sm:$0xff]  }
 0x249   :  { %v11703_v48 = vld [vmem:[%s16273_s3 + $0x9bc] ss:$40 sps:$4 sm:$0xff]  }
 0x24b   :  { %5574 = vmatpush1.bf16.msra.mxu1 %v11620_v38  ;;  %5697 = vmatpush1.bf16.msra.mxu0 %v11623_v49  ;;  %v11698_v38 = vld [vmem:[%s16273_s3 + $0x9b0] ss:$40 sps:$4 sm:$0xff]  }
 0x24c   :  { %5575 = vmatprep.subr.bf16.mxu1 %v11628_v50  ;;  %5698 = vmatprep.subr.bf16.mxu0 %v11631_v51  ;;  %v11701_v49 = vld [vmem:[%s16273_s3 + $0x9b8] ss:$40 sps:$4 sm:$0xff]   ;;  %v11706_v50 = vld [vmem:[%s16273_s3 + $0xa04] ss:$40 sps:$4 sm:$0xff]  }
 0x24d   :  { %v11709_v51 = vld [vmem:[%s16273_s3 + $0xa0c] ss:$40 sps:$4 sm:$0xff]  }
 0x24f   :  { %5576 = vmatpush1.bf16.msra.mxu1 %v11626_v53  ;;  %5699 = vmatpush1.bf16.msra.mxu0 %v11629_v54  ;;  %v14012_v53 = vsub.s32 2, %v13789_v21 }
 0x250   :  { %5577 = vmatprep.subr.bf16.mxu1 %v11634_v55  ;;  %5700 = vmatprep.subr.bf16.mxu0 %v11637_v56  ;;  %v14017_v55 = vsub.s32 3, %v13789_v21 }
 0x251   :  { %v3094_v54 = vrot.slane %v13794_v6, %v14012_v53 }
 0x253   :  { %5578 = vmatpush1.bf16.msra.mxu1 %v11632_v57  ;;  %5701 = vmatpush1.bf16.msra.mxu0 %v11635_v58  ;;  %v3110_v56 = vadd.f32 %v3094_v54, %v3078_v31  ;;  %v3098_v57 = vrot.slane %v13794_v6, %v14017_v55  ;;  %v11715_v31 = vld [vmem:[%s16273_s3 + $0xa5c] ss:$40 sps:$4 sm:$0xff]  }
 0x254   :  { %5579 = vmatprep.subr.bf16.mxu1 %v11640_v59  ;;  %5702 = vmatprep.subr.bf16.mxu0 %v11643_v60  ;;  %v11760_v54 = vld [vmem:[%s16273_s3 + $0x64] ss:$40 sps:$4 sm:$0xff]  }
 0x257   :  { %5580 = vmatpush1.bf16.msra.mxu1 %v11638_v63  ;;  %5703 = vmatpush1.bf16.msra.mxu0 %v11641_v0  ;;  %v3115_v63 = vmul.f32 0.01, %v3110_v56 }
 0x258   :  { %5581 = vmatprep.subr.bf16.mxu1 %v11646_v2  ;;  %5704 = vmatprep.subr.bf16.mxu0 %v11649_v3 }
 0x25b   :  { %5582 = vmatpush1.bf16.msra.mxu1 %v11644_v4  ;;  %5705 = vmatpush1.bf16.msra.mxu0 %v11647_v5 }
 0x25c   :  { %5583 = vmatprep.subr.bf16.mxu1 %v11652_v7  ;;  %5706 = vmatprep.subr.bf16.mxu0 %v11655_v9  ;;  %v3120_v7 = vmax.f32 %v3110_v56, %v3115_v63  ;;  %v11763_v56 = vld [vmem:[%s16273_s3 + $0x6c] ss:$40 sps:$4 sm:$0xff]   ;;  %v11764_v63 = vld [vmem:[%s16273_s3 + $0xb0] ss:$40 sps:$4 sm:$0xff]  }
 0x25e   :  { %v14034_v29 = vpack.c.bf16 %v3120_v7, %v3120_v7  ;;  %v11778_v7 = vld [vmem:[%s16273_s3 + $0x154] ss:$40 sps:$4 sm:$0xff]  }
 0x25f   :  { %5584 = vmatpush1.bf16.msra.mxu1 %v11650_v11  ;;  %5707 = vmatpush1.bf16.msra.mxu0 %v11653_v12  ;;  %v11710_v12 = vld [vmem:[%s16273_s3 + $0xa50] ss:$40 sps:$4 sm:$0xff]  }
 0x260   :  { %5585 = vmatprep.subr.bf16.mxu1 %v11658_v13  ;;  %5708 = vmatprep.subr.bf16.mxu0 %v11661_v25  ;;  %v11713_v13 = vld [vmem:[%s16273_s3 + $0xa58] ss:$40 sps:$4 sm:$0xff]   ;;  %v11718_v25 = vld [vmem:[%s16273_s3 + $0xaa4] ss:$40 sps:$4 sm:$0xff]  }
 0x263   :  { %5586 = vmatpush1.bf16.msra.mxu1 %v11656_v14  ;;  %5709 = vmatpush1.bf16.msra.mxu0 %v11659_v15  ;;  %v11721_v14 = vld [vmem:[%s16273_s3 + $0xaac] ss:$40 sps:$4 sm:$0xff]   ;;  %v11716_v15 = vld [vmem:[%s16273_s3 + $0xaa0] ss:$40 sps:$4 sm:$0xff]  }
 0x264   :  { %5587 = vmatprep.subr.bf16.mxu1 %v11664_v16  ;;  %5710 = vmatprep.subr.bf16.mxu0 %v11667_v18  ;;  %v11719_v16 = vld [vmem:[%s16273_s3 + $0xaa8] ss:$40 sps:$4 sm:$0xff]   ;;  %v11724_v18 = vld [vmem:[%s16273_s3 + $0xaf4] ss:$40 sps:$4 sm:$0xff]  }
 0x267   :  { %5588 = vmatpush1.bf16.msra.mxu1 %v11662_v52  ;;  %5711 = vmatpush1.bf16.msra.mxu0 %v11665_v17  ;;  %v11727_v52 = vld [vmem:[%s16273_s3 + $0xafc] ss:$40 sps:$4 sm:$0xff]   ;;  %v11722_v17 = vld [vmem:[%s16273_s3 + $0xaf0] ss:$40 sps:$4 sm:$0xff]  }
 0x268   :  { %5589 = vmatprep.subr.bf16.mxu1 %v11670_v19  ;;  %5712 = vmatprep.subr.bf16.mxu0 %v11673_v20  ;;  %v11725_v19 = vld [vmem:[%s16273_s3 + $0xaf8] ss:$40 sps:$4 sm:$0xff]   ;;  %v3101_v20 = vsub.s32 4, %v13789_v21  ;;  %v6504_v21 = vld [vmem:[%s16275_s5 + $0x9a8] sm:$0xff] }
 0x26b   :  { %5590 = vmatpush1.bf16.msra.mxu1 %v11668_v36  ;;  %5713 = vmatpush1.bf16.msra.mxu0 %v11671_v23  ;;  %v11730_v36 = vld [vmem:[%s16273_s3 + $0xb44] ss:$40 sps:$4 sm:$0xff]  }
 0x26c   :  { %5591 = vmatprep.subr.bf16.mxu1 %v11676_v26  ;;  %5714 = vmatprep.subr.bf16.mxu0 %v11679_v27  ;;  %v11733_v23 = vld [vmem:[%s16273_s3 + $0xb4c] ss:$40 sps:$4 sm:$0xff]   ;;  %v11728_v26 = vld [vmem:[%s16273_s3 + $0xb40] ss:$40 sps:$4 sm:$0xff]  }
 0x26d   :  { %v11731_v27 = vld [vmem:[%s16273_s3 + $0xb48] ss:$40 sps:$4 sm:$0xff]  }
 0x26f   :  { %5592 = vmatpush1.bf16.msra.mxu1 %v11674_v28  ;;  %5715 = vmatpush1.bf16.msra.mxu0 %v11677_v30  ;;  %v3102_v28 = vrot.slane %v13794_v6, %v3101_v20  ;;  %v11736_v30 = vld [vmem:[%s16273_s3 + $0xb94] ss:$40 sps:$4 sm:$0xff]   ;;  %v11737_v6 = vld [vmem:[%s16273_s3 + $0xb98] ss:$40 sps:$4 sm:$0xff]  }
 0x270   :  { %5593 = vmatprep.subr.bf16.mxu1 %v11682_v32  ;;  %5716 = vmatprep.subr.bf16.mxu0 %v11685_v33  ;;  %v11739_v32 = vld [vmem:[%s16273_s3 + $0xb9c] ss:$40 sps:$4 sm:$0xff]   ;;  %v11734_v33 = vld [vmem:[%s16273_s3 + $0xb90] ss:$40 sps:$4 sm:$0xff]  }
 0x273   :  { %5594 = vmatpush1.bf16.msra.mxu1 %v11680_v34  ;;  %5717 = vmatpush1.bf16.msra.mxu0 %v11683_v35  ;;  %v11742_v35 = vld [vmem:[%s16273_s3 + $0xbe4] ss:$40 sps:$4 sm:$0xff]  }
 0x274   :  { %5595 = vmatprep.subr.bf16.mxu1 %v11688_v37  ;;  %5718 = vmatprep.subr.bf16.mxu0 %v11691_v39  ;;  %v11745_v37 = vld [vmem:[%s16273_s3 + $0xbec] ss:$40 sps:$4 sm:$0xff]   ;;  %v11740_v39 = vld [vmem:[%s16273_s3 + $0xbe0] ss:$40 sps:$4 sm:$0xff]  }
 0x277   :  { %5596 = vmatpush1.bf16.msra.mxu1 %v11686_v41  ;;  %5719 = vmatpush1.bf16.msra.mxu0 %v11689_v8  ;;  %v11743_v41 = vld [vmem:[%s16273_s3 + $0xbe8] ss:$40 sps:$4 sm:$0xff]  }
 0x278   :  { %5597 = vmatprep.subr.bf16.mxu1 %v11694_v43  ;;  %5720 = vmatprep.subr.bf16.mxu0 %v11697_v44  ;;  %v11748_v43 = vld [vmem:[%s16273_s3 + $0xc34] ss:$40 sps:$4 sm:$0xff]  }
 0x279   :  { %v11751_v44 = vld [vmem:[%s16273_s3 + $0xc3c] ss:$40 sps:$4 sm:$0xff]  }
 0x27b   :  { %5598 = vmatpush1.bf16.msra.mxu1 %v11692_v45  ;;  %5721 = vmatpush1.bf16.msra.mxu0 %v11695_v46  ;;  %v11746_v45 = vld [vmem:[%s16273_s3 + $0xc30] ss:$40 sps:$4 sm:$0xff]  }
 0x27c   :  { %5599 = vmatprep.subr.bf16.mxu1 %v11700_v47  ;;  %5722 = vmatprep.subr.bf16.mxu0 %v11703_v48  ;;  %v11749_v46 = vld [vmem:[%s16273_s3 + $0xc38] ss:$40 sps:$4 sm:$0xff]   ;;  %v11754_v48 = vld [vmem:[%s16273_s3 + $0x14] ss:$40 sps:$4 sm:$0xff]  }
 0x27f   :  { %5600 = vmatpush1.bf16.msra.mxu1 %v11698_v38  ;;  %5723 = vmatpush1.bf16.msra.mxu0 %v11701_v49  ;;  %v11757_v38 = vld [vmem:[%s16273_s3 + $0x1c] ss:$40 sps:$4 sm:$0xff]   ;;  %v11752_v49 = vld [vmem:[%s16273_s3 + $0x10] ss:$40 sps:$4 sm:$0xff]  }
 0x280   :  { %5610 = vmatprep.subr.bf16.mxu1 %v11706_v50  ;;  %5733 = vmatprep.subr.bf16.mxu0 %v11709_v51  ;;  %v11755_v51 = vld [vmem:[%s16273_s3 + $0x18] ss:$40 sps:$4 sm:$0xff]  }
 0x295   :  { %v3069_v58 = vpop.f32.mrb[8].mxu0 }
 0x296   :  { %v3079_v59 = vmax.f32 %v13565_v62, %v3069_v58  ;;  %v3071_v60 = vpop.f32.mrb[9].mxu0  ;;  %v11707_v62 = vld [vmem:[%s16273_s3 + $0xa08] ss:$40 sps:$4 sm:$0xff]  }
 0x297   :  { %v3080_v0 = vmax.f32 %v13774_v24, %v3071_v60  ;;  %v3073_v2 = vpop.f32.mrb[10].mxu0  ;;  %v11712_v24 = vld [vmem:[%s16273_s3 + $0xa54] ss:$40 sps:$4 sm:$0xff]   ;;  %v11761_v58 = vld [vmem:[%s16273_s3 + $0x68] ss:$40 sps:$4 sm:$0xff]  }
 0x298   :  { %v3111_v3 = vadd.f32 %v3098_v57, %v3079_v59  ;;  %v3074_v4 = vpop.f32.mrb[11].mxu0  ;;  %v11758_v57 = vld [vmem:[%s16273_s3 + $0x60] ss:$40 sps:$4 sm:$0xff]   ;;  %v11766_v59 = vld [vmem:[%s16273_s3 + $0xb4] ss:$40 sps:$4 sm:$0xff]  }
 0x299   :  { %v3112_v34 = vadd.f32 %v3102_v28, %v3080_v0  ;;  %v11769_v60 = vld [vmem:[%s16273_s3 + $0xbc] ss:$40 sps:$4 sm:$0xff]   ;;  %v11767_v0 = vld [vmem:[%s16273_s3 + $0xb8] ss:$40 sps:$4 sm:$0xff]  }
 0x29a   :  { %v3116_v5 = vmul.f32 0.01, %v3111_v3  ;;  %v11772_v2 = vld [vmem:[%s16273_s3 + $0x104] ss:$40 sps:$4 sm:$0xff]   ;;  %v11770_v4 = vld [vmem:[%s16273_s3 + $0x100] ss:$40 sps:$4 sm:$0xff]  }
 0x29b   :  { %v3117_v8 = vmul.f32 0.01, %v3112_v34  ;;  %v11808_v28 = vld [vmem:[%s16273_s3 + $0x2e4] ss:$40 sps:$4 sm:$0xff]  }
 0x29c   :  { %v3121_v9 = vmax.f32 %v3111_v3, %v3116_v5  ;;  %v11775_v3 = vld [vmem:[%s16273_s3 + $0x10c] ss:$40 sps:$4 sm:$0xff]   ;;  %v11773_v5 = vld [vmem:[%s16273_s3 + $0x108] ss:$40 sps:$4 sm:$0xff]  }
 0x29d   :  { %v3122_v47 = vmax.f32 %v3112_v34, %v3117_v8  ;;  %v11817_v34 = vld [vmem:[%s16273_s3 + $0x33c] ss:$40 sps:$4 sm:$0xff]   ;;  %v11818_v8 = vld [vmem:[%s16273_s3 + $0x380] ss:$40 sps:$4 sm:$0xff]  }
 0x29e   :  { %v14026_v11 = vpack.c.bf16 %v3121_v9, %v3121_v9  ;;  %v11781_v9 = vld [vmem:[%s16273_s3 + $0x15c] ss:$40 sps:$4 sm:$0xff]  }
 0x29f   :  { %v14139_v50 = vpack.c.bf16 %v3122_v47, %v3122_v47  ;;  %v11827_v47 = vld [vmem:[%s16273_s3 + $0x3d8] ss:$40 sps:$4 sm:$0xff]  }
 0x2a0   :  { %5601 = vmatprep.mubr.bf16.mxu1 %v14026_v11  ;;  %5724 = vmatprep.mubr.bf16.mxu0 %v14026_v11 }
 0x2a1   :  { %5602 = vmatmul.mubr.bf16.vlgmr.msra.gmra.mrb[12].mxu1 %v14034_v29  ;;  %5725 = vmatmul.mubr.bf16.vlgmr.msra.gmra.mrb[12].mxu0 %v14034_v29 }
 0x2a2   :  { %5611 = vmatpush1.bf16.msra.mxu1 %v11704_v61  ;;  %5734 = vmatpush1.bf16.msra.mxu0 %v11707_v62  ;;  %v11776_v61 = vld [vmem:[%s16273_s3 + $0x150] ss:$40 sps:$4 sm:$0xff]  }
 0x2a3   :  { %5612 = vmatprep.subr.bf16.mxu1 %v11712_v24  ;;  %5735 = vmatprep.subr.bf16.mxu0 %v11715_v31  ;;  %v11779_v62 = vld [vmem:[%s16273_s3 + $0x158] ss:$40 sps:$4 sm:$0xff]   ;;  %v11784_v24 = vld [vmem:[%s16273_s3 + $0x1a4] ss:$40 sps:$4 sm:$0xff]  }
 0x2a4   :  { %5642 = vmatprep.mubr.bf16.mxu1 %v12236_v1  ;;  %5765 = vmatprep.mubr.bf16.mxu0 %v12236_v1  ;;  %v11787_v31 = vld [vmem:[%s16273_s3 + $0x1ac] ss:$40 sps:$4 sm:$0xff]  }
 0x2a6   :  { %5613 = vmatpush1.bf16.msra.mxu1 %v11710_v12  ;;  %5736 = vmatpush1.bf16.msra.mxu0 %v11713_v13  ;;  %v11782_v12 = vld [vmem:[%s16273_s3 + $0x1a0] ss:$40 sps:$4 sm:$0xff]  }
 0x2a7   :  { %5614 = vmatprep.subr.bf16.mxu1 %v11718_v25  ;;  %5737 = vmatprep.subr.bf16.mxu0 %v11721_v14  ;;  %v11785_v13 = vld [vmem:[%s16273_s3 + $0x1a8] ss:$40 sps:$4 sm:$0xff]   ;;  %v11790_v25 = vld [vmem:[%s16273_s3 + $0x1f4] ss:$40 sps:$4 sm:$0xff]  }
 0x2a8   :  { %v11793_v14 = vld [vmem:[%s16273_s3 + $0x1fc] ss:$40 sps:$4 sm:$0xff]  }
 0x2aa   :  { %5615 = vmatpush1.bf16.msra.mxu1 %v11716_v15  ;;  %5738 = vmatpush1.bf16.msra.mxu0 %v11719_v16  ;;  %v11788_v15 = vld [vmem:[%s16273_s3 + $0x1f0] ss:$40 sps:$4 sm:$0xff]  }
 0x2ab   :  { %5616 = vmatprep.subr.bf16.mxu1 %v11724_v18  ;;  %5739 = vmatprep.subr.bf16.mxu0 %v11727_v52  ;;  %v11791_v16 = vld [vmem:[%s16273_s3 + $0x1f8] ss:$40 sps:$4 sm:$0xff]   ;;  %v11796_v18 = vld [vmem:[%s16273_s3 + $0x244] ss:$40 sps:$4 sm:$0xff]  }
 0x2ac   :  { %v11799_v52 = vld [vmem:[%s16273_s3 + $0x24c] ss:$40 sps:$4 sm:$0xff]  }
 0x2ae   :  { %5617 = vmatpush1.bf16.msra.mxu1 %v11722_v17  ;;  %5740 = vmatpush1.bf16.msra.mxu0 %v11725_v19  ;;  %v11794_v17 = vld [vmem:[%s16273_s3 + $0x240] ss:$40 sps:$4 sm:$0xff]  }
 0x2af   :  { %5618 = vmatprep.subr.bf16.mxu1 %v11730_v36  ;;  %5741 = vmatprep.subr.bf16.mxu0 %v11733_v23  ;;  %v11797_v19 = vld [vmem:[%s16273_s3 + $0x248] ss:$40 sps:$4 sm:$0xff]   ;;  %v11802_v36 = vld [vmem:[%s16273_s3 + $0x294] ss:$40 sps:$4 sm:$0xff]  }
 0x2b0   :  { %v11805_v23 = vld [vmem:[%s16273_s3 + $0x29c] ss:$40 sps:$4 sm:$0xff]  }
 0x2b2   :  { %5619 = vmatpush1.bf16.msra.mxu1 %v11728_v26  ;;  %5742 = vmatpush1.bf16.msra.mxu0 %v11731_v27  ;;  %v11800_v26 = vld [vmem:[%s16273_s3 + $0x290] ss:$40 sps:$4 sm:$0xff]  }
 0x2b3   :  { %5620 = vmatprep.subr.bf16.mxu1 %v11736_v30  ;;  %5743 = vmatprep.subr.bf16.mxu0 %v11739_v32  ;;  %v11803_v27 = vld [vmem:[%s16273_s3 + $0x298] ss:$40 sps:$4 sm:$0xff]   ;;  %v11811_v30 = vld [vmem:[%s16273_s3 + $0x2ec] ss:$40 sps:$4 sm:$0xff]  }
 0x2b4   :  { %v11806_v32 = vld [vmem:[%s16273_s3 + $0x2e0] ss:$40 sps:$4 sm:$0xff]  }
 0x2b6   :  { %5621 = vmatpush1.bf16.msra.mxu1 %v11734_v33  ;;  %5744 = vmatpush1.bf16.msra.mxu0 %v11737_v6  ;;  %v11809_v33 = vld [vmem:[%s16273_s3 + $0x2e8] ss:$40 sps:$4 sm:$0xff]   ;;  %v11814_v6 = vld [vmem:[%s16273_s3 + $0x334] ss:$40 sps:$4 sm:$0xff]  }
 0x2b7   :  { %5622 = vmatprep.subr.bf16.mxu1 %v11742_v35  ;;  %5745 = vmatprep.subr.bf16.mxu0 %v11745_v37  ;;  %v11812_v35 = vld [vmem:[%s16273_s3 + $0x330] ss:$40 sps:$4 sm:$0xff]  }
 0x2b8   :  { %v11815_v37 = vld [vmem:[%s16273_s3 + $0x338] ss:$40 sps:$4 sm:$0xff]  }
 0x2ba   :  { %5623 = vmatpush1.bf16.msra.mxu1 %v11740_v39  ;;  %5746 = vmatpush1.bf16.msra.mxu0 %v11743_v41  ;;  %v11820_v39 = vld [vmem:[%s16273_s3 + $0x384] ss:$40 sps:$4 sm:$0xff]  }
 0x2bb   :  { %5624 = vmatprep.subr.bf16.mxu1 %v11748_v43  ;;  %5747 = vmatprep.subr.bf16.mxu0 %v11751_v44  ;;  %v11823_v41 = vld [vmem:[%s16273_s3 + $0x38c] ss:$40 sps:$4 sm:$0xff]   ;;  %v11821_v43 = vld [vmem:[%s16273_s3 + $0x388] ss:$40 sps:$4 sm:$0xff]  }
 0x2bc   :  { %v11826_v44 = vld [vmem:[%s16273_s3 + $0x3d4] ss:$40 sps:$4 sm:$0xff]  }
 0x2be   :  { %5625 = vmatpush1.bf16.msra.mxu1 %v11746_v45  ;;  %5748 = vmatpush1.bf16.msra.mxu0 %v11749_v46  ;;  %v11829_v45 = vld [vmem:[%s16273_s3 + $0x3dc] ss:$40 sps:$4 sm:$0xff]   ;;  %v11824_v46 = vld [vmem:[%s16273_s3 + $0x3d0] ss:$40 sps:$4 sm:$0xff]  }
 0x2bf   :  { %5774 = vmatprep.subr.bf16.mxu1 %v11754_v48  ;;  %5897 = vmatprep.subr.bf16.mxu0 %v11757_v38  ;;  %v11832_v48 = vld [vmem:[%s16273_s3 + $0x424] ss:$40 sps:$4 sm:$0xff]  }
 0x2c0   :  { %v11835_v38 = vld [vmem:[%s16273_s3 + $0x42c] ss:$40 sps:$4 sm:$0xff]  }
 0x2c1   :  { %5643 = vmatmul.mubr.bf16.vlgmr.msra.gmra.mrb[12].mxu1 %v14139_v50  ;;  %5766 = vmatmul.mubr.bf16.vlgmr.msra.gmra.mrb[12].mxu0 %v14139_v50 }
 0x2c2   :  { %5775 = vmatpush1.bf16.msra.mxu1 %v11752_v49  ;;  %5806 = vmatprep.mubr.bf16.mxu1 %v13811_v40  ;;  %v11830_v49 = vld [vmem:[%s16273_s3 + $0x420] ss:$40 sps:$4 sm:$0xff]  }
 0x2c3   :  { %5898 = vmatpush1.bf16.msra.mxu0 %v11755_v51  ;;  %5929 = vmatprep.mubr.bf16.mxu0 %v13811_v40  ;;  %v11833_v51 = vld [vmem:[%s16273_s3 + $0x428] ss:$40 sps:$4 sm:$0xff]  }
 0x2c4   :  { %5776 = vmatprep.subr.bf16.mxu1 %v11760_v54  ;;  %5899 = vmatprep.subr.bf16.mxu0 %v11763_v56  ;;  %v11838_v54 = vld [vmem:[%s16273_s3 + $0x474] ss:$40 sps:$4 sm:$0xff]  }
 0x2c5   :  { %v11841_v56 = vld [vmem:[%s16273_s3 + $0x47c] ss:$40 sps:$4 sm:$0xff]  }
 0x2c6   :  { %5777 = vmatpush1.bf16.msra.mxu1 %v11758_v57  ;;  %v11836_v57 = vld [vmem:[%s16273_s3 + $0x470] ss:$40 sps:$4 sm:$0xff]  }
 0x2c7   :  { %5900 = vmatpush1.bf16.msra.mxu0 %v11761_v58  ;;  %5778 = vmatprep.subr.bf16.mxu1 %v11766_v59  ;;  %v11839_v58 = vld [vmem:[%s16273_s3 + $0x478] ss:$40 sps:$4 sm:$0xff]   ;;  %v11844_v59 = vld [vmem:[%s16273_s3 + $0x4c4] ss:$40 sps:$4 sm:$0xff]  }
 0x2c8   :  { %5901 = vmatprep.subr.bf16.mxu0 %v11769_v60  ;;  %v11847_v60 = vld [vmem:[%s16273_s3 + $0x4cc] ss:$40 sps:$4 sm:$0xff]  }
 0x2ca   :  { %5779 = vmatpush1.bf16.msra.mxu1 %v11764_v63  ;;  %v11842_v63 = vld [vmem:[%s16273_s3 + $0x4c0] ss:$40 sps:$4 sm:$0xff]  }
 0x2cb   :  { %5902 = vmatpush1.bf16.msra.mxu0 %v11767_v0  ;;  %5780 = vmatprep.subr.bf16.mxu1 %v11772_v2  ;;  %v11845_v0 = vld [vmem:[%s16273_s3 + $0x4c8] ss:$40 sps:$4 sm:$0xff]   ;;  %v11850_v2 = vld [vmem:[%s16273_s3 + $0x514] ss:$40 sps:$4 sm:$0xff]  }
 0x2cc   :  { %5903 = vmatprep.subr.bf16.mxu0 %v11775_v3  ;;  %v11853_v3 = vld [vmem:[%s16273_s3 + $0x51c] ss:$40 sps:$4 sm:$0xff]  }
 0x2ce   :  { %5781 = vmatpush1.bf16.msra.mxu1 %v11770_v4  ;;  %v11848_v4 = vld [vmem:[%s16273_s3 + $0x510] ss:$40 sps:$4 sm:$0xff]  }
 0x2cf   :  { %5904 = vmatpush1.bf16.msra.mxu0 %v11773_v5  ;;  %5782 = vmatprep.subr.bf16.mxu1 %v11778_v7  ;;  %v11851_v5 = vld [vmem:[%s16273_s3 + $0x518] ss:$40 sps:$4 sm:$0xff]   ;;  %v11856_v7 = vld [vmem:[%s16273_s3 + $0x564] ss:$40 sps:$4 sm:$0xff]  }
 0x2d0   :  { %5905 = vmatprep.subr.bf16.mxu0 %v11781_v9  ;;  %v11859_v9 = vld [vmem:[%s16273_s3 + $0x56c] ss:$40 sps:$4 sm:$0xff]  }
 0x2d2   :  { %5783 = vmatpush1.bf16.msra.mxu1 %v11776_v61  ;;  %v11854_v61 = vld [vmem:[%s16273_s3 + $0x560] ss:$40 sps:$4 sm:$0xff]  }
 0x2d3   :  { %5906 = vmatpush1.bf16.msra.mxu0 %v11779_v62  ;;  %5784 = vmatprep.subr.bf16.mxu1 %v11784_v24  ;;  %v11857_v62 = vld [vmem:[%s16273_s3 + $0x568] ss:$40 sps:$4 sm:$0xff]   ;;  %v11862_v24 = vld [vmem:[%s16273_s3 + $0x5b4] ss:$40 sps:$4 sm:$0xff]  }
 0x2d4   :  { %5907 = vmatprep.subr.bf16.mxu0 %v11787_v31  ;;  %v11865_v31 = vld [vmem:[%s16273_s3 + $0x5bc] ss:$40 sps:$4 sm:$0xff]  }
 0x2d6   :  { %5785 = vmatpush1.bf16.msra.mxu1 %v11782_v12  ;;  %v11860_v12 = vld [vmem:[%s16273_s3 + $0x5b0] ss:$40 sps:$4 sm:$0xff]  }
 0x2d7   :  { %5908 = vmatpush1.bf16.msra.mxu0 %v11785_v13  ;;  %5786 = vmatprep.subr.bf16.mxu1 %v11790_v25  ;;  %v11863_v13 = vld [vmem:[%s16273_s3 + $0x5b8] ss:$40 sps:$4 sm:$0xff]   ;;  %v11868_v25 = vld [vmem:[%s16273_s3 + $0x604] ss:$40 sps:$4 sm:$0xff]  }
 0x2d8   :  { %5909 = vmatprep.subr.bf16.mxu0 %v11793_v14  ;;  %v11871_v14 = vld [vmem:[%s16273_s3 + $0x60c] ss:$40 sps:$4 sm:$0xff]  }
 0x2da   :  { %5787 = vmatpush1.bf16.msra.mxu1 %v11788_v15  ;;  %v11866_v15 = vld [vmem:[%s16273_s3 + $0x600] ss:$40 sps:$4 sm:$0xff]  }
 0x2db   :  { %5910 = vmatpush1.bf16.msra.mxu0 %v11791_v16  ;;  %5788 = vmatprep.subr.bf16.mxu1 %v11796_v18  ;;  %v11869_v16 = vld [vmem:[%s16273_s3 + $0x608] ss:$40 sps:$4 sm:$0xff]   ;;  %v11874_v18 = vld [vmem:[%s16273_s3 + $0x654] ss:$40 sps:$4 sm:$0xff]  }
 0x2dc   :  { %5911 = vmatprep.subr.bf16.mxu0 %v11799_v52  ;;  %v11877_v52 = vld [vmem:[%s16273_s3 + $0x65c] ss:$40 sps:$4 sm:$0xff]  }
 0x2de   :  { %5789 = vmatpush1.bf16.msra.mxu1 %v11794_v17  ;;  %v11872_v17 = vld [vmem:[%s16273_s3 + $0x650] ss:$40 sps:$4 sm:$0xff]  }
 0x2df   :  { %5912 = vmatpush1.bf16.msra.mxu0 %v11797_v19  ;;  %5790 = vmatprep.subr.bf16.mxu1 %v11802_v36  ;;  %v11875_v19 = vld [vmem:[%s16273_s3 + $0x658] ss:$40 sps:$4 sm:$0xff]   ;;  %v11880_v36 = vld [vmem:[%s16273_s3 + $0x6a4] ss:$40 sps:$4 sm:$0xff]  }
 0x2e0   :  { %5913 = vmatprep.subr.bf16.mxu0 %v11805_v23  ;;  %v11883_v23 = vld [vmem:[%s16273_s3 + $0x6ac] ss:$40 sps:$4 sm:$0xff]  }
 0x2e2   :  { %5791 = vmatpush1.bf16.msra.mxu1 %v11800_v26  ;;  %v11878_v26 = vld [vmem:[%s16273_s3 + $0x6a0] ss:$40 sps:$4 sm:$0xff]  }
 0x2e3   :  { %5914 = vmatpush1.bf16.msra.mxu0 %v11803_v27  ;;  %5792 = vmatprep.subr.bf16.mxu1 %v11808_v28  ;;  %v11881_v27 = vld [vmem:[%s16273_s3 + $0x6a8] ss:$40 sps:$4 sm:$0xff]   ;;  %v11886_v28 = vld [vmem:[%s16273_s3 + $0x6f4] ss:$40 sps:$4 sm:$0xff]  }
 0x2e4   :  { %5915 = vmatprep.subr.bf16.mxu0 %v11811_v30  ;;  %v11889_v30 = vld [vmem:[%s16273_s3 + $0x6fc] ss:$40 sps:$4 sm:$0xff]  }
 0x2e6   :  { %5793 = vmatpush1.bf16.msra.mxu1 %v11806_v32  ;;  %v11884_v32 = vld [vmem:[%s16273_s3 + $0x6f0] ss:$40 sps:$4 sm:$0xff]  }
 0x2e7   :  { %5916 = vmatpush1.bf16.msra.mxu0 %v11809_v33  ;;  %5794 = vmatprep.subr.bf16.mxu1 %v11814_v6  ;;  %v11887_v33 = vld [vmem:[%s16273_s3 + $0x6f8] ss:$40 sps:$4 sm:$0xff]   ;;  %v11892_v6 = vld [vmem:[%s16273_s3 + $0x744] ss:$40 sps:$4 sm:$0xff]  }
 0x2e8   :  { %5917 = vmatprep.subr.bf16.mxu0 %v11817_v34  ;;  %v11895_v34 = vld [vmem:[%s16273_s3 + $0x74c] ss:$40 sps:$4 sm:$0xff]  }
 0x2ea   :  { %5795 = vmatpush1.bf16.msra.mxu1 %v11812_v35  ;;  %v11890_v35 = vld [vmem:[%s16273_s3 + $0x740] ss:$40 sps:$4 sm:$0xff]  }
 0x2eb   :  { %5918 = vmatpush1.bf16.msra.mxu0 %v11815_v37  ;;  %5796 = vmatprep.subr.bf16.mxu1 %v11820_v39  ;;  %v11893_v37 = vld [vmem:[%s16273_s3 + $0x748] ss:$40 sps:$4 sm:$0xff]   ;;  %v11898_v39 = vld [vmem:[%s16273_s3 + $0x794] ss:$40 sps:$4 sm:$0xff]  }
 0x2ec   :  { %5919 = vmatprep.subr.bf16.mxu0 %v11823_v41  ;;  %v11901_v41 = vld [vmem:[%s16273_s3 + $0x79c] ss:$40 sps:$4 sm:$0xff]  }
 0x2ee   :  { %5797 = vmatpush1.bf16.msra.mxu1 %v11818_v8  ;;  %v11896_v8 = vld [vmem:[%s16273_s3 + $0x790] ss:$40 sps:$4 sm:$0xff]  }
 0x2ef   :  { %5920 = vmatpush1.bf16.msra.mxu0 %v11821_v43  ;;  %5798 = vmatprep.subr.bf16.mxu1 %v11826_v44  ;;  %v11899_v43 = vld [vmem:[%s16273_s3 + $0x798] ss:$40 sps:$4 sm:$0xff]   ;;  %v11904_v44 = vld [vmem:[%s16273_s3 + $0x7e4] ss:$40 sps:$4 sm:$0xff]  }
 0x2f0   :  { %5921 = vmatprep.subr.bf16.mxu0 %v11829_v45  ;;  %v11907_v45 = vld [vmem:[%s16273_s3 + $0x7ec] ss:$40 sps:$4 sm:$0xff]  }
 0x2f2   :  { %5799 = vmatpush1.bf16.msra.mxu1 %v11824_v46  ;;  %v11902_v46 = vld [vmem:[%s16273_s3 + $0x7e0] ss:$40 sps:$4 sm:$0xff]  }
 0x2f3   :  { %5922 = vmatpush1.bf16.msra.mxu0 %v11827_v47  ;;  %5800 = vmatprep.subr.bf16.mxu1 %v11832_v48  ;;  %v11905_v47 = vld [vmem:[%s16273_s3 + $0x7e8] ss:$40 sps:$4 sm:$0xff]   ;;  %v11910_v48 = vld [vmem:[%s16273_s3 + $0x834] ss:$40 sps:$4 sm:$0xff]  }
 0x2f4   :  { %5923 = vmatprep.subr.bf16.mxu0 %v11835_v38  ;;  %v11913_v38 = vld [vmem:[%s16273_s3 + $0x83c] ss:$40 sps:$4 sm:$0xff]  }
 0x2f6   :  { %5801 = vmatpush1.bf16.msra.mxu1 %v11830_v49  ;;  %v11908_v49 = vld [vmem:[%s16273_s3 + $0x830] ss:$40 sps:$4 sm:$0xff]  }
 0x2f7   :  { %5924 = vmatpush1.bf16.msra.mxu0 %v11833_v51  ;;  %5802 = vmatprep.subr.bf16.mxu1 %v11838_v54  ;;  %v11911_v51 = vld [vmem:[%s16273_s3 + $0x838] ss:$40 sps:$4 sm:$0xff]   ;;  %v11916_v54 = vld [vmem:[%s16273_s3 + $0x884] ss:$40 sps:$4 sm:$0xff]  }
 0x2f8   :  { %5925 = vmatprep.subr.bf16.mxu0 %v11841_v56  ;;  %v11919_v56 = vld [vmem:[%s16273_s3 + $0x88c] ss:$40 sps:$4 sm:$0xff]  }
 0x2fa   :  { %5803 = vmatpush1.bf16.msra.mxu1 %v11836_v57  ;;  %v11914_v57 = vld [vmem:[%s16273_s3 + $0x880] ss:$40 sps:$4 sm:$0xff]  }
 0x2fb   :  { %5926 = vmatpush1.bf16.msra.mxu0 %v11839_v58  ;;  %5804 = vmatprep.subr.bf16.mxu1 %v11844_v59  ;;  %v11917_v58 = vld [vmem:[%s16273_s3 + $0x888] ss:$40 sps:$4 sm:$0xff]   ;;  %v11922_v59 = vld [vmem:[%s16273_s3 + $0x8d4] ss:$40 sps:$4 sm:$0xff]  }
 0x2fc   :  { %5927 = vmatprep.subr.bf16.mxu0 %v11847_v60  ;;  %v11925_v60 = vld [vmem:[%s16273_s3 + $0x8dc] ss:$40 sps:$4 sm:$0xff]  }
 0x2fe   :  { %5805 = vmatpush1.bf16.msra.mxu1 %v11842_v63  ;;  %v11920_v63 = vld [vmem:[%s16273_s3 + $0x8d0] ss:$40 sps:$4 sm:$0xff]  }
 0x2ff   :  { %5928 = vmatpush1.bf16.msra.mxu0 %v11845_v0  ;;  %5815 = vmatprep.subr.bf16.mxu1 %v11850_v2  ;;  %v11923_v0 = vld [vmem:[%s16273_s3 + $0x8d8] ss:$40 sps:$4 sm:$0xff]   ;;  %v11928_v2 = vld [vmem:[%s16273_s3 + $0x924] ss:$40 sps:$4 sm:$0xff]  }
 0x300   :  { %5938 = vmatprep.subr.bf16.mxu0 %v11853_v3  ;;  %v11931_v3 = vld [vmem:[%s16273_s3 + $0x92c] ss:$40 sps:$4 sm:$0xff]  }
 0x301   :  { %5807 = vmatmul.mubr.bf16.vlgmr.msra.gmra.mrb[16].mxu1 %v13819_v42 }
 0x302   :  { %5930 = vmatmul.mubr.bf16.vlgmr.msra.gmra.mrb[16].mxu0 %v13819_v42  ;;  %5816 = vmatpush1.bf16.msra.mxu1 %v11848_v4  ;;  %v11926_v4 = vld [vmem:[%s16273_s3 + $0x920] ss:$40 sps:$4 sm:$0xff]  }
 0x303   :  { %5847 = vmatprep.mubr.bf16.mxu1 %v14026_v11  ;;  %5939 = vmatpush1.bf16.msra.mxu0 %v11851_v5  ;;  %v11929_v5 = vld [vmem:[%s16273_s3 + $0x928] ss:$40 sps:$4 sm:$0xff]  }
 0x304   :  { %5970 = vmatprep.mubr.bf16.mxu0 %v14026_v11  ;;  %5817 = vmatprep.subr.bf16.mxu1 %v11856_v7  ;;  %v11934_v7 = vld [vmem:[%s16273_s3 + $0x974] ss:$40 sps:$4 sm:$0xff]  }
 0x305   :  { %5940 = vmatprep.subr.bf16.mxu0 %v11859_v9  ;;  %v11937_v9 = vld [vmem:[%s16273_s3 + $0x97c] ss:$40 sps:$4 sm:$0xff]  }
 0x306   :  { %5818 = vmatpush1.bf16.msra.mxu1 %v11854_v61  ;;  %v11932_v61 = vld [vmem:[%s16273_s3 + $0x970] ss:$40 sps:$4 sm:$0xff]  }
 0x307   :  { %5941 = vmatpush1.bf16.msra.mxu0 %v11857_v62  ;;  %5819 = vmatprep.subr.bf16.mxu1 %v11862_v24  ;;  %v11935_v62 = vld [vmem:[%s16273_s3 + $0x978] ss:$40 sps:$4 sm:$0xff]   ;;  %v11940_v24 = vld [vmem:[%s16273_s3 + $0x9c4] ss:$40 sps:$4 sm:$0xff]  }
 0x308   :  { %5942 = vmatprep.subr.bf16.mxu0 %v11865_v31  ;;  %v11943_v31 = vld [vmem:[%s16273_s3 + $0x9cc] ss:$40 sps:$4 sm:$0xff]  }
 0x30a   :  { %5820 = vmatpush1.bf16.msra.mxu1 %v11860_v12  ;;  %v11938_v12 = vld [vmem:[%s16273_s3 + $0x9c0] ss:$40 sps:$4 sm:$0xff]  }
 0x30b   :  { %5943 = vmatpush1.bf16.msra.mxu0 %v11863_v13  ;;  %5821 = vmatprep.subr.bf16.mxu1 %v11868_v25  ;;  %v11941_v13 = vld [vmem:[%s16273_s3 + $0x9c8] ss:$40 sps:$4 sm:$0xff]   ;;  %v11946_v25 = vld [vmem:[%s16273_s3 + $0xa14] ss:$40 sps:$4 sm:$0xff]  }
 0x30c   :  { %5944 = vmatprep.subr.bf16.mxu0 %v11871_v14  ;;  %v11949_v14 = vld [vmem:[%s16273_s3 + $0xa1c] ss:$40 sps:$4 sm:$0xff]  }
 0x30e   :  { %5822 = vmatpush1.bf16.msra.mxu1 %v11866_v15  ;;  %v11944_v15 = vld [vmem:[%s16273_s3 + $0xa10] ss:$40 sps:$4 sm:$0xff]  }
 0x30f   :  { %5945 = vmatpush1.bf16.msra.mxu0 %v11869_v16  ;;  %5823 = vmatprep.subr.bf16.mxu1 %v11874_v18  ;;  %v11947_v16 = vld [vmem:[%s16273_s3 + $0xa18] ss:$40 sps:$4 sm:$0xff]   ;;  %v11952_v18 = vld [vmem:[%s16273_s3 + $0xa64] ss:$40 sps:$4 sm:$0xff]  }
 0x310   :  { %5946 = vmatprep.subr.bf16.mxu0 %v11877_v52  ;;  %v11955_v52 = vld [vmem:[%s16273_s3 + $0xa6c] ss:$40 sps:$4 sm:$0xff]  }
 0x312   :  { %5824 = vmatpush1.bf16.msra.mxu1 %v11872_v17  ;;  %v11950_v17 = vld [vmem:[%s16273_s3 + $0xa60] ss:$40 sps:$4 sm:$0xff]  }
 0x313   :  { %5947 = vmatpush1.bf16.msra.mxu0 %v11875_v19  ;;  %5825 = vmatprep.subr.bf16.mxu1 %v11880_v36  ;;  %v11953_v19 = vld [vmem:[%s16273_s3 + $0xa68] ss:$40 sps:$4 sm:$0xff]   ;;  %v11958_v36 = vld [vmem:[%s16273_s3 + $0xab4] ss:$40 sps:$4 sm:$0xff]  }
 0x314   :  { %5948 = vmatprep.subr.bf16.mxu0 %v11883_v23  ;;  %v11961_v23 = vld [vmem:[%s16273_s3 + $0xabc] ss:$40 sps:$4 sm:$0xff]  }
 0x316   :  { %5826 = vmatpush1.bf16.msra.mxu1 %v11878_v26  ;;  %v11956_v26 = vld [vmem:[%s16273_s3 + $0xab0] ss:$40 sps:$4 sm:$0xff]  }
 0x317   :  { %5949 = vmatpush1.bf16.msra.mxu0 %v11881_v27  ;;  %5827 = vmatprep.subr.bf16.mxu1 %v11886_v28  ;;  %v11959_v27 = vld [vmem:[%s16273_s3 + $0xab8] ss:$40 sps:$4 sm:$0xff]   ;;  %v11964_v28 = vld [vmem:[%s16273_s3 + $0xb04] ss:$40 sps:$4 sm:$0xff]  }
 0x318   :  { %5950 = vmatprep.subr.bf16.mxu0 %v11889_v30  ;;  %v11967_v30 = vld [vmem:[%s16273_s3 + $0xb0c] ss:$40 sps:$4 sm:$0xff]  }
 0x31a   :  { %5828 = vmatpush1.bf16.msra.mxu1 %v11884_v32  ;;  %v11962_v32 = vld [vmem:[%s16273_s3 + $0xb00] ss:$40 sps:$4 sm:$0xff]  }
 0x31b   :  { %5951 = vmatpush1.bf16.msra.mxu0 %v11887_v33  ;;  %5829 = vmatprep.subr.bf16.mxu1 %v11892_v6  ;;  %v11965_v33 = vld [vmem:[%s16273_s3 + $0xb08] ss:$40 sps:$4 sm:$0xff]   ;;  %v11970_v6 = vld [vmem:[%s16273_s3 + $0xb54] ss:$40 sps:$4 sm:$0xff]  }
 0x31c   :  { %5952 = vmatprep.subr.bf16.mxu0 %v11895_v34  ;;  %v11973_v34 = vld [vmem:[%s16273_s3 + $0xb5c] ss:$40 sps:$4 sm:$0xff]  }
 0x31e   :  { %5830 = vmatpush1.bf16.msra.mxu1 %v11890_v35  ;;  %v11968_v35 = vld [vmem:[%s16273_s3 + $0xb50] ss:$40 sps:$4 sm:$0xff]  }
 0x31f   :  { %5953 = vmatpush1.bf16.msra.mxu0 %v11893_v37  ;;  %5831 = vmatprep.subr.bf16.mxu1 %v11898_v39  ;;  %v11971_v37 = vld [vmem:[%s16273_s3 + $0xb58] ss:$40 sps:$4 sm:$0xff]   ;;  %v11976_v39 = vld [vmem:[%s16273_s3 + $0xba4] ss:$40 sps:$4 sm:$0xff]  }
 0x320   :  { %5954 = vmatprep.subr.bf16.mxu0 %v11901_v41  ;;  %v11979_v41 = vld [vmem:[%s16273_s3 + $0xbac] ss:$40 sps:$4 sm:$0xff]  }
 0x322   :  { %5832 = vmatpush1.bf16.msra.mxu1 %v11896_v8  ;;  %v11974_v8 = vld [vmem:[%s16273_s3 + $0xba0] ss:$40 sps:$4 sm:$0xff]  }
 0x323   :  { %5955 = vmatpush1.bf16.msra.mxu0 %v11899_v43  ;;  %5833 = vmatprep.subr.bf16.mxu1 %v11904_v44  ;;  %v11977_v43 = vld [vmem:[%s16273_s3 + $0xba8] ss:$40 sps:$4 sm:$0xff]   ;;  %v11982_v44 = vld [vmem:[%s16273_s3 + $0xbf4] ss:$40 sps:$4 sm:$0xff]  }
 0x324   :  { %5956 = vmatprep.subr.bf16.mxu0 %v11907_v45  ;;  %v11985_v45 = vld [vmem:[%s16273_s3 + $0xbfc] ss:$40 sps:$4 sm:$0xff]  }
 0x326   :  { %5834 = vmatpush1.bf16.msra.mxu1 %v11902_v46  ;;  %v11980_v46 = vld [vmem:[%s16273_s3 + $0xbf0] ss:$40 sps:$4 sm:$0xff]  }
 0x327   :  { %5957 = vmatpush1.bf16.msra.mxu0 %v11905_v47  ;;  %5835 = vmatprep.subr.bf16.mxu1 %v11910_v48  ;;  %v11983_v47 = vld [vmem:[%s16273_s3 + $0xbf8] ss:$40 sps:$4 sm:$0xff]   ;;  %v11988_v48 = vld [vmem:[%s16273_s3 + $0xc44] ss:$40 sps:$4 sm:$0xff]  }
 0x328   :  { %5958 = vmatprep.subr.bf16.mxu0 %v11913_v38  ;;  %v11991_v38 = vld [vmem:[%s16273_s3 + $0xc4c] ss:$40 sps:$4 sm:$0xff]  }
 0x32a   :  { %5836 = vmatpush1.bf16.msra.mxu1 %v11908_v49  ;;  %v11986_v49 = vld [vmem:[%s16273_s3 + $0xc40] ss:$40 sps:$4 sm:$0xff]  }
 0x32b   :  { %5959 = vmatpush1.bf16.msra.mxu0 %v11911_v51  ;;  %5837 = vmatprep.subr.bf16.mxu1 %v11916_v54  ;;  %v11989_v51 = vld [vmem:[%s16273_s3 + $0xc48] ss:$40 sps:$4 sm:$0xff]   ;;  %v11994_v54 = vld [vmem:[%s16273_s3 + $0x24] ss:$40 sps:$4 sm:$0xff]  }
 0x32c   :  { %5960 = vmatprep.subr.bf16.mxu0 %v11919_v56  ;;  %v11992_v56 = vld [vmem:[%s16273_s3 + $0x20] ss:$40 sps:$4 sm:$0xff]  }
 0x32e   :  { %5838 = vmatpush1.bf16.msra.mxu1 %v11914_v57  ;;  %v11997_v57 = vld [vmem:[%s16273_s3 + $0x74] ss:$40 sps:$4 sm:$0xff]  }
 0x32f   :  { %5961 = vmatpush1.bf16.msra.mxu0 %v11917_v58  ;;  %5839 = vmatprep.subr.bf16.mxu1 %v11922_v59  ;;  %v11995_v58 = vld [vmem:[%s16273_s3 + $0x70] ss:$40 sps:$4 sm:$0xff]   ;;  %v12000_v59 = vld [vmem:[%s16273_s3 + $0xc4] ss:$40 sps:$4 sm:$0xff]  }
 0x330   :  { %5962 = vmatprep.subr.bf16.mxu0 %v11925_v60  ;;  %v11998_v60 = vld [vmem:[%s16273_s3 + $0xc0] ss:$40 sps:$4 sm:$0xff]  }
 0x332   :  { %5840 = vmatpush1.bf16.msra.mxu1 %v11920_v63  ;;  %v12003_v63 = vld [vmem:[%s16273_s3 + $0x114] ss:$40 sps:$4 sm:$0xff]  }
 0x333   :  { %5963 = vmatpush1.bf16.msra.mxu0 %v11923_v0  ;;  %5841 = vmatprep.subr.bf16.mxu1 %v11928_v2  ;;  %v12006_v0 = vld [vmem:[%s16273_s3 + $0x164] ss:$40 sps:$4 sm:$0xff]   ;;  %v12004_v2 = vld [vmem:[%s16273_s3 + $0x160] ss:$40 sps:$4 sm:$0xff]  }
 0x334   :  { %5964 = vmatprep.subr.bf16.mxu0 %v11931_v3  ;;  %v12009_v3 = vld [vmem:[%s16273_s3 + $0x1b4] ss:$40 sps:$4 sm:$0xff]  }
 0x336   :  { %5842 = vmatpush1.bf16.msra.mxu1 %v11926_v4  ;;  %v12007_v4 = vld [vmem:[%s16273_s3 + $0x1b0] ss:$40 sps:$4 sm:$0xff]  }
 0x337   :  { %5965 = vmatpush1.bf16.msra.mxu0 %v11929_v5  ;;  %5843 = vmatprep.subr.bf16.mxu1 %v11934_v7  ;;  %v12012_v5 = vld [vmem:[%s16273_s3 + $0x204] ss:$40 sps:$4 sm:$0xff]   ;;  %v12010_v7 = vld [vmem:[%s16273_s3 + $0x200] ss:$40 sps:$4 sm:$0xff]  }
 0x338   :  { %5966 = vmatprep.subr.bf16.mxu0 %v11937_v9  ;;  %v12015_v9 = vld [vmem:[%s16273_s3 + $0x254] ss:$40 sps:$4 sm:$0xff]  }
 0x33a   :  { %5844 = vmatpush1.bf16.msra.mxu1 %v11932_v61  ;;  %v12013_v61 = vld [vmem:[%s16273_s3 + $0x250] ss:$40 sps:$4 sm:$0xff]  }
 0x33b   :  { %5967 = vmatpush1.bf16.msra.mxu0 %v11935_v62  ;;  %5845 = vmatprep.subr.bf16.mxu1 %v11940_v24  ;;  %v12018_v62 = vld [vmem:[%s16273_s3 + $0x2a4] ss:$40 sps:$4 sm:$0xff]   ;;  %v12016_v24 = vld [vmem:[%s16273_s3 + $0x2a0] ss:$40 sps:$4 sm:$0xff]  }
 0x33c   :  { %5968 = vmatprep.subr.bf16.mxu0 %v11943_v31  ;;  %v12021_v31 = vld [vmem:[%s16273_s3 + $0x2f4] ss:$40 sps:$4 sm:$0xff]  }
 0x33e   :  { %5846 = vmatpush1.bf16.msra.mxu1 %v11938_v12  ;;  %v6195_v12 = vld [vmem:[%s16275_s5] sm:$0xff] }
 0x33f   :  { %5969 = vmatpush1.bf16.msra.mxu0 %v11941_v13  ;;  %5856 = vmatprep.subr.bf16.mxu1 %v11946_v25  ;;  %v6199_v13 = vld [vmem:[%s16275_s5 + $0x20] sm:$0xff] }
 0x340   :  { %5979 = vmatprep.subr.bf16.mxu0 %v11949_v14  ;;  %v10309_v25 = vcombine.low %v6195_v12, %v6199_v13  ;;  %v10310_v14 = vcombine.high %v6195_v12, %v6199_v13  ;;  %v12040_v13 = vld [vmem:[%s16273_s3 + $0x520] ss:$40 sps:$4 sm:$0xff]  }
 0x341   :  { %5848 = vmatmul.mubr.bf16.vlgmr.msra.gmra.mrb[16].mxu1 %v14034_v29 }
 0x342   :  { %5971 = vmatmul.mubr.bf16.vlgmr.msra.gmra.mrb[16].mxu0 %v14034_v29  ;;  %5857 = vmatpush1.bf16.msra.mxu1 %v11944_v15  ;;  %v12019_v15 = vld [vmem:[%s16273_s3 + $0x2f0] ss:$40 sps:$4 sm:$0xff]  }
 0x343   :  { %5980 = vmatpush1.bf16.msra.mxu0 %v11947_v16  ;;  %5858 = vmatprep.subr.bf16.mxu1 %v11952_v18  ;;  %v6203_v16 = vld [vmem:[%s16275_s5 + $0x40] sm:$0xff] }
 0x344   :  { %5981 = vmatprep.subr.bf16.mxu0 %v11955_v52  ;;  %5888 = vmatprep.mubr.bf16.mxu1 %v12236_v1  ;;  %v6207_v18 = vld [vmem:[%s16275_s5 + $0x60] sm:$0xff] }
 0x345   :  { %6011 = vmatprep.mubr.bf16.mxu0 %v12236_v1  ;;  %v12024_v52 = vld [vmem:[%s16273_s3 + $0x344] ss:$40 sps:$4 sm:$0xff]  }
 0x346   :  { %5859 = vmatpush1.bf16.msra.mxu1 %v11950_v17  ;;  %v10317_v17 = vcombine.low %v6203_v16, %v6207_v18 }
 0x347   :  { %5982 = vmatpush1.bf16.msra.mxu0 %v11953_v19  ;;  %5860 = vmatprep.subr.bf16.mxu1 %v11958_v36  ;;  %v10318_v19 = vcombine.high %v6203_v16, %v6207_v18  ;;  %v12022_v36 = vld [vmem:[%s16273_s3 + $0x340] ss:$40 sps:$4 sm:$0xff]  }
 0x348   :  { %5983 = vmatprep.subr.bf16.mxu0 %v11961_v23  ;;  %v6211_v23 = vld [vmem:[%s16275_s5 + $0x80] sm:$0xff] }
 0x34a   :  { %5861 = vmatpush1.bf16.msra.mxu1 %v11956_v26  ;;  %v6215_v26 = vld [vmem:[%s16275_s5 + $0xa0] sm:$0xff] }
 0x34b   :  { %5984 = vmatpush1.bf16.msra.mxu0 %v11959_v27  ;;  %5862 = vmatprep.subr.bf16.mxu1 %v11964_v28  ;;  %v12027_v27 = vld [vmem:[%s16273_s3 + $0x394] ss:$40 sps:$4 sm:$0xff]   ;;  %v10325_v28 = vcombine.low %v6211_v23, %v6215_v26 }
 0x34c   :  { %5985 = vmatprep.subr.bf16.mxu0 %v11967_v30  ;;  %v10326_v30 = vcombine.high %v6211_v23, %v6215_v26  ;;  %v12046_v23 = vld [vmem:[%s16273_s3 + $0x5c0] ss:$40 sps:$4 sm:$0xff]  }
 0x34d   :  { %v6275_v26 = vld [vmem:[%s16275_s5 + $0x280] sm:$0xff] }
 0x34e   :  { %5863 = vmatpush1.bf16.msra.mxu1 %v11962_v32  ;;  %v12025_v32 = vld [vmem:[%s16273_s3 + $0x390] ss:$40 sps:$4 sm:$0xff]  }
 0x34f   :  { %5986 = vmatpush1.bf16.msra.mxu0 %v11965_v33  ;;  %5864 = vmatprep.subr.bf16.mxu1 %v11970_v6  ;;  %v6219_v33 = vld [vmem:[%s16275_s5 + $0xc0] sm:$0xff] }
 0x350   :  { %5987 = vmatprep.subr.bf16.mxu0 %v11973_v34  ;;  %v6223_v6 = vld [vmem:[%s16275_s5 + $0xe0] sm:$0xff] }
 0x351   :  { %v12030_v34 = vld [vmem:[%s16273_s3 + $0x3e4] ss:$40 sps:$4 sm:$0xff]  }
 0x352   :  { %5865 = vmatpush1.bf16.msra.mxu1 %v11968_v35  ;;  %v10333_v35 = vcombine.low %v6219_v33, %v6223_v6 }
 0x353   :  { %5988 = vmatpush1.bf16.msra.mxu0 %v11971_v37  ;;  %5866 = vmatprep.subr.bf16.mxu1 %v11976_v39  ;;  %v10334_v37 = vcombine.high %v6219_v33, %v6223_v6  ;;  %v12028_v39 = vld [vmem:[%s16273_s3 + $0x3e0] ss:$40 sps:$4 sm:$0xff]   ;;  %v12049_v33 = vld [vmem:[%s16273_s3 + $0x610] ss:$40 sps:$4 sm:$0xff]  }
 0x354   :  { %5989 = vmatprep.subr.bf16.mxu0 %v11979_v41  ;;  %v6227_v41 = vld [vmem:[%s16275_s5 + $0x100] sm:$0xff] }
 0x355   :  { %v6283_v6 = vld [vmem:[%s16275_s5 + $0x2c0] sm:$0xff] }
 0x356   :  { %5867 = vmatpush1.bf16.msra.mxu1 %v11974_v8  ;;  %v6231_v8 = vld [vmem:[%s16275_s5 + $0x120] sm:$0xff] }
 0x357   :  { %5990 = vmatpush1.bf16.msra.mxu0 %v11977_v43  ;;  %5868 = vmatprep.subr.bf16.mxu1 %v11982_v44  ;;  %v12033_v43 = vld [vmem:[%s16273_s3 + $0x434] ss:$40 sps:$4 sm:$0xff]   ;;  %v10341_v44 = vcombine.low %v6227_v41, %v6231_v8 }
 0x358   :  { %5991 = vmatprep.subr.bf16.mxu0 %v11985_v45  ;;  %v10342_v45 = vcombine.high %v6227_v41, %v6231_v8  ;;  %v12052_v41 = vld [vmem:[%s16273_s3 + $0x660] ss:$40 sps:$4 sm:$0xff]  }
 0x359   :  { %v6291_v8 = vld [vmem:[%s16275_s5 + $0x300] sm:$0xff] }
 0x35a   :  { %5869 = vmatpush1.bf16.msra.mxu1 %v11980_v46  ;;  %v12031_v46 = vld [vmem:[%s16273_s3 + $0x430] ss:$40 sps:$4 sm:$0xff]  }
 0x35b   :  { %5992 = vmatpush1.bf16.msra.mxu0 %v11983_v47  ;;  %5870 = vmatprep.subr.bf16.mxu1 %v11988_v48  ;;  %v6235_v47 = vld [vmem:[%s16275_s5 + $0x140] sm:$0xff] }
 0x35c   :  { %5993 = vmatprep.subr.bf16.mxu0 %v11991_v38  ;;  %v6239_v48 = vld [vmem:[%s16275_s5 + $0x160] sm:$0xff] }
 0x35d   :  { %v12036_v38 = vld [vmem:[%s16273_s3 + $0x484] ss:$40 sps:$4 sm:$0xff]  }
 0x35e   :  { %5871 = vmatpush1.bf16.msra.mxu1 %v11986_v49  ;;  %v10349_v49 = vcombine.low %v6235_v47, %v6239_v48 }
 0x35f   :  { %5994 = vmatpush1.bf16.msra.mxu0 %v11989_v51  ;;  %6020 = vmatprep.subr.bf16.mxu1 %v11994_v54  ;;  %v10350_v51 = vcombine.high %v6235_v47, %v6239_v48  ;;  %v12055_v47 = vld [vmem:[%s16273_s3 + $0x6b0] ss:$40 sps:$4 sm:$0xff]   ;;  %v12060_v48 = vld [vmem:[%s16273_s3 + $0x704] ss:$40 sps:$4 sm:$0xff]  }
 0x360   :  { %8115 = vmatprep.subr.bf16.mxu0 %v10310_v14  ;;  %v6263_v14 = vld [vmem:[%s16275_s5 + $0x220] sm:$0xff] }
 0x361   :  { %5889 = vmatmul.mubr.bf16.vlgmr.msra.gmra.mrb[16].mxu1 %v14139_v50 }
 0x362   :  { %6012 = vmatmul.mubr.bf16.vlgmr.msra.gmra.mrb[16].mxu0 %v14139_v50  ;;  %6021 = vmatpush1.bf16.msra.mxu1 %v11992_v56 }
 0x363   :  { %6052 = vmatprep.mubr.bf16.mxu1 %v13811_v40  ;;  %6022 = vmatprep.subr.bf16.mxu1 %v11997_v57  ;;  %v12001_v40 = vld [vmem:[%s16273_s3 + $0x110] ss:$40 sps:$4 sm:$0xff]  }
 0x364   :  { %8116 = vmatpush1.bf16.msra.mxu0 %v10309_v25  ;;  %v6259_v25 = vld [vmem:[%s16275_s5 + $0x200] sm:$0xff] }
 0x365   :  { %8117 = vmatprep.subr.bf16.mxu0 %v10318_v19  ;;  %v10373_v16 = vcombine.low %v6259_v25, %v6263_v14  ;;  %v10374_v18 = vcombine.high %v6259_v25, %v6263_v14  ;;  %v6271_v19 = vld [vmem:[%s16275_s5 + $0x260] sm:$0xff]  ;;  %v12067_v25 = vld [vmem:[%s16273_s3 + $0x7f0] ss:$40 sps:$4 sm:$0xff]  }
 0x366   :  { %6023 = vmatpush1.bf16.msra.mxu1 %v11995_v58 }
 0x367   :  { %6024 = vmatprep.subr.bf16.mxu1 %v12000_v59 }
 0x368   :  { %8118 = vmatpush1.bf16.msra.mxu0 %v10317_v17  ;;  %v6267_v17 = vld [vmem:[%s16275_s5 + $0x240] sm:$0xff] }
 0x369   :  { %8119 = vmatprep.subr.bf16.mxu0 %v10326_v30 }
 0x36a   :  { %6025 = vmatpush1.bf16.msra.mxu1 %v11998_v60 }
 0x36b   :  { %6026 = vmatprep.subr.bf16.mxu1 %v12003_v63  ;;  %v12034_v63 = vld [vmem:[%s16273_s3 + $0x480] ss:$40 sps:$4 sm:$0xff]  }
 0x36c   :  { %8120 = vmatpush1.bf16.msra.mxu0 %v10325_v28  ;;  %v12051_v28 = vld [vmem:[%s16273_s3 + $0x614] ss:$40 sps:$4 sm:$0xff]  }
 0x36d   :  { %8121 = vmatprep.subr.bf16.mxu0 %v10334_v37 }
 0x36e   :  { %6027 = vmatpush1.bf16.msra.mxu1 %v12001_v40  ;;  %v6243_v40 = vld [vmem:[%s16275_s5 + $0x180] sm:$0xff] }
 0x36f   :  { %6028 = vmatprep.subr.bf16.mxu1 %v12006_v0  ;;  %v6247_v0 = vld [vmem:[%s16275_s5 + $0x1a0] sm:$0xff] }
 0x370   :  { %8122 = vmatpush1.bf16.msra.mxu0 %v10333_v35  ;;  %v12054_v35 = vld [vmem:[%s16273_s3 + $0x664] ss:$40 sps:$4 sm:$0xff]  }
 0x371   :  { %8123 = vmatprep.subr.bf16.mxu0 %v10342_v45 }
 0x372   :  { %6029 = vmatpush1.bf16.msra.mxu1 %v12004_v2 }
 0x373   :  { %6030 = vmatprep.subr.bf16.mxu1 %v12009_v3 }
 0x374   :  { %8124 = vmatpush1.bf16.msra.mxu0 %v10341_v44  ;;  %v12057_v44 = vld [vmem:[%s16273_s3 + $0x6b4] ss:$40 sps:$4 sm:$0xff]  }
 0x375   :  { %8125 = vmatprep.subr.bf16.mxu0 %v10350_v51 }
 0x376   :  { %6031 = vmatpush1.bf16.msra.mxu1 %v12007_v4  ;;  %v12039_v4 = vld [vmem:[%s16273_s3 + $0x4d4] ss:$40 sps:$4 sm:$0xff]  }
 0x377   :  { %6032 = vmatprep.subr.bf16.mxu1 %v12012_v5  ;;  %v10357_v5 = vcombine.low %v6243_v40, %v6247_v0 }
 0x378   :  { %8126 = vmatpush1.bf16.msra.mxu0 %v10349_v49  ;;  %v6303_v49 = vld [vmem:[%s16275_s5 + $0x360] sm:$0xff] }
 0x37a   :  { %6033 = vmatpush1.bf16.msra.mxu1 %v12010_v7  ;;  %v10358_v7 = vcombine.high %v6243_v40, %v6247_v0  ;;  %v6307_v40 = vld [vmem:[%s16275_s5 + $0x380] sm:$0xff] }
 0x37b   :  { %6034 = vmatprep.subr.bf16.mxu1 %v12015_v9  ;;  %v12037_v9 = vld [vmem:[%s16273_s3 + $0x4d0] ss:$40 sps:$4 sm:$0xff]   ;;  %v6311_v0 = vld [vmem:[%s16275_s5 + $0x3a0] sm:$0xff] }
 0x37c   :  { %8127 = vmatprep.subr.bf16.mxu0 %v10358_v7  ;;  %v6315_v7 = vld [vmem:[%s16275_s5 + $0x3c0] sm:$0xff] }
 0x37d   :  { %8128 = vmatpush1.bf16.msra.mxu0 %v10357_v5  ;;  %v12066_v5 = vld [vmem:[%s16273_s3 + $0x7a4] ss:$40 sps:$4 sm:$0xff]  }
 0x37e   :  { %6035 = vmatpush1.bf16.msra.mxu1 %v12013_v61  ;;  %v6251_v61 = vld [vmem:[%s16275_s5 + $0x1c0] sm:$0xff] }
 0x37f   :  { %6036 = vmatprep.subr.bf16.mxu1 %v12018_v62  ;;  %v6255_v62 = vld [vmem:[%s16275_s5 + $0x1e0] sm:$0xff] }
 0x380   :  { %v10366_v12 = vcombine.high %v6251_v61, %v6255_v62 }
 0x382   :  { %6037 = vmatpush1.bf16.msra.mxu1 %v12016_v24  ;;  %v12042_v24 = vld [vmem:[%s16273_s3 + $0x524] ss:$40 sps:$4 sm:$0xff]   ;;  %8129 = vmatprep.subr.bf16.mxu0 %v10366_v12 }
 0x383   :  { %6038 = vmatprep.subr.bf16.mxu1 %v12021_v31  ;;  %v10365_v31 = vcombine.low %v6251_v61, %v6255_v62  ;;  %v14889_v12 = vld [vmem:[%s16275_s5 + $0x400] sm:$0xff] }
 0x385   :  { %8130 = vmatpush1.bf16.msra.mxu0 %v10365_v31  ;;  %v12069_v31 = vld [vmem:[%s16273_s3 + $0x7f4] ss:$40 sps:$4 sm:$0xff]  }
 0x386   :  { %6039 = vmatpush1.bf16.msra.mxu1 %v12019_v15  ;;  %v12045_v15 = vld [vmem:[%s16273_s3 + $0x574] ss:$40 sps:$4 sm:$0xff]   ;;  %8131 = vmatprep.subr.bf16.mxu0 %v10374_v18  ;;  %v12070_v18 = vld [vmem:[%s16273_s3 + $0x840] ss:$40 sps:$4 sm:$0xff]  }
 0x387   :  { %6040 = vmatprep.subr.bf16.mxu1 %v12024_v52  ;;  %v12043_v52 = vld [vmem:[%s16273_s3 + $0x570] ss:$40 sps:$4 sm:$0xff]  }
 0x389   :  { %8132 = vmatpush1.bf16.msra.mxu0 %v10373_v16  ;;  %v12072_v16 = vld [vmem:[%s16273_s3 + $0x844] ss:$40 sps:$4 sm:$0xff]  }
 0x38a   :  { %6041 = vmatpush1.bf16.msra.mxu1 %v12022_v36  ;;  %v10381_v36 = vcombine.low %v6267_v17, %v6271_v19 }
 0x38b   :  { %6042 = vmatprep.subr.bf16.mxu1 %v12027_v27  ;;  %v6279_v27 = vld [vmem:[%s16275_s5 + $0x2a0] sm:$0xff] }
 0x38c   :  { %v10389_v30 = vcombine.low %v6275_v26, %v6279_v27 }
 0x38e   :  { %6043 = vmatpush1.bf16.msra.mxu1 %v12025_v32  ;;  %v10390_v32 = vcombine.high %v6275_v26, %v6279_v27  ;;  %v12082_v26 = vld [vmem:[%s16273_s3 + $0x980] ss:$40 sps:$4 sm:$0xff]   ;;  %v12087_v27 = vld [vmem:[%s16273_s3 + $0x9d4] ss:$40 sps:$4 sm:$0xff]  }
 0x38f   :  { %6044 = vmatprep.subr.bf16.mxu1 %v12030_v34  ;;  %v6287_v34 = vld [vmem:[%s16275_s5 + $0x2e0] sm:$0xff] }
 0x390   :  { %v10397_v37 = vcombine.low %v6283_v6, %v6287_v34 }
 0x392   :  { %6045 = vmatpush1.bf16.msra.mxu1 %v12028_v39  ;;  %v10398_v39 = vcombine.high %v6283_v6, %v6287_v34  ;;  %v12091_v6 = vld [vmem:[%s16273_s3 + $0xa70] ss:$40 sps:$4 sm:$0xff]   ;;  %v12096_v34 = vld [vmem:[%s16273_s3 + $0xac4] ss:$40 sps:$4 sm:$0xff]  }
 0x393   :  { %6046 = vmatprep.subr.bf16.mxu1 %v12033_v43  ;;  %v6295_v43 = vld [vmem:[%s16275_s5 + $0x320] sm:$0xff] }
 0x394   :  { %v14750_v54 = vpop.f32.mrb[12].mxu1  ;;  %v14752_v56 = vpop.f32.mrb[12].mxu0  ;;  %v10405_v45 = vcombine.low %v6291_v8, %v6295_v43 }
 0x395   :  { %v14754_v57 = vpop.f32.mrb[13].mxu1  ;;  %v14756_v58 = vpop.f32.mrb[13].mxu0 }
 0x396   :  { %v5648_v59 = vpop.f32.mrb[14].mxu1  ;;  %v5771_v60 = vpop.f32.mrb[14].mxu0  ;;  %6047 = vmatpush1.bf16.msra.mxu1 %v12031_v46  ;;  %v10406_v46 = vcombine.high %v6291_v8, %v6295_v43  ;;  %v12105_v8 = vld [vmem:[%s16273_s3 + $0xbb4] ss:$40 sps:$4 sm:$0xff]   ;;  %v12103_v43 = vld [vmem:[%s16273_s3 + $0xbb0] ss:$40 sps:$4 sm:$0xff]  }
 0x397   :  { %v5649_v2 = vpop.f32.mrb[15].mxu1  ;;  %v5772_v3 = vpop.f32.mrb[15].mxu0  ;;  %6048 = vmatprep.subr.bf16.mxu1 %v12036_v38  ;;  %v6299_v38 = vld [vmem:[%s16275_s5 + $0x340] sm:$0xff] }
 0x398   :  { %v10414_v51 = vcombine.high %v6299_v38, %v6303_v49  ;;  %v10413_v59 = vcombine.low %v6299_v38, %v6303_v49  ;;  %v12058_v60 = vld [vmem:[%s16273_s3 + $0x700] ss:$40 sps:$4 sm:$0xff]   ;;  %v10422_v2 = vcombine.high %v6307_v40, %v6311_v0  ;;  %v10421_v3 = vcombine.low %v6307_v40, %v6311_v0  ;;  %v12109_v38 = vld [vmem:[%s16273_s3 + $0xc50] ss:$40 sps:$4 sm:$0xff]  }
 0x399   :  { %v6212_v40 = vld [vmem:[%s16275_s5 + $0x88] sm:$0xff] }
 0x39a   :  { %6049 = vmatpush1.bf16.msra.mxu1 %v12034_v63  ;;  %v12063_v63 = vld [vmem:[%s16273_s3 + $0x754] ss:$40 sps:$4 sm:$0xff]   ;;  %v6216_v0 = vld [vmem:[%s16275_s5 + $0xa8] sm:$0xff] }
 0x39b   :  { %6050 = vmatprep.subr.bf16.mxu1 %v12039_v4  ;;  %v12061_v4 = vld [vmem:[%s16273_s3 + $0x750] ss:$40 sps:$4 sm:$0xff]  }
 0x39e   :  { %6051 = vmatpush1.bf16.msra.mxu1 %v12037_v9  ;;  %v6319_v9 = vld [vmem:[%s16275_s5 + $0x3e0] sm:$0xff] }
 0x39f   :  { %6061 = vmatprep.subr.bf16.mxu1 %v12042_v24  ;;  %v10430_v61 = vcombine.high %v6315_v7, %v6319_v9  ;;  %v10429_v62 = vcombine.low %v6315_v7, %v6319_v9  ;;  %v12064_v24 = vld [vmem:[%s16273_s3 + $0x7a0] ss:$40 sps:$4 sm:$0xff]   ;;  %v10327_v7 = vcombine.low %v6212_v40, %v6216_v0 }
 0x3a1   :  { %6053 = vmatmul.mubr.bf16.vlgmr.msra.gmra.mrb[20].mxu1 %v13819_v42  ;;  %v12048_v42 = vld [vmem:[%s16273_s3 + $0x5c4] ss:$40 sps:$4 sm:$0xff]  }
 0x3a2   :  { %6062 = vmatpush1.bf16.msra.mxu1 %v12040_v13  ;;  %6093 = vmatprep.mubr.bf16.mxu1 %v14026_v11  ;;  %v10382_v11 = vcombine.high %v6267_v17, %v6271_v19  ;;  %v14894_v13 = vld [vmem:[%s16275_s5 + $0x420] sm:$0xff]  ;;  %v12073_v17 = vld [vmem:[%s16273_s3 + $0x890] ss:$40 sps:$4 sm:$0xff]  }
 0x3a3   :  { %6063 = vmatprep.subr.bf16.mxu1 %v12045_v15  ;;  %v10437_v14 = vcombine.low %v14889_v12, %v14894_v13  ;;  %v10438_v15 = vcombine.high %v14889_v12, %v14894_v13  ;;  %v12078_v19 = vld [vmem:[%s16273_s3 + $0x8e4] ss:$40 sps:$4 sm:$0xff]  }
 0x3a4   :  { %8133 = vmatprep.subr.bf16.mxu0 %v10382_v11  ;;  %v12079_v11 = vld [vmem:[%s16273_s3 + $0x930] ss:$40 sps:$4 sm:$0xff]   ;;  %v6348_v12 = vld [vmem:[%s16275_s5 + $0x4c8] sm:$0xff] }
 0x3a5   :  { %8134 = vmatpush1.bf16.msra.mxu0 %v10381_v36  ;;  %v12081_v36 = vld [vmem:[%s16273_s3 + $0x934] ss:$40 sps:$4 sm:$0xff]   ;;  %v6352_v13 = vld [vmem:[%s16275_s5 + $0x4e8] sm:$0xff] }
 0x3a6   :  { %6064 = vmatpush1.bf16.msra.mxu1 %v12043_v52  ;;  %8135 = vmatprep.subr.bf16.mxu0 %v10390_v32  ;;  %v12075_v52 = vld [vmem:[%s16273_s3 + $0x894] ss:$40 sps:$4 sm:$0xff]   ;;  %v12088_v32 = vld [vmem:[%s16273_s3 + $0xa20] ss:$40 sps:$4 sm:$0xff]  }
 0x3a7   :  { %6065 = vmatprep.subr.bf16.mxu1 %v12048_v42  ;;  %v12076_v42 = vld [vmem:[%s16273_s3 + $0x8e0] ss:$40 sps:$4 sm:$0xff]  }
 0x3a9   :  { %8136 = vmatpush1.bf16.msra.mxu0 %v10389_v30  ;;  %v12090_v30 = vld [vmem:[%s16273_s3 + $0xa24] ss:$40 sps:$4 sm:$0xff]  }
 0x3aa   :  { %6066 = vmatpush1.bf16.msra.mxu1 %v12046_v23  ;;  %8137 = vmatprep.subr.bf16.mxu0 %v10398_v39  ;;  %v12084_v23 = vld [vmem:[%s16273_s3 + $0x984] ss:$40 sps:$4 sm:$0xff]  }
 0x3ab   :  { %6067 = vmatprep.subr.bf16.mxu1 %v12051_v28  ;;  %v12085_v28 = vld [vmem:[%s16273_s3 + $0x9d0] ss:$40 sps:$4 sm:$0xff]   ;;  %v12102_v39 = vld [vmem:[%s16273_s3 + $0xb64] ss:$40 sps:$4 sm:$0xff]  }
 0x3ad   :  { %8138 = vmatpush1.bf16.msra.mxu0 %v10397_v37  ;;  %v12097_v37 = vld [vmem:[%s16273_s3 + $0xb10] ss:$40 sps:$4 sm:$0xff]  }
 0x3ae   :  { %6068 = vmatpush1.bf16.msra.mxu1 %v12049_v33  ;;  %8139 = vmatprep.subr.bf16.mxu0 %v10406_v46  ;;  %v12093_v33 = vld [vmem:[%s16273_s3 + $0xa74] ss:$40 sps:$4 sm:$0xff]  }
 0x3af   :  { %6069 = vmatprep.subr.bf16.mxu1 %v12054_v35  ;;  %v12094_v35 = vld [vmem:[%s16273_s3 + $0xac0] ss:$40 sps:$4 sm:$0xff]   ;;  %v12111_v46 = vld [vmem:[%s16273_s3 + $0xc54] ss:$40 sps:$4 sm:$0xff]  }
 0x3b1   :  { %8140 = vmatpush1.bf16.msra.mxu0 %v10405_v45  ;;  %v12106_v45 = vld [vmem:[%s16273_s3 + $0xc00] ss:$40 sps:$4 sm:$0xff]  }
 0x3b2   :  { %6070 = vmatpush1.bf16.msra.mxu1 %v12052_v41  ;;  %8141 = vmatprep.subr.bf16.mxu0 %v10414_v51  ;;  %v12100_v41 = vld [vmem:[%s16273_s3 + $0xb60] ss:$40 sps:$4 sm:$0xff]  }
 0x3b3   :  { %6071 = vmatprep.subr.bf16.mxu1 %v12057_v44  ;;  %v12108_v44 = vld [vmem:[%s16273_s3 + $0xc04] ss:$40 sps:$4 sm:$0xff]  }
 0x3b4   :  { %v6204_v51 = vld [vmem:[%s16275_s5 + $0x48] sm:$0xff] }
 0x3b5   :  { %8142 = vmatpush1.bf16.msra.mxu0 %v10413_v59  ;;  %v6208_v59 = vld [vmem:[%s16275_s5 + $0x68] sm:$0xff] }
 0x3b6   :  { %6072 = vmatpush1.bf16.msra.mxu1 %v12055_v47  ;;  %8143 = vmatprep.subr.bf16.mxu0 %v10422_v2  ;;  %v6196_v47 = vld [vmem:[%s16275_s5 + $0x8] sm:$0xff]  ;;  %v10319_v2 = vcombine.low %v6204_v51, %v6208_v59 }
 0x3b7   :  { %6073 = vmatprep.subr.bf16.mxu1 %v12060_v48  ;;  %v6200_v48 = vld [vmem:[%s16275_s5 + $0x28] sm:$0xff] }
 0x3b8   :  { %v10312_v49 = vcombine.high %v6196_v47, %v6200_v48 }
 0x3b9   :  { %8144 = vmatpush1.bf16.msra.mxu0 %v10421_v3  ;;  %v10328_v3 = vcombine.high %v6212_v40, %v6216_v0  ;;  %v15083_v40 = vld [vmem:[%s16276_s4] sm:$0x1f] }
 0x3ba   :  { %6074 = vmatpush1.bf16.msra.mxu1 %v12058_v60  ;;  %8145 = vmatprep.subr.bf16.mxu0 %v10430_v61  ;;  %v10311_v60 = vcombine.low %v6196_v47, %v6200_v48  ;;  %v6232_v61 = vld [vmem:[%s16275_s5 + $0x128] sm:$0xff] }
 0x3bb   :  { %6075 = vmatprep.subr.bf16.mxu1 %v12063_v63  ;;  %v10320_v63 = vcombine.high %v6204_v51, %v6208_v59 }
 0x3bd   :  { %8146 = vmatpush1.bf16.msra.mxu0 %v10429_v62 }
 0x3be   :  { %6076 = vmatpush1.bf16.msra.mxu1 %v12061_v4  ;;  %8156 = vmatprep.subr.bf16.mxu0 %v10438_v15  ;;  %v6220_v4 = vld [vmem:[%s16275_s5 + $0xc8] sm:$0xff] }
 0x3bf   :  { %6077 = vmatprep.subr.bf16.mxu1 %v12066_v5  ;;  %v6224_v5 = vld [vmem:[%s16275_s5 + $0xe8] sm:$0xff] }
 0x3c0   :  { %v10336_v9 = vcombine.high %v6220_v4, %v6224_v5  ;;  %v10335_v62 = vcombine.low %v6220_v4, %v6224_v5  ;;  %v6157_v4 = vrot.slane %v15083_v40, %v13802_v22  ;;  %v6153_v5 = vrot.slane %v15083_v40, %v13797_v10 }
 0x3c2   :  { %6078 = vmatpush1.bf16.msra.mxu1 %v12064_v24 }
 0x3c3   :  { %6079 = vmatprep.subr.bf16.mxu1 %v12069_v31  ;;  %v6236_v31 = vld [vmem:[%s16275_s5 + $0x148] sm:$0xff] }
 0x3c6   :  { %6080 = vmatpush1.bf16.msra.mxu1 %v12067_v25  ;;  %v6240_v25 = vld [vmem:[%s16275_s5 + $0x168] sm:$0xff] }
 0x3c7   :  { %6081 = vmatprep.subr.bf16.mxu1 %v12072_v16  ;;  %v10352_v16 = vcombine.high %v6236_v31, %v6240_v25 }
 0x3ca   :  { %6082 = vmatpush1.bf16.msra.mxu1 %v12070_v18  ;;  %v6244_v18 = vld [vmem:[%s16275_s5 + $0x188] sm:$0xff] }
 0x3cb   :  { %6083 = vmatprep.subr.bf16.mxu1 %v12075_v52  ;;  %v6248_v52 = vld [vmem:[%s16275_s5 + $0x1a8] sm:$0xff] }
 0x3ce   :  { %6084 = vmatpush1.bf16.msra.mxu1 %v12073_v17  ;;  %v10351_v17 = vcombine.low %v6236_v31, %v6240_v25 }
 0x3cf   :  { %6085 = vmatprep.subr.bf16.mxu1 %v12078_v19  ;;  %v10360_v19 = vcombine.high %v6244_v18, %v6248_v52 }
 0x3d2   :  { %6086 = vmatpush1.bf16.msra.mxu1 %v12076_v42  ;;  %v6252_v42 = vld [vmem:[%s16275_s5 + $0x1c8] sm:$0xff] }
 0x3d3   :  { %6087 = vmatprep.subr.bf16.mxu1 %v12081_v36  ;;  %v6256_v36 = vld [vmem:[%s16275_s5 + $0x1e8] sm:$0xff] }
 0x3d6   :  { %6088 = vmatpush1.bf16.msra.mxu1 %v12079_v11  ;;  %v10359_v11 = vcombine.low %v6244_v18, %v6248_v52 }
 0x3d7   :  { %6089 = vmatprep.subr.bf16.mxu1 %v12084_v23  ;;  %v10368_v23 = vcombine.high %v6252_v42, %v6256_v36 }
 0x3da   :  { %6090 = vmatpush1.bf16.msra.mxu1 %v12082_v26  ;;  %v6260_v26 = vld [vmem:[%s16275_s5 + $0x208] sm:$0xff] }
 0x3db   :  { %6091 = vmatprep.subr.bf16.mxu1 %v12087_v27  ;;  %v6264_v27 = vld [vmem:[%s16275_s5 + $0x228] sm:$0xff] }
 0x3de   :  { %6092 = vmatpush1.bf16.msra.mxu1 %v12085_v28  ;;  %v10367_v28 = vcombine.low %v6252_v42, %v6256_v36 }
 0x3df   :  { %6102 = vmatprep.subr.bf16.mxu1 %v12090_v30  ;;  %v10376_v30 = vcombine.high %v6260_v26, %v6264_v27 }
 0x3e1   :  { %6094 = vmatmul.mubr.bf16.vlgmr.msra.gmra.mrb[20].mxu1 %v14034_v29  ;;  %v12099_v29 = vld [vmem:[%s16273_s3 + $0xb14] ss:$40 sps:$4 sm:$0xff]  }
 0x3e2   :  { %6103 = vmatpush1.bf16.msra.mxu1 %v12088_v32  ;;  %6134 = vmatprep.mubr.bf16.mxu1 %v12236_v1  ;;  %v6268_v32 = vld [vmem:[%s16275_s5 + $0x248] sm:$0xff] }
 0x3e3   :  { %6104 = vmatprep.subr.bf16.mxu1 %v12093_v33  ;;  %v6272_v33 = vld [vmem:[%s16275_s5 + $0x268] sm:$0xff] }
 0x3e6   :  { %6105 = vmatpush1.bf16.msra.mxu1 %v12091_v6  ;;  %v10375_v6 = vcombine.low %v6260_v26, %v6264_v27 }
 0x3e7   :  { %6106 = vmatprep.subr.bf16.mxu1 %v12096_v34  ;;  %v10384_v34 = vcombine.high %v6268_v32, %v6272_v33 }
 0x3ea   :  { %6107 = vmatpush1.bf16.msra.mxu1 %v12094_v35  ;;  %v6276_v35 = vld [vmem:[%s16275_s5 + $0x288] sm:$0xff] }
 0x3eb   :  { %6108 = vmatprep.subr.bf16.mxu1 %v12099_v29  ;;  %v6280_v29 = vld [vmem:[%s16275_s5 + $0x2a8] sm:$0xff] }
 0x3ee   :  { %6109 = vmatpush1.bf16.msra.mxu1 %v12097_v37  ;;  %v10383_v37 = vcombine.low %v6268_v32, %v6272_v33  ;;  %v6335_v33 = vld [vmem:[%s16275_s5 + $0x460] sm:$0xff] }
 0x3ef   :  { %6110 = vmatprep.subr.bf16.mxu1 %v12102_v39  ;;  %v10392_v39 = vcombine.high %v6276_v35, %v6280_v29 }
 0x3f2   :  { %6111 = vmatpush1.bf16.msra.mxu1 %v12100_v41  ;;  %v6284_v41 = vld [vmem:[%s16275_s5 + $0x2c8] sm:$0xff] }
 0x3f3   :  { %6112 = vmatprep.subr.bf16.mxu1 %v12105_v8  ;;  %v6288_v8 = vld [vmem:[%s16275_s5 + $0x2e8] sm:$0xff] }
 0x3f4   :  { %v10399_v47 = vcombine.low %v6284_v41, %v6288_v8 }
 0x3f6   :  { %6113 = vmatpush1.bf16.msra.mxu1 %v12103_v43  ;;  %v10391_v43 = vcombine.low %v6276_v35, %v6280_v29 }
 0x3f7   :  { %6114 = vmatprep.subr.bf16.mxu1 %v12108_v44  ;;  %v10400_v44 = vcombine.high %v6284_v41, %v6288_v8  ;;  %v6339_v8 = vld [vmem:[%s16275_s5 + $0x480] sm:$0xff] }
 0x3fa   :  { %6115 = vmatpush1.bf16.msra.mxu1 %v12106_v45  ;;  %v6292_v45 = vld [vmem:[%s16275_s5 + $0x308] sm:$0xff] }
 0x3fb   :  { %6116 = vmatprep.subr.bf16.mxu1 %v12111_v46  ;;  %v6296_v46 = vld [vmem:[%s16275_s5 + $0x328] sm:$0xff] }
 0x3fc   :  { %v10408_v48 = vcombine.high %v6292_v45, %v6296_v46  ;;  %v10407_v51 = vcombine.low %v6292_v45, %v6296_v46  ;;  %v6344_v45 = vld [vmem:[%s16275_s5 + $0x4a8] sm:$0xff] }
 0x3fe   :  { %6117 = vmatpush1.bf16.msra.mxu1 %v12109_v38  ;;  %v6300_v38 = vld [vmem:[%s16275_s5 + $0x348] sm:$0xff] }
 0x3ff   :  { %8238 = vmatprep.subr.bf16.mxu1 %v10312_v49  ;;  %v6304_v49 = vld [vmem:[%s16275_s5 + $0x368] sm:$0xff] }
 0x400   :  { %v10416_v59 = vcombine.high %v6300_v38, %v6304_v49  ;;  %v10415_v0 = vcombine.low %v6300_v38, %v6304_v49  ;;  %v6347_v49 = vld [vmem:[%s16275_s5 + $0x4c0] sm:$0xff] }
 0x401   :  { %6135 = vmatmul.mubr.bf16.vlgmr.msra.gmra.mrb[20].mxu1 %v14139_v50  ;;  %v6228_v50 = vld [vmem:[%s16275_s5 + $0x108] sm:$0xff] }
 0x402   :  { %8239 = vmatpush1.bf16.msra.mxu1 %v10311_v60  ;;  %v10344_v24 = vcombine.high %v6228_v50, %v6232_v61  ;;  %v10343_v15 = vcombine.low %v6228_v50, %v6232_v61  ;;  %v6308_v60 = vld [vmem:[%s16275_s5 + $0x388] sm:$0xff] }
 0x403   :  { %8240 = vmatprep.subr.bf16.mxu1 %v10320_v63  ;;  %v6312_v63 = vld [vmem:[%s16275_s5 + $0x3a8] sm:$0xff] }
 0x406   :  { %8241 = vmatpush1.bf16.msra.mxu1 %v10319_v2  ;;  %v10424_v2 = vcombine.high %v6308_v60, %v6312_v63 }
 0x407   :  { %8242 = vmatprep.subr.bf16.mxu1 %v10328_v3 }
 0x40a   :  { %8243 = vmatpush1.bf16.msra.mxu1 %v10327_v7  ;;  %v6316_v7 = vld [vmem:[%s16275_s5 + $0x3c8] sm:$0xff] }
 0x40b   :  { %8244 = vmatprep.subr.bf16.mxu1 %v10336_v9  ;;  %v6320_v9 = vld [vmem:[%s16275_s5 + $0x3e8] sm:$0xff] }
 0x40c   :  { %v10431_v26 = vcombine.low %v6316_v7, %v6320_v9 }
 0x40e   :  { %8245 = vmatpush1.bf16.msra.mxu1 %v10335_v62 }
 0x40f   :  { %8246 = vmatprep.subr.bf16.mxu1 %v10344_v24 }
 0x412   :  { %8247 = vmatpush1.bf16.msra.mxu1 %v10343_v15  ;;  %v10423_v15 = vcombine.low %v6308_v60, %v6312_v63  ;;  %v10464_v63 = vcombine.high %v6348_v12, %v6352_v13 }
 0x413   :  { %8248 = vmatprep.subr.bf16.mxu1 %v10352_v16 }
 0x416   :  { %8249 = vmatpush1.bf16.msra.mxu1 %v10351_v17  ;;  %v10432_v17 = vcombine.high %v6316_v7, %v6320_v9  ;;  %v10463_v9 = vcombine.low %v6348_v12, %v6352_v13  ;;  %v6400_v12 = vld [vmem:[%s16275_s5 + $0x668] sm:$0xff] }
 0x417   :  { %8250 = vmatprep.subr.bf16.mxu1 %v10360_v19 }
 0x41a   :  { %8251 = vmatpush1.bf16.msra.mxu1 %v10359_v11 }
 0x41b   :  { %8252 = vmatprep.subr.bf16.mxu1 %v10368_v23 }
 0x41e   :  { %8253 = vmatpush1.bf16.msra.mxu1 %v10367_v28  ;;  %v6331_v28 = vld [vmem:[%s16275_s5 + $0x440] sm:$0xff] }
 0x41f   :  { %8254 = vmatprep.subr.bf16.mxu1 %v10376_v30  ;;  %v10445_v46 = vcombine.low %v6331_v28, %v6335_v33 }
 0x422   :  { %8255 = vmatpush1.bf16.msra.mxu1 %v10375_v6  ;;  %v6332_v6 = vld [vmem:[%s16275_s5 + $0x448] sm:$0xff] }
 0x423   :  { %8256 = vmatprep.subr.bf16.mxu1 %v10384_v34  ;;  %v6336_v34 = vld [vmem:[%s16275_s5 + $0x468] sm:$0xff] }
 0x424   :  { %v10448_v41 = vcombine.high %v6332_v6, %v6336_v34 }
 0x426   :  { %8257 = vmatpush1.bf16.msra.mxu1 %v10383_v37 }
 0x427   :  { %8258 = vmatprep.subr.bf16.mxu1 %v10392_v39  ;;  %v10446_v39 = vcombine.high %v6331_v28, %v6335_v33  ;;  %v6379_v28 = vld [vmem:[%s16275_s5 + $0x5c0] sm:$0xff]  ;;  %v6384_v33 = vld [vmem:[%s16275_s5 + $0x5e8] sm:$0xff] }
 0x42a   :  { %8259 = vmatpush1.bf16.msra.mxu1 %v10391_v43  ;;  %v6343_v43 = vld [vmem:[%s16275_s5 + $0x4a0] sm:$0xff] }
 0x42b   :  { %8260 = vmatprep.subr.bf16.mxu1 %v10400_v44  ;;  %v6340_v44 = vld [vmem:[%s16275_s5 + $0x488] sm:$0xff] }
 0x42c   :  { %v10456_v38 = vcombine.high %v6340_v44, %v6344_v45 }
 0x42e   :  { %8261 = vmatpush1.bf16.msra.mxu1 %v10399_v47  ;;  %v10447_v47 = vcombine.low %v6332_v6, %v6336_v34 }
 0x42f   :  { %8262 = vmatprep.subr.bf16.mxu1 %v10408_v48  ;;  %v10454_v48 = vcombine.high %v6339_v8, %v6343_v43 }
 0x432   :  { %8263 = vmatpush1.bf16.msra.mxu1 %v10407_v51  ;;  %v6351_v51 = vld [vmem:[%s16275_s5 + $0x4e0] sm:$0xff] }
 0x433   :  { %8264 = vmatprep.subr.bf16.mxu1 %v10416_v59  ;;  %v10455_v59 = vcombine.low %v6340_v44, %v6344_v45  ;;  %v10462_v60 = vcombine.high %v6347_v49, %v6351_v51  ;;  %v10461_v7 = vcombine.low %v6347_v49, %v6351_v51  ;;  %v6392_v44 = vld [vmem:[%s16275_s5 + $0x628] sm:$0xff]  ;;  %v6399_v49 = vld [vmem:[%s16275_s5 + $0x660] sm:$0xff] }
 0x434   :  { %v15085_v3 = vpop.f32.mrb[16].mxu1  ;;  %v6396_v51 = vld [vmem:[%s16275_s5 + $0x648] sm:$0xff] }
 0x435   :  { %v6013_v50 = vpop.f32.mrb[16].mxu0  ;;  %v5892_v61 = vpop.f32.mrb[17].mxu1 }
 0x436   :  { %v6144_v62 = vmax.f32 %v14754_v57, %v6013_v50  ;;  %v6143_v24 = vmax.f32 %v14750_v54, %v5892_v61  ;;  %v15099_v31 = vpop.f32.mrb[17].mxu0  ;;  %v5894_v25 = vpop.f32.mrb[18].mxu1  ;;  %8265 = vmatpush1.bf16.msra.mxu1 %v10415_v0  ;;  %v6324_v57 = vld [vmem:[%s16275_s5 + $0x408] sm:$0xff]  ;;  %v6355_v0 = vld [vmem:[%s16275_s5 + $0x500] sm:$0xff] }
 0x437   :  { %v6145_v16 = vmax.f32 %v14752_v56, %v15099_v31  ;;  %v6017_v18 = vpop.f32.mrb[18].mxu0  ;;  %v5895_v52 = vpop.f32.mrb[19].mxu1  ;;  %8266 = vmatprep.subr.bf16.mxu1 %v10424_v2  ;;  %v6328_v54 = vld [vmem:[%s16275_s5 + $0x428] sm:$0xff]  ;;  %v6359_v2 = vld [vmem:[%s16275_s5 + $0x520] sm:$0xff] }
 0x438   :  { %v6176_v19 = vadd.f32 %v6157_v4, %v6144_v62  ;;  %v6175_v42 = vadd.f32 %v6153_v5, %v6143_v24  ;;  %v6018_v36 = vpop.f32.mrb[19].mxu0  ;;  %v10440_v27 = vcombine.high %v6324_v57, %v6328_v54  ;;  %v10439_v37 = vcombine.low %v6324_v57, %v6328_v54  ;;  %v6356_v4 = vld [vmem:[%s16275_s5 + $0x508] sm:$0xff]  ;;  %v6363_v62 = vld [vmem:[%s16275_s5 + $0x540] sm:$0xff] }
 0x439   :  { %v6360_v5 = vld [vmem:[%s16275_s5 + $0x528] sm:$0xff]  ;;  %v10470_v50 = vcombine.high %v6355_v0, %v6359_v2  ;;  %v6367_v24 = vld [vmem:[%s16275_s5 + $0x560] sm:$0xff]  ;;  %v10469_v18 = vcombine.low %v6355_v0, %v6359_v2  ;;  %v10512_v2 = vcombine.high %v6396_v51, %v6400_v12 }
 0x43a   :  { %v6181_v11 = vmul.f32 0.01, %v6176_v19  ;;  %v6180_v23 = vmul.f32 0.01, %v6175_v42  ;;  %8267 = vmatpush1.bf16.msra.mxu1 %v10423_v15  ;;  %v10472_v61 = vcombine.high %v6356_v4, %v6360_v5  ;;  %v6364_v25 = vld [vmem:[%s16275_s5 + $0x548] sm:$0xff]  ;;  %v10471_v52 = vcombine.low %v6356_v4, %v6360_v5  ;;  %v6375_v36 = vld [vmem:[%s16275_s5 + $0x5a0] sm:$0xff] }
 0x43b   :  { %8268 = vmatprep.subr.bf16.mxu1 %v10432_v17  ;;  %v6368_v15 = vld [vmem:[%s16275_s5 + $0x568] sm:$0xff]  ;;  %v10478_v17 = vcombine.high %v6363_v62, %v6367_v24  ;;  %v6403_v4 = vld [vmem:[%s16275_s5 + $0x680] sm:$0xff] }
 0x43c   :  { %v6186_v30 = vmax.f32 %v6176_v19, %v6181_v11  ;;  %v6185_v32 = vmax.f32 %v6175_v42, %v6180_v23  ;;  %v10480_v19 = vcombine.high %v6364_v25, %v6368_v15  ;;  %v6371_v42 = vld [vmem:[%s16275_s5 + $0x580] sm:$0xff]  ;;  %v6372_v57 = vld [vmem:[%s16275_s5 + $0x588] sm:$0xff]  ;;  %v10477_v11 = vcombine.low %v6363_v62, %v6367_v24 }
 0x43d   :  { %v6376_v54 = vld [vmem:[%s16275_s5 + $0x5a8] sm:$0xff]  ;;  %v10479_v23 = vcombine.low %v6364_v25, %v6368_v15  ;;  %v10485_v6 = vcombine.low %v6371_v42, %v6375_v36  ;;  %v10511_v25 = vcombine.low %v6396_v51, %v6400_v12  ;;  %v6459_v56 = vld [vmem:[%s16275_s5 + $0x840] sm:$0xff] }
 0x43e   :  { %v15121_v35 = vpack.c.bf16 %v6186_v30, %v6186_v30  ;;  %v15123_v29 = vpack.c.bf16 %v6185_v32, %v6185_v32  ;;  %8269 = vmatpush1.bf16.msra.mxu1 %v10431_v26  ;;  %v10486_v26 = vcombine.high %v6371_v42, %v6375_v36  ;;  %v6383_v30 = vld [vmem:[%s16275_s5 + $0x5e0] sm:$0xff]  ;;  %v6380_v32 = vld [vmem:[%s16275_s5 + $0x5c8] sm:$0xff]  ;;  %v10487_v34 = vcombine.low %v6372_v57, %v6376_v54 }
 0x43f   :  { %8279 = vmatprep.subr.bf16.mxu1 %v10440_v27  ;;  %v10488_v27 = vcombine.high %v6372_v57, %v6376_v54  ;;  %v10493_v45 = vcombine.low %v6379_v28, %v6383_v30  ;;  %v6416_v42 = vld [vmem:[%s16275_s5 + $0x6e8] sm:$0xff] }
 0x440   :  { %8147 = vmatprep.mubr.bf16.mxu0 %v15121_v35  ;;  %8270 = vmatprep.mubr.bf16.mxu1 %v15121_v35 }
 0x441   :  { %8148 = vmatmul.mubr.bf16.vlgmr.msra.gmra.mrb[20].mxu0 %v15123_v29  ;;  %8271 = vmatmul.mubr.bf16.vlgmr.msra.gmra.mrb[24].mxu1 %v15123_v29 }
 0x442   :  { %8157 = vmatpush1.bf16.msra.mxu0 %v10437_v14  ;;  %8280 = vmatpush1.bf16.msra.mxu1 %v10439_v37  ;;  %v10453_v14 = vcombine.low %v6339_v8, %v6343_v43  ;;  %v10494_v37 = vcombine.high %v6379_v28, %v6383_v30  ;;  %v6391_v8 = vld [vmem:[%s16275_s5 + $0x620] sm:$0xff]  ;;  %v6388_v43 = vld [vmem:[%s16275_s5 + $0x608] sm:$0xff] }
 0x443   :  { %8158 = vmatprep.subr.bf16.mxu0 %v10446_v39  ;;  %8281 = vmatprep.subr.bf16.mxu1 %v10448_v41  ;;  %v10496_v39 = vcombine.high %v6380_v32, %v6384_v33  ;;  %v6387_v41 = vld [vmem:[%s16275_s5 + $0x600] sm:$0xff]  ;;  %v6424_v28 = vld [vmem:[%s16275_s5 + $0x728] sm:$0xff] }
 0x444   :  { %v10501_v13 = vcombine.low %v6387_v41, %v6391_v8 }
 0x446   :  { %8159 = vmatpush1.bf16.msra.mxu0 %v10445_v46  ;;  %8282 = vmatpush1.bf16.msra.mxu1 %v10447_v47  ;;  %v10495_v46 = vcombine.low %v6380_v32, %v6384_v33  ;;  %v10502_v47 = vcombine.high %v6387_v41, %v6391_v8  ;;  %v6432_v41 = vld [vmem:[%s16275_s5 + $0x768] sm:$0xff] }
 0x447   :  { %8160 = vmatprep.subr.bf16.mxu0 %v10454_v48  ;;  %8283 = vmatprep.subr.bf16.mxu1 %v10456_v38  ;;  %v10504_v48 = vcombine.high %v6388_v43, %v6392_v44  ;;  %v6395_v38 = vld [vmem:[%s16275_s5 + $0x640] sm:$0xff] }
 0x448   :  { %v10510_v0 = vcombine.high %v6395_v38, %v6399_v49  ;;  %v10509_v24 = vcombine.low %v6395_v38, %v6399_v49  ;;  %v6440_v38 = vld [vmem:[%s16275_s5 + $0x7a8] sm:$0xff] }
 0x44a   :  { %8161 = vmatpush1.bf16.msra.mxu0 %v10453_v14  ;;  %8284 = vmatpush1.bf16.msra.mxu1 %v10455_v59  ;;  %v10503_v14 = vcombine.low %v6388_v43, %v6392_v44  ;;  %v15231_v59 = vld [vmem:[%s16275_s5 + $0x800] sm:$0xff] }
 0x44b   :  { %8162 = vmatprep.subr.bf16.mxu0 %v10462_v60  ;;  %8285 = vmatprep.subr.bf16.mxu1 %v10464_v63  ;;  %v15236_v60 = vld [vmem:[%s16275_s5 + $0x820] sm:$0xff]  ;;  %v15241_v63 = vld [vmem:[%s16275_s5 + $0x808] sm:$0xff] }
 0x44c   :  { %v10565_v5 = vcombine.low %v15231_v59, %v15236_v60 }
 0x44e   :  { %8163 = vmatpush1.bf16.msra.mxu0 %v10461_v7  ;;  %8286 = vmatpush1.bf16.msra.mxu1 %v10463_v9  ;;  %v15251_v7 = vld [vmem:[%s16275_s5 + $0x828] sm:$0xff]  ;;  %v6407_v9 = vld [vmem:[%s16275_s5 + $0x6a0] sm:$0xff] }
 0x44f   :  { %8164 = vmatprep.subr.bf16.mxu0 %v10470_v50  ;;  %8287 = vmatprep.subr.bf16.mxu1 %v10472_v61  ;;  %v6404_v50 = vld [vmem:[%s16275_s5 + $0x688] sm:$0xff]  ;;  %v10567_v62 = vcombine.low %v15241_v63, %v15251_v7  ;;  %v10518_v15 = vcombine.high %v6403_v4, %v6407_v9  ;;  %v10517_v36 = vcombine.low %v6403_v4, %v6407_v9 }
 0x450   :  { %v6408_v61 = vld [vmem:[%s16275_s5 + $0x6a8] sm:$0xff] }
 0x451   :  { %v10519_v57 = vcombine.low %v6404_v50, %v6408_v61  ;;  %v6448_v4 = vld [vmem:[%s16275_s5 + $0x7e8] sm:$0xff] }
 0x452   :  { %8165 = vmatpush1.bf16.msra.mxu0 %v10469_v18  ;;  %8288 = vmatpush1.bf16.msra.mxu1 %v10471_v52  ;;  %v10520_v18 = vcombine.high %v6404_v50, %v6408_v61  ;;  %v6411_v52 = vld [vmem:[%s16275_s5 + $0x6c0] sm:$0xff] }
 0x453   :  { %8166 = vmatprep.subr.bf16.mxu0 %v10478_v17  ;;  %8289 = vmatprep.subr.bf16.mxu1 %v10480_v19  ;;  %v6415_v17 = vld [vmem:[%s16275_s5 + $0x6e0] sm:$0xff]  ;;  %v6412_v19 = vld [vmem:[%s16275_s5 + $0x6c8] sm:$0xff] }
 0x454   :  { %v10526_v54 = vcombine.high %v6411_v52, %v6415_v17  ;;  %v10525_v30 = vcombine.low %v6411_v52, %v6415_v17  ;;  %v10527_v32 = vcombine.low %v6412_v19, %v6416_v42  ;;  %v10568_v52 = vcombine.high %v15241_v63, %v15251_v7 }
 0x455   :  { %v6161_v17 = vrot.slane %v15083_v40, %v14012_v53 }
 0x456   :  { %8167 = vmatpush1.bf16.msra.mxu0 %v10477_v11  ;;  %8290 = vmatpush1.bf16.msra.mxu1 %v10479_v23  ;;  %v10528_v11 = vcombine.high %v6412_v19, %v6416_v42  ;;  %v6419_v23 = vld [vmem:[%s16275_s5 + $0x700] sm:$0xff]  ;;  %v6165_v42 = vrot.slane %v15083_v40, %v14017_v55 }
 0x457   :  { %8168 = vmatprep.subr.bf16.mxu0 %v10486_v26  ;;  %8291 = vmatprep.subr.bf16.mxu1 %v10488_v27  ;;  %v6423_v26 = vld [vmem:[%s16275_s5 + $0x720] sm:$0xff]  ;;  %v6420_v27 = vld [vmem:[%s16275_s5 + $0x708] sm:$0xff]  ;;  %v6177_v19 = vadd.f32 %v6161_v17, %v6145_v16 }
 0x458   :  { %v10534_v33 = vcombine.high %v6419_v23, %v6423_v26  ;;  %v10533_v8 = vcombine.low %v6419_v23, %v6423_v26  ;;  %v10535_v43 = vcombine.low %v6420_v27, %v6424_v28  ;;  %v6460_v16 = vld [vmem:[%s16275_s5 + $0x848] sm:$0xff] }
 0x45a   :  { %8169 = vmatpush1.bf16.msra.mxu0 %v10485_v6  ;;  %8292 = vmatpush1.bf16.msra.mxu1 %v10487_v34  ;;  %v10536_v6 = vcombine.high %v6420_v27, %v6424_v28  ;;  %v6427_v34 = vld [vmem:[%s16275_s5 + $0x740] sm:$0xff] }
 0x45b   :  { %8170 = vmatprep.subr.bf16.mxu0 %v10494_v37  ;;  %8293 = vmatprep.subr.bf16.mxu1 %v10496_v39  ;;  %v6431_v37 = vld [vmem:[%s16275_s5 + $0x760] sm:$0xff]  ;;  %v6428_v39 = vld [vmem:[%s16275_s5 + $0x748] sm:$0xff] }
 0x45c   :  { %v10542_v44 = vcombine.high %v6427_v34, %v6431_v37  ;;  %v10541_v49 = vcombine.low %v6427_v34, %v6431_v37  ;;  %v10543_v51 = vcombine.low %v6428_v39, %v6432_v41 }
 0x45e   :  { %8171 = vmatpush1.bf16.msra.mxu0 %v10493_v45  ;;  %8294 = vmatpush1.bf16.msra.mxu1 %v10495_v46  ;;  %v10544_v45 = vcombine.high %v6428_v39, %v6432_v41  ;;  %v6435_v46 = vld [vmem:[%s16275_s5 + $0x780] sm:$0xff] }
 0x45f   :  { %8172 = vmatprep.subr.bf16.mxu0 %v10502_v47  ;;  %8295 = vmatprep.subr.bf16.mxu1 %v10504_v48  ;;  %v6439_v47 = vld [vmem:[%s16275_s5 + $0x7a0] sm:$0xff]  ;;  %v6436_v48 = vld [vmem:[%s16275_s5 + $0x788] sm:$0xff] }
 0x460   :  { %v10550_v12 = vcombine.high %v6435_v46, %v6439_v47  ;;  %v10549_v9 = vcombine.low %v6435_v46, %v6439_v47  ;;  %v10551_v50 = vcombine.low %v6436_v48, %v6440_v38  ;;  %v6467_v41 = vld [vmem:[%s16275_s5 + $0x880] sm:$0xff] }
 0x462   :  { %8173 = vmatpush1.bf16.msra.mxu0 %v10501_v13  ;;  %8296 = vmatpush1.bf16.msra.mxu1 %v10503_v14  ;;  %v10552_v13 = vcombine.high %v6436_v48, %v6440_v38  ;;  %v6443_v14 = vld [vmem:[%s16275_s5 + $0x7c0] sm:$0xff] }
 0x463   :  { %8174 = vmatprep.subr.bf16.mxu0 %v10510_v0  ;;  %8297 = vmatprep.subr.bf16.mxu1 %v10512_v2  ;;  %v6447_v0 = vld [vmem:[%s16275_s5 + $0x7e0] sm:$0xff]  ;;  %v6444_v2 = vld [vmem:[%s16275_s5 + $0x7c8] sm:$0xff] }
 0x464   :  { %v10558_v61 = vcombine.high %v6443_v14, %v6447_v0  ;;  %v6475_v38 = vld [vmem:[%s16275_s5 + $0x8c0] sm:$0xff] }
 0x466   :  { %8175 = vmatpush1.bf16.msra.mxu0 %v10509_v24  ;;  %8298 = vmatpush1.bf16.msra.mxu1 %v10511_v25  ;;  %v10560_v24 = vcombine.high %v6444_v2, %v6448_v4  ;;  %v10557_v25 = vcombine.low %v6443_v14, %v6447_v0  ;;  %v6488_v14 = vld [vmem:[%s16275_s5 + $0x928] sm:$0xff] }
 0x467   :  { %8176 = vmatprep.subr.bf16.mxu0 %v10518_v15  ;;  %8299 = vmatprep.subr.bf16.mxu1 %v10520_v18  ;;  %v10559_v15 = vcombine.low %v6444_v2, %v6448_v4  ;;  %v10566_v18 = vcombine.high %v15231_v59, %v15236_v60  ;;  %v6476_v59 = vld [vmem:[%s16275_s5 + $0x8c8] sm:$0xff] }
 0x468   :  { %v6480_v60 = vld [vmem:[%s16275_s5 + $0x8e8] sm:$0xff] }
 0x469   :  { %v10591_v2 = vcombine.low %v6476_v59, %v6480_v60 }
 0x46a   :  { %8177 = vmatpush1.bf16.msra.mxu0 %v10517_v36  ;;  %8300 = vmatpush1.bf16.msra.mxu1 %v10519_v57 }
 0x46b   :  { %8178 = vmatprep.subr.bf16.mxu0 %v10526_v54  ;;  %8301 = vmatprep.subr.bf16.mxu1 %v10528_v11  ;;  %v6182_v11 = vmul.f32 0.01, %v6177_v19 }
 0x46e   :  { %8179 = vmatpush1.bf16.msra.mxu0 %v10525_v30  ;;  %8302 = vmatpush1.bf16.msra.mxu1 %v10527_v32  ;;  %v6187_v32 = vmax.f32 %v6177_v19, %v6182_v11 }
 0x46f   :  { %8180 = vmatprep.subr.bf16.mxu0 %v10534_v33  ;;  %8303 = vmatprep.subr.bf16.mxu1 %v10536_v6  ;;  %v6464_v33 = vld [vmem:[%s16275_s5 + $0x868] sm:$0xff] }
 0x470   :  { %v15354_v34 = vpack.c.bf16 %v6187_v32, %v6187_v32  ;;  %v10576_v39 = vcombine.high %v6460_v16, %v6464_v33  ;;  %v10575_v46 = vcombine.low %v6460_v16, %v6464_v33  ;;  %v6508_v32 = vld [vmem:[%s16275_s5 + $0x9c8] sm:$0xff]  ;;  %v6197_v16 = vld [vmem:[%s16275_s5 + $0x10] sm:$0xff] }
 0x471   :  { %v6201_v33 = vld [vmem:[%s16275_s5 + $0x30] sm:$0xff] }
 0x472   :  { %8181 = vmatpush1.bf16.msra.mxu0 %v10533_v8  ;;  %8304 = vmatpush1.bf16.msra.mxu1 %v10535_v43  ;;  %v6471_v8 = vld [vmem:[%s16275_s5 + $0x8a0] sm:$0xff]  ;;  %v6468_v43 = vld [vmem:[%s16275_s5 + $0x888] sm:$0xff] }
 0x473   :  { %8182 = vmatprep.subr.bf16.mxu0 %v10542_v44  ;;  %8305 = vmatprep.subr.bf16.mxu1 %v10544_v45  ;;  %v6472_v44 = vld [vmem:[%s16275_s5 + $0x8a8] sm:$0xff]  ;;  %v10582_v47 = vcombine.high %v6467_v41, %v6471_v8  ;;  %v10581_v63 = vcombine.low %v6467_v41, %v6471_v8 }
 0x474   :  { %v10584_v48 = vcombine.high %v6468_v43, %v6472_v44 }
 0x476   :  { %8183 = vmatpush1.bf16.msra.mxu0 %v10541_v49  ;;  %8306 = vmatpush1.bf16.msra.mxu1 %v10543_v51  ;;  %v6479_v49 = vld [vmem:[%s16275_s5 + $0x8e0] sm:$0xff] }
 0x477   :  { %8184 = vmatprep.subr.bf16.mxu0 %v10550_v12  ;;  %8307 = vmatprep.subr.bf16.mxu1 %v10552_v13  ;;  %v10590_v7 = vcombine.high %v6475_v38, %v6479_v49  ;;  %v6483_v51 = vld [vmem:[%s16275_s5 + $0x900] sm:$0xff]  ;;  %v6484_v13 = vld [vmem:[%s16275_s5 + $0x908] sm:$0xff]  ;;  %v10589_v0 = vcombine.low %v6475_v38, %v6479_v49  ;;  %v6210_v38 = vld [vmem:[%s16275_s5 + $0x78] sm:$0xff]  ;;  %v10313_v49 = vcombine.low %v6197_v16, %v6201_v33 }
 0x478   :  { %v6487_v12 = vld [vmem:[%s16275_s5 + $0x920] sm:$0xff] }
 0x479   :  { %v10598_v4 = vcombine.high %v6483_v51, %v6487_v12 }
 0x47a   :  { %8185 = vmatpush1.bf16.msra.mxu0 %v10549_v9  ;;  %8308 = vmatpush1.bf16.msra.mxu1 %v10551_v50  ;;  %v10600_v9 = vcombine.high %v6484_v13, %v6488_v14  ;;  %v6491_v50 = vld [vmem:[%s16275_s5 + $0x940] sm:$0xff] }
 0x47b   :  { %8186 = vmatprep.subr.bf16.mxu0 %v10558_v61  ;;  %8309 = vmatprep.subr.bf16.mxu1 %v10560_v24  ;;  %v6495_v61 = vld [vmem:[%s16275_s5 + $0x960] sm:$0xff]  ;;  %v6492_v24 = vld [vmem:[%s16275_s5 + $0x948] sm:$0xff] }
 0x47c   :  { %v10606_v17 = vcombine.high %v6491_v50, %v6495_v61 }
 0x47e   :  { %8187 = vmatpush1.bf16.msra.mxu0 %v10557_v25  ;;  %8310 = vmatpush1.bf16.msra.mxu1 %v10559_v15  ;;  %v6496_v25 = vld [vmem:[%s16275_s5 + $0x968] sm:$0xff]  ;;  %v10597_v15 = vcombine.low %v6483_v51, %v6487_v12  ;;  %v6214_v51 = vld [vmem:[%s16275_s5 + $0x98] sm:$0xff] }
 0x47f   :  { %8197 = vmatprep.subr.bf16.mxu0 %v10566_v18  ;;  %8320 = vmatprep.subr.bf16.mxu1 %v10568_v52  ;;  %v10599_v18 = vcombine.low %v6484_v13, %v6488_v14  ;;  %v6169_v52 = vrot.slane %v15083_v40, %v3101_v20  ;;  %v10608_v19 = vcombine.high %v6492_v24, %v6496_v25  ;;  %v6218_v12 = vld [vmem:[%s16275_s5 + $0xb8] sm:$0xff] }
 0x480   :  { %v10605_v20 = vcombine.low %v6491_v50, %v6495_v61  ;;  %v10607_v40 = vcombine.low %v6492_v24, %v6496_v25  ;;  %v6222_v50 = vld [vmem:[%s16275_s5 + $0xd8] sm:$0xff]  ;;  %v10331_v24 = vcombine.low %v6214_v51, %v6218_v12 }
 0x4d4   :  { %v6136_v36 = vpop.f32.mrb[20].mxu1 }
 0x4d5   :  { %v6146_v57 = vmax.f32 %v14756_v58, %v6136_v36  ;;  %v15336_v54 = vpop.f32.mrb[21].mxu1  ;;  %v6463_v58 = vld [vmem:[%s16275_s5 + $0x860] sm:$0xff] }
 0x4d6   :  { %v6147_v23 = vmax.f32 %v15085_v3, %v15336_v54  ;;  %v6140_v26 = vpop.f32.mrb[22].mxu1  ;;  %v10574_v37 = vcombine.high %v6459_v56, %v6463_v58  ;;  %v10573_v45 = vcombine.low %v6459_v56, %v6463_v58  ;;  %v6503_v36 = vld [vmem:[%s16275_s5 + $0x9a0] sm:$0xff]  ;;  %v6512_v3 = vld [vmem:[%s16275_s5 + $0x9e8] sm:$0xff] }
 0x4d7   :  { %v6178_v27 = vadd.f32 %v6165_v42, %v6146_v57  ;;  %v6141_v28 = vpop.f32.mrb[23].mxu1  ;;  %v6499_v42 = vld [vmem:[%s16275_s5 + $0x980] sm:$0xff]  ;;  %v6500_v57 = vld [vmem:[%s16275_s5 + $0x988] sm:$0xff]  ;;  %v10624_v58 = vcombine.high %v6508_v32, %v6512_v3  ;;  %v10623_v8 = vcombine.low %v6508_v32, %v6512_v3  ;;  %v6245_v3 = vld [vmem:[%s16275_s5 + $0x190] sm:$0xff] }
 0x4d8   :  { %v6179_v11 = vadd.f32 %v6169_v52, %v6147_v23  ;;  %v10614_v26 = vcombine.high %v6499_v42, %v6503_v36  ;;  %v6507_v28 = vld [vmem:[%s16275_s5 + $0x9c0] sm:$0xff]  ;;  %v10613_v54 = vcombine.low %v6499_v42, %v6503_v36  ;;  %v10615_v23 = vcombine.low %v6500_v57, %v6504_v21  ;;  %v6233_v52 = vld [vmem:[%s16275_s5 + $0x130] sm:$0xff] }
 0x4d9   :  { %v6183_v30 = vmul.f32 0.01, %v6178_v27 }
 0x4da   :  { %v6184_v56 = vmul.f32 0.01, %v6179_v11 }
 0x4db   :  { %v6188_v31 = vmax.f32 %v6178_v27, %v6183_v30  ;;  %v10616_v27 = vcombine.high %v6500_v57, %v6504_v21  ;;  %v6511_v30 = vld [vmem:[%s16275_s5 + $0x9e0] sm:$0xff] }
 0x4dc   :  { %v10621_v41 = vcombine.low %v6507_v28, %v6511_v30 }
 0x4dd   :  { %v15352_v6 = vpack.c.bf16 %v6188_v31, %v6188_v31  ;;  %v10622_v31 = vcombine.high %v6507_v28, %v6511_v30 }
 0x4df   :  { %8188 = vmatprep.mubr.bf16.mxu0 %v15352_v6  ;;  %8311 = vmatprep.mubr.bf16.mxu1 %v15352_v6 }
 0x4e0   :  { %8189 = vmatmul.mubr.bf16.vlgmr.msra.gmra.mrb[20].mxu0 %v15354_v34  ;;  %8312 = vmatmul.mubr.bf16.vlgmr.msra.gmra.mrb[24].mxu1 %v15354_v34 }
 0x4e1   :  { %8198 = vmatpush1.bf16.msra.mxu0 %v10565_v5  ;;  %8321 = vmatpush1.bf16.msra.mxu1 %v10567_v62  ;;  %v10583_v5 = vcombine.low %v6468_v43, %v6472_v44  ;;  %v10592_v62 = vcombine.high %v6476_v59, %v6480_v60  ;;  %v6189_v43 = vmax.f32 %v6179_v11, %v6184_v56  ;;  %v6238_v11 = vld [vmem:[%s16275_s5 + $0x158] sm:$0xff] }
 0x4e2   :  { %8199 = vmatprep.subr.bf16.mxu0 %v10574_v37  ;;  %8322 = vmatprep.subr.bf16.mxu1 %v10576_v39  ;;  %v6198_v37 = vld [vmem:[%s16275_s5 + $0x18] sm:$0xff]  ;;  %v10314_v44 = vcombine.high %v6197_v16, %v6201_v33 }
 0x4e3   :  { %8229 = vmatprep.mubr.bf16.mxu0 %v12236_v1  ;;  %8352 = vmatprep.mubr.bf16.mxu1 %v12236_v1  ;;  %v6202_v39 = vld [vmem:[%s16275_s5 + $0x38] sm:$0xff]  ;;  %v15470_v59 = vpack.c.bf16 %v6189_v43, %v6189_v43 }
 0x4e4   :  { %v10315_v60 = vcombine.low %v6198_v37, %v6202_v39  ;;  %v6250_v56 = vld [vmem:[%s16275_s5 + $0x1b8] sm:$0xff] }
 0x4e5   :  { %8200 = vmatpush1.bf16.msra.mxu0 %v10573_v45  ;;  %8323 = vmatpush1.bf16.msra.mxu1 %v10575_v46  ;;  %v10316_v45 = vcombine.high %v6198_v37, %v6202_v39  ;;  %v6205_v46 = vld [vmem:[%s16275_s5 + $0x50] sm:$0xff] }
 0x4e6   :  { %8201 = vmatprep.subr.bf16.mxu0 %v10582_v47  ;;  %8324 = vmatprep.subr.bf16.mxu1 %v10584_v48  ;;  %v6209_v47 = vld [vmem:[%s16275_s5 + $0x70] sm:$0xff]  ;;  %v6206_v48 = vld [vmem:[%s16275_s5 + $0x58] sm:$0xff] }
 0x4e7   :  { %v10321_v13 = vcombine.low %v6205_v46, %v6209_v47  ;;  %v10323_v14 = vcombine.low %v6206_v48, %v6210_v38  ;;  %v6253_v37 = vld [vmem:[%s16275_s5 + $0x1d0] sm:$0xff] }
 0x4e8   :  { %v6257_v39 = vld [vmem:[%s16275_s5 + $0x1f0] sm:$0xff] }
 0x4e9   :  { %8202 = vmatpush1.bf16.msra.mxu0 %v10581_v63  ;;  %8325 = vmatpush1.bf16.msra.mxu1 %v10583_v5  ;;  %v10322_v63 = vcombine.high %v6205_v46, %v6209_v47  ;;  %v10324_v5 = vcombine.high %v6206_v48, %v6210_v38  ;;  %v6261_v47 = vld [vmem:[%s16275_s5 + $0x210] sm:$0xff]  ;;  %v6262_v38 = vld [vmem:[%s16275_s5 + $0x218] sm:$0xff] }
 0x4ea   :  { %8203 = vmatprep.subr.bf16.mxu0 %v10590_v7  ;;  %8326 = vmatprep.subr.bf16.mxu1 %v10592_v62  ;;  %v6213_v7 = vld [vmem:[%s16275_s5 + $0x90] sm:$0xff] }
 0x4eb   :  { %v6217_v62 = vld [vmem:[%s16275_s5 + $0xb0] sm:$0xff] }
 0x4ec   :  { %v10329_v61 = vcombine.low %v6213_v7, %v6217_v62  ;;  %v6265_v48 = vld [vmem:[%s16275_s5 + $0x230] sm:$0xff] }
 0x4ed   :  { %8204 = vmatpush1.bf16.msra.mxu0 %v10589_v0  ;;  %8327 = vmatpush1.bf16.msra.mxu1 %v10591_v2  ;;  %v10330_v0 = vcombine.high %v6213_v7, %v6217_v62  ;;  %v10332_v2 = vcombine.high %v6214_v51, %v6218_v12  ;;  %v6269_v62 = vld [vmem:[%s16275_s5 + $0x250] sm:$0xff]  ;;  %v6270_v12 = vld [vmem:[%s16275_s5 + $0x258] sm:$0xff] }
 0x4ee   :  { %8205 = vmatprep.subr.bf16.mxu0 %v10598_v4  ;;  %8328 = vmatprep.subr.bf16.mxu1 %v10600_v9  ;;  %v6221_v4 = vld [vmem:[%s16275_s5 + $0xd0] sm:$0xff] }
 0x4ef   :  { %v6225_v9 = vld [vmem:[%s16275_s5 + $0xf0] sm:$0xff] }
 0x4f0   :  { %v10338_v25 = vcombine.high %v6221_v4, %v6225_v9  ;;  %v10337_v42 = vcombine.low %v6221_v4, %v6225_v9  ;;  %v6273_v51 = vld [vmem:[%s16275_s5 + $0x270] sm:$0xff] }
 0x4f1   :  { %8206 = vmatpush1.bf16.msra.mxu0 %v10597_v15  ;;  %8329 = vmatpush1.bf16.msra.mxu1 %v10599_v18  ;;  %v6229_v18 = vld [vmem:[%s16275_s5 + $0x110] sm:$0xff] }
 0x4f2   :  { %8207 = vmatprep.subr.bf16.mxu0 %v10606_v17  ;;  %8330 = vmatprep.subr.bf16.mxu1 %v10608_v19  ;;  %v6230_v17 = vld [vmem:[%s16275_s5 + $0x118] sm:$0xff]  ;;  %v10346_v57 = vcombine.high %v6229_v18, %v6233_v52  ;;  %v6277_v9 = vld [vmem:[%s16275_s5 + $0x290] sm:$0xff] }
 0x4f3   :  { %v6234_v19 = vld [vmem:[%s16275_s5 + $0x138] sm:$0xff] }
 0x4f4   :  { %v10348_v21 = vcombine.high %v6230_v17, %v6234_v19  ;;  %v10347_v28 = vcombine.low %v6230_v17, %v6234_v19  ;;  %v6289_v17 = vld [vmem:[%s16275_s5 + $0x2f0] sm:$0xff]  ;;  %v6286_v19 = vld [vmem:[%s16275_s5 + $0x2d8] sm:$0xff] }
 0x4f5   :  { %8208 = vmatpush1.bf16.msra.mxu0 %v10605_v20  ;;  %8331 = vmatpush1.bf16.msra.mxu1 %v10607_v40  ;;  %v6237_v20 = vld [vmem:[%s16275_s5 + $0x150] sm:$0xff] }
 0x4f6   :  { %8209 = vmatprep.subr.bf16.mxu0 %v10614_v26  ;;  %8332 = vmatprep.subr.bf16.mxu1 %v10616_v27  ;;  %v6241_v40 = vld [vmem:[%s16275_s5 + $0x170] sm:$0xff]  ;;  %v6242_v26 = vld [vmem:[%s16275_s5 + $0x178] sm:$0xff]  ;;  %v10345_v27 = vcombine.low %v6229_v18, %v6233_v52 }
 0x4f7   :  { %v10354_v30 = vcombine.high %v6237_v20, %v6241_v40  ;;  %v10356_v32 = vcombine.high %v6238_v11, %v6242_v26  ;;  %v6285_v52 = vld [vmem:[%s16275_s5 + $0x2d0] sm:$0xff] }
 0x4f9   :  { %8210 = vmatpush1.bf16.msra.mxu0 %v10613_v54  ;;  %8333 = vmatpush1.bf16.msra.mxu1 %v10615_v23  ;;  %v6249_v54 = vld [vmem:[%s16275_s5 + $0x1b0] sm:$0xff]  ;;  %v6246_v23 = vld [vmem:[%s16275_s5 + $0x198] sm:$0xff] }
 0x4fa   :  { %8211 = vmatprep.subr.bf16.mxu0 %v10622_v31  ;;  %8334 = vmatprep.subr.bf16.mxu1 %v10624_v58  ;;  %v10353_v31 = vcombine.low %v6237_v20, %v6241_v40  ;;  %v10355_v58 = vcombine.low %v6238_v11, %v6242_v26  ;;  %v10362_v16 = vcombine.high %v6245_v3, %v6249_v54  ;;  %v6293_v40 = vld [vmem:[%s16275_s5 + $0x310] sm:$0xff]  ;;  %v6294_v26 = vld [vmem:[%s16275_s5 + $0x318] sm:$0xff] }
 0x4fb   :  { %v10364_v33 = vcombine.high %v6246_v23, %v6250_v56  ;;  %v10361_v43 = vcombine.low %v6245_v3, %v6249_v54  ;;  %v6297_v11 = vld [vmem:[%s16275_s5 + $0x330] sm:$0xff] }
 0x4fc   :  { %v6301_v54 = vld [vmem:[%s16275_s5 + $0x350] sm:$0xff] }
 0x4fd   :  { %8212 = vmatpush1.bf16.msra.mxu0 %v10621_v41  ;;  %8335 = vmatpush1.bf16.msra.mxu1 %v10623_v8  ;;  %v6254_v41 = vld [vmem:[%s16275_s5 + $0x1d8] sm:$0xff] }
 0x4fe   :  { %8361 = vmatprep.subr.bf16.mxu0 %v10314_v44  ;;  %8484 = vmatprep.subr.bf16.mxu1 %v10316_v45  ;;  %v6258_v8 = vld [vmem:[%s16275_s5 + $0x1f8] sm:$0xff]  ;;  %v10363_v44 = vcombine.low %v6246_v23, %v6250_v56  ;;  %v10370_v45 = vcombine.high %v6253_v37, %v6257_v39  ;;  %v6305_v23 = vld [vmem:[%s16275_s5 + $0x370] sm:$0xff] }
 0x4ff   :  { %v10372_v46 = vcombine.high %v6254_v41, %v6258_v8  ;;  %v6302_v56 = vld [vmem:[%s16275_s5 + $0x358] sm:$0xff] }
 0x500   :  { %8230 = vmatmul.mubr.bf16.vlgmr.msra.gmra.mrb[20].mxu0 %v15470_v59  ;;  %8353 = vmatmul.mubr.bf16.vlgmr.msra.gmra.mrb[24].mxu1 %v15470_v59 }
 0x501   :  { %8362 = vmatpush1.bf16.msra.mxu0 %v10313_v49  ;;  %8393 = vmatprep.mubr.bf16.mxu0 %v15121_v35  ;;  %v6266_v49 = vld [vmem:[%s16275_s5 + $0x238] sm:$0xff] }
 0x502   :  { %8485 = vmatpush1.bf16.msra.mxu1 %v10315_v60  ;;  %8516 = vmatprep.mubr.bf16.mxu1 %v15121_v35  ;;  %v6226_v35 = vld [vmem:[%s16275_s5 + $0xf8] sm:$0xff]  ;;  %v10369_v60 = vcombine.low %v6253_v37, %v6257_v39  ;;  %v10380_v7 = vcombine.high %v6262_v38, %v6266_v49  ;;  %v6309_v39 = vld [vmem:[%s16275_s5 + $0x390] sm:$0xff] }
 0x503   :  { %8363 = vmatprep.subr.bf16.mxu0 %v10322_v63  ;;  %8486 = vmatprep.subr.bf16.mxu1 %v10324_v5  ;;  %v10340_v15 = vcombine.high %v6222_v50, %v6226_v35  ;;  %v10339_v36 = vcombine.low %v6222_v50, %v6226_v35  ;;  %v10371_v63 = vcombine.low %v6254_v41, %v6258_v8  ;;  %v6281_v50 = vld [vmem:[%s16275_s5 + $0x2b0] sm:$0xff]  ;;  %v6278_v35 = vld [vmem:[%s16275_s5 + $0x298] sm:$0xff] }
 0x504   :  { %v10378_v5 = vcombine.high %v6261_v47, %v6265_v48  ;;  %v6313_v41 = vld [vmem:[%s16275_s5 + $0x3b0] sm:$0xff]  ;;  %v6310_v8 = vld [vmem:[%s16275_s5 + $0x398] sm:$0xff] }
 0x505   :  { %8364 = vmatpush1.bf16.msra.mxu0 %v10321_v13  ;;  %v6274_v13 = vld [vmem:[%s16275_s5 + $0x278] sm:$0xff] }
 0x506   :  { %8487 = vmatpush1.bf16.msra.mxu1 %v10323_v14  ;;  %8365 = vmatprep.subr.bf16.mxu0 %v10330_v0  ;;  %v10377_v14 = vcombine.low %v6261_v47, %v6265_v48  ;;  %v10379_v0 = vcombine.low %v6262_v38, %v6266_v49  ;;  %v10388_v4 = vcombine.high %v6270_v12, %v6274_v13  ;;  %v6317_v48 = vld [vmem:[%s16275_s5 + $0x3d0] sm:$0xff]  ;;  %v6318_v49 = vld [vmem:[%s16275_s5 + $0x3d8] sm:$0xff] }
 0x507   :  { %8488 = vmatprep.subr.bf16.mxu1 %v10332_v2  ;;  %v10386_v2 = vcombine.high %v6269_v62, %v6273_v51  ;;  %v6321_v38 = vld [vmem:[%s16275_s5 + $0x3f0] sm:$0xff] }
 0x509   :  { %8366 = vmatpush1.bf16.msra.mxu0 %v10329_v61  ;;  %v6282_v61 = vld [vmem:[%s16275_s5 + $0x2b8] sm:$0xff] }
 0x50a   :  { %8489 = vmatpush1.bf16.msra.mxu1 %v10331_v24  ;;  %8367 = vmatprep.subr.bf16.mxu0 %v10338_v25  ;;  %v10385_v24 = vcombine.low %v6269_v62, %v6273_v51  ;;  %v10387_v25 = vcombine.low %v6270_v12, %v6274_v13  ;;  %v10396_v18 = vcombine.high %v6278_v35, %v6282_v61  ;;  %v6325_v51 = vld [vmem:[%s16275_s5 + $0x410] sm:$0xff]  ;;  %v6326_v13 = vld [vmem:[%s16275_s5 + $0x418] sm:$0xff] }
 0x50b   :  { %8490 = vmatprep.subr.bf16.mxu1 %v10340_v15  ;;  %v10394_v15 = vcombine.high %v6277_v9, %v6281_v50  ;;  %v6329_v12 = vld [vmem:[%s16275_s5 + $0x430] sm:$0xff] }
 0x50d   :  { %8368 = vmatpush1.bf16.msra.mxu0 %v10337_v42  ;;  %v6290_v42 = vld [vmem:[%s16275_s5 + $0x2f8] sm:$0xff] }
 0x50e   :  { %8491 = vmatpush1.bf16.msra.mxu1 %v10339_v36  ;;  %8369 = vmatprep.subr.bf16.mxu0 %v10346_v57  ;;  %v10393_v36 = vcombine.low %v6277_v9, %v6281_v50  ;;  %v10395_v57 = vcombine.low %v6278_v35, %v6282_v61  ;;  %v10404_v20 = vcombine.high %v6286_v19, %v6290_v42  ;;  %v6333_v50 = vld [vmem:[%s16275_s5 + $0x450] sm:$0xff] }
 0x50f   :  { %8492 = vmatprep.subr.bf16.mxu1 %v10348_v21  ;;  %v10402_v21 = vcombine.high %v6285_v52, %v6289_v17  ;;  %v6337_v35 = vld [vmem:[%s16275_s5 + $0x470] sm:$0xff]  ;;  %v10441_v61 = vcombine.low %v6325_v51, %v6329_v12 }
 0x511   :  { %8370 = vmatpush1.bf16.msra.mxu0 %v10345_v27  ;;  %v6298_v27 = vld [vmem:[%s16275_s5 + $0x338] sm:$0xff] }
 0x512   :  { %8493 = vmatpush1.bf16.msra.mxu1 %v10347_v28  ;;  %8371 = vmatprep.subr.bf16.mxu0 %v10354_v30  ;;  %v10401_v28 = vcombine.low %v6285_v52, %v6289_v17  ;;  %v10403_v30 = vcombine.low %v6286_v19, %v6290_v42  ;;  %v10412_v3 = vcombine.high %v6294_v26, %v6298_v27  ;;  %v6341_v52 = vld [vmem:[%s16275_s5 + $0x490] sm:$0xff]  ;;  %v6342_v42 = vld [vmem:[%s16275_s5 + $0x498] sm:$0xff] }
 0x513   :  { %8494 = vmatprep.subr.bf16.mxu1 %v10356_v32  ;;  %v10410_v32 = vcombine.high %v6293_v40, %v6297_v11  ;;  %v6345_v17 = vld [vmem:[%s16275_s5 + $0x4b0] sm:$0xff] }
 0x515   :  { %8372 = vmatpush1.bf16.msra.mxu0 %v10353_v31  ;;  %v6306_v31 = vld [vmem:[%s16275_s5 + $0x378] sm:$0xff] }
 0x516   :  { %8495 = vmatpush1.bf16.msra.mxu1 %v10355_v58  ;;  %8373 = vmatprep.subr.bf16.mxu0 %v10362_v16  ;;  %v10409_v58 = vcombine.low %v6293_v40, %v6297_v11  ;;  %v10411_v16 = vcombine.low %v6294_v26, %v6298_v27  ;;  %v10420_v37 = vcombine.high %v6302_v56, %v6306_v31  ;;  %v6349_v11 = vld [vmem:[%s16275_s5 + $0x4d0] sm:$0xff]  ;;  %v6354_v27 = vld [vmem:[%s16275_s5 + $0x4f8] sm:$0xff] }
 0x517   :  { %8496 = vmatprep.subr.bf16.mxu1 %v10364_v33  ;;  %v10418_v33 = vcombine.high %v6301_v54, %v6305_v23  ;;  %v6353_v26 = vld [vmem:[%s16275_s5 + $0x4f0] sm:$0xff] }
 0x519   :  { %8374 = vmatpush1.bf16.msra.mxu0 %v10361_v43  ;;  %v6314_v43 = vld [vmem:[%s16275_s5 + $0x3b8] sm:$0xff] }
 0x51a   :  { %8497 = vmatpush1.bf16.msra.mxu1 %v10363_v44  ;;  %8375 = vmatprep.subr.bf16.mxu0 %v10370_v45  ;;  %v10417_v44 = vcombine.low %v6301_v54, %v6305_v23  ;;  %v10419_v45 = vcombine.low %v6302_v56, %v6306_v31  ;;  %v10428_v47 = vcombine.high %v6310_v8, %v6314_v43  ;;  %v6361_v54 = vld [vmem:[%s16275_s5 + $0x530] sm:$0xff]  ;;  %v6358_v23 = vld [vmem:[%s16275_s5 + $0x518] sm:$0xff] }
 0x51b   :  { %8498 = vmatprep.subr.bf16.mxu1 %v10372_v46  ;;  %v10426_v46 = vcombine.high %v6309_v39, %v6313_v41  ;;  %v6362_v56 = vld [vmem:[%s16275_s5 + $0x538] sm:$0xff]  ;;  %v10465_v31 = vcombine.low %v6349_v11, %v6353_v26 }
 0x51d   :  { %8376 = vmatpush1.bf16.msra.mxu0 %v10369_v60  ;;  %v6322_v60 = vld [vmem:[%s16275_s5 + $0x3f8] sm:$0xff] }
 0x51e   :  { %8499 = vmatpush1.bf16.msra.mxu1 %v10371_v63  ;;  %8377 = vmatprep.subr.bf16.mxu0 %v10378_v5  ;;  %v10425_v63 = vcombine.low %v6309_v39, %v6313_v41  ;;  %v10427_v5 = vcombine.low %v6310_v8, %v6314_v43  ;;  %v10436_v62 = vcombine.high %v6318_v49, %v6322_v60  ;;  %v6369_v39 = vld [vmem:[%s16275_s5 + $0x570] sm:$0xff]  ;;  %v6366_v41 = vld [vmem:[%s16275_s5 + $0x558] sm:$0xff] }
 0x51f   :  { %8500 = vmatprep.subr.bf16.mxu1 %v10380_v7  ;;  %v10434_v7 = vcombine.high %v6317_v48, %v6321_v38  ;;  %v6370_v8 = vld [vmem:[%s16275_s5 + $0x578] sm:$0xff] }
 0x521   :  { %8378 = vmatpush1.bf16.msra.mxu0 %v10377_v14  ;;  %v6330_v14 = vld [vmem:[%s16275_s5 + $0x438] sm:$0xff] }
 0x522   :  { %8501 = vmatpush1.bf16.msra.mxu1 %v10379_v0  ;;  %8379 = vmatprep.subr.bf16.mxu0 %v10386_v2  ;;  %v10433_v0 = vcombine.low %v6317_v48, %v6321_v38  ;;  %v10435_v2 = vcombine.low %v6318_v49, %v6322_v60  ;;  %v10444_v9 = vcombine.high %v6326_v13, %v6330_v14  ;;  %v6377_v48 = vld [vmem:[%s16275_s5 + $0x5b0] sm:$0xff]  ;;  %v6374_v38 = vld [vmem:[%s16275_s5 + $0x598] sm:$0xff] }
 0x523   :  { %8502 = vmatprep.subr.bf16.mxu1 %v10388_v4  ;;  %v10442_v4 = vcombine.high %v6325_v51, %v6329_v12  ;;  %v6378_v49 = vld [vmem:[%s16275_s5 + $0x5b8] sm:$0xff]  ;;  %v6385_v51 = vld [vmem:[%s16275_s5 + $0x5f0] sm:$0xff] }
 0x524   :  { %v6382_v12 = vld [vmem:[%s16275_s5 + $0x5d8] sm:$0xff] }
 0x525   :  { %8380 = vmatpush1.bf16.msra.mxu0 %v10385_v24  ;;  %v6334_v24 = vld [vmem:[%s16275_s5 + $0x458] sm:$0xff] }
 0x526   :  { %8503 = vmatpush1.bf16.msra.mxu1 %v10387_v25  ;;  %8381 = vmatprep.subr.bf16.mxu0 %v10394_v15  ;;  %v6338_v25 = vld [vmem:[%s16275_s5 + $0x478] sm:$0xff]  ;;  %v10443_v15 = vcombine.low %v6326_v13, %v6330_v14 }
 0x527   :  { %8504 = vmatprep.subr.bf16.mxu1 %v10396_v18  ;;  %v10450_v18 = vcombine.high %v6333_v50, %v6337_v35  ;;  %v10452_v19 = vcombine.high %v6334_v24, %v6338_v25  ;;  %v6386_v13 = vld [vmem:[%s16275_s5 + $0x5f8] sm:$0xff] }
 0x529   :  { %8382 = vmatpush1.bf16.msra.mxu0 %v10393_v36  ;;  %v6346_v36 = vld [vmem:[%s16275_s5 + $0x4b8] sm:$0xff] }
 0x52a   :  { %8505 = vmatpush1.bf16.msra.mxu1 %v10395_v57  ;;  %8383 = vmatprep.subr.bf16.mxu0 %v10402_v21  ;;  %v10449_v57 = vcombine.low %v6333_v50, %v6337_v35  ;;  %v10451_v21 = vcombine.low %v6334_v24, %v6338_v25  ;;  %v10460_v40 = vcombine.high %v6342_v42, %v6346_v36  ;;  %v6390_v35 = vld [vmem:[%s16275_s5 + $0x618] sm:$0xff] }
 0x52b   :  { %8506 = vmatprep.subr.bf16.mxu1 %v10404_v20  ;;  %v10458_v20 = vcombine.high %v6341_v52, %v6345_v17  ;;  %v10500_v50 = vcombine.high %v6382_v12, %v6386_v13  ;;  %v10499_v25 = vcombine.low %v6382_v12, %v6386_v13 }
 0x52d   :  { %8384 = vmatpush1.bf16.msra.mxu0 %v10401_v28  ;;  %v10459_v28 = vcombine.low %v6342_v42, %v6346_v36  ;;  %v6402_v42 = vld [vmem:[%s16275_s5 + $0x678] sm:$0xff] }
 0x52e   :  { %8507 = vmatpush1.bf16.msra.mxu1 %v10403_v30  ;;  %8385 = vmatprep.subr.bf16.mxu0 %v10410_v32  ;;  %v10466_v30 = vcombine.high %v6349_v11, %v6353_v26  ;;  %v6406_v26 = vld [vmem:[%s16275_s5 + $0x698] sm:$0xff] }
 0x52f   :  { %8508 = vmatprep.subr.bf16.mxu1 %v10412_v3  ;;  %v6357_v3 = vld [vmem:[%s16275_s5 + $0x510] sm:$0xff] }
 0x530   :  { %v10473_v43 = vcombine.low %v6357_v3, %v6361_v54 }
 0x531   :  { %8386 = vmatpush1.bf16.msra.mxu0 %v10409_v58 }
 0x532   :  { %8509 = vmatpush1.bf16.msra.mxu1 %v10411_v16  ;;  %8387 = vmatprep.subr.bf16.mxu0 %v10418_v33  ;;  %v10474_v16 = vcombine.high %v6357_v3, %v6361_v54  ;;  %v10476_v33 = vcombine.high %v6358_v23, %v6362_v56  ;;  %v6414_v54 = vld [vmem:[%s16275_s5 + $0x6d8] sm:$0xff] }
 0x533   :  { %8510 = vmatprep.subr.bf16.mxu1 %v10420_v37  ;;  %v6365_v37 = vld [vmem:[%s16275_s5 + $0x550] sm:$0xff] }
 0x534   :  { %v10481_v60 = vcombine.low %v6365_v37, %v6369_v39 }
 0x535   :  { %8388 = vmatpush1.bf16.msra.mxu0 %v10417_v44  ;;  %v10475_v44 = vcombine.low %v6358_v23, %v6362_v56  ;;  %v6418_v23 = vld [vmem:[%s16275_s5 + $0x6f8] sm:$0xff] }
 0x536   :  { %8511 = vmatpush1.bf16.msra.mxu1 %v10419_v45  ;;  %8389 = vmatprep.subr.bf16.mxu0 %v10426_v46  ;;  %v10482_v45 = vcombine.high %v6365_v37, %v6369_v39  ;;  %v10484_v46 = vcombine.high %v6366_v41, %v6370_v8  ;;  %v10532_v37 = vcombine.high %v6414_v54, %v6418_v23  ;;  %v6422_v39 = vld [vmem:[%s16275_s5 + $0x718] sm:$0xff] }
 0x537   :  { %8512 = vmatprep.subr.bf16.mxu1 %v10428_v47  ;;  %v6373_v47 = vld [vmem:[%s16275_s5 + $0x590] sm:$0xff] }
 0x538   :  { %v10489_v14 = vcombine.low %v6373_v47, %v6377_v48 }
 0x539   :  { %8390 = vmatpush1.bf16.msra.mxu0 %v10425_v63  ;;  %v10483_v63 = vcombine.low %v6366_v41, %v6370_v8  ;;  %v6426_v41 = vld [vmem:[%s16275_s5 + $0x738] sm:$0xff] }
 0x53a   :  { %8513 = vmatpush1.bf16.msra.mxu1 %v10427_v5  ;;  %8391 = vmatprep.subr.bf16.mxu0 %v10434_v7  ;;  %v10490_v5 = vcombine.high %v6373_v47, %v6377_v48  ;;  %v10492_v7 = vcombine.high %v6374_v38, %v6378_v49  ;;  %v6430_v47 = vld [vmem:[%s16275_s5 + $0x758] sm:$0xff] }
 0x53b   :  { %8514 = vmatprep.subr.bf16.mxu1 %v10436_v62  ;;  %v6381_v62 = vld [vmem:[%s16275_s5 + $0x5d0] sm:$0xff]  ;;  %v6434_v48 = vld [vmem:[%s16275_s5 + $0x778] sm:$0xff] }
 0x53c   :  { %v10497_v24 = vcombine.low %v6381_v62, %v6385_v51  ;;  %v10548_v12 = vcombine.high %v6430_v47, %v6434_v48 }
 0x53d   :  { %8392 = vmatpush1.bf16.msra.mxu0 %v10433_v0  ;;  %v10491_v0 = vcombine.low %v6374_v38, %v6378_v49  ;;  %v10540_v38 = vcombine.high %v6422_v39, %v6426_v41 }
 0x53e   :  { %8515 = vmatpush1.bf16.msra.mxu1 %v10435_v2  ;;  %8402 = vmatprep.subr.bf16.mxu0 %v10442_v4  ;;  %v10498_v2 = vcombine.high %v6381_v62, %v6385_v51  ;;  %v6389_v4 = vld [vmem:[%s16275_s5 + $0x610] sm:$0xff]  ;;  %v6438_v62 = vld [vmem:[%s16275_s5 + $0x798] sm:$0xff] }
 0x53f   :  { %8525 = vmatprep.subr.bf16.mxu1 %v10444_v9  ;;  %v6393_v9 = vld [vmem:[%s16275_s5 + $0x630] sm:$0xff]  ;;  %v6442_v51 = vld [vmem:[%s16275_s5 + $0x7b8] sm:$0xff] }
 0x540   :  { %8394 = vmatmul.mubr.bf16.vlgmr.msra.gmra.mrb[24].mxu0 %v15123_v29  ;;  %v10505_v36 = vcombine.low %v6389_v4, %v6393_v9 }
 0x541   :  { %8517 = vmatmul.mubr.bf16.vlgmr.msra.gmra.mrb[28].mxu1 %v15123_v29  ;;  %8403 = vmatpush1.bf16.msra.mxu0 %v10441_v61  ;;  %v6350_v29 = vld [vmem:[%s16275_s5 + $0x4d8] sm:$0xff] }
 0x542   :  { %8434 = vmatprep.mubr.bf16.mxu0 %v15352_v6  ;;  %8526 = vmatpush1.bf16.msra.mxu1 %v10443_v15  ;;  %v10468_v32 = vcombine.high %v6350_v29, %v6354_v27  ;;  %v10467_v58 = vcombine.low %v6350_v29, %v6354_v27  ;;  %v6394_v61 = vld [vmem:[%s16275_s5 + $0x638] sm:$0xff]  ;;  %v10506_v15 = vcombine.high %v6389_v4, %v6393_v9 }
 0x543   :  { %8557 = vmatprep.mubr.bf16.mxu1 %v15352_v6  ;;  %8404 = vmatprep.subr.bf16.mxu0 %v10450_v18  ;;  %v10457_v6 = vcombine.low %v6341_v52, %v6345_v17  ;;  %v6397_v18 = vld [vmem:[%s16275_s5 + $0x650] sm:$0xff]  ;;  %v10508_v17 = vcombine.high %v6390_v35, %v6394_v61  ;;  %v6410_v29 = vld [vmem:[%s16275_s5 + $0x6b8] sm:$0xff] }
 0x544   :  { %8527 = vmatprep.subr.bf16.mxu1 %v10452_v19  ;;  %v6401_v52 = vld [vmem:[%s16275_s5 + $0x670] sm:$0xff]  ;;  %v6398_v19 = vld [vmem:[%s16275_s5 + $0x658] sm:$0xff]  ;;  %v10524_v3 = vcombine.high %v6406_v26, %v6410_v29 }
 0x545   :  { %8405 = vmatpush1.bf16.msra.mxu0 %v10449_v57  ;;  %v10507_v57 = vcombine.low %v6390_v35, %v6394_v61  ;;  %v10516_v11 = vcombine.high %v6398_v19, %v6402_v42  ;;  %v10513_v27 = vcombine.low %v6397_v18, %v6401_v52  ;;  %v6446_v9 = vld [vmem:[%s16275_s5 + $0x7d8] sm:$0xff]  ;;  %v10556_v35 = vcombine.high %v6438_v62, %v6442_v51 }
 0x546   :  { %8528 = vmatpush1.bf16.msra.mxu1 %v10451_v21  ;;  %8406 = vmatprep.subr.bf16.mxu0 %v10458_v20  ;;  %v10514_v21 = vcombine.high %v6397_v18, %v6401_v52  ;;  %v6405_v20 = vld [vmem:[%s16275_s5 + $0x690] sm:$0xff] }
 0x547   :  { %8529 = vmatprep.subr.bf16.mxu1 %v10460_v40  ;;  %v6409_v40 = vld [vmem:[%s16275_s5 + $0x6b0] sm:$0xff] }
 0x548   :  { %v10521_v56 = vcombine.low %v6405_v20, %v6409_v40  ;;  %v6453_v18 = vld [vmem:[%s16275_s5 + $0x810] sm:$0xff] }
 0x549   :  { %8407 = vmatpush1.bf16.msra.mxu0 %v10457_v6  ;;  %v10515_v6 = vcombine.low %v6398_v19, %v6402_v42  ;;  %v6457_v52 = vld [vmem:[%s16275_s5 + $0x830] sm:$0xff]  ;;  %v6458_v19 = vld [vmem:[%s16275_s5 + $0x838] sm:$0xff] }
 0x54a   :  { %8530 = vmatpush1.bf16.msra.mxu1 %v10459_v28  ;;  %8408 = vmatprep.subr.bf16.mxu0 %v10466_v30  ;;  %v10522_v28 = vcombine.high %v6405_v20, %v6409_v40  ;;  %v6413_v30 = vld [vmem:[%s16275_s5 + $0x6d0] sm:$0xff] }
 0x54b   :  { %8531 = vmatprep.subr.bf16.mxu1 %v10468_v32  ;;  %v6417_v32 = vld [vmem:[%s16275_s5 + $0x6f0] sm:$0xff] }
 0x54c   :  { %v10529_v8 = vcombine.low %v6413_v30, %v6417_v32  ;;  %v6461_v20 = vld [vmem:[%s16275_s5 + $0x850] sm:$0xff] }
 0x54d   :  { %8409 = vmatpush1.bf16.msra.mxu0 %v10465_v31  ;;  %v10523_v31 = vcombine.low %v6406_v26, %v6410_v29  ;;  %v6465_v40 = vld [vmem:[%s16275_s5 + $0x870] sm:$0xff]  ;;  %v6466_v26 = vld [vmem:[%s16275_s5 + $0x878] sm:$0xff]  ;;  %v10569_v29 = vcombine.low %v6453_v18, %v6457_v52 }
 0x54e   :  { %8532 = vmatpush1.bf16.msra.mxu1 %v10467_v58  ;;  %8410 = vmatprep.subr.bf16.mxu0 %v10474_v16  ;;  %v10530_v58 = vcombine.high %v6413_v30, %v6417_v32  ;;  %v6421_v16 = vld [vmem:[%s16275_s5 + $0x710] sm:$0xff] }
 0x54f   :  { %8533 = vmatprep.subr.bf16.mxu1 %v10476_v33  ;;  %v6425_v33 = vld [vmem:[%s16275_s5 + $0x730] sm:$0xff] }
 0x550   :  { %v10537_v49 = vcombine.low %v6421_v16, %v6425_v33  ;;  %v6469_v30 = vld [vmem:[%s16275_s5 + $0x890] sm:$0xff] }
 0x551   :  { %8411 = vmatpush1.bf16.msra.mxu0 %v10473_v43  ;;  %v6429_v43 = vld [vmem:[%s16275_s5 + $0x750] sm:$0xff] }
 0x552   :  { %8534 = vmatpush1.bf16.msra.mxu1 %v10475_v44  ;;  %8412 = vmatprep.subr.bf16.mxu0 %v10482_v45  ;;  %v6433_v44 = vld [vmem:[%s16275_s5 + $0x770] sm:$0xff]  ;;  %v10531_v45 = vcombine.low %v6414_v54, %v6418_v23  ;;  %v6474_v54 = vld [vmem:[%s16275_s5 + $0x8b8] sm:$0xff]  ;;  %v10577_v23 = vcombine.low %v6461_v20, %v6465_v40 }
 0x553   :  { %8535 = vmatprep.subr.bf16.mxu1 %v10484_v46  ;;  %v10538_v46 = vcombine.high %v6421_v16, %v6425_v33  ;;  %v10545_v13 = vcombine.low %v6429_v43, %v6433_v44  ;;  %v6473_v32 = vld [vmem:[%s16275_s5 + $0x8b0] sm:$0xff] }
 0x554   :  { %v6477_v16 = vld [vmem:[%s16275_s5 + $0x8d0] sm:$0xff] }
 0x555   :  { %8413 = vmatpush1.bf16.msra.mxu0 %v10481_v60  ;;  %v6437_v60 = vld [vmem:[%s16275_s5 + $0x790] sm:$0xff] }
 0x556   :  { %8536 = vmatpush1.bf16.msra.mxu1 %v10483_v63  ;;  %8414 = vmatprep.subr.bf16.mxu0 %v10490_v5  ;;  %v6441_v63 = vld [vmem:[%s16275_s5 + $0x7b0] sm:$0xff]  ;;  %v10539_v5 = vcombine.low %v6422_v39, %v6426_v41  ;;  %v10585_v39 = vcombine.low %v6469_v30, %v6473_v32 }
 0x557   :  { %8537 = vmatprep.subr.bf16.mxu1 %v10492_v7  ;;  %v10546_v7 = vcombine.high %v6429_v43, %v6433_v44  ;;  %v10554_v4 = vcombine.high %v6437_v60, %v6441_v63  ;;  %v10553_v61 = vcombine.low %v6437_v60, %v6441_v63  ;;  %v6481_v33 = vld [vmem:[%s16275_s5 + $0x8f0] sm:$0xff] }
 0x558   :  { %v6485_v44 = vld [vmem:[%s16275_s5 + $0x910] sm:$0xff] }
 0x559   :  { %8415 = vmatpush1.bf16.msra.mxu0 %v10489_v14  ;;  %v6445_v14 = vld [vmem:[%s16275_s5 + $0x7d0] sm:$0xff] }
 0x55a   :  { %8538 = vmatpush1.bf16.msra.mxu1 %v10491_v0  ;;  %8416 = vmatprep.subr.bf16.mxu0 %v10498_v2  ;;  %v6449_v0 = vld [vmem:[%s16275_s5 + $0x7f0] sm:$0xff]  ;;  %v10547_v2 = vcombine.low %v6430_v47, %v6434_v48  ;;  %v10593_v47 = vcombine.low %v6477_v16, %v6481_v33 }
 0x55b   :  { %8539 = vmatprep.subr.bf16.mxu1 %v10500_v50  ;;  %v6450_v50 = vld [vmem:[%s16275_s5 + $0x7f8] sm:$0xff]  ;;  %v10561_v42 = vcombine.low %v6445_v14, %v6449_v0  ;;  %v6493_v60 = vld [vmem:[%s16275_s5 + $0x950] sm:$0xff] }
 0x55c   :  { %v6497_v63 = vld [vmem:[%s16275_s5 + $0x970] sm:$0xff] }
 0x55d   :  { %8417 = vmatpush1.bf16.msra.mxu0 %v10497_v24  ;;  %v10555_v24 = vcombine.low %v6438_v62, %v6442_v51 }
 0x55e   :  { %8540 = vmatpush1.bf16.msra.mxu1 %v10499_v25  ;;  %8418 = vmatprep.subr.bf16.mxu0 %v10506_v15  ;;  %v10562_v25 = vcombine.high %v6445_v14, %v6449_v0  ;;  %v10564_v15 = vcombine.high %v6446_v9, %v6450_v50  ;;  %v6501_v14 = vld [vmem:[%s16275_s5 + $0x990] sm:$0xff] }
 0x55f   :  { %8541 = vmatprep.subr.bf16.mxu1 %v10508_v17  ;;  %v6454_v17 = vld [vmem:[%s16275_s5 + $0x818] sm:$0xff]  ;;  %v6505_v0 = vld [vmem:[%s16275_s5 + $0x9b0] sm:$0xff] }
 0x561   :  { %8419 = vmatpush1.bf16.msra.mxu0 %v10505_v36  ;;  %v10563_v36 = vcombine.low %v6446_v9, %v6450_v50  ;;  %v10609_v9 = vcombine.low %v6493_v60, %v6497_v63 }
 0x562   :  { %8542 = vmatpush1.bf16.msra.mxu1 %v10507_v57  ;;  %8420 = vmatprep.subr.bf16.mxu0 %v10514_v21  ;;  %v10570_v57 = vcombine.high %v6453_v18, %v6457_v52  ;;  %v10572_v21 = vcombine.high %v6454_v17, %v6458_v19  ;;  %v6514_v18 = vld [vmem:[%s16275_s5 + $0x9f8] sm:$0xff]  ;;  %v10617_v52 = vcombine.low %v6501_v14, %v6505_v0 }
 0x563   :  { %8543 = vmatprep.subr.bf16.mxu1 %v10516_v11  ;;  %v6462_v11 = vld [vmem:[%s16275_s5 + $0x858] sm:$0xff] }
 0x565   :  { %8421 = vmatpush1.bf16.msra.mxu0 %v10513_v27  ;;  %v10571_v27 = vcombine.low %v6454_v17, %v6458_v19 }
 0x566   :  { %8544 = vmatpush1.bf16.msra.mxu1 %v10515_v6  ;;  %8422 = vmatprep.subr.bf16.mxu0 %v10522_v28  ;;  %v10578_v6 = vcombine.high %v6461_v20, %v6465_v40  ;;  %v10580_v28 = vcombine.high %v6462_v11, %v6466_v26  ;;  %v12112_v20 = vld [vmem:[%s16277_s7] ss:$8 sps:$4 sm:$0xff]   ;;  %v12117_v40 = vld [vmem:[%s16277_s7 + $0x14] ss:$8 sps:$4 sm:$0xff]  }
 0x567   :  { %8545 = vmatprep.subr.bf16.mxu1 %v10524_v3  ;;  %v6470_v3 = vld [vmem:[%s16275_s5 + $0x898] sm:$0xff] }
 0x568   :  { %v10587_v41 = vcombine.low %v6470_v3, %v6474_v54 }
 0x569   :  { %8423 = vmatpush1.bf16.msra.mxu0 %v10521_v56  ;;  %v10579_v56 = vcombine.low %v6462_v11, %v6466_v26  ;;  %v12115_v11 = vld [vmem:[%s16277_s7 + $0x10] ss:$8 sps:$4 sm:$0xff]   ;;  %v12120_v26 = vld [vmem:[%s16277_s7 + $0x24] ss:$8 sps:$4 sm:$0xff]  }
 0x56a   :  { %8546 = vmatpush1.bf16.msra.mxu1 %v10523_v31  ;;  %8424 = vmatprep.subr.bf16.mxu0 %v10530_v58  ;;  %v10586_v31 = vcombine.high %v6469_v30, %v6473_v32  ;;  %v10588_v58 = vcombine.high %v6470_v3, %v6474_v54  ;;  %v12129_v30 = vld [vmem:[%s16277_s7 + $0x54] ss:$8 sps:$4 sm:$0xff]   ;;  %v12127_v32 = vld [vmem:[%s16277_s7 + $0x50] ss:$8 sps:$4 sm:$0xff]   ;;  %v12132_v3 = vld [vmem:[%s16277_s7 + $0x64] ss:$8 sps:$4 sm:$0xff]  }
 0x56b   :  { %8547 = vmatprep.subr.bf16.mxu1 %v10532_v37  ;;  %v6482_v37 = vld [vmem:[%s16275_s5 + $0x8f8] sm:$0xff]  ;;  %v12130_v54 = vld [vmem:[%s16277_s7 + $0x60] ss:$8 sps:$4 sm:$0xff]  }
 0x56d   :  { %8425 = vmatpush1.bf16.msra.mxu0 %v10529_v8  ;;  %v10594_v8 = vcombine.high %v6477_v16, %v6481_v33  ;;  %v12141_v16 = vld [vmem:[%s16277_s7 + $0x94] ss:$8 sps:$4 sm:$0xff]   ;;  %v12139_v33 = vld [vmem:[%s16277_s7 + $0x90] ss:$8 sps:$4 sm:$0xff]  }
 0x56e   :  { %8548 = vmatpush1.bf16.msra.mxu1 %v10531_v45  ;;  %8426 = vmatprep.subr.bf16.mxu0 %v10538_v46  ;;  %v6489_v45 = vld [vmem:[%s16275_s5 + $0x930] sm:$0xff]  ;;  %v6490_v46 = vld [vmem:[%s16275_s5 + $0x938] sm:$0xff] }
 0x56f   :  { %8549 = vmatprep.subr.bf16.mxu1 %v10540_v38  ;;  %v10602_v38 = vcombine.high %v6485_v44, %v6489_v45  ;;  %v10601_v62 = vcombine.low %v6485_v44, %v6489_v45 }
 0x571   :  { %8427 = vmatpush1.bf16.msra.mxu0 %v10537_v49 }
 0x572   :  { %8550 = vmatpush1.bf16.msra.mxu1 %v10539_v5  ;;  %8428 = vmatprep.subr.bf16.mxu0 %v10546_v7  ;;  %v6494_v5 = vld [vmem:[%s16275_s5 + $0x958] sm:$0xff] }
 0x573   :  { %8551 = vmatprep.subr.bf16.mxu1 %v10548_v12  ;;  %v6498_v7 = vld [vmem:[%s16275_s5 + $0x978] sm:$0xff]  ;;  %v10610_v12 = vcombine.high %v6493_v60, %v6497_v63 }
 0x574   :  { %v10611_v50 = vcombine.low %v6494_v5, %v6498_v7  ;;  %v12153_v60 = vld [vmem:[%s16277_s7 + $0xd4] ss:$8 sps:$4 sm:$0xff]   ;;  %v12151_v63 = vld [vmem:[%s16277_s7 + $0xd0] ss:$8 sps:$4 sm:$0xff]  }
 0x575   :  { %8429 = vmatpush1.bf16.msra.mxu0 %v10545_v13  ;;  %v10612_v13 = vcombine.high %v6494_v5, %v6498_v7  ;;  %v12156_v5 = vld [vmem:[%s16277_s7 + $0xe4] ss:$8 sps:$4 sm:$0xff]   ;;  %v12154_v7 = vld [vmem:[%s16277_s7 + $0xe0] ss:$8 sps:$4 sm:$0xff]  }
 0x576   :  { %8552 = vmatpush1.bf16.msra.mxu1 %v10547_v2  ;;  %8430 = vmatprep.subr.bf16.mxu0 %v10554_v4  ;;  %v6502_v2 = vld [vmem:[%s16275_s5 + $0x998] sm:$0xff] }
 0x577   :  { %8553 = vmatprep.subr.bf16.mxu1 %v10556_v35  ;;  %v6506_v4 = vld [vmem:[%s16275_s5 + $0x9b8] sm:$0xff]  ;;  %v10618_v35 = vcombine.high %v6501_v14, %v6505_v0  ;;  %v12209_v14 = vld [vmem:[%s16278_s9] sm:$0xff]   ;;  %v12210_v0 = vld [vmem:[%s16278_s9 + $0x48] sm:$0xff]  }
 0x578   :  { %v10619_v17 = vcombine.low %v6502_v2, %v6506_v4 }
 0x579   :  { %8431 = vmatpush1.bf16.msra.mxu0 %v10553_v61  ;;  %v10620_v61 = vcombine.high %v6502_v2, %v6506_v4  ;;  %v12211_v2 = vld [vmem:[%s16278_s9 + $0x8] sm:$0xff]   ;;  %v12212_v4 = vld [vmem:[%s16278_s9 + $0x50] sm:$0xff]  }
 0x57a   :  { %8554 = vmatpush1.bf16.msra.mxu1 %v10555_v24  ;;  %8432 = vmatprep.subr.bf16.mxu0 %v10562_v25  ;;  %v6509_v24 = vld [vmem:[%s16275_s5 + $0x9d0] sm:$0xff] }
 0x57b   :  { %8555 = vmatprep.subr.bf16.mxu1 %v10564_v15  ;;  %v6513_v25 = vld [vmem:[%s16275_s5 + $0x9f0] sm:$0xff]  ;;  %v6510_v15 = vld [vmem:[%s16275_s5 + $0x9d8] sm:$0xff] }
 0x57c   :  { %v10626_v19 = vcombine.high %v6509_v24, %v6513_v25 }
 0x57d   :  { %8433 = vmatpush1.bf16.msra.mxu0 %v10561_v42  ;;  %v10628_v42 = vcombine.high %v6510_v15, %v6514_v18 }
 0x57e   :  { %8556 = vmatpush1.bf16.msra.mxu1 %v10563_v36  ;;  %8443 = vmatprep.subr.bf16.mxu0 %v10570_v57  ;;  %v10625_v36 = vcombine.low %v6509_v24, %v6513_v25  ;;  %v10627_v57 = vcombine.low %v6510_v15, %v6514_v18  ;;  %v12217_v24 = vld [vmem:[%s16278_s9 + $0x20] sm:$0xff]   ;;  %v12218_v25 = vld [vmem:[%s16278_s9 + $0x68] sm:$0xff]  }
 0x57f   :  { %8566 = vmatprep.subr.bf16.mxu1 %v10572_v21  ;;  %v12114_v21 = vld [vmem:[%s16277_s7 + $0x4] ss:$8 sps:$4 sm:$0xff]   ;;  %v8611_v18 = vld [vmem:[%s16279_s6] sm:$0xf] }
 0x580   :  { %8435 = vmatmul.mubr.bf16.vlgmr.msra.gmra.mrb[24].mxu0 %v15354_v34  ;;  %v12219_v15 = vld [vmem:[%s16278_s9 + $0x28] sm:$0xff]  }
 0x581   :  { %8558 = vmatmul.mubr.bf16.vlgmr.msra.gmra.mrb[28].mxu1 %v15354_v34  ;;  %8444 = vmatpush1.bf16.msra.mxu0 %v10569_v29  ;;  %v6478_v34 = vld [vmem:[%s16275_s5 + $0x8d8] sm:$0xff]  ;;  %v12118_v29 = vld [vmem:[%s16277_s7 + $0x20] ss:$8 sps:$4 sm:$0xff]  }
 0x582   :  { %8567 = vmatpush1.bf16.msra.mxu1 %v10571_v27  ;;  %8445 = vmatprep.subr.bf16.mxu0 %v10578_v6  ;;  %v10596_v43 = vcombine.high %v6478_v34, %v6482_v37  ;;  %v10595_v48 = vcombine.low %v6478_v34, %v6482_v37  ;;  %v12121_v27 = vld [vmem:[%s16277_s7 + $0x30] ss:$8 sps:$4 sm:$0xff]   ;;  %v12126_v6 = vld [vmem:[%s16277_s7 + $0x44] ss:$8 sps:$4 sm:$0xff]   ;;  %v12142_v37 = vld [vmem:[%s16277_s7 + $0xa0] ss:$8 sps:$4 sm:$0xff]  }
 0x583   :  { %8568 = vmatprep.subr.bf16.mxu1 %v10580_v28  ;;  %8475 = vmatprep.mubr.bf16.mxu0 %v12236_v1  ;;  %v12124_v28 = vld [vmem:[%s16277_s7 + $0x40] ss:$8 sps:$4 sm:$0xff]   ;;  %v12144_v34 = vld [vmem:[%s16277_s7 + $0xa4] ss:$8 sps:$4 sm:$0xff]  }
 0x584   :  { %8598 = vmatprep.mubr.bf16.mxu1 %v12236_v1  ;;  %v6486_v1 = vld [vmem:[%s16275_s5 + $0x918] sm:$0xff] }
 0x585   :  { %8446 = vmatpush1.bf16.msra.mxu0 %v10577_v23  ;;  %v10604_v49 = vcombine.high %v6486_v1, %v6490_v46  ;;  %v10603_v51 = vcombine.low %v6486_v1, %v6490_v46  ;;  %v12135_v23 = vld [vmem:[%s16277_s7 + $0x74] ss:$8 sps:$4 sm:$0xff]  }
 0x586   :  { %8569 = vmatpush1.bf16.msra.mxu1 %v10579_v56  ;;  %8447 = vmatprep.subr.bf16.mxu0 %v10586_v31  ;;  %v12133_v56 = vld [vmem:[%s16277_s7 + $0x70] ss:$8 sps:$4 sm:$0xff]   ;;  %v12138_v31 = vld [vmem:[%s16277_s7 + $0x84] ss:$8 sps:$4 sm:$0xff]  }
 0x587   :  { %8570 = vmatprep.subr.bf16.mxu1 %v10588_v58  ;;  %v12136_v58 = vld [vmem:[%s16277_s7 + $0x80] ss:$8 sps:$4 sm:$0xff]  }
 0x589   :  { %8448 = vmatpush1.bf16.msra.mxu0 %v10585_v39  ;;  %v12147_v39 = vld [vmem:[%s16277_s7 + $0xb4] ss:$8 sps:$4 sm:$0xff]  }
 0x58a   :  { %8571 = vmatpush1.bf16.msra.mxu1 %v10587_v41  ;;  %8449 = vmatprep.subr.bf16.mxu0 %v10594_v8  ;;  %v12145_v41 = vld [vmem:[%s16277_s7 + $0xb0] ss:$8 sps:$4 sm:$0xff]   ;;  %v12150_v8 = vld [vmem:[%s16277_s7 + $0xc4] ss:$8 sps:$4 sm:$0xff]  }
 0x58b   :  { %8572 = vmatprep.subr.bf16.mxu1 %v10596_v43  ;;  %v12148_v43 = vld [vmem:[%s16277_s7 + $0xc0] ss:$8 sps:$4 sm:$0xff]  }
 0x58d   :  { %8450 = vmatpush1.bf16.msra.mxu0 %v10593_v47 }
 0x58e   :  { %8573 = vmatpush1.bf16.msra.mxu1 %v10595_v48  ;;  %8451 = vmatprep.subr.bf16.mxu0 %v10602_v38 }
 0x58f   :  { %8574 = vmatprep.subr.bf16.mxu1 %v10604_v49 }
 0x591   :  { %8452 = vmatpush1.bf16.msra.mxu0 %v10601_v62  ;;  %v12159_v62 = vld [vmem:[%s16277_s7 + $0xf4] ss:$8 sps:$4 sm:$0xff]  }
 0x592   :  { %8575 = vmatpush1.bf16.msra.mxu1 %v10603_v51  ;;  %8453 = vmatprep.subr.bf16.mxu0 %v10610_v12  ;;  %v12157_v51 = vld [vmem:[%s16277_s7 + $0xf0] ss:$8 sps:$4 sm:$0xff]   ;;  %v12162_v12 = vld [vmem:[%s16277_s7 + $0x104] ss:$8 sps:$4 sm:$0xff]  }
 0x593   :  { %8576 = vmatprep.subr.bf16.mxu1 %v10612_v13  ;;  %v12208_v13 = vld [vmem:[%s16278_s9 + $0x40] sm:$0xff]  }
 0x595   :  { %8454 = vmatpush1.bf16.msra.mxu0 %v10609_v9  ;;  %v12213_v9 = vld [vmem:[%s16278_s9 + $0x10] sm:$0xff]  }
 0x596   :  { %8577 = vmatpush1.bf16.msra.mxu1 %v10611_v50  ;;  %8455 = vmatprep.subr.bf16.mxu0 %v10618_v35  ;;  %v12214_v50 = vld [vmem:[%s16278_s9 + $0x58] sm:$0xff]  }
 0x597   :  { %8578 = vmatprep.subr.bf16.mxu1 %v10620_v61  ;;  %v12215_v35 = vld [vmem:[%s16278_s9 + $0x18] sm:$0xff]   ;;  %v12216_v61 = vld [vmem:[%s16278_s9 + $0x60] sm:$0xff]  }
 0x599   :  { %8456 = vmatpush1.bf16.msra.mxu0 %v10617_v52  ;;  %v8616_v52 = vrot.slane %v8611_v18, %v13797_v10 }
 0x59a   :  { %8579 = vmatpush1.bf16.msra.mxu1 %v10619_v17  ;;  %8457 = vmatprep.subr.bf16.mxu0 %v10626_v19  ;;  %v8624_v19 = vrot.slane %v8611_v18, %v14012_v53 }
 0x59b   :  { %8580 = vmatprep.subr.bf16.mxu1 %v10628_v42  ;;  %v8620_v42 = vrot.slane %v8611_v18, %v13802_v22 }
 0x59d   :  { %8458 = vmatpush1.bf16.msra.mxu0 %v10625_v36 }
 0x59e   :  { %8581 = vmatpush1.bf16.msra.mxu1 %v10627_v57  ;;  %9045 = vmatprep.subr.bf16.mxu0 %v12114_v21 }
 0x59f   :  { %10725 = vmatprep.subr.bf16.mxu1 %v12208_v13  ;;  %v12190_v13 = vld [vmem:[%s16277_s7 + $0x1a0] ss:$8 sps:$4 sm:$0xff]  }
 0x5a0   :  { %8476 = vmatmul.mubr.bf16.vlgmr.msra.gmra.mrb[24].mxu0 %v15470_v59 }
 0x5a1   :  { %8599 = vmatmul.mubr.bf16.vlgmr.msra.gmra.mrb[28].mxu1 %v15470_v59  ;;  %9046 = vmatpush1.bf16.msra.mxu0 %v12112_v20  ;;  %v12123_v59 = vld [vmem:[%s16277_s7 + $0x34] ss:$8 sps:$4 sm:$0xff]   ;;  %v8628_v20 = vrot.slane %v8611_v18, %v14017_v55 }
 0x5a2   :  { %9047 = vmatprep.subr.bf16.mxu0 %v12117_v40  ;;  %10726 = vmatpush3.bf16.msra.mxu1 %v12209_v14  ;;  %v12195_v14 = vld [vmem:[%s16277_s7 + $0x1b4] ss:$8 sps:$4 sm:$0xff]  }
 0x5a3   :  { %10727 = vmatprep.subr.bf16.mxu1 %v12210_v0  ;;  %v12193_v0 = vld [vmem:[%s16277_s7 + $0x1b0] ss:$8 sps:$4 sm:$0xff]  }
 0x5a5   :  { %9048 = vmatpush1.bf16.msra.mxu0 %v12115_v11 }
 0x5a6   :  { %9049 = vmatprep.subr.bf16.mxu0 %v12120_v26  ;;  %10728 = vmatpush3.bf16.msra.mxu1 %v12211_v2  ;;  %v12198_v2 = vld [vmem:[%s16277_s7 + $0x1c4] ss:$8 sps:$4 sm:$0xff]  }
 0x5a7   :  { %10729 = vmatprep.subr.bf16.mxu1 %v12212_v4  ;;  %v12196_v4 = vld [vmem:[%s16277_s7 + $0x1c0] ss:$8 sps:$4 sm:$0xff]  }
 0x5a9   :  { %9050 = vmatpush1.bf16.msra.mxu0 %v12118_v29 }
 0x5aa   :  { %9051 = vmatprep.subr.bf16.mxu0 %v12123_v59  ;;  %10730 = vmatpush3.bf16.msra.mxu1 %v12213_v9  ;;  %v12201_v9 = vld [vmem:[%s16277_s7 + $0x1d4] ss:$8 sps:$4 sm:$0xff]  }
 0x5ab   :  { %10731 = vmatprep.subr.bf16.mxu1 %v12214_v50  ;;  %v12199_v50 = vld [vmem:[%s16277_s7 + $0x1d0] ss:$8 sps:$4 sm:$0xff]  }
 0x5ad   :  { %9052 = vmatpush1.bf16.msra.mxu0 %v12121_v27 }
 0x5ae   :  { %9053 = vmatprep.subr.bf16.mxu0 %v12126_v6  ;;  %10732 = vmatpush3.bf16.msra.mxu1 %v12215_v35  ;;  %v12204_v35 = vld [vmem:[%s16277_s7 + $0x1e4] ss:$8 sps:$4 sm:$0xff]  }
 0x5af   :  { %10733 = vmatprep.subr.bf16.mxu1 %v12216_v61  ;;  %v12202_v61 = vld [vmem:[%s16277_s7 + $0x1e0] ss:$8 sps:$4 sm:$0xff]  }
 0x5b1   :  { %9054 = vmatpush1.bf16.msra.mxu0 %v12124_v28 }
 0x5b2   :  { %9055 = vmatprep.subr.bf16.mxu0 %v12129_v30  ;;  %10734 = vmatpush3.bf16.msra.mxu1 %v12217_v24 }
 0x5b3   :  { %10735 = vmatprep.subr.bf16.mxu1 %v12218_v25  ;;  %v12207_v25 = vld [vmem:[%s16277_s7 + $0x1f4] ss:$8 sps:$4 sm:$0xff]  }
 0x5b5   :  { %9056 = vmatpush1.bf16.msra.mxu0 %v12127_v32 }
 0x5b6   :  { %9057 = vmatprep.subr.bf16.mxu0 %v12132_v3  ;;  %10736 = vmatpush3.bf16.msra.mxu1 %v12219_v15  ;;  %v12205_v15 = vld [vmem:[%s16277_s7 + $0x1f0] ss:$8 sps:$4 sm:$0xff]  }
 0x5b9   :  { %9058 = vmatpush1.bf16.msra.mxu0 %v12130_v54 }
 0x5ba   :  { %9059 = vmatprep.subr.bf16.mxu0 %v12135_v23 }
 0x5bd   :  { %9060 = vmatpush1.bf16.msra.mxu0 %v12133_v56 }
 0x5be   :  { %9061 = vmatprep.subr.bf16.mxu0 %v12138_v31 }
 0x5c1   :  { %9062 = vmatpush1.bf16.msra.mxu0 %v12136_v58 }
 0x5c2   :  { %9063 = vmatprep.subr.bf16.mxu0 %v12141_v16 }
 0x5c5   :  { %9064 = vmatpush1.bf16.msra.mxu0 %v12139_v33  ;;  %v12160_v33 = vld [vmem:[%s16277_s7 + $0x100] ss:$8 sps:$4 sm:$0xff]  }
 0x5c6   :  { %9065 = vmatprep.subr.bf16.mxu0 %v12144_v34 }
 0x5c9   :  { %9066 = vmatpush1.bf16.msra.mxu0 %v12142_v37  ;;  %v12165_v37 = vld [vmem:[%s16277_s7 + $0x114] ss:$8 sps:$4 sm:$0xff]  }
 0x5ca   :  { %9067 = vmatprep.subr.bf16.mxu0 %v12147_v39 }
 0x5cd   :  { %9068 = vmatpush1.bf16.msra.mxu0 %v12145_v41  ;;  %v12163_v41 = vld [vmem:[%s16277_s7 + $0x110] ss:$8 sps:$4 sm:$0xff]  }
 0x5ce   :  { %9069 = vmatprep.subr.bf16.mxu0 %v12150_v8  ;;  %v12168_v8 = vld [vmem:[%s16277_s7 + $0x124] ss:$8 sps:$4 sm:$0xff]  }
 0x5d1   :  { %9070 = vmatpush1.bf16.msra.mxu0 %v12148_v43  ;;  %v12166_v43 = vld [vmem:[%s16277_s7 + $0x120] ss:$8 sps:$4 sm:$0xff]  }
 0x5d2   :  { %9071 = vmatprep.subr.bf16.mxu0 %v12153_v60  ;;  %v12183_v60 = vld [vmem:[%s16277_s7 + $0x174] ss:$8 sps:$4 sm:$0xff]  }
 0x5d3   :  { %v8231_v44 = vpop.f32.mrb[20].mxu0  ;;  %v16020_v45 = vpop.f32.mrb[24].mxu1 }
 0x5d4   :  { %v16022_v1 = vpop.f32.mrb[21].mxu0  ;;  %v16024_v46 = vpop.f32.mrb[25].mxu1 }
 0x5d5   :  { %v8235_v47 = vpop.f32.mrb[22].mxu0  ;;  %v8358_v48 = vpop.f32.mrb[26].mxu1  ;;  %9072 = vmatpush1.bf16.msra.mxu0 %v12151_v63  ;;  %v12181_v63 = vld [vmem:[%s16277_s7 + $0x170] ss:$8 sps:$4 sm:$0xff]  }
 0x5d6   :  { %v8236_v38 = vpop.f32.mrb[23].mxu0  ;;  %v8359_v49 = vpop.f32.mrb[27].mxu1  ;;  %9073 = vmatprep.subr.bf16.mxu0 %v12156_v5  ;;  %v12177_v47 = vld [vmem:[%s16277_s7 + $0x154] ss:$8 sps:$4 sm:$0xff]   ;;  %v12175_v48 = vld [vmem:[%s16277_s7 + $0x150] ss:$8 sps:$4 sm:$0xff]  }
 0x5d7   :  { %v12180_v38 = vld [vmem:[%s16277_s7 + $0x164] ss:$8 sps:$4 sm:$0xff]   ;;  %v12178_v49 = vld [vmem:[%s16277_s7 + $0x160] ss:$8 sps:$4 sm:$0xff]  }
 0x5d8   :  { %v12186_v5 = vld [vmem:[%s16277_s7 + $0x184] ss:$8 sps:$4 sm:$0xff]  }
 0x5d9   :  { %9074 = vmatpush1.bf16.msra.mxu0 %v12154_v7  ;;  %v12184_v7 = vld [vmem:[%s16277_s7 + $0x180] ss:$8 sps:$4 sm:$0xff]  }
 0x5da   :  { %9075 = vmatprep.subr.bf16.mxu0 %v12159_v62  ;;  %v12189_v62 = vld [vmem:[%s16277_s7 + $0x194] ss:$8 sps:$4 sm:$0xff]  }
 0x5dd   :  { %9076 = vmatpush1.bf16.msra.mxu0 %v12157_v51  ;;  %v12187_v51 = vld [vmem:[%s16277_s7 + $0x190] ss:$8 sps:$4 sm:$0xff]  }
 0x5de   :  { %9086 = vmatprep.subr.bf16.mxu0 %v12162_v12  ;;  %v12192_v12 = vld [vmem:[%s16277_s7 + $0x1a4] ss:$8 sps:$4 sm:$0xff]  }
 0x673   :  { %v8477_v17 = vpop.f32.mrb[24].mxu0 }
 0x674   :  { %v8607_v36 = vmax.f32 %v8231_v44, %v8477_v17  ;;  %v8600_v57 = vpop.f32.mrb[28].mxu1  ;;  %v8479_v21 = vpop.f32.mrb[25].mxu0  ;;  %v12171_v44 = vld [vmem:[%s16277_s7 + $0x134] ss:$8 sps:$4 sm:$0xff]  }
 0x675   :  { %v8609_v40 = vmax.f32 %v16020_v45, %v8600_v57  ;;  %v8608_v11 = vmax.f32 %v16022_v1, %v8479_v21  ;;  %v8602_v26 = vpop.f32.mrb[29].mxu1  ;;  %v8481_v29 = vpop.f32.mrb[26].mxu0  ;;  %v12169_v45 = vld [vmem:[%s16277_s7 + $0x130] ss:$8 sps:$4 sm:$0xff]   ;;  %v12174_v1 = vld [vmem:[%s16277_s7 + $0x144] ss:$8 sps:$4 sm:$0xff]  }
 0x676   :  { %v8633_v59 = vadd.f32 %v8616_v52, %v8607_v36  ;;  %v8610_v27 = vmax.f32 %v16024_v46, %v8602_v26  ;;  %v8604_v6 = vpop.f32.mrb[30].mxu1  ;;  %v8482_v28 = vpop.f32.mrb[27].mxu0  ;;  %v12172_v46 = vld [vmem:[%s16277_s7 + $0x140] ss:$8 sps:$4 sm:$0xff]   ;;  %v12220_v17 = vld [vmem:[%s16278_s9 + $0x70] sm:$0xff]   ;;  %v12223_v36 = vld [vmem:[%s16278_s9 + $0x38] sm:$0xff]  }
 0x677   :  { %v16093_v30 = vadd.f32 %v8624_v19, %v8609_v40  ;;  %v8634_v53 = vadd.f32 %v8620_v42, %v8608_v11  ;;  %v8605_v32 = vpop.f32.mrb[31].mxu1  ;;  %v12221_v19 = vld [vmem:[%s16278_s9 + $0x30] sm:$0xff]   ;;  %10737 = vmatprep.subr.bf16.mxu1 %v12220_v17  ;;  %v12222_v42 = vld [vmem:[%s16278_s9 + $0x78] sm:$0xff]   ;;  %v12237_v57 = vmov 0.0   ;;  %v8713_v21 = vld [vmem:[%s16281_s8] sm:$0x3] }
 0x678   :  { %v8637_v3 = vmul.f32 0.01, %v8633_v59  ;;  %v8636_v54 = vadd.f32 %v8628_v20, %v8610_v27  ;;  %10738 = vmatpush3.bf16.msra.mxu1 %v12221_v19  ;;  %v8718_v20 = vrot.slane %v8713_v21, %v13797_v10  ;;  %v8722_v40 = vrot.slane %v8713_v21, %v13802_v22  ;;  %v12224_v32 = vld [vmem:[%s16280_s11] sm:$0xff]   ;;  %v12225_v10 = vld [vmem:[%s16280_s11 + $0x8] sm:$0xff]   ;;  %v12226_v22 = vld [vmem:[%s16280_s11 + $0x10] sm:$0xff]  }
 0x679   :  { %v8638_v23 = vmul.f32 0.01, %v8634_v53  ;;  %v8639_v24 = vmul.f32 0.01, %v16093_v30  ;;  %10739 = vmatprep.subr.bf16.mxu1 %v12222_v42 }
 0x67a   :  { %v8641_v56 = vmax.f32 %v8633_v59, %v8637_v3  ;;  %v8640_v55 = vmul.f32 0.01, %v8636_v54 }
 0x67b   :  { %v8642_v31 = vmax.f32 %v8634_v53, %v8638_v23  ;;  %v8643_v18 = vmax.f32 %v16093_v30, %v8639_v24  ;;  %v12228_v23 = vld [vmem:[%s16280_s11 + $0x20] sm:$0xff]  }
 0x67c   :  { %v8644_v58 = vmax.f32 %v8636_v54, %v8640_v55  ;;  %v8645_v34 = vpack.c.bf16 %v8641_v56, %v8641_v56  ;;  %10740 = vmatpush3.bf16.msra.mxu1 %v12223_v36  ;;  %v12227_v54 = vld [vmem:[%s16280_s11 + $0x18] sm:$0xff]   ;;  %v12229_v56 = vld [vmem:[%s16280_s11 + $0x28] sm:$0xff]   ;;  %v12230_v55 = vld [vmem:[%s16280_s11 + $0x30] sm:$0xff]  }
 0x67d   :  { %v8646_v16 = vpack.c.bf16 %v8642_v31, %v8642_v31  ;;  %v8647_v52 = vpack.c.bf16 %v8643_v18, %v8643_v18  ;;  %10761 = vmatprep.subr.bf16.mxu1 %v12237_v57  ;;  %v12231_v31 = vld [vmem:[%s16280_s11 + $0x38] sm:$0xff]  }
 0x67e   :  { %v8648_v39 = vpack.c.bf16 %v8644_v58, %v8644_v58 }
 0x67f   :  { %9077 = vmatprep.mubr.bf16.mxu0 %v8646_v16  ;;  %v10693_v16 = vld [vmem:[%s16283_s10] ss:$0 sm:$0xff] }
 0x680   :  { %9078 = vmatmul.mubr.bf16.vlgmr.msra.gmra.mrb[28].mxu0 %v8645_v34 }
 0x681   :  { %9087 = vmatpush1.bf16.msra.mxu0 %v12160_v33  ;;  %9118 = vmatprep.mubr.bf16.mxu0 %v8648_v39 }
 0x682   :  { %9088 = vmatprep.subr.bf16.mxu0 %v12165_v37 }
 0x685   :  { %9089 = vmatpush1.bf16.msra.mxu0 %v12163_v41 }
 0x686   :  { %9090 = vmatprep.subr.bf16.mxu0 %v12168_v8 }
 0x689   :  { %9091 = vmatpush1.bf16.msra.mxu0 %v12166_v43  ;;  %v12232_v43 = vld [vmem:[%s16282_s13] sm:$0xff]  }
 0x68a   :  { %9092 = vmatprep.subr.bf16.mxu0 %v12171_v44 }
 0x68d   :  { %9093 = vmatpush1.bf16.msra.mxu0 %v12169_v45  ;;  %v12233_v45 = vld [vmem:[%s16282_s13 + $0x8] sm:$0xff]  }
 0x68e   :  { %9094 = vmatprep.subr.bf16.mxu0 %v12174_v1  ;;  %v12234_v1 = vld [vmem:[%s16282_s13 + $0x10] sm:$0xff]  }
 0x691   :  { %9095 = vmatpush1.bf16.msra.mxu0 %v12172_v46  ;;  %v12235_v46 = vld [vmem:[%s16282_s13 + $0x18] sm:$0xff]  }
 0x692   :  { %9096 = vmatprep.subr.bf16.mxu0 %v12177_v47  ;;  %v10710_v47 = vld [vmem:[%s16284_s12] ss:$0 sm:$0xff] }
 0x695   :  { %9097 = vmatpush1.bf16.msra.mxu0 %v12175_v48 }
 0x696   :  { %9098 = vmatprep.subr.bf16.mxu0 %v12180_v38 }
 0x699   :  { %9099 = vmatpush1.bf16.msra.mxu0 %v12178_v49 }
 0x69a   :  { %9100 = vmatprep.subr.bf16.mxu0 %v12183_v60 }
 0x69d   :  { %9101 = vmatpush1.bf16.msra.mxu0 %v12181_v63 }
 0x69e   :  { %9102 = vmatprep.subr.bf16.mxu0 %v12186_v5 }
 0x6a1   :  { %9103 = vmatpush1.bf16.msra.mxu0 %v12184_v7 }
 0x6a2   :  { %9104 = vmatprep.subr.bf16.mxu0 %v12189_v62  ;;  %v10719_v62 = vld [vmem:[%s16285_s14] ss:$0 sm:$0xff] }
 0x6a5   :  { %9105 = vmatpush1.bf16.msra.mxu0 %v12187_v51 }
 0x6a6   :  { %9106 = vmatprep.subr.bf16.mxu0 %v12192_v12 }
 0x6a9   :  { %9107 = vmatpush1.bf16.msra.mxu0 %v12190_v13 }
 0x6aa   :  { %9108 = vmatprep.subr.bf16.mxu0 %v12195_v14 }
 0x6ad   :  { %9109 = vmatpush1.bf16.msra.mxu0 %v12193_v0 }
 0x6ae   :  { %9110 = vmatprep.subr.bf16.mxu0 %v12198_v2 }
 0x6b1   :  { %9111 = vmatpush1.bf16.msra.mxu0 %v12196_v4 }
 0x6b2   :  { %9112 = vmatprep.subr.bf16.mxu0 %v12201_v9 }
 0x6b5   :  { %9113 = vmatpush1.bf16.msra.mxu0 %v12199_v50 }
 0x6b6   :  { %9114 = vmatprep.subr.bf16.mxu0 %v12204_v35 }
 0x6b9   :  { %9115 = vmatpush1.bf16.msra.mxu0 %v12202_v61 }
 0x6ba   :  { %9116 = vmatprep.subr.bf16.mxu0 %v12207_v25 }
 0x6bd   :  { %9117 = vmatpush1.bf16.msra.mxu0 %v12205_v15 }
 0x6c0   :  { %9119 = vmatmul.mubr.bf16.vlgmr.msra.gmra.mrb[28].mxu0 %v8647_v52 }
 0x793   :  { %v9120_v11 = vpop.f32.mrb[28].mxu0 }
 0x794   :  { %v10795_v26 = vadd.f32 %v9120_v11, %v8718_v20  ;;  %v9122_v29 = vpop.f32.mrb[29].mxu0 }
 0x795   :  { %v10796_v59 = vadd.f32 %v9122_v29, %v8722_v40  ;;  %v9124_v27 = vpop.f32.mrb[30].mxu0 }
 0x796   :  { %v9127_v6 = vmax.f32 %v10795_v26, 0.0  ;;  %v9125_v28 = vpop.f32.mrb[31].mxu0 }
 0x797   :  { %v9128_v30 = vmax.f32 %v10796_v59, 0.0 }
 0x798   :  { %v9129_v3 = vpack.c.bf16 %v9127_v6, %v9127_v6 }
 0x799   :  { %v9130_v53 = vpack.c.bf16 %v9128_v30, %v9128_v30 }
 0x79b   :  { %9298 = vmatprep.mubr.bf16.mxu1 %v9130_v53 }
 0x79c   :  { %9299 = vmatmul.mubr.bf16.vlgmr.msra.gmra.mrb[32].mxu1 %v9129_v3 }
 0x79d   :  { %10762 = vmatpush3.bf16.msra.mxu1 %v12224_v32  ;;  %10777 = vmatprep.mubr.msk.bf16.mxu1 %vm12238_vm0, %v12237_v57 }
 0x79e   :  { %10763 = vmatprep.subr.bf16.mxu1 %v12237_v57 }
 0x7a1   :  { %10764 = vmatpush3.bf16.msra.mxu1 %v12225_v10 }
 0x7a2   :  { %10765 = vmatprep.subr.bf16.mxu1 %v12237_v57 }
 0x7a5   :  { %10766 = vmatpush3.bf16.msra.mxu1 %v12226_v22 }
 0x7a6   :  { %10767 = vmatprep.subr.bf16.mxu1 %v12237_v57 }
 0x7a9   :  { %10768 = vmatpush3.bf16.msra.mxu1 %v12227_v54 }
 0x7aa   :  { %10769 = vmatprep.subr.bf16.mxu1 %v12237_v57 }
 0x7ad   :  { %10770 = vmatpush3.bf16.msra.mxu1 %v12228_v23 }
 0x7ae   :  { %10771 = vmatprep.subr.bf16.mxu1 %v12237_v57 }
 0x7b1   :  { %10772 = vmatpush3.bf16.msra.mxu1 %v12229_v56 }
 0x7b2   :  { %10773 = vmatprep.subr.bf16.mxu1 %v12237_v57 }
 0x7b5   :  { %10774 = vmatpush3.bf16.msra.mxu1 %v12230_v55 }
 0x7b6   :  { %10775 = vmatprep.subr.bf16.mxu1 %v12237_v57 }
 0x7b9   :  { %10776 = vmatpush3.bf16.msra.mxu1 %v12231_v31 }
 0x7ba   :  { %10781 = vmatprep.subr.bf16.mxu1 %v12237_v57 }
 0x86f   :  { %v10741_v58 = vpop.f32.mrb[32].mxu1 }
 0x870   :  { %v10742_v33 = vpop.f32.mrb[33].mxu1 }
 0x871   :  { %v10743_v34 = vadd.f32 %v10742_v33, %v10741_v58  ;;  %v10744_v37 = vpop.f32.mrb[34].mxu1 }
 0x872   :  { %v10745_v39 = vpop.f32.mrb[35].mxu1 }
 0x873   :  { %v9301_v41 = vadd.f32 %v10743_v34, %v10693_v16 }
 0x875   :  { %v9306_v8 = vmax.f32 %v9301_v41, 0.0 }
 0x877   :  { %v9307_v44 = vpack.c.bf16 %v9306_v8, %v9306_v8 }
 0x879   :  { %10778 = vmatmul.mubr.bf16.vlgmr.msra.gmra.mrb[36].mxu1 %v9307_v44 }
 0x87a   :  { %10782 = vmatpush3.bf16.msra.mxu1 %v12232_v43  ;;  %10789 = vmatprep.mubr.msk.bf16.mxu1 %vm12238_vm0, %v12237_v57 }
 0x87b   :  { %10783 = vmatprep.subr.bf16.mxu1 %v12237_v57 }
 0x87e   :  { %10784 = vmatpush3.bf16.msra.mxu1 %v12233_v45 }
 0x87f   :  { %10785 = vmatprep.subr.bf16.mxu1 %v12237_v57 }
 0x882   :  { %10786 = vmatpush3.bf16.msra.mxu1 %v12234_v1 }
 0x883   :  { %10787 = vmatprep.subr.bf16.mxu1 %v12237_v57 }
 0x886   :  { %10788 = vmatpush3.bf16.msra.mxu1 %v12235_v46 }
 0x94c   :  { %v9413_v48 = vpop.f32.mrb[36].mxu1 }
 0x94d   :  { %v9414_v38 = vadd.f32 %v10710_v47, %v9413_v48  ;;  %v10779_v49 = vpop.f32.mrb[37].mxu1 }
 0x94e   :  { %v9416_v60 = vpop.f32.mrb[38].mxu1 }
 0x94f   :  { %v9419_v63 = vmax.f32 %v9414_v38, 0.0  ;;  %v10780_v5 = vpop.f32.mrb[39].mxu1 }
 0x951   :  { %v9420_v7 = vpack.c.bf16 %v9419_v63, %v9419_v63 }
 0x953   :  { %10790 = vmatmul.mubr.msk.bf16.vlgmr.msra.gmra.mrb[40].mxu1 %vm9460_vm1, %v9420_v7 }
 0xa26   :  { %v9498_v51 = vpop.f32.mrb[40].mxu1 }
 0xa27   :  { %v9499_v12 = vadd.f32 %v10719_v62, %v9498_v51  ;;  %v10791_v13 = vpop.f32.mrb[41].mxu1 }
 0xa28   :  { %v9501_v14 = vpop.f32.mrb[42].mxu1 }
 0xa29   :  { %9504 = vst [vmem:[%s16286_s15] sm:$0xff] %v9499_v12  ;;  %v10792_v0 = vpop.f32.mrb[43].mxu1 }

</bundles_post_ra>
